<compile_context>
chip_gen: v7x
topology: tpu7x:2x2x1
jax: 0.10.0
libtpu: 0.0.40
codegen_flags: <defaults>
</compile_context>

<pallas_src>
import functools

import jax
import jax.numpy as jnp
from jax.experimental import pallas as pl
from jax.experimental.pallas import tpu as pltpu

EMB_DIM = 128


# ------------------------------ batch-block sizing -----------------------------------

def _pick_bblk(n_imgs, in_rows, in_cols, out_rows, out_cols, budget_bytes=6 << 20):
    """Images per grid step: keep >=2 grid steps (megacore / both v7x TCs) and keep
    double-buffered in+out blocks under a budget that is safe for v5e's 16 MiB
    scoped-VMEM default (and well under v6e/v7x limits)."""
    def padded_bytes(rows, cols, elem_bytes):
        lanes = -(-cols // 128) * 128
        return rows * lanes * elem_bytes
    per_img = 2 * (padded_bytes(in_rows, in_cols, 2)      # bf16 input, double buffered
                   + padded_bytes(out_rows, out_cols, 4)) # output (<= f32), double buffered
    bblk = max(1, min(max(n_imgs // 2, 1), budget_bytes // max(per_img, 1)))
    while n_imgs % bblk:
        bblk -= 1
    return bblk


# --------------------------- conv 3x3 + bias + ReLU kernel ---------------------------

def _conv_kernel(x_ref, w_ref, b_ref, o_ref, *, rows_out, row_offsets, relu, pool_mean):
    # x_ref: (Bblk, rows_in, K)       bf16  -- im2col'ed (layer 1) / dx-expanded (2,3)
    # w_ref: (n_taps, K, Cout)        bf16
    # b_ref: (1, Cout)                f32
    # o_ref: (Bblk, rows_out, Cout)   bf16   conv activations, or
    #        (Bblk, 1, Cout)          f32    fused global-average-pool epilogue
    bblk = o_ref.shape[0]
    inv_rows = 1.0 / float(rows_out)
    for i in range(bblk):                       # static loop: Bblk images per grid step
        acc = None
        for t, off in enumerate(row_offsets):
            # Slice the REF (not a loaded value): only the aligned rows each dot
            # needs are loaded.  off is a static multiple of W (multiple of 8).
            patch = x_ref[i, off:off + rows_out, :]
            d = jnp.dot(patch, w_ref[t], preferred_element_type=jnp.float32)
            acc = d if acc is None else acc + d
        acc = acc + b_ref[...]
        if relu:
            acc = jnp.maximum(acc, 0.0)
        if pool_mean:
            # Fused GAP epilogue: write (1, Cout) pooled features in f32.
            o_ref[i] = jnp.sum(acc, axis=0, keepdims=True) * inv_rows
        else:
            o_ref[i] = acc.astype(o_ref.dtype)


def conv3x3_bias_relu(x_nhwc, w, b, *, full_im2col, pool_mean=False):
    """3x3 conv, stride 1, pad 1, bias + ReLU.

    full_im2col=True : all 9 taps expanded in glue (K = 9*Cin), single MXU dot.
    full_im2col=False: 3 dx-shifts in glue (lane axis), dy accumulated in-kernel
                       with 3 sublane-aligned row slices.
    pool_mean=True   : global-average-pool fused into the kernel epilogue.
    """
    B, H, W, Cin = x_nhwc.shape
    n_taps, K, Cout = w.shape
    if full_im2col:
        assert n_taps == 1 and K == 9 * Cin
        xp = jnp.pad(x_nhwc, ((0, 0), (1, 1), (1, 1), (0, 0)))
        cols = [xp[:, dy:dy + H, dx:dx + W, :] for dy in range(3) for dx in range(3)]
        xk = jnp.concatenate(cols, axis=-1).reshape(B, H * W, K)
        rows_in = H * W
        row_offsets = (0,)
    else:
        assert n_taps == 3 and K == 3 * Cin
        assert W % 8 == 0, "aligned in-kernel dy slices require W % 8 == 0"
        xp = jnp.pad(x_nhwc, ((0, 0), (1, 1), (1, 1), (0, 0)))
        xk = jnp.concatenate([xp[:, :, dx:dx + W, :] for dx in range(3)], axis=-1)
        xk = xk.reshape(B, (H + 2) * W, K)
        rows_in = (H + 2) * W
        row_offsets = (0, W, 2 * W)
    rows_out = H * W

    out_rows = 1 if pool_mean else rows_out
    bblk = _pick_bblk(B, rows_in, K, out_rows, Cout)
    grid = (B // bblk,)

    if pool_mean:
        out_shape = jax.ShapeDtypeStruct((B, 1, Cout), jnp.float32)
        out_block = (bblk, 1, Cout)
    else:
        out_shape = jax.ShapeDtypeStruct((B, rows_out, Cout), jnp.bfloat16)
        out_block = (bblk, rows_out, Cout)

    kernel = functools.partial(_conv_kernel, rows_out=rows_out,
                               row_offsets=row_offsets, relu=True,
                               pool_mean=pool_mean)
    out = pl.pallas_call(
        kernel,
        out_shape=out_shape,
        grid=grid,
        in_specs=[
            pl.BlockSpec((bblk, rows_in, K), lambda n: (n, 0, 0)),
            pl.BlockSpec((n_taps, K, Cout), lambda n: (0, 0, 0)),
            pl.BlockSpec((1, Cout), lambda n: (0, 0)),
        ],
        out_specs=pl.BlockSpec(out_block, lambda n: (n, 0, 0)),
        compiler_params=pltpu.CompilerParams(
            dimension_semantics=("parallel",),
        ),
    )(xk, w, b)

    if pool_mean:
        return out.reshape(B, Cout)           # (B, Cout) pooled features, f32
    return out.reshape(B, H, W, Cout)


def maxpool2x2(x_nhwc):
    # Cheap XLA glue.  TODO(synk): fuse into the conv kernel epilogue for
    # 112^2-class face crops where the pre-pool activation HBM round trip matters.
    B, H, W, C = x_nhwc.shape
    assert H % 2 == 0 and W % 2 == 0, "2x2 maxpool requires even H, W"
    return x_nhwc.reshape(B, H // 2, 2, W // 2, 2, C).max(axis=(2, 4))


# ------------------------------- face-embedding network ------------------------------

def init_face_model_params(key):
    # TODO(synk): a pretrained face-recognition model (self.model in the PyTorch
    # module) cannot be loaded in-script; a deterministic He-initialized CNN
    # embedder with the same forward contract (image -> embedding) is used.
    cfg = [(3, 64), (64, 128), (128, 128)]
    convs = []
    for li, (cin, cout) in enumerate(cfg):
        key, wk = jax.random.split(key)
        std = (2.0 / (9.0 * cin)) ** 0.5
        w = jax.random.normal(wk, (3, 3, cin, cout), jnp.float32) * std
        if li == 0:
            wr = w.reshape(1, 9 * cin, cout)      # (1, (dy,dx,cin), cout): full im2col
        else:
            wr = w.reshape(3, 3 * cin, cout)      # (dy, (dx,cin), cout): dy in kernel
        convs.append((wr.astype(jnp.bfloat16), jnp.zeros((1, cout), jnp.float32)))
    key, wk = jax.random.split(key)
    w_fc = (jax.random.normal(wk, (128, EMB_DIM), jnp.float32)
            * (1.0 / 128.0) ** 0.5).astype(jnp.bfloat16)
    b_fc = jnp.zeros((1, EMB_DIM), jnp.float32)
    return {"convs": convs, "fc": (w_fc, b_fc)}


def face_features(x_nhwc_bf16, params):
    """Conv stack with GAP fused into the last conv -> (B, C) pooled features (f32)."""
    h = x_nhwc_bf16
    convs = params["convs"]
    n = len(convs)
    for li, (w, b) in enumerate(convs):
        last = li == n - 1
        h = conv3x3_bias_relu(h, w, b, full_im2col=(li == 0), pool_mean=last)
        if not last:
            h = maxpool2x2(h)
    return h                                      # (B, C) f32


# ------------------------- fused FC projection + cosine loss -------------------------

def _fc_cosine_loss_kernel(p_ref, w_ref, b_ref, loss_ref, *, half):
    # p_ref: (2B, C) f32 pooled features; w_ref: (C, D) bf16; b_ref: (1, D) f32.
    pooled = p_ref[...]
    emb = jnp.dot(pooled.astype(jnp.bfloat16), w_ref[...],
                  preferred_element_type=jnp.float32) + b_ref[...]     # (2B, D) f32
    e1 = emb[0:half]                         # embeddings of out_images
    e2 = emb[half:2 * half]                  # embeddings of target_images
    dots = jnp.sum(e1 * e2, axis=-1, keepdims=True)                    # (B, 1)
    nsq = (jnp.sum(e1 * e1, axis=-1, keepdims=True)
           * jnp.sum(e2 * e2, axis=-1, keepdims=True))
    # eps clamp (like torch cosine_similarity eps=1e-8 on the norm product):
    # guards against inf/NaN for a zero / underflowed embedding.
    per_sample = 1.0 - dots * jax.lax.rsqrt(jnp.maximum(nsq, 1e-16))
    loss_ref[...] = jnp.reshape(jnp.mean(per_sample), (1, 1))


def face_identity_loss_pallas(out_images_nchw, target_images_nchw, params):
    B = out_images_nchw.shape[0]
    # Single batched embedding pass over [out; target]: halves weight reads and
    # kernel launches versus two separate passes.
    x = jnp.concatenate([out_images_nchw, target_images_nchw], axis=0)
    x = jnp.transpose(x, (0, 2, 3, 1)).astype(jnp.bfloat16)        # NCHW -> NHWC bf16
    pooled = face_features(x, params)                              # (2B, C) f32
    w_fc, b_fc = params["fc"]
    loss = pl.pallas_call(
        functools.partial(_fc_cosine_loss_kernel, half=B),
        out_shape=jax.ShapeDtypeStruct((1, 1), jnp.float32),
        in_specs=[pl.BlockSpec(memory_space=pltpu.MemorySpace.VMEM)] * 3,
        out_specs=pl.BlockSpec(memory_space=pltpu.MemorySpace.VMEM),
    )(pooled, w_fc, b_fc)
    return loss[0, 0]


if __name__ == "__main__":
    key = jax.random.PRNGKey(0)
    k1, k2, k3 = jax.random.split(key, 3)

    # Small shapes consistent with the module: batch=2, 3-channel 32x32 face crops.
    out_images = jax.random.uniform(k1, (2, 3, 32, 32), jnp.float32)
    target_images = jax.random.uniform(k2, (2, 3, 32, 32), jnp.float32)
    params = init_face_model_params(k3)

    loss_fn = jax.jit(face_identity_loss_pallas)
    loss = loss_fn(out_images, target_images, params)
    loss = jax.block_until_ready(loss)
    assert bool(jnp.isfinite(loss)), "loss is not finite"
    print("KERNEL_OK")
</pallas_src>

<mosaic_0001>
module attributes {stable_mosaic.version = 11 : i64} {
  func.func @_conv_kernel(%arg0: i32, %arg1: memref<2x1024x27xbf16, #tpu.memory_space<vmem>>, %arg2: memref<1x27x64xbf16, #tpu.memory_space<vmem>>, %arg3: memref<1x64xf32, #tpu.memory_space<vmem>>, %arg4: memref<2x1024x64xbf16, #tpu.memory_space<vmem>>) attributes {dimension_semantics = [#tpu.dimension_semantics<parallel>], iteration_bounds = array<i64: 2>, scalar_prefetch = 0 : i64, scratch_operands = 0 : i64, tpu.core_type = #tpu.core_type<tc>, window_params = [{transform_indices = @transform_0, window_bounds = array<i64: 2, 1024, 27>}, {pipeline_mode = #tpu.pipeline_mode<synchronous>, transform_indices = @transform_1, window_bounds = array<i64: 1, 27, 64>}, {pipeline_mode = #tpu.pipeline_mode<synchronous>, transform_indices = @transform_2, window_bounds = array<i64: 1, 64>}, {transform_indices = @transform_3, window_bounds = array<i64: 2, 1024, 64>}]} {
    %c0 = arith.constant 0 : index
    %c0_0 = arith.constant 0 : index
    %c0_1 = arith.constant 0 : index
    %0 = vector.load %arg1[%c0, %c0_0, %c0_1] : memref<2x1024x27xbf16, #tpu.memory_space<vmem>>, vector<1x1024x27xbf16>
    %1 = vector.shape_cast %0 : vector<1x1024x27xbf16> to vector<1024x27xbf16>
    %c0_2 = arith.constant 0 : index
    %c0_3 = arith.constant 0 : index
    %c0_4 = arith.constant 0 : index
    %2 = vector.load %arg2[%c0_2, %c0_3, %c0_4] : memref<1x27x64xbf16, #tpu.memory_space<vmem>>, vector<1x27x64xbf16>
    %3 = vector.shape_cast %2 : vector<1x27x64xbf16> to vector<27x64xbf16>
    %cst = arith.constant dense<0.000000e+00> : vector<1024x64xf32>
    %4 = tpu.matmul %1, %3, %cst {dimension_numbers = #tpu.dot_dimension_numbers<[1], [0], [0], [1], [0, 0, 1, 1], [], []>} : vector<1024x27xbf16>, vector<27x64xbf16>, vector<1024x64xf32> -> vector<1024x64xf32>
    %c0_5 = arith.constant 0 : index
    %c0_6 = arith.constant 0 : index
    %5 = vector.load %arg3[%c0_5, %c0_6] : memref<1x64xf32, #tpu.memory_space<vmem>>, vector<1x64xf32>
    %6 = vector.broadcast %5 : vector<1x64xf32> to vector<1024x64xf32>
    %7 = arith.addf %4, %6 : vector<1024x64xf32>
    %cst_7 = arith.constant 0.000000e+00 : f32
    %8 = vector.broadcast %cst_7 : f32 to vector<1024x64xf32>
    %9 = arith.maximumf %7, %8 : vector<1024x64xf32>
    %10 = arith.truncf %9 : vector<1024x64xf32> to vector<1024x64xbf16>
    %c0_8 = arith.constant 0 : index
    %c0_9 = arith.constant 0 : index
    %c0_10 = arith.constant 0 : index
    %11 = vector.load %arg4[%c0_8, %c0_9, %c0_10] : memref<2x1024x64xbf16, #tpu.memory_space<vmem>>, vector<1x1024x64xbf16>
    %12 = vector.shape_cast %11 : vector<1x1024x64xbf16> to vector<1024x64xbf16>
    %13 = vector.shape_cast %10 : vector<1024x64xbf16> to vector<1x1024x64xbf16>
    tpu.vector_store %arg4[%c0_8, %c0_9, %c0_10], %13 {strides = array<i32>} : memref<2x1024x64xbf16, #tpu.memory_space<vmem>>, vector<1x1024x64xbf16>,
    %c1 = arith.constant 1 : index
    %c0_11 = arith.constant 0 : index
    %c0_12 = arith.constant 0 : index
    %14 = vector.load %arg1[%c1, %c0_11, %c0_12] : memref<2x1024x27xbf16, #tpu.memory_space<vmem>>, vector<1x1024x27xbf16>
    %15 = vector.shape_cast %14 : vector<1x1024x27xbf16> to vector<1024x27xbf16>
    %c0_13 = arith.constant 0 : index
    %c0_14 = arith.constant 0 : index
    %c0_15 = arith.constant 0 : index
    %16 = vector.load %arg2[%c0_13, %c0_14, %c0_15] : memref<1x27x64xbf16, #tpu.memory_space<vmem>>, vector<1x27x64xbf16>
    %17 = vector.shape_cast %16 : vector<1x27x64xbf16> to vector<27x64xbf16>
    %cst_16 = arith.constant dense<0.000000e+00> : vector<1024x64xf32>
    %18 = tpu.matmul %15, %17, %cst_16 {dimension_numbers = #tpu.dot_dimension_numbers<[1], [0], [0], [1], [0, 0, 1, 1], [], []>} : vector<1024x27xbf16>, vector<27x64xbf16>, vector<1024x64xf32> -> vector<1024x64xf32>
    %c0_17 = arith.constant 0 : index
    %c0_18 = arith.constant 0 : index
    %19 = vector.load %arg3[%c0_17, %c0_18] : memref<1x64xf32, #tpu.memory_space<vmem>>, vector<1x64xf32>
    %20 = vector.broadcast %19 : vector<1x64xf32> to vector<1024x64xf32>
    %21 = arith.addf %18, %20 : vector<1024x64xf32>
    %cst_19 = arith.constant 0.000000e+00 : f32
    %22 = vector.broadcast %cst_19 : f32 to vector<1024x64xf32>
    %23 = arith.maximumf %21, %22 : vector<1024x64xf32>
    %24 = arith.truncf %23 : vector<1024x64xf32> to vector<1024x64xbf16>
    %c1_20 = arith.constant 1 : index
    %c0_21 = arith.constant 0 : index
    %c0_22 = arith.constant 0 : index
    %25 = vector.load %arg4[%c1_20, %c0_21, %c0_22] : memref<2x1024x64xbf16, #tpu.memory_space<vmem>>, vector<1x1024x64xbf16>
    %26 = vector.shape_cast %25 : vector<1x1024x64xbf16> to vector<1024x64xbf16>
    %27 = vector.shape_cast %24 : vector<1024x64xbf16> to vector<1x1024x64xbf16>
    tpu.vector_store %arg4[%c1_20, %c0_21, %c0_22], %27 {strides = array<i32>} : memref<2x1024x64xbf16, #tpu.memory_space<vmem>>, vector<1x1024x64xbf16>,
    return
  }
  func.func @transform_0(%arg0: i32) -> (i32, i32, i32) {
    %c0_i32 = arith.constant 0 : i32
    %c0_i32_0 = arith.constant 0 : i32
    %c0_i32_1 = arith.constant 0 : i32
    return %arg0, %c0_i32, %c0_i32_0 : i32, i32, i32
  }
  func.func @transform_1(%arg0: i32) -> (i32, i32, i32) {
    %c0_i32 = arith.constant 0 : i32
    %c0_i32_0 = arith.constant 0 : i32
    %c0_i32_1 = arith.constant 0 : i32
    %c0_i32_2 = arith.constant 0 : i32
    return %c0_i32, %c0_i32_0, %c0_i32_1 : i32, i32, i32
  }
  func.func @transform_2(%arg0: i32) -> (i32, i32) {
    %c0_i32 = arith.constant 0 : i32
    %c0_i32_0 = arith.constant 0 : i32
    %c0_i32_1 = arith.constant 0 : i32
    return %c0_i32, %c0_i32_0 : i32, i32
  }
  func.func @transform_3(%arg0: i32) -> (i32, i32, i32) {
    %c0_i32 = arith.constant 0 : i32
    %c0_i32_0 = arith.constant 0 : i32
    %c0_i32_1 = arith.constant 0 : i32
    return %arg0, %c0_i32, %c0_i32_0 : i32, i32, i32
  }
}

module attributes {stable_mosaic.version = 11 : i64} {
  func.func @_conv_kernel(%arg0: i32, %arg1: memref<2x288x192xbf16, #tpu.memory_space<vmem>>, %arg2: memref<3x192x128xbf16, #tpu.memory_space<vmem>>, %arg3: memref<1x128xf32, #tpu.memory_space<vmem>>, %arg4: memref<2x256x128xbf16, #tpu.memory_space<vmem>>) attributes {dimension_semantics = [#tpu.dimension_semantics<parallel>], iteration_bounds = array<i64: 2>, scalar_prefetch = 0 : i64, scratch_operands = 0 : i64, tpu.core_type = #tpu.core_type<tc>, window_params = [{transform_indices = @transform_0, window_bounds = array<i64: 2, 288, 192>}, {pipeline_mode = #tpu.pipeline_mode<synchronous>, transform_indices = @transform_1, window_bounds = array<i64: 3, 192, 128>}, {pipeline_mode = #tpu.pipeline_mode<synchronous>, transform_indices = @transform_2, window_bounds = array<i64: 1, 128>}, {transform_indices = @transform_3, window_bounds = array<i64: 2, 256, 128>}]} {
    %c0 = arith.constant 0 : index
    %c0_0 = arith.constant 0 : index
    %c0_1 = arith.constant 0 : index
    %0 = vector.load %arg1[%c0, %c0_0, %c0_1] : memref<2x288x192xbf16, #tpu.memory_space<vmem>>, vector<1x256x192xbf16>
    %1 = vector.shape_cast %0 : vector<1x256x192xbf16> to vector<256x192xbf16>
    %c0_2 = arith.constant 0 : index
    %c0_3 = arith.constant 0 : index
    %c0_4 = arith.constant 0 : index
    %2 = vector.load %arg2[%c0_2, %c0_3, %c0_4] : memref<3x192x128xbf16, #tpu.memory_space<vmem>>, vector<1x192x128xbf16>
    %3 = vector.shape_cast %2 : vector<1x192x128xbf16> to vector<192x128xbf16>
    %cst = arith.constant dense<0.000000e+00> : vector<256x128xf32>
    %4 = tpu.matmul %1, %3, %cst {dimension_numbers = #tpu.dot_dimension_numbers<[1], [0], [0], [1], [0, 0, 1, 1], [], []>} : vector<256x192xbf16>, vector<192x128xbf16>, vector<256x128xf32> -> vector<256x128xf32>
    %c0_5 = arith.constant 0 : index
    %c16 = arith.constant 16 : index
    %c0_6 = arith.constant 0 : index
    %5 = vector.load %arg1[%c0_5, %c16, %c0_6] : memref<2x288x192xbf16, #tpu.memory_space<vmem>>, vector<1x256x192xbf16>
    %6 = vector.shape_cast %5 : vector<1x256x192xbf16> to vector<256x192xbf16>
    %c1 = arith.constant 1 : index
    %c0_7 = arith.constant 0 : index
    %c0_8 = arith.constant 0 : index
    %7 = vector.load %arg2[%c1, %c0_7, %c0_8] : memref<3x192x128xbf16, #tpu.memory_space<vmem>>, vector<1x192x128xbf16>
    %8 = vector.shape_cast %7 : vector<1x192x128xbf16> to vector<192x128xbf16>
    %cst_9 = arith.constant dense<0.000000e+00> : vector<256x128xf32>
    %9 = tpu.matmul %6, %8, %cst_9 {dimension_numbers = #tpu.dot_dimension_numbers<[1], [0], [0], [1], [0, 0, 1, 1], [], []>} : vector<256x192xbf16>, vector<192x128xbf16>, vector<256x128xf32> -> vector<256x128xf32>
    %10 = arith.addf %4, %9 : vector<256x128xf32>
    %c0_10 = arith.constant 0 : index
    %c32 = arith.constant 32 : index
    %c0_11 = arith.constant 0 : index
    %11 = vector.load %arg1[%c0_10, %c32, %c0_11] : memref<2x288x192xbf16, #tpu.memory_space<vmem>>, vector<1x256x192xbf16>
    %12 = vector.shape_cast %11 : vector<1x256x192xbf16> to vector<256x192xbf16>
    %c2 = arith.constant 2 : index
    %c0_12 = arith.constant 0 : index
    %c0_13 = arith.constant 0 : index
    %13 = vector.load %arg2[%c2, %c0_12, %c0_13] : memref<3x192x128xbf16, #tpu.memory_space<vmem>>, vector<1x192x128xbf16>
    %14 = vector.shape_cast %13 : vector<1x192x128xbf16> to vector<192x128xbf16>
    %cst_14 = arith.constant dense<0.000000e+00> : vector<256x128xf32>
    %15 = tpu.matmul %12, %14, %cst_14 {dimension_numbers = #tpu.dot_dimension_numbers<[1], [0], [0], [1], [0, 0, 1, 1], [], []>} : vector<256x192xbf16>, vector<192x128xbf16>, vector<256x128xf32> -> vector<256x128xf32>
    %16 = arith.addf %10, %15 : vector<256x128xf32>
    %c0_15 = arith.constant 0 : index
    %c0_16 = arith.constant 0 : index
    %17 = vector.load %arg3[%c0_15, %c0_16] : memref<1x128xf32, #tpu.memory_space<vmem>>, vector<1x128xf32>
    %18 = vector.broadcast %17 : vector<1x128xf32> to vector<256x128xf32>
    %19 = arith.addf %16, %18 : vector<256x128xf32>
    %cst_17 = arith.constant 0.000000e+00 : f32
    %20 = vector.broadcast %cst_17 : f32 to vector<256x128xf32>
    %21 = arith.maximumf %19, %20 : vector<256x128xf32>
    %22 = arith.truncf %21 : vector<256x128xf32> to vector<256x128xbf16>
    %c0_18 = arith.constant 0 : index
    %c0_19 = arith.constant 0 : index
    %c0_20 = arith.constant 0 : index
    %23 = vector.load %arg4[%c0_18, %c0_19, %c0_20] : memref<2x256x128xbf16, #tpu.memory_space<vmem>>, vector<1x256x128xbf16>
    %24 = vector.shape_cast %23 : vector<1x256x128xbf16> to vector<256x128xbf16>
    %25 = vector.shape_cast %22 : vector<256x128xbf16> to vector<1x256x128xbf16>
    tpu.vector_store %arg4[%c0_18, %c0_19, %c0_20], %25 {strides = array<i32>} : memref<2x256x128xbf16, #tpu.memory_space<vmem>>, vector<1x256x128xbf16>,
    %c1_21 = arith.constant 1 : index
    %c0_22 = arith.constant 0 : index
    %c0_23 = arith.constant 0 : index
    %26 = vector.load %arg1[%c1_21, %c0_22, %c0_23] : memref<2x288x192xbf16, #tpu.memory_space<vmem>>, vector<1x256x192xbf16>
    %27 = vector.shape_cast %26 : vector<1x256x192xbf16> to vector<256x192xbf16>
    %c0_24 = arith.constant 0 : index
    %c0_25 = arith.constant 0 : index
    %c0_26 = arith.constant 0 : index
    %28 = vector.load %arg2[%c0_24, %c0_25, %c0_26] : memref<3x192x128xbf16, #tpu.memory_space<vmem>>, vector<1x192x128xbf16>
    %29 = vector.shape_cast %28 : vector<1x192x128xbf16> to vector<192x128xbf16>
    %cst_27 = arith.constant dense<0.000000e+00> : vector<256x128xf32>
    %30 = tpu.matmul %27, %29, %cst_27 {dimension_numbers = #tpu.dot_dimension_numbers<[1], [0], [0], [1], [0, 0, 1, 1], [], []>} : vector<256x192xbf16>, vector<192x128xbf16>, vector<256x128xf32> -> vector<256x128xf32>
    %c1_28 = arith.constant 1 : index
    %c16_29 = arith.constant 16 : index
    %c0_30 = arith.constant 0 : index
    %31 = vector.load %arg1[%c1_28, %c16_29, %c0_30] : memref<2x288x192xbf16, #tpu.memory_space<vmem>>, vector<1x256x192xbf16>
    %32 = vector.shape_cast %31 : vector<1x256x192xbf16> to vector<256x192xbf16>
    %c1_31 = arith.constant 1 : index
    %c0_32 = arith.constant 0 : index
    %c0_33 = arith.constant 0 : index
    %33 = vector.load %arg2[%c1_31, %c0_32, %c0_33] : memref<3x192x128xbf16, #tpu.memory_space<vmem>>, vector<1x192x128xbf16>
    %34 = vector.shape_cast %33 : vector<1x192x128xbf16> to vector<192x128xbf16>
    %cst_34 = arith.constant dense<0.000000e+00> : vector<256x128xf32>
    %35 = tpu.matmul %32, %34, %cst_34 {dimension_numbers = #tpu.dot_dimension_numbers<[1], [0], [0], [1], [0, 0, 1, 1], [], []>} : vector<256x192xbf16>, vector<192x128xbf16>, vector<256x128xf32> -> vector<256x128xf32>
    %36 = arith.addf %30, %35 : vector<256x128xf32>
    %c1_35 = arith.constant 1 : index
    %c32_36 = arith.constant 32 : index
    %c0_37 = arith.constant 0 : index
    %37 = vector.load %arg1[%c1_35, %c32_36, %c0_37] : memref<2x288x192xbf16, #tpu.memory_space<vmem>>, vector<1x256x192xbf16>
    %38 = vector.shape_cast %37 : vector<1x256x192xbf16> to vector<256x192xbf16>
    %c2_38 = arith.constant 2 : index
    %c0_39 = arith.constant 0 : index
    %c0_40 = arith.constant 0 : index
    %39 = vector.load %arg2[%c2_38, %c0_39, %c0_40] : memref<3x192x128xbf16, #tpu.memory_space<vmem>>, vector<1x192x128xbf16>
    %40 = vector.shape_cast %39 : vector<1x192x128xbf16> to vector<192x128xbf16>
    %cst_41 = arith.constant dense<0.000000e+00> : vector<256x128xf32>
    %41 = tpu.matmul %38, %40, %cst_41 {dimension_numbers = #tpu.dot_dimension_numbers<[1], [0], [0], [1], [0, 0, 1, 1], [], []>} : vector<256x192xbf16>, vector<192x128xbf16>, vector<256x128xf32> -> vector<256x128xf32>
    %42 = arith.addf %36, %41 : vector<256x128xf32>
    %c0_42 = arith.constant 0 : index
    %c0_43 = arith.constant 0 : index
    %43 = vector.load %arg3[%c0_42, %c0_43] : memref<1x128xf32, #tpu.memory_space<vmem>>, vector<1x128xf32>
    %44 = vector.broadcast %43 : vector<1x128xf32> to vector<256x128xf32>
    %45 = arith.addf %42, %44 : vector<256x128xf32>
    %cst_44 = arith.constant 0.000000e+00 : f32
    %46 = vector.broadcast %cst_44 : f32 to vector<256x128xf32>
    %47 = arith.maximumf %45, %46 : vector<256x128xf32>
    %48 = arith.truncf %47 : vector<256x128xf32> to vector<256x128xbf16>
    %c1_45 = arith.constant 1 : index
    %c0_46 = arith.constant 0 : index
    %c0_47 = arith.constant 0 : index
    %49 = vector.load %arg4[%c1_45, %c0_46, %c0_47] : memref<2x256x128xbf16, #tpu.memory_space<vmem>>, vector<1x256x128xbf16>
    %50 = vector.shape_cast %49 : vector<1x256x128xbf16> to vector<256x128xbf16>
    %51 = vector.shape_cast %48 : vector<256x128xbf16> to vector<1x256x128xbf16>
    tpu.vector_store %arg4[%c1_45, %c0_46, %c0_47], %51 {strides = array<i32>} : memref<2x256x128xbf16, #tpu.memory_space<vmem>>, vector<1x256x128xbf16>,
    return
  }
  func.func @transform_0(%arg0: i32) -> (i32, i32, i32) {
    %c0_i32 = arith.constant 0 : i32
    %c0_i32_0 = arith.constant 0 : i32
    %c0_i32_1 = arith.constant 0 : i32
    return %arg0, %c0_i32, %c0_i32_0 : i32, i32, i32
  }
  func.func @transform_1(%arg0: i32) -> (i32, i32, i32) {
    %c0_i32 = arith.constant 0 : i32
    %c0_i32_0 = arith.constant 0 : i32
    %c0_i32_1 = arith.constant 0 : i32
    %c0_i32_2 = arith.constant 0 : i32
    return %c0_i32, %c0_i32_0, %c0_i32_1 : i32, i32, i32
  }
  func.func @transform_2(%arg0: i32) -> (i32, i32) {
    %c0_i32 = arith.constant 0 : i32
    %c0_i32_0 = arith.constant 0 : i32
    %c0_i32_1 = arith.constant 0 : i32
    return %c0_i32, %c0_i32_0 : i32, i32
  }
  func.func @transform_3(%arg0: i32) -> (i32, i32, i32) {
    %c0_i32 = arith.constant 0 : i32
    %c0_i32_0 = arith.constant 0 : i32
    %c0_i32_1 = arith.constant 0 : i32
    return %arg0, %c0_i32, %c0_i32_0 : i32, i32, i32
  }
}

module attributes {stable_mosaic.version = 11 : i64} {
  func.func @_conv_kernel(%arg0: i32, %arg1: memref<2x80x384xbf16, #tpu.memory_space<vmem>>, %arg2: memref<3x384x128xbf16, #tpu.memory_space<vmem>>, %arg3: memref<1x128xf32, #tpu.memory_space<vmem>>, %arg4: memref<2x1x128xf32, #tpu.memory_space<vmem>>) attributes {dimension_semantics = [#tpu.dimension_semantics<parallel>], iteration_bounds = array<i64: 2>, scalar_prefetch = 0 : i64, scratch_operands = 0 : i64, tpu.core_type = #tpu.core_type<tc>, window_params = [{transform_indices = @transform_0, window_bounds = array<i64: 2, 80, 384>}, {pipeline_mode = #tpu.pipeline_mode<synchronous>, transform_indices = @transform_1, window_bounds = array<i64: 3, 384, 128>}, {pipeline_mode = #tpu.pipeline_mode<synchronous>, transform_indices = @transform_2, window_bounds = array<i64: 1, 128>}, {transform_indices = @transform_3, window_bounds = array<i64: 2, 1, 128>}]} {
    %c0 = arith.constant 0 : index
    %c0_0 = arith.constant 0 : index
    %c0_1 = arith.constant 0 : index
    %0 = vector.load %arg1[%c0, %c0_0, %c0_1] : memref<2x80x384xbf16, #tpu.memory_space<vmem>>, vector<1x64x384xbf16>
    %1 = vector.shape_cast %0 : vector<1x64x384xbf16> to vector<64x384xbf16>
    %c0_2 = arith.constant 0 : index
    %c0_3 = arith.constant 0 : index
    %c0_4 = arith.constant 0 : index
    %2 = vector.load %arg2[%c0_2, %c0_3, %c0_4] : memref<3x384x128xbf16, #tpu.memory_space<vmem>>, vector<1x384x128xbf16>
    %3 = vector.shape_cast %2 : vector<1x384x128xbf16> to vector<384x128xbf16>
    %cst = arith.constant dense<0.000000e+00> : vector<64x128xf32>
    %4 = tpu.matmul %1, %3, %cst {dimension_numbers = #tpu.dot_dimension_numbers<[1], [0], [0], [1], [0, 0, 1, 1], [], []>} : vector<64x384xbf16>, vector<384x128xbf16>, vector<64x128xf32> -> vector<64x128xf32>
    %c0_5 = arith.constant 0 : index
    %c8 = arith.constant 8 : index
    %c0_6 = arith.constant 0 : index
    %5 = vector.load %arg1[%c0_5, %c8, %c0_6] : memref<2x80x384xbf16, #tpu.memory_space<vmem>>, vector<1x64x384xbf16>
    %6 = vector.shape_cast %5 : vector<1x64x384xbf16> to vector<64x384xbf16>
    %c1 = arith.constant 1 : index
    %c0_7 = arith.constant 0 : index
    %c0_8 = arith.constant 0 : index
    %7 = vector.load %arg2[%c1, %c0_7, %c0_8] : memref<3x384x128xbf16, #tpu.memory_space<vmem>>, vector<1x384x128xbf16>
    %8 = vector.shape_cast %7 : vector<1x384x128xbf16> to vector<384x128xbf16>
    %cst_9 = arith.constant dense<0.000000e+00> : vector<64x128xf32>
    %9 = tpu.matmul %6, %8, %cst_9 {dimension_numbers = #tpu.dot_dimension_numbers<[1], [0], [0], [1], [0, 0, 1, 1], [], []>} : vector<64x384xbf16>, vector<384x128xbf16>, vector<64x128xf32> -> vector<64x128xf32>
    %10 = arith.addf %4, %9 : vector<64x128xf32>
    %c0_10 = arith.constant 0 : index
    %c16 = arith.constant 16 : index
    %c0_11 = arith.constant 0 : index
    %11 = vector.load %arg1[%c0_10, %c16, %c0_11] : memref<2x80x384xbf16, #tpu.memory_space<vmem>>, vector<1x64x384xbf16>
    %12 = vector.shape_cast %11 : vector<1x64x384xbf16> to vector<64x384xbf16>
    %c2 = arith.constant 2 : index
    %c0_12 = arith.constant 0 : index
    %c0_13 = arith.constant 0 : index
    %13 = vector.load %arg2[%c2, %c0_12, %c0_13] : memref<3x384x128xbf16, #tpu.memory_space<vmem>>, vector<1x384x128xbf16>
    %14 = vector.shape_cast %13 : vector<1x384x128xbf16> to vector<384x128xbf16>
    %cst_14 = arith.constant dense<0.000000e+00> : vector<64x128xf32>
    %15 = tpu.matmul %12, %14, %cst_14 {dimension_numbers = #tpu.dot_dimension_numbers<[1], [0], [0], [1], [0, 0, 1, 1], [], []>} : vector<64x384xbf16>, vector<384x128xbf16>, vector<64x128xf32> -> vector<64x128xf32>
    %16 = arith.addf %10, %15 : vector<64x128xf32>
    %c0_15 = arith.constant 0 : index
    %c0_16 = arith.constant 0 : index
    %17 = vector.load %arg3[%c0_15, %c0_16] : memref<1x128xf32, #tpu.memory_space<vmem>>, vector<1x128xf32>
    %18 = vector.broadcast %17 : vector<1x128xf32> to vector<64x128xf32>
    %19 = arith.addf %16, %18 : vector<64x128xf32>
    %cst_17 = arith.constant 0.000000e+00 : f32
    %20 = vector.broadcast %cst_17 : f32 to vector<64x128xf32>
    %21 = arith.maximumf %19, %20 : vector<64x128xf32>
    %cst_18 = arith.constant dense<0.000000e+00> : vector<128xf32>
    %22 = vector.multi_reduction <add>, %21, %cst_18 [0] : vector<64x128xf32> to vector<128xf32>
    %23 = vector.shape_cast %22 : vector<128xf32> to vector<1x128xf32>
    %cst_19 = arith.constant 1.562500e-02 : f32
    %24 = vector.broadcast %cst_19 : f32 to vector<1x128xf32>
    %25 = arith.mulf %23, %24 : vector<1x128xf32>
    %c0_20 = arith.constant 0 : index
    %c0_21 = arith.constant 0 : index
    %c0_22 = arith.constant 0 : index
    %26 = vector.load %arg4[%c0_20, %c0_21, %c0_22] : memref<2x1x128xf32, #tpu.memory_space<vmem>>, vector<1x1x128xf32>
    %27 = vector.shape_cast %26 : vector<1x1x128xf32> to vector<1x128xf32>
    %28 = vector.shape_cast %25 : vector<1x128xf32> to vector<1x1x128xf32>
    tpu.vector_store %arg4[%c0_20, %c0_21, %c0_22], %28 {strides = array<i32>} : memref<2x1x128xf32, #tpu.memory_space<vmem>>, vector<1x1x128xf32>,
    %c1_23 = arith.constant 1 : index
    %c0_24 = arith.constant 0 : index
    %c0_25 = arith.constant 0 : index
    %29 = vector.load %arg1[%c1_23, %c0_24, %c0_25] : memref<2x80x384xbf16, #tpu.memory_space<vmem>>, vector<1x64x384xbf16>
    %30 = vector.shape_cast %29 : vector<1x64x384xbf16> to vector<64x384xbf16>
    %c0_26 = arith.constant 0 : index
    %c0_27 = arith.constant 0 : index
    %c0_28 = arith.constant 0 : index
    %31 = vector.load %arg2[%c0_26, %c0_27, %c0_28] : memref<3x384x128xbf16, #tpu.memory_space<vmem>>, vector<1x384x128xbf16>
    %32 = vector.shape_cast %31 : vector<1x384x128xbf16> to vector<384x128xbf16>
    %cst_29 = arith.constant dense<0.000000e+00> : vector<64x128xf32>
    %33 = tpu.matmul %30, %32, %cst_29 {dimension_numbers = #tpu.dot_dimension_numbers<[1], [0], [0], [1], [0, 0, 1, 1], [], []>} : vector<64x384xbf16>, vector<384x128xbf16>, vector<64x128xf32> -> vector<64x128xf32>
    %c1_30 = arith.constant 1 : index
    %c8_31 = arith.constant 8 : index
    %c0_32 = arith.constant 0 : index
    %34 = vector.load %arg1[%c1_30, %c8_31, %c0_32] : memref<2x80x384xbf16, #tpu.memory_space<vmem>>, vector<1x64x384xbf16>
    %35 = vector.shape_cast %34 : vector<1x64x384xbf16> to vector<64x384xbf16>
    %c1_33 = arith.constant 1 : index
    %c0_34 = arith.constant 0 : index
    %c0_35 = arith.constant 0 : index
    %36 = vector.load %arg2[%c1_33, %c0_34, %c0_35] : memref<3x384x128xbf16, #tpu.memory_space<vmem>>, vector<1x384x128xbf16>
    %37 = vector.shape_cast %36 : vector<1x384x128xbf16> to vector<384x128xbf16>
    %cst_36 = arith.constant dense<0.000000e+00> : vector<64x128xf32>
    %38 = tpu.matmul %35, %37, %cst_36 {dimension_numbers = #tpu.dot_dimension_numbers<[1], [0], [0], [1], [0, 0, 1, 1], [], []>} : vector<64x384xbf16>, vector<384x128xbf16>, vector<64x128xf32> -> vector<64x128xf32>
    %39 = arith.addf %33, %38 : vector<64x128xf32>
    %c1_37 = arith.constant 1 : index
    %c16_38 = arith.constant 16 : index
    %c0_39 = arith.constant 0 : index
    %40 = vector.load %arg1[%c1_37, %c16_38, %c0_39] : memref<2x80x384xbf16, #tpu.memory_space<vmem>>, vector<1x64x384xbf16>
    %41 = vector.shape_cast %40 : vector<1x64x384xbf16> to vector<64x384xbf16>
    %c2_40 = arith.constant 2 : index
    %c0_41 = arith.constant 0 : index
    %c0_42 = arith.constant 0 : index
    %42 = vector.load %arg2[%c2_40, %c0_41, %c0_42] : memref<3x384x128xbf16, #tpu.memory_space<vmem>>, vector<1x384x128xbf16>
    %43 = vector.shape_cast %42 : vector<1x384x128xbf16> to vector<384x128xbf16>
    %cst_43 = arith.constant dense<0.000000e+00> : vector<64x128xf32>
    %44 = tpu.matmul %41, %43, %cst_43 {dimension_numbers = #tpu.dot_dimension_numbers<[1], [0], [0], [1], [0, 0, 1, 1], [], []>} : vector<64x384xbf16>, vector<384x128xbf16>, vector<64x128xf32> -> vector<64x128xf32>
    %45 = arith.addf %39, %44 : vector<64x128xf32>
    %c0_44 = arith.constant 0 : index
    %c0_45 = arith.constant 0 : index
    %46 = vector.load %arg3[%c0_44, %c0_45] : memref<1x128xf32, #tpu.memory_space<vmem>>, vector<1x128xf32>
    %47 = vector.broadcast %46 : vector<1x128xf32> to vector<64x128xf32>
    %48 = arith.addf %45, %47 : vector<64x128xf32>
    %cst_46 = arith.constant 0.000000e+00 : f32
    %49 = vector.broadcast %cst_46 : f32 to vector<64x128xf32>
    %50 = arith.maximumf %48, %49 : vector<64x128xf32>
    %cst_47 = arith.constant dense<0.000000e+00> : vector<128xf32>
    %51 = vector.multi_reduction <add>, %50, %cst_47 [0] : vector<64x128xf32> to vector<128xf32>
    %52 = vector.shape_cast %51 : vector<128xf32> to vector<1x128xf32>
    %cst_48 = arith.constant 1.562500e-02 : f32
    %53 = vector.broadcast %cst_48 : f32 to vector<1x128xf32>
    %54 = arith.mulf %52, %53 : vector<1x128xf32>
    %c1_49 = arith.constant 1 : index
    %c0_50 = arith.constant 0 : index
    %c0_51 = arith.constant 0 : index
    %55 = vector.load %arg4[%c1_49, %c0_50, %c0_51] : memref<2x1x128xf32, #tpu.memory_space<vmem>>, vector<1x1x128xf32>
    %56 = vector.shape_cast %55 : vector<1x1x128xf32> to vector<1x128xf32>
    %57 = vector.shape_cast %54 : vector<1x128xf32> to vector<1x1x128xf32>
    tpu.vector_store %arg4[%c1_49, %c0_50, %c0_51], %57 {strides = array<i32>} : memref<2x1x128xf32, #tpu.memory_space<vmem>>, vector<1x1x128xf32>,
    return
  }
  func.func @transform_0(%arg0: i32) -> (i32, i32, i32) {
    %c0_i32 = arith.constant 0 : i32
    %c0_i32_0 = arith.constant 0 : i32
    %c0_i32_1 = arith.constant 0 : i32
    return %arg0, %c0_i32, %c0_i32_0 : i32, i32, i32
  }
  func.func @transform_1(%arg0: i32) -> (i32, i32, i32) {
    %c0_i32 = arith.constant 0 : i32
    %c0_i32_0 = arith.constant 0 : i32
    %c0_i32_1 = arith.constant 0 : i32
    %c0_i32_2 = arith.constant 0 : i32
    return %c0_i32, %c0_i32_0, %c0_i32_1 : i32, i32, i32
  }
  func.func @transform_2(%arg0: i32) -> (i32, i32) {
    %c0_i32 = arith.constant 0 : i32
    %c0_i32_0 = arith.constant 0 : i32
    %c0_i32_1 = arith.constant 0 : i32
    return %c0_i32, %c0_i32_0 : i32, i32
  }
  func.func @transform_3(%arg0: i32) -> (i32, i32, i32) {
    %c0_i32 = arith.constant 0 : i32
    %c0_i32_0 = arith.constant 0 : i32
    %c0_i32_1 = arith.constant 0 : i32
    return %arg0, %c0_i32, %c0_i32_0 : i32, i32, i32
  }
}

module attributes {stable_mosaic.version = 11 : i64} {
  func.func @_fc_cosine_loss_kernel(%arg0: memref<4x128xf32, #tpu.memory_space<vmem>>, %arg1: memref<128x128xbf16, #tpu.memory_space<vmem>>, %arg2: memref<1x128xf32, #tpu.memory_space<vmem>>, %arg3: memref<1x1xf32, #tpu.memory_space<vmem>>) attributes {dimension_semantics = [], scalar_prefetch = 0 : i64, scratch_operands = 0 : i64, tpu.core_type = #tpu.core_type<tc>} {
    %c0 = arith.constant 0 : index
    %c0_0 = arith.constant 0 : index
    %0 = vector.load %arg0[%c0, %c0_0] : memref<4x128xf32, #tpu.memory_space<vmem>>, vector<4x128xf32>
    %1 = arith.truncf %0 : vector<4x128xf32> to vector<4x128xbf16>
    %c0_1 = arith.constant 0 : index
    %c0_2 = arith.constant 0 : index
    %2 = vector.load %arg1[%c0_1, %c0_2] : memref<128x128xbf16, #tpu.memory_space<vmem>>, vector<128x128xbf16>
    %cst = arith.constant dense<0.000000e+00> : vector<4x128xf32>
    %3 = tpu.matmul %1, %2, %cst {dimension_numbers = #tpu.dot_dimension_numbers<[1], [0], [0], [1], [0, 0, 1, 1], [], []>} : vector<4x128xbf16>, vector<128x128xbf16>, vector<4x128xf32> -> vector<4x128xf32>
    %c0_3 = arith.constant 0 : index
    %c0_4 = arith.constant 0 : index
    %4 = vector.load %arg2[%c0_3, %c0_4] : memref<1x128xf32, #tpu.memory_space<vmem>>, vector<1x128xf32>
    %5 = vector.broadcast %4 : vector<1x128xf32> to vector<4x128xf32>
    %6 = arith.addf %3, %5 : vector<4x128xf32>
    %7 = vector.extract_strided_slice %6 {offsets = [0, 0], sizes = [2, 128], strides = [1, 1]} : vector<4x128xf32> to vector<2x128xf32>
    %8 = vector.extract_strided_slice %6 {offsets = [2, 0], sizes = [2, 128], strides = [1, 1]} : vector<4x128xf32> to vector<2x128xf32>
    %9 = arith.mulf %7, %8 : vector<2x128xf32>
    %cst_5 = arith.constant dense<0.000000e+00> : vector<2xf32>
    %10 = vector.multi_reduction <add>, %9, %cst_5 [1] : vector<2x128xf32> to vector<2xf32>
    %11 = vector.shape_cast %10 : vector<2xf32> to vector<2x1xf32>
    %12 = arith.mulf %7, %7 : vector<2x128xf32>
    %cst_6 = arith.constant dense<0.000000e+00> : vector<2xf32>
    %13 = vector.multi_reduction <add>, %12, %cst_6 [1] : vector<2x128xf32> to vector<2xf32>
    %14 = vector.shape_cast %13 : vector<2xf32> to vector<2x1xf32>
    %15 = arith.mulf %8, %8 : vector<2x128xf32>
    %cst_7 = arith.constant dense<0.000000e+00> : vector<2xf32>
    %16 = vector.multi_reduction <add>, %15, %cst_7 [1] : vector<2x128xf32> to vector<2xf32>
    %17 = vector.shape_cast %16 : vector<2xf32> to vector<2x1xf32>
    %18 = arith.mulf %14, %17 : vector<2x1xf32>
    %cst_8 = arith.constant 1.000000e-16 : f32
    %19 = vector.broadcast %cst_8 : f32 to vector<2x1xf32>
    %20 = arith.maximumf %18, %19 : vector<2x1xf32>
    %21 = math.rsqrt %20 : vector<2x1xf32>
    %22 = arith.mulf %11, %21 : vector<2x1xf32>
    %cst_9 = arith.constant 1.000000e+00 : f32
    %23 = vector.broadcast %cst_9 : f32 to vector<2x1xf32>
    %24 = arith.subf %23, %22 : vector<2x1xf32>
    %25 = vector.shape_cast %24 : vector<2x1xf32> to vector<1x2x1xf32>
    %cst_10 = arith.constant dense<0.000000e+00> : vector<1xf32>
    %26 = vector.multi_reduction <add>, %25, %cst_10 [1, 2] : vector<1x2x1xf32> to vector<1xf32>
    %27 = vector.shape_cast %26 : vector<1xf32> to vector<1x1x1xf32>
    %28 = vector.extract %27[0, 0, 0] : f32 from vector<1x1x1xf32>
    %cst_11 = arith.constant 2.000000e+00 : f32
    %29 = arith.divf %28, %cst_11 : f32
    %30 = vector.broadcast %29 : f32 to vector<1x1xf32>
    %c0_12 = arith.constant 0 : index
    %c0_13 = arith.constant 0 : index
    %31 = vector.load %arg3[%c0_12, %c0_13] : memref<1x1xf32, #tpu.memory_space<vmem>>, vector<1x1xf32>
    tpu.vector_store %arg3[%c0_12, %c0_13], %30 {strides = array<i32>} : memref<1x1xf32, #tpu.memory_space<vmem>>, vector<1x1xf32>,
    return
  }
}

</mosaic_0001>

<bundles_post_ra>
// kernel: face_identity_loss_pallas.4
= control target key start
LH: loop header
LB: loop body
LE: loop exit
PB: predicated region body
PF: predicated region fallthrough
CT: control target
= control target key end

     0   :  { %s5815_s12 = smov 0   ;;  %s6894_s0 = inlined_call_operand.vmem [shape: bf16[4,1024,27], index: 0, kind: input, shape index: {}]   ;;  %s6895_s1 = inlined_call_operand.vmem [shape: bf16[1,27,64], index: 1, kind: input, shape index: {}]   ;;  %s6896_s2 = inlined_call_operand.vmem [shape: f32[1,64], index: 2, kind: input, shape index: {}]   ;;  %s6897_s3 = inlined_call_operand.vmem [shape: bf16[4,1024,64], index: 3, kind: output, shape index: {}]  }
   0x1 LB: > { %s4202_s13 = sadd.s32 4294967295, %s5792_s12   ;;  %p4206_p0 = scmp.ge.s32.totalorder %s5792_s12, 1  ;;  %s5792_s12 = sphi %s5815_s12, %s13_s12  }
   0x2   : > { %p139_p1 = scmp.lt.s32.totalorder %s5792_s12, 3 }
   0x4   : > { %p140_p2 = pnand %p4206_p0, %p139_p1 }
   0x5   : > { %v5652_v0 = vld [vmem:[%s6895_s1] sm:$0xff] (!%p140_p2)   ;;  %vm843_vm0 = vcmask (!%p140_p2), 1044480   ;;  %vm844_vm1 = vcmask (!%p140_p2), 1045504   ;;  %v5654_v2 = vld [vmem:[%s6895_s1 + $0x8] sm:$0x3f] (!%p140_p2)   ;;  %s4207_s20 = sshll.u32 (!%p140_p2), %s4202_s13, 1 }
   0x6   : > { %143 = sbr.rel (%p140_p2) target bundleno = 489 (0x1e9), region = 32  ;;  %v5653_v1 = vld [vmem:[%s6895_s1] sm:$0xff] (!%p140_p2)   ;;  %5379 = vmatprep.subr.bf16.mxu0 (!%p140_p2), %v5652_v0  ;;  %v5794_v3 = vmov (!%p140_p2), 65535   ;;  %v5655_v5 = vld [vmem:[%s6895_s1 + $0x8] sm:$0x3f] (!%p140_p2)   ;;  %p166_p3 = scmp.lt.s32.totalorder (!%p140_p2), %s4207_s20, 3 }
   0x7   : > { %5511 = vmatprep.subr.bf16.mxu1 (!%p140_p2), %v5653_v1  ;;  %5380 = vmatpush3.bf16.msra.mxu0 (!%p140_p2), %v5652_v0  ;;  %v845_v4 = vsel (!%p140_p2), %vm843_vm0, 4294967295, %v5794_v3  ;;  %vm650_vm2 = vcmask (!%p140_p2), 220160   ;;  %vm2035_vm3 = vcmask (!%p140_p2), 519168  }
   0x8   : > { %5512 = vmatpush3.bf16.msra.mxu1 (!%p140_p2), %v5653_v1  ;;  %v846_v6 = vsel (!%p140_p2), %vm844_vm1, %v845_v4, 0 }
   0x9   : > { %v848_v7 = vand.u32 (!%p140_p2), %v5654_v2, %v846_v6  ;;  %v2828_v8 = vand.u32 (!%p140_p2), %v5655_v5, %v846_v6 }
   0xb   : > { %5381 = vmatprep.subr.bf16.mxu0 (!%p140_p2), %v848_v7  ;;  %5513 = vmatprep.subr.bf16.mxu1 (!%p140_p2), %v2828_v8 }
   0xc   : > { %5382 = vmatpush3.bf16.msra.mxu0 (!%p140_p2), %v848_v7  ;;  %5514 = vmatpush3.bf16.msra.mxu1 (!%p140_p2), %v2828_v8 }
   0xd   : > { %s6899_s20 = smov (!%p166_p3, %s4207_s20), 3 }
   0xe   : > { %s4989_s23 = sshll.u32 %s6899_s20, 9 }
   0xf   : > { %s5843_s26 = scalar_lea.vmem %s6894_s0, %s4989_s23  ;;  %s6084_s4 = scalar_lea.vmem %s6897_s3, %s4989_s23 }
  0x10   : > { %v5656_v9 = vld [vmem:[%s5843_s26] sm:$0xff]   ;;  %v5658_v11 = vld [vmem:[%s5843_s26 + $0x8] sm:$0xff]   ;;  %v5660_v13 = vld [vmem:[%s5843_s26 + $0x10] sm:$0xff]  }
  0x11   : > { %v5657_v10 = vld [vmem:[%s5843_s26 + $0x200] sm:$0xff]   ;;  %5383 = vmatprep.mubr.msk.bf16.mxu0 %vm650_vm2, %v5656_v9  ;;  %v5659_v12 = vld [vmem:[%s5843_s26 + $0x208] sm:$0xff]   ;;  %v5661_v14 = vld [vmem:[%s5843_s26 + $0x210] sm:$0xff]  }
  0x12   : > { %5515 = vmatprep.mubr.msk.bf16.mxu1 %vm650_vm2, %v5657_v10  ;;  %5384 = vmatmul.mubr.msk.bf16.vlgmr.msra.gmra.mrb[0].mxu0 %vm650_vm2, %v5658_v11  ;;  %v5662_v15 = vld [vmem:[%s5843_s26 + $0x18] sm:$0xff]   ;;  %v5664_v17 = vld [vmem:[%s5843_s26 + $0x20] sm:$0xff]   ;;  %v5666_v19 = vld [vmem:[%s5843_s26 + $0x28] sm:$0xff]  }
  0x13   : > { %5516 = vmatmul.mubr.msk.bf16.vlgmr.msra.gmra.mrb[0].mxu1 %vm650_vm2, %v5659_v12  ;;  %5387 = vmatprep.mubr.msk.bf16.mxu0 %vm650_vm2, %v5660_v13  ;;  %v5663_v16 = vld [vmem:[%s5843_s26 + $0x218] sm:$0xff]   ;;  %v5665_v18 = vld [vmem:[%s5843_s26 + $0x220] sm:$0xff]   ;;  %v5667_v20 = vld [vmem:[%s5843_s26 + $0x228] sm:$0xff]  }
  0x14   : > { %5519 = vmatprep.mubr.msk.bf16.mxu1 %vm650_vm2, %v5661_v14  ;;  %v5668_v21 = vld [vmem:[%s5843_s26 + $0x30] sm:$0xff]   ;;  %v5670_v23 = vld [vmem:[%s5843_s26 + $0x38] sm:$0xff]   ;;  %v5672_v25 = vld [vmem:[%s5843_s26 + $0x40] sm:$0xff]  }
  0x15   : > { %v5669_v22 = vld [vmem:[%s5843_s26 + $0x230] sm:$0xff]   ;;  %v5671_v24 = vld [vmem:[%s5843_s26 + $0x238] sm:$0xff]   ;;  %v5673_v26 = vld [vmem:[%s5843_s26 + $0x240] sm:$0xff]  }
  0x16   : > { %v5674_v27 = vld [vmem:[%s5843_s26 + $0x48] sm:$0xff]   ;;  %v5676_v29 = vld [vmem:[%s5843_s26 + $0x50] sm:$0xff]   ;;  %v5678_v31 = vld [vmem:[%s5843_s26 + $0x58] sm:$0xff]  }
  0x17   : > { %v5675_v28 = vld [vmem:[%s5843_s26 + $0x248] sm:$0xff]   ;;  %v5677_v30 = vld [vmem:[%s5843_s26 + $0x250] sm:$0xff]   ;;  %v5679_v32 = vld [vmem:[%s5843_s26 + $0x258] sm:$0xff]  }
  0x18   : > { %v5680_v33 = vld [vmem:[%s5843_s26 + $0x60] sm:$0xff]   ;;  %v5682_v35 = vld [vmem:[%s5843_s26 + $0x68] sm:$0xff]   ;;  %v5684_v37 = vld [vmem:[%s5843_s26 + $0x70] sm:$0xff]  }
  0x19   : > { %v5681_v34 = vld [vmem:[%s5843_s26 + $0x260] sm:$0xff]   ;;  %v5683_v36 = vld [vmem:[%s5843_s26 + $0x268] sm:$0xff]   ;;  %v5685_v38 = vld [vmem:[%s5843_s26 + $0x270] sm:$0xff]  }
  0x1a   : > { %5388 = vmatmul.mubr.msk.bf16.gmra.mrb[4].mxu0 %vm650_vm2, %v5662_v15  ;;  %v5686_v39 = vld [vmem:[%s5843_s26 + $0x78] sm:$0xff]   ;;  %v5688_v41 = vld [vmem:[%s5843_s26 + $0x80] sm:$0xff]   ;;  %v5690_v43 = vld [vmem:[%s5843_s26 + $0x88] sm:$0xff]  }
  0x1b   : > { %5520 = vmatmul.mubr.msk.bf16.gmra.mrb[4].mxu1 %vm650_vm2, %v5663_v16  ;;  %5391 = vmatprep.mubr.msk.bf16.mxu0 %vm650_vm2, %v5664_v17  ;;  %v5687_v40 = vld [vmem:[%s5843_s26 + $0x278] sm:$0xff]   ;;  %v5689_v42 = vld [vmem:[%s5843_s26 + $0x280] sm:$0xff]   ;;  %v5691_v44 = vld [vmem:[%s5843_s26 + $0x288] sm:$0xff]  }
  0x1c   : > { %5523 = vmatprep.mubr.msk.bf16.mxu1 %vm650_vm2, %v5665_v18  ;;  %v5692_v45 = vld [vmem:[%s5843_s26 + $0x90] sm:$0xff]   ;;  %v5694_v47 = vld [vmem:[%s5843_s26 + $0x98] sm:$0xff]   ;;  %v5696_v49 = vld [vmem:[%s5843_s26 + $0xa0] sm:$0xff]  }
  0x1d   : > { %v5693_v46 = vld [vmem:[%s5843_s26 + $0x290] sm:$0xff]   ;;  %v5695_v48 = vld [vmem:[%s5843_s26 + $0x298] sm:$0xff]   ;;  %v5697_v50 = vld [vmem:[%s5843_s26 + $0x2a0] sm:$0xff]  }
  0x1e   : > { %v5698_v51 = vld [vmem:[%s5843_s26 + $0xa8] sm:$0xff]   ;;  %v5700_v53 = vld [vmem:[%s5843_s26 + $0xb0] sm:$0xff]   ;;  %v5702_v55 = vld [vmem:[%s5843_s26 + $0xb8] sm:$0xff]  }
  0x1f   : > { %v5699_v52 = vld [vmem:[%s5843_s26 + $0x2a8] sm:$0xff]   ;;  %v5701_v54 = vld [vmem:[%s5843_s26 + $0x2b0] sm:$0xff]   ;;  %v5703_v56 = vld [vmem:[%s5843_s26 + $0x2b8] sm:$0xff]  }
  0x20   : > { %v5704_v57 = vld [vmem:[%s5843_s26 + $0xc0] sm:$0xff]   ;;  %v5706_v59 = vld [vmem:[%s5843_s26 + $0xc8] sm:$0xff]   ;;  %v5708_v61 = vld [vmem:[%s5843_s26 + $0xd0] sm:$0xff]  }
  0x21   : > { %v5705_v58 = vld [vmem:[%s5843_s26 + $0x2c0] sm:$0xff]   ;;  %v5707_v60 = vld [vmem:[%s5843_s26 + $0x2c8] sm:$0xff]   ;;  %v5709_v62 = vld [vmem:[%s5843_s26 + $0x2d0] sm:$0xff]  }
  0x22   : > { %5392 = vmatmul.mubr.msk.bf16.gmra.mrb[8].mxu0 %vm650_vm2, %v5666_v19  ;;  %v5710_v63 = vld [vmem:[%s5843_s26 + $0xd8] sm:$0xff]   ;;  %v5712_v1 = vld [vmem:[%s5843_s26 + $0xe0] sm:$0xff]   ;;  %v5714_v3 = vld [vmem:[%s5843_s26 + $0xe8] sm:$0xff]  }
  0x23   : > { %5524 = vmatmul.mubr.msk.bf16.gmra.mrb[8].mxu1 %vm650_vm2, %v5667_v20  ;;  %5395 = vmatprep.mubr.msk.bf16.mxu0 %vm650_vm2, %v5668_v21  ;;  %v5711_v0 = vld [vmem:[%s5843_s26 + $0x2d8] sm:$0xff]   ;;  %v5713_v2 = vld [vmem:[%s5843_s26 + $0x2e0] sm:$0xff]   ;;  %v5715_v4 = vld [vmem:[%s5843_s26 + $0x2e8] sm:$0xff]  }
  0x24   : > { %5527 = vmatprep.mubr.msk.bf16.mxu1 %vm650_vm2, %v5669_v22  ;;  %v5716_v5 = vld [vmem:[%s5843_s26 + $0xf0] sm:$0xff]   ;;  %v5718_v7 = vld [vmem:[%s5843_s26 + $0xf8] sm:$0xff]   ;;  %v5720_v9 = vld [vmem:[%s5843_s26 + $0x100] sm:$0xff]  }
  0x25   : > { %v5717_v6 = vld [vmem:[%s5843_s26 + $0x2f0] sm:$0xff]   ;;  %v5719_v8 = vld [vmem:[%s5843_s26 + $0x2f8] sm:$0xff]   ;;  %v5721_v10 = vld [vmem:[%s5843_s26 + $0x300] sm:$0xff]  }
  0x26   : > { %v5722_v11 = vld [vmem:[%s5843_s26 + $0x108] sm:$0xff]   ;;  %v5724_v13 = vld [vmem:[%s5843_s26 + $0x110] sm:$0xff]   ;;  %v5726_v15 = vld [vmem:[%s5843_s26 + $0x118] sm:$0xff]  }
  0x27   : > { %v5723_v12 = vld [vmem:[%s5843_s26 + $0x308] sm:$0xff]   ;;  %v5725_v14 = vld [vmem:[%s5843_s26 + $0x310] sm:$0xff]   ;;  %v5727_v16 = vld [vmem:[%s5843_s26 + $0x318] sm:$0xff]  }
  0x28   : > { %v5728_v17 = vld [vmem:[%s5843_s26 + $0x120] sm:$0xff]   ;;  %v5730_v19 = vld [vmem:[%s5843_s26 + $0x128] sm:$0xff]   ;;  %v5732_v21 = vld [vmem:[%s5843_s26 + $0x130] sm:$0xff]  }
  0x29   : > { %v5729_v18 = vld [vmem:[%s5843_s26 + $0x320] sm:$0xff]   ;;  %v5731_v20 = vld [vmem:[%s5843_s26 + $0x328] sm:$0xff]   ;;  %v5733_v22 = vld [vmem:[%s5843_s26 + $0x330] sm:$0xff]  }
  0x2a   : > { %5396 = vmatmul.mubr.msk.bf16.gmra.mrb[12].mxu0 %vm650_vm2, %v5670_v23  ;;  %v5734_v23 = vld [vmem:[%s5843_s26 + $0x138] sm:$0xff]  }
  0x2b   : > { %5528 = vmatmul.mubr.msk.bf16.gmra.mrb[12].mxu1 %vm650_vm2, %v5671_v24  ;;  %5399 = vmatprep.mubr.msk.bf16.mxu0 %vm650_vm2, %v5672_v25  ;;  %v5735_v24 = vld [vmem:[%s5843_s26 + $0x338] sm:$0xff]   ;;  %v5736_v25 = vld [vmem:[%s5843_s26 + $0x140] sm:$0xff]  }
  0x2c   : > { %5531 = vmatprep.mubr.msk.bf16.mxu1 %vm650_vm2, %v5673_v26  ;;  %v5737_v26 = vld [vmem:[%s5843_s26 + $0x340] sm:$0xff]  }
  0x32   : > { %5400 = vmatmul.mubr.msk.bf16.gmra.mrb[16].mxu0 %vm650_vm2, %v5674_v27  ;;  %v5738_v27 = vld [vmem:[%s5843_s26 + $0x148] sm:$0xff]  }
  0x33   : > { %5532 = vmatmul.mubr.msk.bf16.gmra.mrb[16].mxu1 %vm650_vm2, %v5675_v28  ;;  %5403 = vmatprep.mubr.msk.bf16.mxu0 %vm650_vm2, %v5676_v29  ;;  %v5739_v28 = vld [vmem:[%s5843_s26 + $0x348] sm:$0xff]   ;;  %v5740_v29 = vld [vmem:[%s5843_s26 + $0x150] sm:$0xff]  }
  0x34   : > { %5535 = vmatprep.mubr.msk.bf16.mxu1 %vm650_vm2, %v5677_v30  ;;  %v5741_v30 = vld [vmem:[%s5843_s26 + $0x350] sm:$0xff]  }
  0x3a   : > { %5404 = vmatmul.mubr.msk.bf16.gmra.mrb[20].mxu0 %vm650_vm2, %v5678_v31  ;;  %v5742_v31 = vld [vmem:[%s5843_s26 + $0x158] sm:$0xff]  }
  0x3b   : > { %5536 = vmatmul.mubr.msk.bf16.gmra.mrb[20].mxu1 %vm650_vm2, %v5679_v32  ;;  %5407 = vmatprep.mubr.msk.bf16.mxu0 %vm650_vm2, %v5680_v33  ;;  %v5743_v32 = vld [vmem:[%s5843_s26 + $0x358] sm:$0xff]   ;;  %v5744_v33 = vld [vmem:[%s5843_s26 + $0x160] sm:$0xff]  }
  0x3c   : > { %5539 = vmatprep.mubr.msk.bf16.mxu1 %vm650_vm2, %v5681_v34  ;;  %v5745_v34 = vld [vmem:[%s5843_s26 + $0x360] sm:$0xff]  }
  0x42   : > { %5408 = vmatmul.mubr.msk.bf16.gmra.mrb[24].mxu0 %vm650_vm2, %v5682_v35  ;;  %v5746_v35 = vld [vmem:[%s5843_s26 + $0x168] sm:$0xff]  }
  0x43   : > { %5540 = vmatmul.mubr.msk.bf16.gmra.mrb[24].mxu1 %vm650_vm2, %v5683_v36  ;;  %5411 = vmatprep.mubr.msk.bf16.mxu0 %vm650_vm2, %v5684_v37  ;;  %v5747_v36 = vld [vmem:[%s5843_s26 + $0x368] sm:$0xff]   ;;  %v5748_v37 = vld [vmem:[%s5843_s26 + $0x170] sm:$0xff]  }
  0x44   : > { %5543 = vmatprep.mubr.msk.bf16.mxu1 %vm650_vm2, %v5685_v38  ;;  %v5749_v38 = vld [vmem:[%s5843_s26 + $0x370] sm:$0xff]  }
  0x4a   : > { %5412 = vmatmul.mubr.msk.bf16.gmra.mrb[28].mxu0 %vm650_vm2, %v5686_v39  ;;  %v5750_v39 = vld [vmem:[%s5843_s26 + $0x178] sm:$0xff]  }
  0x4b   : > { %5544 = vmatmul.mubr.msk.bf16.gmra.mrb[28].mxu1 %vm650_vm2, %v5687_v40  ;;  %5415 = vmatprep.mubr.msk.bf16.mxu0 %vm650_vm2, %v5688_v41  ;;  %v5751_v40 = vld [vmem:[%s5843_s26 + $0x378] sm:$0xff]   ;;  %v5752_v41 = vld [vmem:[%s5843_s26 + $0x180] sm:$0xff]  }
  0x4c   : > { %5547 = vmatprep.mubr.msk.bf16.mxu1 %vm650_vm2, %v5689_v42  ;;  %v5753_v42 = vld [vmem:[%s5843_s26 + $0x380] sm:$0xff]  }
  0x52   : > { %5416 = vmatmul.mubr.msk.bf16.gmra.mrb[32].mxu0 %vm650_vm2, %v5690_v43  ;;  %v5754_v43 = vld [vmem:[%s5843_s26 + $0x188] sm:$0xff]  }
  0x53   : > { %5548 = vmatmul.mubr.msk.bf16.gmra.mrb[32].mxu1 %vm650_vm2, %v5691_v44  ;;  %5419 = vmatprep.mubr.msk.bf16.mxu0 %vm650_vm2, %v5692_v45  ;;  %v5755_v44 = vld [vmem:[%s5843_s26 + $0x388] sm:$0xff]   ;;  %v5756_v45 = vld [vmem:[%s5843_s26 + $0x190] sm:$0xff]  }
  0x54   : > { %5551 = vmatprep.mubr.msk.bf16.mxu1 %vm650_vm2, %v5693_v46  ;;  %v5757_v46 = vld [vmem:[%s5843_s26 + $0x390] sm:$0xff]  }
  0x5a   : > { %5420 = vmatmul.mubr.msk.bf16.gmra.mrb[36].mxu0 %vm650_vm2, %v5694_v47  ;;  %v5758_v47 = vld [vmem:[%s5843_s26 + $0x198] sm:$0xff]  }
  0x5b   : > { %5552 = vmatmul.mubr.msk.bf16.gmra.mrb[36].mxu1 %vm650_vm2, %v5695_v48  ;;  %5423 = vmatprep.mubr.msk.bf16.mxu0 %vm650_vm2, %v5696_v49  ;;  %v5759_v48 = vld [vmem:[%s5843_s26 + $0x398] sm:$0xff]   ;;  %v5760_v49 = vld [vmem:[%s5843_s26 + $0x1a0] sm:$0xff]  }
  0x5c   : > { %5555 = vmatprep.mubr.msk.bf16.mxu1 %vm650_vm2, %v5697_v50  ;;  %v5761_v50 = vld [vmem:[%s5843_s26 + $0x3a0] sm:$0xff]  }
  0x62   : > { %5424 = vmatmul.mubr.msk.bf16.gmra.mrb[40].mxu0 %vm650_vm2, %v5698_v51  ;;  %v5762_v51 = vld [vmem:[%s5843_s26 + $0x1a8] sm:$0xff]  }
  0x63   : > { %5556 = vmatmul.mubr.msk.bf16.gmra.mrb[40].mxu1 %vm650_vm2, %v5699_v52  ;;  %5427 = vmatprep.mubr.msk.bf16.mxu0 %vm650_vm2, %v5700_v53  ;;  %v5763_v52 = vld [vmem:[%s5843_s26 + $0x3a8] sm:$0xff]   ;;  %v5764_v53 = vld [vmem:[%s5843_s26 + $0x1b0] sm:$0xff]  }
  0x64   : > { %5559 = vmatprep.mubr.msk.bf16.mxu1 %vm650_vm2, %v5701_v54  ;;  %v5765_v54 = vld [vmem:[%s5843_s26 + $0x3b0] sm:$0xff]  }
  0x6a   : > { %5428 = vmatmul.mubr.msk.bf16.gmra.mrb[44].mxu0 %vm650_vm2, %v5702_v55  ;;  %v6066_v55 = vld [vmem:[%s6896_s2] ss:$0 sm:$0xff] }
  0x6b   : > { %5560 = vmatmul.mubr.msk.bf16.gmra.mrb[44].mxu1 %vm650_vm2, %v5703_v56  ;;  %5431 = vmatprep.mubr.msk.bf16.mxu0 %vm650_vm2, %v5704_v57 }
  0x6c   : > { %5563 = vmatprep.mubr.msk.bf16.mxu1 %vm650_vm2, %v5705_v58 }
  0x72   : > { %5432 = vmatmul.mubr.msk.bf16.gmra.mrb[48].mxu0 %vm650_vm2, %v5706_v59 }
  0x73   : > { %5564 = vmatmul.mubr.msk.bf16.gmra.mrb[48].mxu1 %vm650_vm2, %v5707_v60  ;;  %5435 = vmatprep.mubr.msk.bf16.mxu0 %vm650_vm2, %v5708_v61  ;;  %v5766_v60 = vld [vmem:[%s5843_s26 + $0x1b8] sm:$0xff]  }
  0x74   : > { %5567 = vmatprep.mubr.msk.bf16.mxu1 %vm650_vm2, %v5709_v62 }
  0x7a   : > { %5436 = vmatmul.mubr.msk.bf16.gmra.mrb[52].mxu0 %vm650_vm2, %v5710_v63 }
  0x7b   : > { %5568 = vmatmul.mubr.msk.bf16.gmra.mrb[52].mxu1 %vm650_vm2, %v5711_v0  ;;  %5439 = vmatprep.mubr.msk.bf16.mxu0 %vm650_vm2, %v5712_v1  ;;  %v5767_v1 = vld [vmem:[%s5843_s26 + $0x3b8] sm:$0xff]  }
  0x7c   : > { %5571 = vmatprep.mubr.msk.bf16.mxu1 %vm650_vm2, %v5713_v2  ;;  %v5768_v2 = vld [vmem:[%s5843_s26 + $0x1c0] sm:$0xff]  }
  0x82   : > { %5440 = vmatmul.mubr.msk.bf16.gmra.mrb[56].mxu0 %vm650_vm2, %v5714_v3 }
  0x83   : > { %5572 = vmatmul.mubr.msk.bf16.gmra.mrb[56].mxu1 %vm650_vm2, %v5715_v4  ;;  %5443 = vmatprep.mubr.msk.bf16.mxu0 %vm650_vm2, %v5716_v5 }
  0x84   : > { %5575 = vmatprep.mubr.msk.bf16.mxu1 %vm650_vm2, %v5717_v6 }
  0x8a   : > { %5444 = vmatmul.mubr.msk.bf16.gmra.mrb[60].mxu0 %vm650_vm2, %v5718_v7 }
  0x8b   : > { %5576 = vmatmul.mubr.msk.bf16.gmra.mrb[60].mxu1 %vm650_vm2, %v5719_v8  ;;  %5447 = vmatprep.mubr.msk.bf16.mxu0 %vm650_vm2, %v5720_v9  ;;  %v5769_v8 = vld [vmem:[%s5843_s26 + $0x3c0] sm:$0xff]  }
  0x8c   : > { %5579 = vmatprep.mubr.msk.bf16.mxu1 %vm650_vm2, %v5721_v10 }
  0x92   : > { %5448 = vmatmul.mubr.msk.bf16.gmra.mrb[64].mxu0 %vm650_vm2, %v5722_v11 }
  0x93   : > { %5580 = vmatmul.mubr.msk.bf16.gmra.mrb[64].mxu1 %vm650_vm2, %v5723_v12  ;;  %5451 = vmatprep.mubr.msk.bf16.mxu0 %vm650_vm2, %v5724_v13 }
  0x94   : > { %5583 = vmatprep.mubr.msk.bf16.mxu1 %vm650_vm2, %v5725_v14 }
  0x9a   : > { %5452 = vmatmul.mubr.msk.bf16.gmra.mrb[68].mxu0 %vm650_vm2, %v5726_v15 }
  0x9b   : > { %5584 = vmatmul.mubr.msk.bf16.gmra.mrb[68].mxu1 %vm650_vm2, %v5727_v16  ;;  %5455 = vmatprep.mubr.msk.bf16.mxu0 %vm650_vm2, %v5728_v17 }
  0x9c   : > { %5587 = vmatprep.mubr.msk.bf16.mxu1 %vm650_vm2, %v5729_v18 }
  0xa2   : > { %5456 = vmatmul.mubr.msk.bf16.gmra.mrb[72].mxu0 %vm650_vm2, %v5730_v19 }
  0xa3   : > { %5588 = vmatmul.mubr.msk.bf16.gmra.mrb[72].mxu1 %vm650_vm2, %v5731_v20  ;;  %5459 = vmatprep.mubr.msk.bf16.mxu0 %vm650_vm2, %v5732_v21 }
  0xa4   : > { %5591 = vmatprep.mubr.msk.bf16.mxu1 %vm650_vm2, %v5733_v22 }
  0xaa   : > { %5460 = vmatmul.mubr.msk.bf16.gmra.mrb[76].mxu0 %vm650_vm2, %v5734_v23 }
  0xab   : > { %5592 = vmatmul.mubr.msk.bf16.gmra.mrb[76].mxu1 %vm650_vm2, %v5735_v24  ;;  %5463 = vmatprep.mubr.msk.bf16.mxu0 %vm650_vm2, %v5736_v25 }
  0xac   : > { %5595 = vmatprep.mubr.msk.bf16.mxu1 %vm650_vm2, %v5737_v26 }
  0xb2   : > { %5464 = vmatmul.mubr.msk.bf16.gmra.mrb[80].mxu0 %vm650_vm2, %v5738_v27 }
  0xb3   : > { %5596 = vmatmul.mubr.msk.bf16.gmra.mrb[80].mxu1 %vm650_vm2, %v5739_v28  ;;  %5467 = vmatprep.mubr.msk.bf16.mxu0 %vm650_vm2, %v5740_v29 }
  0xb4   : > { %5599 = vmatprep.mubr.msk.bf16.mxu1 %vm650_vm2, %v5741_v30 }
  0xba   : > { %5468 = vmatmul.mubr.msk.bf16.gmra.mrb[84].mxu0 %vm650_vm2, %v5742_v31 }
  0xbb   : > { %5600 = vmatmul.mubr.msk.bf16.gmra.mrb[84].mxu1 %vm650_vm2, %v5743_v32  ;;  %5471 = vmatprep.mubr.msk.bf16.mxu0 %vm650_vm2, %v5744_v33  ;;  %v5770_v32 = vld [vmem:[%s5843_s26 + $0x1c8] sm:$0xff]  }
  0xbc   : > { %5603 = vmatprep.mubr.msk.bf16.mxu1 %vm650_vm2, %v5745_v34 }
  0xc2   : > { %5472 = vmatmul.mubr.msk.bf16.gmra.mrb[88].mxu0 %vm650_vm2, %v5746_v35 }
  0xc3   : > { %5604 = vmatmul.mubr.msk.bf16.gmra.mrb[88].mxu1 %vm650_vm2, %v5747_v36  ;;  %5475 = vmatprep.mubr.msk.bf16.mxu0 %vm650_vm2, %v5748_v37  ;;  %v5771_v37 = vld [vmem:[%s5843_s26 + $0x3c8] sm:$0xff]  }
  0xc4   : > { %5607 = vmatprep.mubr.msk.bf16.mxu1 %vm650_vm2, %v5749_v38  ;;  %v5772_v38 = vld [vmem:[%s5843_s26 + $0x1d0] sm:$0xff]  }
  0xca   : > { %5476 = vmatmul.mubr.msk.bf16.gmra.mrb[92].mxu0 %vm650_vm2, %v5750_v39 }
  0xcb   : > { %5608 = vmatmul.mubr.msk.bf16.gmra.mrb[92].mxu1 %vm650_vm2, %v5751_v40  ;;  %5479 = vmatprep.mubr.msk.bf16.mxu0 %vm650_vm2, %v5752_v41 }
  0xcc   : > { %5611 = vmatprep.mubr.msk.bf16.mxu1 %vm650_vm2, %v5753_v42 }
  0xd2   : > { %5480 = vmatmul.mubr.msk.bf16.gmra.mrb[96].mxu0 %vm650_vm2, %v5754_v43 }
  0xd3   : > { %5612 = vmatmul.mubr.msk.bf16.gmra.mrb[96].mxu1 %vm650_vm2, %v5755_v44  ;;  %5483 = vmatprep.mubr.msk.bf16.mxu0 %vm650_vm2, %v5756_v45  ;;  %v5773_v44 = vld [vmem:[%s5843_s26 + $0x3d0] sm:$0xff]  }
  0xd4   : > { %5615 = vmatprep.mubr.msk.bf16.mxu1 %vm650_vm2, %v5757_v46 }
  0xda   : > { %5484 = vmatmul.mubr.msk.bf16.gmra.mrb[100].mxu0 %vm650_vm2, %v5758_v47 }
  0xdb   : > { %5616 = vmatmul.mubr.msk.bf16.gmra.mrb[100].mxu1 %vm650_vm2, %v5759_v48  ;;  %5487 = vmatprep.mubr.msk.bf16.mxu0 %vm650_vm2, %v5760_v49 }
  0xdc   : > { %5619 = vmatprep.mubr.msk.bf16.mxu1 %vm650_vm2, %v5761_v50 }
  0xe2   : > { %5488 = vmatmul.mubr.msk.bf16.gmra.mrb[104].mxu0 %vm650_vm2, %v5762_v51 }
  0xe3   : > { %5620 = vmatmul.mubr.msk.bf16.gmra.mrb[104].mxu1 %vm650_vm2, %v5763_v52  ;;  %5491 = vmatprep.mubr.msk.bf16.mxu0 %vm650_vm2, %v5764_v53 }
  0xe4   : > { %5623 = vmatprep.mubr.msk.bf16.mxu1 %vm650_vm2, %v5765_v54 }
  0xe5   : > { %v5385_v56 = vpop.f32.mrb[0].mxu0 }
  0xe6   : > { %v893_v57 = vadd.f32 %v5385_v56, %v6066_v55  ;;  %v5517_v58 = vpop.f32.mrb[0].mxu1  ;;  %v884_v59 = vpop.f32.mrb[1].mxu0 }
  0xe7   : > { %v2873_v61 = vadd.f32 %v5517_v58, %v6066_v55  ;;  %v885_v62 = vadd.f32 %v6066_v55, %v884_v59  ;;  %v2864_v63 = vpop.f32.mrb[1].mxu1  ;;  %v5386_v0 = vpop.f32.mrb[2].mxu0 }
  0xe8   : > { %v1397_v3 = vmax.f32 %v893_v57, 0.0  ;;  %v2865_v4 = vadd.f32 %v6066_v55, %v2864_v63  ;;  %v896_v5 = vadd.f32 %v5386_v0, %v6066_v55  ;;  %v5518_v6 = vpop.f32.mrb[2].mxu1  ;;  %v887_v7 = vpop.f32.mrb[3].mxu0 }
  0xe9   : > { %v3377_v9 = vmax.f32 %v2873_v61, 0.0  ;;  %v1395_v10 = vmax.f32 %v885_v62, 0.0  ;;  %v2876_v11 = vadd.f32 %v5518_v6, %v6066_v55  ;;  %v888_v12 = vadd.f32 %v6066_v55, %v887_v7  ;;  %v2867_v13 = vpop.f32.mrb[3].mxu1 }
  0xea   : > { %v4993_v14 = vpack.c.bf16 %v1397_v3, %v1397_v3  ;;  %v3375_v15 = vmax.f32 %v2865_v4, 0.0  ;;  %v1398_v16 = vmax.f32 %v896_v5, 0.0  ;;  %v2868_v17 = vadd.f32 %v6066_v55, %v2867_v13  ;;  %5492 = vmatmul.mubr.msk.bf16.gmra.mrb[108].mxu0 %vm650_vm2, %v5766_v60  ;;  %v5774_v5 = vld [vmem:[%s5843_s26 + $0x1d8] sm:$0xff]  }
  0xeb   : > { %v5121_v18 = vpack.c.bf16 %v3377_v9, %v3377_v9  ;;  %v4991_v19 = vpack.c.bf16 %v1395_v10, %v1395_v10  ;;  %v3378_v20 = vmax.f32 %v2876_v11, 0.0  ;;  %v1396_v21 = vmax.f32 %v888_v12, 0.0  ;;  %5624 = vmatmul.mubr.msk.bf16.gmra.mrb[108].mxu1 %vm650_vm2, %v5767_v1  ;;  %5495 = vmatprep.mubr.msk.bf16.mxu0 %vm650_vm2, %v5768_v2  ;;  %v5775_v10 = vld [vmem:[%s5843_s26 + $0x3d8] sm:$0xff]   ;;  %v5776_v11 = vld [vmem:[%s5843_s26 + $0x1e0] sm:$0xff]  }
  0xec   : > { %2038 = vst.msk [vmem:[%s6084_s4 + $0x8] sm:$0xf] %vm2035_vm3, %v4993_v14  ;;  %v5119_v22 = vpack.c.bf16 %v3375_v15, %v3375_v15  ;;  %v4994_v23 = vpack.c.bf16 %v1398_v16, %v1398_v16  ;;  %v3376_v24 = vmax.f32 %v2868_v17, 0.0  ;;  %5627 = vmatprep.mubr.msk.bf16.mxu1 %vm650_vm2, %v5769_v8  ;;  %v5777_v17 = vld [vmem:[%s5843_s26 + $0x3e0] sm:$0xff]  }
  0xed   : > { %4861 = vst.msk [vmem:[%s6084_s4 + $0x208] sm:$0xf] %vm2035_vm3, %v5121_v18  ;;  %2036 = vst.msk [vmem:[%s6084_s4] sm:$0xf] %vm2035_vm3, %v4991_v19  ;;  %v5122_v25 = vpack.c.bf16 %v3378_v20, %v3378_v20  ;;  %v4992_v26 = vpack.c.bf16 %v1396_v21, %v1396_v21  ;;  %v5389_v27 = vpop.f32.mrb[4].mxu0 }
  0xee   : > { %4859 = vst.msk [vmem:[%s6084_s4 + $0x200] sm:$0xf] %vm2035_vm3, %v5119_v22  ;;  %2039 = vst.msk [vmem:[%s6084_s4 + $0xc] sm:$0xf] %vm2035_vm3, %v4994_v23  ;;  %v5120_v28 = vpack.c.bf16 %v3376_v24, %v3376_v24  ;;  %v909_v29 = vadd.f32 %v5389_v27, %v6066_v55  ;;  %v5521_v30 = vpop.f32.mrb[4].mxu1  ;;  %v900_v31 = vpop.f32.mrb[5].mxu0 }
  0xef   : > { %4862 = vst.msk [vmem:[%s6084_s4 + $0x20c] sm:$0xf] %vm2035_vm3, %v5122_v25  ;;  %2037 = vst.msk [vmem:[%s6084_s4 + $0x4] sm:$0xf] %vm2035_vm3, %v4992_v26  ;;  %v2889_v33 = vadd.f32 %v5521_v30, %v6066_v55  ;;  %v901_v34 = vadd.f32 %v6066_v55, %v900_v31  ;;  %v2880_v35 = vpop.f32.mrb[5].mxu1  ;;  %v5390_v36 = vpop.f32.mrb[6].mxu0 }
  0xf0   : > { %4860 = vst.msk [vmem:[%s6084_s4 + $0x204] sm:$0xf] %vm2035_vm3, %v5120_v28  ;;  %v1401_v39 = vmax.f32 %v909_v29, 0.0  ;;  %v2881_v40 = vadd.f32 %v6066_v55, %v2880_v35  ;;  %v912_v41 = vadd.f32 %v5390_v36, %v6066_v55  ;;  %v5522_v42 = vpop.f32.mrb[6].mxu1  ;;  %v903_v43 = vpop.f32.mrb[7].mxu0 }
  0xf1   : > { %v3381_v45 = vmax.f32 %v2889_v33, 0.0  ;;  %v1399_v46 = vmax.f32 %v901_v34, 0.0  ;;  %v2892_v47 = vadd.f32 %v5522_v42, %v6066_v55  ;;  %v904_v48 = vadd.f32 %v6066_v55, %v903_v43  ;;  %v2883_v49 = vpop.f32.mrb[7].mxu1 }
  0xf2   : > { %v4997_v50 = vpack.c.bf16 %v1401_v39, %v1401_v39  ;;  %v3379_v51 = vmax.f32 %v2881_v40, 0.0  ;;  %v1402_v52 = vmax.f32 %v912_v41, 0.0  ;;  %v2884_v53 = vadd.f32 %v6066_v55, %v2883_v49  ;;  %5496 = vmatmul.mubr.msk.bf16.gmra.mrb[112].mxu0 %vm650_vm2, %v5770_v32  ;;  %v5778_v41 = vld [vmem:[%s5843_s26 + $0x1e8] sm:$0xff]  }
  0xf3   : > { %v5125_v54 = vpack.c.bf16 %v3381_v45, %v3381_v45  ;;  %v4995_v56 = vpack.c.bf16 %v1399_v46, %v1399_v46  ;;  %v3382_v57 = vmax.f32 %v2892_v47, 0.0  ;;  %v1400_v58 = vmax.f32 %v904_v48, 0.0  ;;  %5628 = vmatmul.mubr.msk.bf16.gmra.mrb[112].mxu1 %vm650_vm2, %v5771_v37  ;;  %5499 = vmatprep.mubr.msk.bf16.mxu0 %vm650_vm2, %v5772_v38  ;;  %v5779_v46 = vld [vmem:[%s5843_s26 + $0x3e8] sm:$0xff]   ;;  %v5780_v47 = vld [vmem:[%s5843_s26 + $0x1f0] sm:$0xff]  }
  0xf4   : > { %2042 = vst.msk [vmem:[%s6084_s4 + $0x18] sm:$0xf] %vm2035_vm3, %v4997_v50  ;;  %v5123_v59 = vpack.c.bf16 %v3379_v51, %v3379_v51  ;;  %v4998_v60 = vpack.c.bf16 %v1402_v52, %v1402_v52  ;;  %v3380_v61 = vmax.f32 %v2884_v53, 0.0  ;;  %5631 = vmatprep.mubr.msk.bf16.mxu1 %vm650_vm2, %v5773_v44  ;;  %v5781_v53 = vld [vmem:[%s5843_s26 + $0x3f0] sm:$0xff]  }
  0xf5   : > { %4865 = vst.msk [vmem:[%s6084_s4 + $0x218] sm:$0xf] %vm2035_vm3, %v5125_v54  ;;  %2040 = vst.msk [vmem:[%s6084_s4 + $0x10] sm:$0xf] %vm2035_vm3, %v4995_v56  ;;  %v5126_v62 = vpack.c.bf16 %v3382_v57, %v3382_v57  ;;  %v4996_v63 = vpack.c.bf16 %v1400_v58, %v1400_v58  ;;  %v5393_v0 = vpop.f32.mrb[8].mxu0 }
  0xf6   : > { %4863 = vst.msk [vmem:[%s6084_s4 + $0x210] sm:$0xf] %vm2035_vm3, %v5123_v59  ;;  %2043 = vst.msk [vmem:[%s6084_s4 + $0x1c] sm:$0xf] %vm2035_vm3, %v4998_v60  ;;  %v5124_v1 = vpack.c.bf16 %v3380_v61, %v3380_v61  ;;  %v925_v2 = vadd.f32 %v5393_v0, %v6066_v55  ;;  %v5525_v3 = vpop.f32.mrb[8].mxu1  ;;  %v916_v4 = vpop.f32.mrb[9].mxu0 }
  0xf7   : > { %4866 = vst.msk [vmem:[%s6084_s4 + $0x21c] sm:$0xf] %vm2035_vm3, %v5126_v62  ;;  %2041 = vst.msk [vmem:[%s6084_s4 + $0x14] sm:$0xf] %vm2035_vm3, %v4996_v63  ;;  %v2905_v6 = vadd.f32 %v5525_v3, %v6066_v55  ;;  %v917_v7 = vadd.f32 %v6066_v55, %v916_v4  ;;  %v2896_v8 = vpop.f32.mrb[9].mxu1  ;;  %v5394_v9 = vpop.f32.mrb[10].mxu0 }
  0xf8   : > { %4864 = vst.msk [vmem:[%s6084_s4 + $0x214] sm:$0xf] %vm2035_vm3, %v5124_v1  ;;  %v1405_v12 = vmax.f32 %v925_v2, 0.0  ;;  %v2897_v13 = vadd.f32 %v6066_v55, %v2896_v8  ;;  %v928_v14 = vadd.f32 %v5394_v9, %v6066_v55  ;;  %v5526_v15 = vpop.f32.mrb[10].mxu1  ;;  %v919_v16 = vpop.f32.mrb[11].mxu0 }
  0xf9   : > { %v3385_v18 = vmax.f32 %v2905_v6, 0.0  ;;  %v1403_v19 = vmax.f32 %v917_v7, 0.0  ;;  %v2908_v20 = vadd.f32 %v5526_v15, %v6066_v55  ;;  %v920_v21 = vadd.f32 %v6066_v55, %v919_v16  ;;  %v2899_v22 = vpop.f32.mrb[11].mxu1 }
  0xfa   : > { %v5001_v23 = vpack.c.bf16 %v1405_v12, %v1405_v12  ;;  %v3383_v24 = vmax.f32 %v2897_v13, 0.0  ;;  %v1406_v25 = vmax.f32 %v928_v14, 0.0  ;;  %v2900_v26 = vadd.f32 %v6066_v55, %v2899_v22  ;;  %5500 = vmatmul.mubr.msk.bf16.gmra.mrb[116].mxu0 %vm650_vm2, %v5774_v5  ;;  %v5782_v14 = vld [vmem:[%s5843_s26 + $0x1f8] sm:$0xff]  }
  0xfb   : > { %v5129_v27 = vpack.c.bf16 %v3385_v18, %v3385_v18  ;;  %v4999_v28 = vpack.c.bf16 %v1403_v19, %v1403_v19  ;;  %v3386_v29 = vmax.f32 %v2908_v20, 0.0  ;;  %v1404_v30 = vmax.f32 %v920_v21, 0.0  ;;  %5632 = vmatmul.mubr.msk.bf16.gmra.mrb[116].mxu1 %vm650_vm2, %v5775_v10  ;;  %5503 = vmatprep.mubr.msk.bf16.mxu0 %vm650_vm2, %v5776_v11  ;;  %v5783_v19 = vld [vmem:[%s5843_s26 + $0x3f8] sm:$0xff]  }
  0xfc   : > { %2046 = vst.msk [vmem:[%s6084_s4 + $0x28] sm:$0xf] %vm2035_vm3, %v5001_v23  ;;  %v5127_v31 = vpack.c.bf16 %v3383_v24, %v3383_v24  ;;  %v5002_v32 = vpack.c.bf16 %v1406_v25, %v1406_v25  ;;  %v3384_v33 = vmax.f32 %v2900_v26, 0.0  ;;  %5635 = vmatprep.mubr.msk.bf16.mxu1 %vm650_vm2, %v5777_v17 }
  0xfd   : > { %4869 = vst.msk [vmem:[%s6084_s4 + $0x228] sm:$0xf] %vm2035_vm3, %v5129_v27  ;;  %2044 = vst.msk [vmem:[%s6084_s4 + $0x20] sm:$0xf] %vm2035_vm3, %v4999_v28  ;;  %v5130_v34 = vpack.c.bf16 %v3386_v29, %v3386_v29  ;;  %v5000_v35 = vpack.c.bf16 %v1404_v30, %v1404_v30  ;;  %v5397_v36 = vpop.f32.mrb[12].mxu0 }
  0xfe   : > { %4867 = vst.msk [vmem:[%s6084_s4 + $0x220] sm:$0xf] %vm2035_vm3, %v5127_v31  ;;  %2047 = vst.msk [vmem:[%s6084_s4 + $0x2c] sm:$0xf] %vm2035_vm3, %v5002_v32  ;;  %v5128_v37 = vpack.c.bf16 %v3384_v33, %v3384_v33  ;;  %v941_v38 = vadd.f32 %v5397_v36, %v6066_v55  ;;  %v5529_v39 = vpop.f32.mrb[12].mxu1  ;;  %v932_v40 = vpop.f32.mrb[13].mxu0 }
  0xff   : > { %4870 = vst.msk [vmem:[%s6084_s4 + $0x22c] sm:$0xf] %vm2035_vm3, %v5130_v34  ;;  %2045 = vst.msk [vmem:[%s6084_s4 + $0x24] sm:$0xf] %vm2035_vm3, %v5000_v35  ;;  %v2921_v42 = vadd.f32 %v5529_v39, %v6066_v55  ;;  %v933_v43 = vadd.f32 %v6066_v55, %v932_v40  ;;  %v2912_v44 = vpop.f32.mrb[13].mxu1  ;;  %v5398_v45 = vpop.f32.mrb[14].mxu0 }
 0x100   : > { %4868 = vst.msk [vmem:[%s6084_s4 + $0x224] sm:$0xf] %vm2035_vm3, %v5128_v37  ;;  %v1409_v48 = vmax.f32 %v941_v38, 0.0  ;;  %v2913_v49 = vadd.f32 %v6066_v55, %v2912_v44  ;;  %v944_v50 = vadd.f32 %v5398_v45, %v6066_v55  ;;  %v5530_v51 = vpop.f32.mrb[14].mxu1  ;;  %v935_v52 = vpop.f32.mrb[15].mxu0 }
 0x101   : > { %v3389_v54 = vmax.f32 %v2921_v42, 0.0  ;;  %v1407_v56 = vmax.f32 %v933_v43, 0.0  ;;  %v2924_v57 = vadd.f32 %v5530_v51, %v6066_v55  ;;  %v936_v58 = vadd.f32 %v6066_v55, %v935_v52  ;;  %v2915_v59 = vpop.f32.mrb[15].mxu1 }
 0x102   : > { %v5005_v60 = vpack.c.bf16 %v1409_v48, %v1409_v48  ;;  %v3387_v61 = vmax.f32 %v2913_v49, 0.0  ;;  %v1410_v62 = vmax.f32 %v944_v50, 0.0  ;;  %v2916_v63 = vadd.f32 %v6066_v55, %v2915_v59  ;;  %5504 = vmatmul.mubr.msk.bf16.gmra.mrb[120].mxu0 %vm650_vm2, %v5778_v41 }
 0x103   : > { %v5133_v0 = vpack.c.bf16 %v3389_v54, %v3389_v54  ;;  %v5003_v1 = vpack.c.bf16 %v1407_v56, %v1407_v56  ;;  %v3390_v2 = vmax.f32 %v2924_v57, 0.0  ;;  %v1408_v3 = vmax.f32 %v936_v58, 0.0  ;;  %5636 = vmatmul.mubr.msk.bf16.gmra.mrb[120].mxu1 %vm650_vm2, %v5779_v46  ;;  %5507 = vmatprep.mubr.msk.bf16.mxu0 %vm650_vm2, %v5780_v47 }
 0x104   : > { %2050 = vst.msk [vmem:[%s6084_s4 + $0x38] sm:$0xf] %vm2035_vm3, %v5005_v60  ;;  %v5131_v4 = vpack.c.bf16 %v3387_v61, %v3387_v61  ;;  %v5006_v5 = vpack.c.bf16 %v1410_v62, %v1410_v62  ;;  %v3388_v6 = vmax.f32 %v2916_v63, 0.0  ;;  %5639 = vmatprep.mubr.msk.bf16.mxu1 %vm650_vm2, %v5781_v53 }
 0x105   : > { %4873 = vst.msk [vmem:[%s6084_s4 + $0x238] sm:$0xf] %vm2035_vm3, %v5133_v0  ;;  %2048 = vst.msk [vmem:[%s6084_s4 + $0x30] sm:$0xf] %vm2035_vm3, %v5003_v1  ;;  %v5134_v7 = vpack.c.bf16 %v3390_v2, %v3390_v2  ;;  %v5004_v8 = vpack.c.bf16 %v1408_v3, %v1408_v3  ;;  %v5401_v9 = vpop.f32.mrb[16].mxu0 }
 0x106   : > { %4871 = vst.msk [vmem:[%s6084_s4 + $0x230] sm:$0xf] %vm2035_vm3, %v5131_v4  ;;  %2051 = vst.msk [vmem:[%s6084_s4 + $0x3c] sm:$0xf] %vm2035_vm3, %v5006_v5  ;;  %v5132_v10 = vpack.c.bf16 %v3388_v6, %v3388_v6  ;;  %v957_v11 = vadd.f32 %v5401_v9, %v6066_v55  ;;  %v5533_v12 = vpop.f32.mrb[16].mxu1  ;;  %v948_v13 = vpop.f32.mrb[17].mxu0 }
 0x107   : > { %4874 = vst.msk [vmem:[%s6084_s4 + $0x23c] sm:$0xf] %vm2035_vm3, %v5134_v7  ;;  %2049 = vst.msk [vmem:[%s6084_s4 + $0x34] sm:$0xf] %vm2035_vm3, %v5004_v8  ;;  %v2937_v15 = vadd.f32 %v5533_v12, %v6066_v55  ;;  %v949_v16 = vadd.f32 %v6066_v55, %v948_v13  ;;  %v2928_v17 = vpop.f32.mrb[17].mxu1  ;;  %v5402_v18 = vpop.f32.mrb[18].mxu0 }
 0x108   : > { %4872 = vst.msk [vmem:[%s6084_s4 + $0x234] sm:$0xf] %vm2035_vm3, %v5132_v10  ;;  %v1413_v20 = vmax.f32 %v957_v11, 0.0  ;;  %v2929_v21 = vadd.f32 %v6066_v55, %v2928_v17  ;;  %v960_v22 = vadd.f32 %v5402_v18, %v6066_v55  ;;  %v5534_v23 = vpop.f32.mrb[18].mxu1  ;;  %v951_v24 = vpop.f32.mrb[19].mxu0 }
 0x109   : > { %v3393_v25 = vmax.f32 %v2937_v15, 0.0  ;;  %v1411_v26 = vmax.f32 %v949_v16, 0.0  ;;  %v2940_v27 = vadd.f32 %v5534_v23, %v6066_v55  ;;  %v952_v28 = vadd.f32 %v6066_v55, %v951_v24  ;;  %v2931_v29 = vpop.f32.mrb[19].mxu1 }
 0x10a   : > { %v5009_v30 = vpack.c.bf16 %v1413_v20, %v1413_v20  ;;  %v3391_v31 = vmax.f32 %v2929_v21, 0.0  ;;  %v1414_v32 = vmax.f32 %v960_v22, 0.0  ;;  %v2932_v33 = vadd.f32 %v6066_v55, %v2931_v29  ;;  %5508 = vmatmul.mubr.msk.bf16.gmra.mrb[124].mxu0 %vm650_vm2, %v5782_v14 }
 0x10b   : > { %v5137_v34 = vpack.c.bf16 %v3393_v25, %v3393_v25  ;;  %v5007_v35 = vpack.c.bf16 %v1411_v26, %v1411_v26  ;;  %v3394_v36 = vmax.f32 %v2940_v27, 0.0  ;;  %v1412_v37 = vmax.f32 %v952_v28, 0.0  ;;  %5640 = vmatmul.mubr.msk.bf16.gmra.mrb[124].mxu1 %vm650_vm2, %v5783_v19 }
 0x10c   : > { %2054 = vst.msk [vmem:[%s6084_s4 + $0x48] sm:$0xf] %vm2035_vm3, %v5009_v30  ;;  %v5135_v38 = vpack.c.bf16 %v3391_v31, %v3391_v31  ;;  %v5010_v39 = vpack.c.bf16 %v1414_v32, %v1414_v32  ;;  %v3392_v40 = vmax.f32 %v2932_v33, 0.0 }
 0x10d   : > { %4877 = vst.msk [vmem:[%s6084_s4 + $0x248] sm:$0xf] %vm2035_vm3, %v5137_v34  ;;  %2052 = vst.msk [vmem:[%s6084_s4 + $0x40] sm:$0xf] %vm2035_vm3, %v5007_v35  ;;  %v5138_v41 = vpack.c.bf16 %v3394_v36, %v3394_v36  ;;  %v5008_v42 = vpack.c.bf16 %v1412_v37, %v1412_v37  ;;  %v5405_v43 = vpop.f32.mrb[20].mxu0 }
 0x10e   : > { %4875 = vst.msk [vmem:[%s6084_s4 + $0x240] sm:$0xf] %vm2035_vm3, %v5135_v38  ;;  %2055 = vst.msk [vmem:[%s6084_s4 + $0x4c] sm:$0xf] %vm2035_vm3, %v5010_v39  ;;  %v5136_v44 = vpack.c.bf16 %v3392_v40, %v3392_v40  ;;  %v973_v45 = vadd.f32 %v5405_v43, %v6066_v55  ;;  %v5537_v46 = vpop.f32.mrb[20].mxu1  ;;  %v964_v47 = vpop.f32.mrb[21].mxu0 }
 0x10f   : > { %4878 = vst.msk [vmem:[%s6084_s4 + $0x24c] sm:$0xf] %vm2035_vm3, %v5138_v41  ;;  %2053 = vst.msk [vmem:[%s6084_s4 + $0x44] sm:$0xf] %vm2035_vm3, %v5008_v42  ;;  %v2953_v48 = vadd.f32 %v5537_v46, %v6066_v55  ;;  %v965_v49 = vadd.f32 %v6066_v55, %v964_v47  ;;  %v2944_v50 = vpop.f32.mrb[21].mxu1  ;;  %v5406_v51 = vpop.f32.mrb[22].mxu0 }
 0x110   : > { %4876 = vst.msk [vmem:[%s6084_s4 + $0x244] sm:$0xf] %vm2035_vm3, %v5136_v44  ;;  %v1417_v52 = vmax.f32 %v973_v45, 0.0  ;;  %v2945_v53 = vadd.f32 %v6066_v55, %v2944_v50  ;;  %v976_v54 = vadd.f32 %v5406_v51, %v6066_v55  ;;  %v5538_v56 = vpop.f32.mrb[22].mxu1  ;;  %v967_v57 = vpop.f32.mrb[23].mxu0 }
 0x111   : > { %v3397_v58 = vmax.f32 %v2953_v48, 0.0  ;;  %v1415_v59 = vmax.f32 %v965_v49, 0.0  ;;  %v2956_v60 = vadd.f32 %v5538_v56, %v6066_v55  ;;  %v968_v61 = vadd.f32 %v6066_v55, %v967_v57  ;;  %v2947_v62 = vpop.f32.mrb[23].mxu1 }
 0x112   : > { %v5013_v63 = vpack.c.bf16 %v1417_v52, %v1417_v52  ;;  %v3395_v0 = vmax.f32 %v2945_v53, 0.0  ;;  %v1418_v1 = vmax.f32 %v976_v54, 0.0  ;;  %v2948_v2 = vadd.f32 %v6066_v55, %v2947_v62 }
 0x113   : > { %v5141_v3 = vpack.c.bf16 %v3397_v58, %v3397_v58  ;;  %v5011_v4 = vpack.c.bf16 %v1415_v59, %v1415_v59  ;;  %v3398_v5 = vmax.f32 %v2956_v60, 0.0  ;;  %v1416_v6 = vmax.f32 %v968_v61, 0.0 }
 0x114   : > { %2058 = vst.msk [vmem:[%s6084_s4 + $0x58] sm:$0xf] %vm2035_vm3, %v5013_v63  ;;  %v5139_v7 = vpack.c.bf16 %v3395_v0, %v3395_v0  ;;  %v5014_v8 = vpack.c.bf16 %v1418_v1, %v1418_v1  ;;  %v3396_v9 = vmax.f32 %v2948_v2, 0.0 }
 0x115   : > { %4881 = vst.msk [vmem:[%s6084_s4 + $0x258] sm:$0xf] %vm2035_vm3, %v5141_v3  ;;  %2056 = vst.msk [vmem:[%s6084_s4 + $0x50] sm:$0xf] %vm2035_vm3, %v5011_v4  ;;  %v5142_v10 = vpack.c.bf16 %v3398_v5, %v3398_v5  ;;  %v5012_v11 = vpack.c.bf16 %v1416_v6, %v1416_v6  ;;  %v5409_v12 = vpop.f32.mrb[24].mxu0 }
 0x116   : > { %4879 = vst.msk [vmem:[%s6084_s4 + $0x250] sm:$0xf] %vm2035_vm3, %v5139_v7  ;;  %2059 = vst.msk [vmem:[%s6084_s4 + $0x5c] sm:$0xf] %vm2035_vm3, %v5014_v8  ;;  %v5140_v13 = vpack.c.bf16 %v3396_v9, %v3396_v9  ;;  %v989_v14 = vadd.f32 %v5409_v12, %v6066_v55  ;;  %v5541_v15 = vpop.f32.mrb[24].mxu1  ;;  %v980_v16 = vpop.f32.mrb[25].mxu0 }
 0x117   : > { %4882 = vst.msk [vmem:[%s6084_s4 + $0x25c] sm:$0xf] %vm2035_vm3, %v5142_v10  ;;  %2057 = vst.msk [vmem:[%s6084_s4 + $0x54] sm:$0xf] %vm2035_vm3, %v5012_v11  ;;  %v2969_v17 = vadd.f32 %v5541_v15, %v6066_v55  ;;  %v981_v18 = vadd.f32 %v6066_v55, %v980_v16  ;;  %v2960_v19 = vpop.f32.mrb[25].mxu1  ;;  %v5410_v20 = vpop.f32.mrb[26].mxu0 }
 0x118   : > { %4880 = vst.msk [vmem:[%s6084_s4 + $0x254] sm:$0xf] %vm2035_vm3, %v5140_v13  ;;  %v1421_v21 = vmax.f32 %v989_v14, 0.0  ;;  %v2961_v22 = vadd.f32 %v6066_v55, %v2960_v19  ;;  %v992_v23 = vadd.f32 %v5410_v20, %v6066_v55  ;;  %v5542_v24 = vpop.f32.mrb[26].mxu1  ;;  %v983_v25 = vpop.f32.mrb[27].mxu0 }
 0x119   : > { %v3401_v26 = vmax.f32 %v2969_v17, 0.0  ;;  %v1419_v27 = vmax.f32 %v981_v18, 0.0  ;;  %v2972_v28 = vadd.f32 %v5542_v24, %v6066_v55  ;;  %v984_v29 = vadd.f32 %v6066_v55, %v983_v25  ;;  %v2963_v30 = vpop.f32.mrb[27].mxu1 }
 0x11a   : > { %v5017_v31 = vpack.c.bf16 %v1421_v21, %v1421_v21  ;;  %v3399_v32 = vmax.f32 %v2961_v22, 0.0  ;;  %v1422_v33 = vmax.f32 %v992_v23, 0.0  ;;  %v2964_v34 = vadd.f32 %v6066_v55, %v2963_v30 }
 0x11b   : > { %v5145_v35 = vpack.c.bf16 %v3401_v26, %v3401_v26  ;;  %v5015_v36 = vpack.c.bf16 %v1419_v27, %v1419_v27  ;;  %v3402_v37 = vmax.f32 %v2972_v28, 0.0  ;;  %v1420_v38 = vmax.f32 %v984_v29, 0.0 }
 0x11c   : > { %2062 = vst.msk [vmem:[%s6084_s4 + $0x68] sm:$0xf] %vm2035_vm3, %v5017_v31  ;;  %v5143_v39 = vpack.c.bf16 %v3399_v32, %v3399_v32  ;;  %v5018_v40 = vpack.c.bf16 %v1422_v33, %v1422_v33  ;;  %v3400_v41 = vmax.f32 %v2964_v34, 0.0 }
 0x11d   : > { %4885 = vst.msk [vmem:[%s6084_s4 + $0x268] sm:$0xf] %vm2035_vm3, %v5145_v35  ;;  %2060 = vst.msk [vmem:[%s6084_s4 + $0x60] sm:$0xf] %vm2035_vm3, %v5015_v36  ;;  %v5146_v42 = vpack.c.bf16 %v3402_v37, %v3402_v37  ;;  %v5016_v43 = vpack.c.bf16 %v1420_v38, %v1420_v38  ;;  %v5413_v44 = vpop.f32.mrb[28].mxu0 }
 0x11e   : > { %4883 = vst.msk [vmem:[%s6084_s4 + $0x260] sm:$0xf] %vm2035_vm3, %v5143_v39  ;;  %2063 = vst.msk [vmem:[%s6084_s4 + $0x6c] sm:$0xf] %vm2035_vm3, %v5018_v40  ;;  %v5144_v45 = vpack.c.bf16 %v3400_v41, %v3400_v41  ;;  %v1005_v46 = vadd.f32 %v5413_v44, %v6066_v55  ;;  %v5545_v47 = vpop.f32.mrb[28].mxu1  ;;  %v996_v48 = vpop.f32.mrb[29].mxu0 }
 0x11f   : > { %4886 = vst.msk [vmem:[%s6084_s4 + $0x26c] sm:$0xf] %vm2035_vm3, %v5146_v42  ;;  %2061 = vst.msk [vmem:[%s6084_s4 + $0x64] sm:$0xf] %vm2035_vm3, %v5016_v43  ;;  %v2985_v49 = vadd.f32 %v5545_v47, %v6066_v55  ;;  %v997_v50 = vadd.f32 %v6066_v55, %v996_v48  ;;  %v2976_v51 = vpop.f32.mrb[29].mxu1  ;;  %v5414_v52 = vpop.f32.mrb[30].mxu0 }
 0x120   : > { %4884 = vst.msk [vmem:[%s6084_s4 + $0x264] sm:$0xf] %vm2035_vm3, %v5144_v45  ;;  %v1425_v53 = vmax.f32 %v1005_v46, 0.0  ;;  %v2977_v54 = vadd.f32 %v6066_v55, %v2976_v51  ;;  %v1008_v56 = vadd.f32 %v5414_v52, %v6066_v55  ;;  %v5546_v57 = vpop.f32.mrb[30].mxu1  ;;  %v999_v58 = vpop.f32.mrb[31].mxu0 }
 0x121   : > { %v3405_v59 = vmax.f32 %v2985_v49, 0.0  ;;  %v1423_v60 = vmax.f32 %v997_v50, 0.0  ;;  %v2988_v61 = vadd.f32 %v5546_v57, %v6066_v55  ;;  %v1000_v62 = vadd.f32 %v6066_v55, %v999_v58  ;;  %v2979_v63 = vpop.f32.mrb[31].mxu1 }
 0x122   : > { %v5021_v0 = vpack.c.bf16 %v1425_v53, %v1425_v53  ;;  %v3403_v1 = vmax.f32 %v2977_v54, 0.0  ;;  %v1426_v2 = vmax.f32 %v1008_v56, 0.0  ;;  %v2980_v3 = vadd.f32 %v6066_v55, %v2979_v63 }
 0x123   : > { %v5149_v4 = vpack.c.bf16 %v3405_v59, %v3405_v59  ;;  %v5019_v5 = vpack.c.bf16 %v1423_v60, %v1423_v60  ;;  %v3406_v6 = vmax.f32 %v2988_v61, 0.0  ;;  %v1424_v7 = vmax.f32 %v1000_v62, 0.0 }
 0x124   : > { %2066 = vst.msk [vmem:[%s6084_s4 + $0x78] sm:$0xf] %vm2035_vm3, %v5021_v0  ;;  %v5147_v8 = vpack.c.bf16 %v3403_v1, %v3403_v1  ;;  %v5022_v9 = vpack.c.bf16 %v1426_v2, %v1426_v2  ;;  %v3404_v10 = vmax.f32 %v2980_v3, 0.0 }
 0x125   : > { %4889 = vst.msk [vmem:[%s6084_s4 + $0x278] sm:$0xf] %vm2035_vm3, %v5149_v4  ;;  %2064 = vst.msk [vmem:[%s6084_s4 + $0x70] sm:$0xf] %vm2035_vm3, %v5019_v5  ;;  %v5150_v11 = vpack.c.bf16 %v3406_v6, %v3406_v6  ;;  %v5020_v12 = vpack.c.bf16 %v1424_v7, %v1424_v7  ;;  %v5417_v13 = vpop.f32.mrb[32].mxu0 }
 0x126   : > { %4887 = vst.msk [vmem:[%s6084_s4 + $0x270] sm:$0xf] %vm2035_vm3, %v5147_v8  ;;  %2067 = vst.msk [vmem:[%s6084_s4 + $0x7c] sm:$0xf] %vm2035_vm3, %v5022_v9  ;;  %v5148_v14 = vpack.c.bf16 %v3404_v10, %v3404_v10  ;;  %v1021_v15 = vadd.f32 %v5417_v13, %v6066_v55  ;;  %v5549_v16 = vpop.f32.mrb[32].mxu1  ;;  %v1012_v17 = vpop.f32.mrb[33].mxu0 }
 0x127   : > { %4890 = vst.msk [vmem:[%s6084_s4 + $0x27c] sm:$0xf] %vm2035_vm3, %v5150_v11  ;;  %2065 = vst.msk [vmem:[%s6084_s4 + $0x74] sm:$0xf] %vm2035_vm3, %v5020_v12  ;;  %v3001_v18 = vadd.f32 %v5549_v16, %v6066_v55  ;;  %v1013_v19 = vadd.f32 %v6066_v55, %v1012_v17  ;;  %v2992_v20 = vpop.f32.mrb[33].mxu1  ;;  %v5418_v21 = vpop.f32.mrb[34].mxu0 }
 0x128   : > { %4888 = vst.msk [vmem:[%s6084_s4 + $0x274] sm:$0xf] %vm2035_vm3, %v5148_v14  ;;  %v1429_v22 = vmax.f32 %v1021_v15, 0.0  ;;  %v2993_v23 = vadd.f32 %v6066_v55, %v2992_v20  ;;  %v1024_v24 = vadd.f32 %v5418_v21, %v6066_v55  ;;  %v5550_v25 = vpop.f32.mrb[34].mxu1  ;;  %v1015_v26 = vpop.f32.mrb[35].mxu0 }
 0x129   : > { %v3409_v27 = vmax.f32 %v3001_v18, 0.0  ;;  %v1427_v28 = vmax.f32 %v1013_v19, 0.0  ;;  %v3004_v29 = vadd.f32 %v5550_v25, %v6066_v55  ;;  %v1016_v30 = vadd.f32 %v6066_v55, %v1015_v26  ;;  %v2995_v31 = vpop.f32.mrb[35].mxu1 }
 0x12a   : > { %v5025_v32 = vpack.c.bf16 %v1429_v22, %v1429_v22  ;;  %v3407_v33 = vmax.f32 %v2993_v23, 0.0  ;;  %v1430_v34 = vmax.f32 %v1024_v24, 0.0  ;;  %v2996_v35 = vadd.f32 %v6066_v55, %v2995_v31 }
 0x12b   : > { %v5153_v36 = vpack.c.bf16 %v3409_v27, %v3409_v27  ;;  %v5023_v37 = vpack.c.bf16 %v1427_v28, %v1427_v28  ;;  %v3410_v38 = vmax.f32 %v3004_v29, 0.0  ;;  %v1428_v39 = vmax.f32 %v1016_v30, 0.0 }
 0x12c   : > { %2070 = vst.msk [vmem:[%s6084_s4 + $0x88] sm:$0xf] %vm2035_vm3, %v5025_v32  ;;  %v5151_v40 = vpack.c.bf16 %v3407_v33, %v3407_v33  ;;  %v5026_v41 = vpack.c.bf16 %v1430_v34, %v1430_v34  ;;  %v3408_v42 = vmax.f32 %v2996_v35, 0.0 }
 0x12d   : > { %4893 = vst.msk [vmem:[%s6084_s4 + $0x288] sm:$0xf] %vm2035_vm3, %v5153_v36  ;;  %2068 = vst.msk [vmem:[%s6084_s4 + $0x80] sm:$0xf] %vm2035_vm3, %v5023_v37  ;;  %v5154_v43 = vpack.c.bf16 %v3410_v38, %v3410_v38  ;;  %v5024_v44 = vpack.c.bf16 %v1428_v39, %v1428_v39  ;;  %v5421_v45 = vpop.f32.mrb[36].mxu0 }
 0x12e   : > { %4891 = vst.msk [vmem:[%s6084_s4 + $0x280] sm:$0xf] %vm2035_vm3, %v5151_v40  ;;  %2071 = vst.msk [vmem:[%s6084_s4 + $0x8c] sm:$0xf] %vm2035_vm3, %v5026_v41  ;;  %v5152_v46 = vpack.c.bf16 %v3408_v42, %v3408_v42  ;;  %v1037_v47 = vadd.f32 %v5421_v45, %v6066_v55  ;;  %v5553_v48 = vpop.f32.mrb[36].mxu1  ;;  %v1028_v49 = vpop.f32.mrb[37].mxu0 }
 0x12f   : > { %4894 = vst.msk [vmem:[%s6084_s4 + $0x28c] sm:$0xf] %vm2035_vm3, %v5154_v43  ;;  %2069 = vst.msk [vmem:[%s6084_s4 + $0x84] sm:$0xf] %vm2035_vm3, %v5024_v44  ;;  %v3017_v50 = vadd.f32 %v5553_v48, %v6066_v55  ;;  %v1029_v51 = vadd.f32 %v6066_v55, %v1028_v49  ;;  %v3008_v52 = vpop.f32.mrb[37].mxu1  ;;  %v5422_v53 = vpop.f32.mrb[38].mxu0 }
 0x130   : > { %4892 = vst.msk [vmem:[%s6084_s4 + $0x284] sm:$0xf] %vm2035_vm3, %v5152_v46  ;;  %v1433_v54 = vmax.f32 %v1037_v47, 0.0  ;;  %v3009_v56 = vadd.f32 %v6066_v55, %v3008_v52  ;;  %v1040_v57 = vadd.f32 %v5422_v53, %v6066_v55  ;;  %v5554_v58 = vpop.f32.mrb[38].mxu1  ;;  %v1031_v59 = vpop.f32.mrb[39].mxu0 }
 0x131   : > { %v3413_v60 = vmax.f32 %v3017_v50, 0.0  ;;  %v1431_v61 = vmax.f32 %v1029_v51, 0.0  ;;  %v3020_v62 = vadd.f32 %v5554_v58, %v6066_v55  ;;  %v1032_v63 = vadd.f32 %v6066_v55, %v1031_v59  ;;  %v3011_v0 = vpop.f32.mrb[39].mxu1 }
 0x132   : > { %v5029_v1 = vpack.c.bf16 %v1433_v54, %v1433_v54  ;;  %v3411_v2 = vmax.f32 %v3009_v56, 0.0  ;;  %v1434_v3 = vmax.f32 %v1040_v57, 0.0  ;;  %v3012_v4 = vadd.f32 %v6066_v55, %v3011_v0 }
 0x133   : > { %v5157_v5 = vpack.c.bf16 %v3413_v60, %v3413_v60  ;;  %v5027_v6 = vpack.c.bf16 %v1431_v61, %v1431_v61  ;;  %v3414_v7 = vmax.f32 %v3020_v62, 0.0  ;;  %v1432_v8 = vmax.f32 %v1032_v63, 0.0 }
 0x134   : > { %2074 = vst.msk [vmem:[%s6084_s4 + $0x98] sm:$0xf] %vm2035_vm3, %v5029_v1  ;;  %v5155_v9 = vpack.c.bf16 %v3411_v2, %v3411_v2  ;;  %v5030_v10 = vpack.c.bf16 %v1434_v3, %v1434_v3  ;;  %v3412_v11 = vmax.f32 %v3012_v4, 0.0 }
 0x135   : > { %4897 = vst.msk [vmem:[%s6084_s4 + $0x298] sm:$0xf] %vm2035_vm3, %v5157_v5  ;;  %2072 = vst.msk [vmem:[%s6084_s4 + $0x90] sm:$0xf] %vm2035_vm3, %v5027_v6  ;;  %v5158_v12 = vpack.c.bf16 %v3414_v7, %v3414_v7  ;;  %v5028_v13 = vpack.c.bf16 %v1432_v8, %v1432_v8  ;;  %v5425_v14 = vpop.f32.mrb[40].mxu0 }
 0x136   : > { %4895 = vst.msk [vmem:[%s6084_s4 + $0x290] sm:$0xf] %vm2035_vm3, %v5155_v9  ;;  %2075 = vst.msk [vmem:[%s6084_s4 + $0x9c] sm:$0xf] %vm2035_vm3, %v5030_v10  ;;  %v5156_v15 = vpack.c.bf16 %v3412_v11, %v3412_v11  ;;  %v1053_v16 = vadd.f32 %v5425_v14, %v6066_v55  ;;  %v5557_v17 = vpop.f32.mrb[40].mxu1  ;;  %v1044_v18 = vpop.f32.mrb[41].mxu0 }
 0x137   : > { %4898 = vst.msk [vmem:[%s6084_s4 + $0x29c] sm:$0xf] %vm2035_vm3, %v5158_v12  ;;  %2073 = vst.msk [vmem:[%s6084_s4 + $0x94] sm:$0xf] %vm2035_vm3, %v5028_v13  ;;  %v3033_v19 = vadd.f32 %v5557_v17, %v6066_v55  ;;  %v1045_v20 = vadd.f32 %v6066_v55, %v1044_v18  ;;  %v3024_v21 = vpop.f32.mrb[41].mxu1  ;;  %v5426_v22 = vpop.f32.mrb[42].mxu0 }
 0x138   : > { %4896 = vst.msk [vmem:[%s6084_s4 + $0x294] sm:$0xf] %vm2035_vm3, %v5156_v15  ;;  %v1437_v23 = vmax.f32 %v1053_v16, 0.0  ;;  %v3025_v24 = vadd.f32 %v6066_v55, %v3024_v21  ;;  %v1056_v25 = vadd.f32 %v5426_v22, %v6066_v55  ;;  %v5558_v26 = vpop.f32.mrb[42].mxu1  ;;  %v1047_v27 = vpop.f32.mrb[43].mxu0 }
 0x139   : > { %v3417_v28 = vmax.f32 %v3033_v19, 0.0  ;;  %v1435_v29 = vmax.f32 %v1045_v20, 0.0  ;;  %v3036_v30 = vadd.f32 %v5558_v26, %v6066_v55  ;;  %v1048_v31 = vadd.f32 %v6066_v55, %v1047_v27  ;;  %v3027_v32 = vpop.f32.mrb[43].mxu1  ;;  %v6398_v16 = vld [vmem:[%s6896_s2] ss:$0 sm:$0xff] }
 0x13a   : > { %v5033_v33 = vpack.c.bf16 %v1437_v23, %v1437_v23  ;;  %v3415_v34 = vmax.f32 %v3025_v24, 0.0  ;;  %v1438_v35 = vmax.f32 %v1056_v25, 0.0  ;;  %v3028_v36 = vadd.f32 %v6066_v55, %v3027_v32 }
 0x13b   : > { %v5161_v37 = vpack.c.bf16 %v3417_v28, %v3417_v28  ;;  %v5031_v38 = vpack.c.bf16 %v1435_v29, %v1435_v29  ;;  %v3418_v39 = vmax.f32 %v3036_v30, 0.0  ;;  %v1436_v40 = vmax.f32 %v1048_v31, 0.0 }
 0x13c   : > { %2078 = vst.msk [vmem:[%s6084_s4 + $0xa8] sm:$0xf] %vm2035_vm3, %v5033_v33  ;;  %v5159_v41 = vpack.c.bf16 %v3415_v34, %v3415_v34  ;;  %v5034_v42 = vpack.c.bf16 %v1438_v35, %v1438_v35  ;;  %v3416_v43 = vmax.f32 %v3028_v36, 0.0 }
 0x13d   : > { %4901 = vst.msk [vmem:[%s6084_s4 + $0x2a8] sm:$0xf] %vm2035_vm3, %v5161_v37  ;;  %2076 = vst.msk [vmem:[%s6084_s4 + $0xa0] sm:$0xf] %vm2035_vm3, %v5031_v38  ;;  %v5162_v44 = vpack.c.bf16 %v3418_v39, %v3418_v39  ;;  %v5032_v45 = vpack.c.bf16 %v1436_v40, %v1436_v40  ;;  %v5429_v46 = vpop.f32.mrb[44].mxu0 }
 0x13e   : > { %4899 = vst.msk [vmem:[%s6084_s4 + $0x2a0] sm:$0xf] %vm2035_vm3, %v5159_v41  ;;  %2079 = vst.msk [vmem:[%s6084_s4 + $0xac] sm:$0xf] %vm2035_vm3, %v5034_v42  ;;  %v5160_v47 = vpack.c.bf16 %v3416_v43, %v3416_v43  ;;  %v1069_v48 = vadd.f32 %v5429_v46, %v6066_v55  ;;  %v5561_v49 = vpop.f32.mrb[44].mxu1  ;;  %v1060_v50 = vpop.f32.mrb[45].mxu0 }
 0x13f   : > { %4902 = vst.msk [vmem:[%s6084_s4 + $0x2ac] sm:$0xf] %vm2035_vm3, %v5162_v44  ;;  %2077 = vst.msk [vmem:[%s6084_s4 + $0xa4] sm:$0xf] %vm2035_vm3, %v5032_v45  ;;  %v3049_v51 = vadd.f32 %v5561_v49, %v6066_v55  ;;  %v1061_v52 = vadd.f32 %v6066_v55, %v1060_v50  ;;  %v3040_v53 = vpop.f32.mrb[45].mxu1  ;;  %v5430_v54 = vpop.f32.mrb[46].mxu0 }
 0x140   : > { %4900 = vst.msk [vmem:[%s6084_s4 + $0x2a4] sm:$0xf] %vm2035_vm3, %v5160_v47  ;;  %v1441_v56 = vmax.f32 %v1069_v48, 0.0  ;;  %v3041_v57 = vadd.f32 %v6066_v55, %v3040_v53  ;;  %v1072_v58 = vadd.f32 %v5430_v54, %v6066_v55  ;;  %v5562_v59 = vpop.f32.mrb[46].mxu1  ;;  %v1063_v60 = vpop.f32.mrb[47].mxu0 }
 0x141   : > { %v3421_v61 = vmax.f32 %v3049_v51, 0.0  ;;  %v1439_v62 = vmax.f32 %v1061_v52, 0.0  ;;  %v3052_v63 = vadd.f32 %v5562_v59, %v6066_v55  ;;  %v1064_v0 = vadd.f32 %v6066_v55, %v1063_v60  ;;  %v3043_v1 = vpop.f32.mrb[47].mxu1 }
 0x142   : > { %v5037_v2 = vpack.c.bf16 %v1441_v56, %v1441_v56  ;;  %v3419_v3 = vmax.f32 %v3041_v57, 0.0  ;;  %v1442_v4 = vmax.f32 %v1072_v58, 0.0  ;;  %v3044_v5 = vadd.f32 %v6066_v55, %v3043_v1 }
 0x143   : > { %v5165_v6 = vpack.c.bf16 %v3421_v61, %v3421_v61  ;;  %v5035_v7 = vpack.c.bf16 %v1439_v62, %v1439_v62  ;;  %v3422_v8 = vmax.f32 %v3052_v63, 0.0  ;;  %v1440_v9 = vmax.f32 %v1064_v0, 0.0 }
 0x144   : > { %2082 = vst.msk [vmem:[%s6084_s4 + $0xb8] sm:$0xf] %vm2035_vm3, %v5037_v2  ;;  %v5163_v10 = vpack.c.bf16 %v3419_v3, %v3419_v3  ;;  %v5038_v11 = vpack.c.bf16 %v1442_v4, %v1442_v4  ;;  %v3420_v12 = vmax.f32 %v3044_v5, 0.0 }
 0x145   : > { %4905 = vst.msk [vmem:[%s6084_s4 + $0x2b8] sm:$0xf] %vm2035_vm3, %v5165_v6  ;;  %2080 = vst.msk [vmem:[%s6084_s4 + $0xb0] sm:$0xf] %vm2035_vm3, %v5035_v7  ;;  %v5166_v13 = vpack.c.bf16 %v3422_v8, %v3422_v8  ;;  %v5036_v14 = vpack.c.bf16 %v1440_v9, %v1440_v9  ;;  %v5433_v15 = vpop.f32.mrb[48].mxu0 }
 0x146   : > { %4903 = vst.msk [vmem:[%s6084_s4 + $0x2b0] sm:$0xf] %vm2035_vm3, %v5163_v10  ;;  %2083 = vst.msk [vmem:[%s6084_s4 + $0xbc] sm:$0xf] %vm2035_vm3, %v5038_v11  ;;  %v5164_v55 = vpack.c.bf16 %v3420_v12, %v3420_v12  ;;  %v1085_v17 = vadd.f32 %v6398_v16, %v5433_v15  ;;  %v5565_v18 = vpop.f32.mrb[48].mxu1  ;;  %v1076_v19 = vpop.f32.mrb[49].mxu0 }
 0x147   : > { %4906 = vst.msk [vmem:[%s6084_s4 + $0x2bc] sm:$0xf] %vm2035_vm3, %v5166_v13  ;;  %2081 = vst.msk [vmem:[%s6084_s4 + $0xb4] sm:$0xf] %vm2035_vm3, %v5036_v14  ;;  %v3065_v20 = vadd.f32 %v6398_v16, %v5565_v18  ;;  %v1077_v21 = vadd.f32 %v6398_v16, %v1076_v19  ;;  %v3056_v22 = vpop.f32.mrb[49].mxu1  ;;  %v5434_v23 = vpop.f32.mrb[50].mxu0 }
 0x148   : > { %4904 = vst.msk [vmem:[%s6084_s4 + $0x2b4] sm:$0xf] %vm2035_vm3, %v5164_v55  ;;  %v1445_v24 = vmax.f32 %v1085_v17, 0.0  ;;  %v3057_v25 = vadd.f32 %v6398_v16, %v3056_v22  ;;  %v1088_v26 = vadd.f32 %v6398_v16, %v5434_v23  ;;  %v5566_v27 = vpop.f32.mrb[50].mxu1  ;;  %v1079_v28 = vpop.f32.mrb[51].mxu0 }
 0x149   : > { %v3425_v29 = vmax.f32 %v3065_v20, 0.0  ;;  %v1443_v30 = vmax.f32 %v1077_v21, 0.0  ;;  %v3068_v31 = vadd.f32 %v6398_v16, %v5566_v27  ;;  %v1080_v32 = vadd.f32 %v6398_v16, %v1079_v28  ;;  %v3059_v33 = vpop.f32.mrb[51].mxu1 }
 0x14a   : > { %v5041_v34 = vpack.c.bf16 %v1445_v24, %v1445_v24  ;;  %v3423_v35 = vmax.f32 %v3057_v25, 0.0  ;;  %v1446_v36 = vmax.f32 %v1088_v26, 0.0  ;;  %v3060_v37 = vadd.f32 %v6398_v16, %v3059_v33 }
 0x14b   : > { %v5169_v38 = vpack.c.bf16 %v3425_v29, %v3425_v29  ;;  %v5039_v39 = vpack.c.bf16 %v1443_v30, %v1443_v30  ;;  %v3426_v40 = vmax.f32 %v3068_v31, 0.0  ;;  %v1444_v41 = vmax.f32 %v1080_v32, 0.0 }
 0x14c   : > { %2086 = vst.msk [vmem:[%s6084_s4 + $0xc8] sm:$0xf] %vm2035_vm3, %v5041_v34  ;;  %v5167_v42 = vpack.c.bf16 %v3423_v35, %v3423_v35  ;;  %v5042_v43 = vpack.c.bf16 %v1446_v36, %v1446_v36  ;;  %v3424_v44 = vmax.f32 %v3060_v37, 0.0 }
 0x14d   : > { %4909 = vst.msk [vmem:[%s6084_s4 + $0x2c8] sm:$0xf] %vm2035_vm3, %v5169_v38  ;;  %2084 = vst.msk [vmem:[%s6084_s4 + $0xc0] sm:$0xf] %vm2035_vm3, %v5039_v39  ;;  %v5170_v45 = vpack.c.bf16 %v3426_v40, %v3426_v40  ;;  %v5040_v46 = vpack.c.bf16 %v1444_v41, %v1444_v41  ;;  %v5437_v47 = vpop.f32.mrb[52].mxu0 }
 0x14e   : > { %4907 = vst.msk [vmem:[%s6084_s4 + $0x2c0] sm:$0xf] %vm2035_vm3, %v5167_v42  ;;  %2087 = vst.msk [vmem:[%s6084_s4 + $0xcc] sm:$0xf] %vm2035_vm3, %v5042_v43  ;;  %v5168_v48 = vpack.c.bf16 %v3424_v44, %v3424_v44  ;;  %v1101_v49 = vadd.f32 %v6398_v16, %v5437_v47  ;;  %v5569_v50 = vpop.f32.mrb[52].mxu1  ;;  %v1092_v51 = vpop.f32.mrb[53].mxu0 }
 0x14f   : > { %4910 = vst.msk [vmem:[%s6084_s4 + $0x2cc] sm:$0xf] %vm2035_vm3, %v5170_v45  ;;  %2085 = vst.msk [vmem:[%s6084_s4 + $0xc4] sm:$0xf] %vm2035_vm3, %v5040_v46  ;;  %v3081_v52 = vadd.f32 %v6398_v16, %v5569_v50  ;;  %v1093_v53 = vadd.f32 %v6398_v16, %v1092_v51  ;;  %v3072_v54 = vpop.f32.mrb[53].mxu1  ;;  %v5438_v56 = vpop.f32.mrb[54].mxu0 }
 0x150   : > { %4908 = vst.msk [vmem:[%s6084_s4 + $0x2c4] sm:$0xf] %vm2035_vm3, %v5168_v48  ;;  %v1449_v57 = vmax.f32 %v1101_v49, 0.0  ;;  %v3073_v58 = vadd.f32 %v6398_v16, %v3072_v54  ;;  %v1104_v59 = vadd.f32 %v6398_v16, %v5438_v56  ;;  %v5570_v60 = vpop.f32.mrb[54].mxu1  ;;  %v1095_v61 = vpop.f32.mrb[55].mxu0 }
 0x151   : > { %v3429_v62 = vmax.f32 %v3081_v52, 0.0  ;;  %v1447_v63 = vmax.f32 %v1093_v53, 0.0  ;;  %v3084_v0 = vadd.f32 %v6398_v16, %v5570_v60  ;;  %v1096_v1 = vadd.f32 %v6398_v16, %v1095_v61  ;;  %v3075_v2 = vpop.f32.mrb[55].mxu1 }
 0x152   : > { %v5045_v3 = vpack.c.bf16 %v1449_v57, %v1449_v57  ;;  %v3427_v4 = vmax.f32 %v3073_v58, 0.0  ;;  %v1450_v5 = vmax.f32 %v1104_v59, 0.0  ;;  %v3076_v6 = vadd.f32 %v6398_v16, %v3075_v2 }
 0x153   : > { %v5173_v7 = vpack.c.bf16 %v3429_v62, %v3429_v62  ;;  %v5043_v8 = vpack.c.bf16 %v1447_v63, %v1447_v63  ;;  %v3430_v9 = vmax.f32 %v3084_v0, 0.0  ;;  %v1448_v10 = vmax.f32 %v1096_v1, 0.0 }
 0x154   : > { %2090 = vst.msk [vmem:[%s6084_s4 + $0xd8] sm:$0xf] %vm2035_vm3, %v5045_v3  ;;  %v5171_v11 = vpack.c.bf16 %v3427_v4, %v3427_v4  ;;  %v5046_v12 = vpack.c.bf16 %v1450_v5, %v1450_v5  ;;  %v3428_v13 = vmax.f32 %v3076_v6, 0.0 }
 0x155   : > { %4913 = vst.msk [vmem:[%s6084_s4 + $0x2d8] sm:$0xf] %vm2035_vm3, %v5173_v7  ;;  %2088 = vst.msk [vmem:[%s6084_s4 + $0xd0] sm:$0xf] %vm2035_vm3, %v5043_v8  ;;  %v5174_v14 = vpack.c.bf16 %v3430_v9, %v3430_v9  ;;  %v5044_v15 = vpack.c.bf16 %v1448_v10, %v1448_v10  ;;  %v5441_v55 = vpop.f32.mrb[56].mxu0 }
 0x156   : > { %4911 = vst.msk [vmem:[%s6084_s4 + $0x2d0] sm:$0xf] %vm2035_vm3, %v5171_v11  ;;  %2091 = vst.msk [vmem:[%s6084_s4 + $0xdc] sm:$0xf] %vm2035_vm3, %v5046_v12  ;;  %v5172_v17 = vpack.c.bf16 %v3428_v13, %v3428_v13  ;;  %v1117_v18 = vadd.f32 %v6398_v16, %v5441_v55  ;;  %v5573_v19 = vpop.f32.mrb[56].mxu1  ;;  %v1108_v20 = vpop.f32.mrb[57].mxu0 }
 0x157   : > { %4914 = vst.msk [vmem:[%s6084_s4 + $0x2dc] sm:$0xf] %vm2035_vm3, %v5174_v14  ;;  %2089 = vst.msk [vmem:[%s6084_s4 + $0xd4] sm:$0xf] %vm2035_vm3, %v5044_v15  ;;  %v3097_v21 = vadd.f32 %v6398_v16, %v5573_v19  ;;  %v1109_v22 = vadd.f32 %v6398_v16, %v1108_v20  ;;  %v3088_v23 = vpop.f32.mrb[57].mxu1  ;;  %v5442_v24 = vpop.f32.mrb[58].mxu0 }
 0x158   : > { %4912 = vst.msk [vmem:[%s6084_s4 + $0x2d4] sm:$0xf] %vm2035_vm3, %v5172_v17  ;;  %v1453_v25 = vmax.f32 %v1117_v18, 0.0  ;;  %v3089_v26 = vadd.f32 %v6398_v16, %v3088_v23  ;;  %v1120_v27 = vadd.f32 %v6398_v16, %v5442_v24  ;;  %v5574_v28 = vpop.f32.mrb[58].mxu1  ;;  %v1111_v29 = vpop.f32.mrb[59].mxu0 }
 0x159   : > { %v3433_v30 = vmax.f32 %v3097_v21, 0.0  ;;  %v1451_v31 = vmax.f32 %v1109_v22, 0.0  ;;  %v3100_v32 = vadd.f32 %v6398_v16, %v5574_v28  ;;  %v1112_v33 = vadd.f32 %v6398_v16, %v1111_v29  ;;  %v3091_v34 = vpop.f32.mrb[59].mxu1 }
 0x15a   : > { %v5049_v35 = vpack.c.bf16 %v1453_v25, %v1453_v25  ;;  %v3431_v36 = vmax.f32 %v3089_v26, 0.0  ;;  %v1454_v37 = vmax.f32 %v1120_v27, 0.0  ;;  %v3092_v38 = vadd.f32 %v6398_v16, %v3091_v34 }
 0x15b   : > { %v5177_v39 = vpack.c.bf16 %v3433_v30, %v3433_v30  ;;  %v5047_v40 = vpack.c.bf16 %v1451_v31, %v1451_v31  ;;  %v3434_v41 = vmax.f32 %v3100_v32, 0.0  ;;  %v1452_v42 = vmax.f32 %v1112_v33, 0.0 }
 0x15c   : > { %2094 = vst.msk [vmem:[%s6084_s4 + $0xe8] sm:$0xf] %vm2035_vm3, %v5049_v35  ;;  %v5175_v43 = vpack.c.bf16 %v3431_v36, %v3431_v36  ;;  %v5050_v44 = vpack.c.bf16 %v1454_v37, %v1454_v37  ;;  %v3432_v45 = vmax.f32 %v3092_v38, 0.0 }
 0x15d   : > { %4917 = vst.msk [vmem:[%s6084_s4 + $0x2e8] sm:$0xf] %vm2035_vm3, %v5177_v39  ;;  %2092 = vst.msk [vmem:[%s6084_s4 + $0xe0] sm:$0xf] %vm2035_vm3, %v5047_v40  ;;  %v5178_v46 = vpack.c.bf16 %v3434_v41, %v3434_v41  ;;  %v5048_v47 = vpack.c.bf16 %v1452_v42, %v1452_v42  ;;  %v5445_v48 = vpop.f32.mrb[60].mxu0 }
 0x15e   : > { %4915 = vst.msk [vmem:[%s6084_s4 + $0x2e0] sm:$0xf] %vm2035_vm3, %v5175_v43  ;;  %2095 = vst.msk [vmem:[%s6084_s4 + $0xec] sm:$0xf] %vm2035_vm3, %v5050_v44  ;;  %v5176_v49 = vpack.c.bf16 %v3432_v45, %v3432_v45  ;;  %v1133_v50 = vadd.f32 %v6398_v16, %v5445_v48  ;;  %v5577_v51 = vpop.f32.mrb[60].mxu1  ;;  %v1124_v52 = vpop.f32.mrb[61].mxu0 }
 0x15f   : > { %4918 = vst.msk [vmem:[%s6084_s4 + $0x2ec] sm:$0xf] %vm2035_vm3, %v5178_v46  ;;  %2093 = vst.msk [vmem:[%s6084_s4 + $0xe4] sm:$0xf] %vm2035_vm3, %v5048_v47  ;;  %v3113_v53 = vadd.f32 %v6398_v16, %v5577_v51  ;;  %v1125_v54 = vadd.f32 %v6398_v16, %v1124_v52  ;;  %v3104_v56 = vpop.f32.mrb[61].mxu1  ;;  %v5446_v57 = vpop.f32.mrb[62].mxu0 }
 0x160   : > { %4916 = vst.msk [vmem:[%s6084_s4 + $0x2e4] sm:$0xf] %vm2035_vm3, %v5176_v49  ;;  %v1457_v58 = vmax.f32 %v1133_v50, 0.0  ;;  %v3105_v59 = vadd.f32 %v6398_v16, %v3104_v56  ;;  %v1136_v60 = vadd.f32 %v6398_v16, %v5446_v57  ;;  %v5578_v61 = vpop.f32.mrb[62].mxu1  ;;  %v1127_v62 = vpop.f32.mrb[63].mxu0 }
 0x161   : > { %v3437_v63 = vmax.f32 %v3113_v53, 0.0  ;;  %v1455_v0 = vmax.f32 %v1125_v54, 0.0  ;;  %v3116_v1 = vadd.f32 %v6398_v16, %v5578_v61  ;;  %v1128_v2 = vadd.f32 %v6398_v16, %v1127_v62  ;;  %v3107_v3 = vpop.f32.mrb[63].mxu1 }
 0x162   : > { %v5053_v4 = vpack.c.bf16 %v1457_v58, %v1457_v58  ;;  %v3435_v5 = vmax.f32 %v3105_v59, 0.0  ;;  %v1458_v6 = vmax.f32 %v1136_v60, 0.0  ;;  %v3108_v7 = vadd.f32 %v6398_v16, %v3107_v3 }
 0x163   : > { %v5181_v8 = vpack.c.bf16 %v3437_v63, %v3437_v63  ;;  %v5051_v9 = vpack.c.bf16 %v1455_v0, %v1455_v0  ;;  %v3438_v10 = vmax.f32 %v3116_v1, 0.0  ;;  %v1456_v11 = vmax.f32 %v1128_v2, 0.0 }
 0x164   : > { %2098 = vst.msk [vmem:[%s6084_s4 + $0xf8] sm:$0xf] %vm2035_vm3, %v5053_v4  ;;  %v5179_v12 = vpack.c.bf16 %v3435_v5, %v3435_v5  ;;  %v5054_v13 = vpack.c.bf16 %v1458_v6, %v1458_v6  ;;  %v3436_v14 = vmax.f32 %v3108_v7, 0.0 }
 0x165   : > { %4921 = vst.msk [vmem:[%s6084_s4 + $0x2f8] sm:$0xf] %vm2035_vm3, %v5181_v8  ;;  %2096 = vst.msk [vmem:[%s6084_s4 + $0xf0] sm:$0xf] %vm2035_vm3, %v5051_v9  ;;  %v5182_v15 = vpack.c.bf16 %v3438_v10, %v3438_v10  ;;  %v5052_v55 = vpack.c.bf16 %v1456_v11, %v1456_v11  ;;  %v5449_v17 = vpop.f32.mrb[64].mxu0 }
 0x166   : > { %4919 = vst.msk [vmem:[%s6084_s4 + $0x2f0] sm:$0xf] %vm2035_vm3, %v5179_v12  ;;  %2099 = vst.msk [vmem:[%s6084_s4 + $0xfc] sm:$0xf] %vm2035_vm3, %v5054_v13  ;;  %v5180_v18 = vpack.c.bf16 %v3436_v14, %v3436_v14  ;;  %v1149_v19 = vadd.f32 %v6398_v16, %v5449_v17  ;;  %v5581_v20 = vpop.f32.mrb[64].mxu1  ;;  %v1140_v21 = vpop.f32.mrb[65].mxu0 }
 0x167   : > { %4922 = vst.msk [vmem:[%s6084_s4 + $0x2fc] sm:$0xf] %vm2035_vm3, %v5182_v15  ;;  %2097 = vst.msk [vmem:[%s6084_s4 + $0xf4] sm:$0xf] %vm2035_vm3, %v5052_v55  ;;  %v3129_v22 = vadd.f32 %v6398_v16, %v5581_v20  ;;  %v1141_v23 = vadd.f32 %v6398_v16, %v1140_v21  ;;  %v3120_v24 = vpop.f32.mrb[65].mxu1  ;;  %v5450_v25 = vpop.f32.mrb[66].mxu0 }
 0x168   : > { %4920 = vst.msk [vmem:[%s6084_s4 + $0x2f4] sm:$0xf] %vm2035_vm3, %v5180_v18  ;;  %v1461_v26 = vmax.f32 %v1149_v19, 0.0  ;;  %v3121_v27 = vadd.f32 %v6398_v16, %v3120_v24  ;;  %v1152_v28 = vadd.f32 %v6398_v16, %v5450_v25  ;;  %v5582_v29 = vpop.f32.mrb[66].mxu1  ;;  %v1143_v30 = vpop.f32.mrb[67].mxu0 }
 0x169   : > { %v3441_v31 = vmax.f32 %v3129_v22, 0.0  ;;  %v1459_v32 = vmax.f32 %v1141_v23, 0.0  ;;  %v3132_v33 = vadd.f32 %v6398_v16, %v5582_v29  ;;  %v1144_v34 = vadd.f32 %v6398_v16, %v1143_v30  ;;  %v3123_v35 = vpop.f32.mrb[67].mxu1 }
 0x16a   : > { %v5057_v36 = vpack.c.bf16 %v1461_v26, %v1461_v26  ;;  %v3439_v37 = vmax.f32 %v3121_v27, 0.0  ;;  %v1462_v38 = vmax.f32 %v1152_v28, 0.0  ;;  %v3124_v39 = vadd.f32 %v6398_v16, %v3123_v35 }
 0x16b   : > { %v5185_v40 = vpack.c.bf16 %v3441_v31, %v3441_v31  ;;  %v5055_v41 = vpack.c.bf16 %v1459_v32, %v1459_v32  ;;  %v3442_v42 = vmax.f32 %v3132_v33, 0.0  ;;  %v1460_v43 = vmax.f32 %v1144_v34, 0.0 }
 0x16c   : > { %2102 = vst.msk [vmem:[%s6084_s4 + $0x108] sm:$0xf] %vm2035_vm3, %v5057_v36  ;;  %v5183_v44 = vpack.c.bf16 %v3439_v37, %v3439_v37  ;;  %v5058_v45 = vpack.c.bf16 %v1462_v38, %v1462_v38  ;;  %v3440_v46 = vmax.f32 %v3124_v39, 0.0 }
 0x16d   : > { %4925 = vst.msk [vmem:[%s6084_s4 + $0x308] sm:$0xf] %vm2035_vm3, %v5185_v40  ;;  %2100 = vst.msk [vmem:[%s6084_s4 + $0x100] sm:$0xf] %vm2035_vm3, %v5055_v41  ;;  %v5186_v47 = vpack.c.bf16 %v3442_v42, %v3442_v42  ;;  %v5056_v48 = vpack.c.bf16 %v1460_v43, %v1460_v43  ;;  %v5453_v49 = vpop.f32.mrb[68].mxu0 }
 0x16e   : > { %4923 = vst.msk [vmem:[%s6084_s4 + $0x300] sm:$0xf] %vm2035_vm3, %v5183_v44  ;;  %2103 = vst.msk [vmem:[%s6084_s4 + $0x10c] sm:$0xf] %vm2035_vm3, %v5058_v45  ;;  %v5184_v50 = vpack.c.bf16 %v3440_v46, %v3440_v46  ;;  %v1165_v51 = vadd.f32 %v6398_v16, %v5453_v49  ;;  %v5585_v52 = vpop.f32.mrb[68].mxu1  ;;  %v1156_v53 = vpop.f32.mrb[69].mxu0 }
 0x16f   : > { %4926 = vst.msk [vmem:[%s6084_s4 + $0x30c] sm:$0xf] %vm2035_vm3, %v5186_v47  ;;  %2101 = vst.msk [vmem:[%s6084_s4 + $0x104] sm:$0xf] %vm2035_vm3, %v5056_v48  ;;  %v3145_v54 = vadd.f32 %v6398_v16, %v5585_v52  ;;  %v1157_v56 = vadd.f32 %v6398_v16, %v1156_v53  ;;  %v3136_v57 = vpop.f32.mrb[69].mxu1  ;;  %v5454_v58 = vpop.f32.mrb[70].mxu0 }
 0x170   : > { %4924 = vst.msk [vmem:[%s6084_s4 + $0x304] sm:$0xf] %vm2035_vm3, %v5184_v50  ;;  %v1465_v59 = vmax.f32 %v1165_v51, 0.0  ;;  %v3137_v60 = vadd.f32 %v6398_v16, %v3136_v57  ;;  %v1168_v61 = vadd.f32 %v6398_v16, %v5454_v58  ;;  %v5586_v62 = vpop.f32.mrb[70].mxu1  ;;  %v1159_v63 = vpop.f32.mrb[71].mxu0 }
 0x171   : > { %v3445_v0 = vmax.f32 %v3145_v54, 0.0  ;;  %v1463_v1 = vmax.f32 %v1157_v56, 0.0  ;;  %v3148_v2 = vadd.f32 %v6398_v16, %v5586_v62  ;;  %v1160_v3 = vadd.f32 %v6398_v16, %v1159_v63  ;;  %v3139_v4 = vpop.f32.mrb[71].mxu1 }
 0x172   : > { %v5061_v5 = vpack.c.bf16 %v1465_v59, %v1465_v59  ;;  %v3443_v6 = vmax.f32 %v3137_v60, 0.0  ;;  %v1466_v7 = vmax.f32 %v1168_v61, 0.0  ;;  %v3140_v8 = vadd.f32 %v6398_v16, %v3139_v4 }
 0x173   : > { %v5189_v9 = vpack.c.bf16 %v3445_v0, %v3445_v0  ;;  %v5059_v10 = vpack.c.bf16 %v1463_v1, %v1463_v1  ;;  %v3446_v11 = vmax.f32 %v3148_v2, 0.0  ;;  %v1464_v12 = vmax.f32 %v1160_v3, 0.0 }
 0x174   : > { %2106 = vst.msk [vmem:[%s6084_s4 + $0x118] sm:$0xf] %vm2035_vm3, %v5061_v5  ;;  %v5187_v13 = vpack.c.bf16 %v3443_v6, %v3443_v6  ;;  %v5062_v14 = vpack.c.bf16 %v1466_v7, %v1466_v7  ;;  %v3444_v15 = vmax.f32 %v3140_v8, 0.0 }
 0x175   : > { %4929 = vst.msk [vmem:[%s6084_s4 + $0x318] sm:$0xf] %vm2035_vm3, %v5189_v9  ;;  %2104 = vst.msk [vmem:[%s6084_s4 + $0x110] sm:$0xf] %vm2035_vm3, %v5059_v10  ;;  %v5190_v55 = vpack.c.bf16 %v3446_v11, %v3446_v11  ;;  %v5060_v17 = vpack.c.bf16 %v1464_v12, %v1464_v12  ;;  %v5457_v18 = vpop.f32.mrb[72].mxu0 }
 0x176   : > { %4927 = vst.msk [vmem:[%s6084_s4 + $0x310] sm:$0xf] %vm2035_vm3, %v5187_v13  ;;  %2107 = vst.msk [vmem:[%s6084_s4 + $0x11c] sm:$0xf] %vm2035_vm3, %v5062_v14  ;;  %v5188_v19 = vpack.c.bf16 %v3444_v15, %v3444_v15  ;;  %v1181_v20 = vadd.f32 %v6398_v16, %v5457_v18  ;;  %v5589_v21 = vpop.f32.mrb[72].mxu1  ;;  %v1172_v22 = vpop.f32.mrb[73].mxu0 }
 0x177   : > { %4930 = vst.msk [vmem:[%s6084_s4 + $0x31c] sm:$0xf] %vm2035_vm3, %v5190_v55  ;;  %2105 = vst.msk [vmem:[%s6084_s4 + $0x114] sm:$0xf] %vm2035_vm3, %v5060_v17  ;;  %v3161_v23 = vadd.f32 %v6398_v16, %v5589_v21  ;;  %v1173_v24 = vadd.f32 %v6398_v16, %v1172_v22  ;;  %v3152_v25 = vpop.f32.mrb[73].mxu1  ;;  %v5458_v26 = vpop.f32.mrb[74].mxu0 }
 0x178   : > { %4928 = vst.msk [vmem:[%s6084_s4 + $0x314] sm:$0xf] %vm2035_vm3, %v5188_v19  ;;  %v1469_v27 = vmax.f32 %v1181_v20, 0.0  ;;  %v3153_v28 = vadd.f32 %v6398_v16, %v3152_v25  ;;  %v1184_v29 = vadd.f32 %v6398_v16, %v5458_v26  ;;  %v5590_v30 = vpop.f32.mrb[74].mxu1  ;;  %v1175_v31 = vpop.f32.mrb[75].mxu0 }
 0x179   : > { %v3449_v32 = vmax.f32 %v3161_v23, 0.0  ;;  %v1467_v33 = vmax.f32 %v1173_v24, 0.0  ;;  %v3164_v34 = vadd.f32 %v6398_v16, %v5590_v30  ;;  %v1176_v35 = vadd.f32 %v6398_v16, %v1175_v31  ;;  %v3155_v36 = vpop.f32.mrb[75].mxu1 }
 0x17a   : > { %v5065_v37 = vpack.c.bf16 %v1469_v27, %v1469_v27  ;;  %v3447_v38 = vmax.f32 %v3153_v28, 0.0  ;;  %v1470_v39 = vmax.f32 %v1184_v29, 0.0  ;;  %v3156_v40 = vadd.f32 %v6398_v16, %v3155_v36 }
 0x17b   : > { %v5193_v41 = vpack.c.bf16 %v3449_v32, %v3449_v32  ;;  %v5063_v42 = vpack.c.bf16 %v1467_v33, %v1467_v33  ;;  %v3450_v43 = vmax.f32 %v3164_v34, 0.0  ;;  %v1468_v44 = vmax.f32 %v1176_v35, 0.0 }
 0x17c   : > { %2110 = vst.msk [vmem:[%s6084_s4 + $0x128] sm:$0xf] %vm2035_vm3, %v5065_v37  ;;  %v5191_v45 = vpack.c.bf16 %v3447_v38, %v3447_v38  ;;  %v5066_v46 = vpack.c.bf16 %v1470_v39, %v1470_v39  ;;  %v3448_v47 = vmax.f32 %v3156_v40, 0.0 }
 0x17d   : > { %4933 = vst.msk [vmem:[%s6084_s4 + $0x328] sm:$0xf] %vm2035_vm3, %v5193_v41  ;;  %2108 = vst.msk [vmem:[%s6084_s4 + $0x120] sm:$0xf] %vm2035_vm3, %v5063_v42  ;;  %v5194_v48 = vpack.c.bf16 %v3450_v43, %v3450_v43  ;;  %v5064_v49 = vpack.c.bf16 %v1468_v44, %v1468_v44  ;;  %v5461_v50 = vpop.f32.mrb[76].mxu0 }
 0x17e   : > { %4931 = vst.msk [vmem:[%s6084_s4 + $0x320] sm:$0xf] %vm2035_vm3, %v5191_v45  ;;  %2111 = vst.msk [vmem:[%s6084_s4 + $0x12c] sm:$0xf] %vm2035_vm3, %v5066_v46  ;;  %v5192_v51 = vpack.c.bf16 %v3448_v47, %v3448_v47  ;;  %v1197_v52 = vadd.f32 %v6398_v16, %v5461_v50  ;;  %v5593_v53 = vpop.f32.mrb[76].mxu1  ;;  %v1188_v54 = vpop.f32.mrb[77].mxu0 }
 0x17f   : > { %4934 = vst.msk [vmem:[%s6084_s4 + $0x32c] sm:$0xf] %vm2035_vm3, %v5194_v48  ;;  %2109 = vst.msk [vmem:[%s6084_s4 + $0x124] sm:$0xf] %vm2035_vm3, %v5064_v49  ;;  %v3177_v56 = vadd.f32 %v6398_v16, %v5593_v53  ;;  %v1189_v57 = vadd.f32 %v6398_v16, %v1188_v54  ;;  %v3168_v58 = vpop.f32.mrb[77].mxu1  ;;  %v5462_v59 = vpop.f32.mrb[78].mxu0 }
 0x180   : > { %4932 = vst.msk [vmem:[%s6084_s4 + $0x324] sm:$0xf] %vm2035_vm3, %v5192_v51  ;;  %v1473_v60 = vmax.f32 %v1197_v52, 0.0  ;;  %v3169_v61 = vadd.f32 %v6398_v16, %v3168_v58  ;;  %v1200_v62 = vadd.f32 %v6398_v16, %v5462_v59  ;;  %v5594_v63 = vpop.f32.mrb[78].mxu1  ;;  %v1191_v0 = vpop.f32.mrb[79].mxu0 }
 0x181   : > { %v3453_v1 = vmax.f32 %v3177_v56, 0.0  ;;  %v1471_v2 = vmax.f32 %v1189_v57, 0.0  ;;  %v3180_v3 = vadd.f32 %v6398_v16, %v5594_v63  ;;  %v1192_v4 = vadd.f32 %v6398_v16, %v1191_v0  ;;  %v3171_v5 = vpop.f32.mrb[79].mxu1 }
 0x182   : > { %v5069_v6 = vpack.c.bf16 %v1473_v60, %v1473_v60  ;;  %v3451_v7 = vmax.f32 %v3169_v61, 0.0  ;;  %v1474_v8 = vmax.f32 %v1200_v62, 0.0  ;;  %v3172_v9 = vadd.f32 %v6398_v16, %v3171_v5 }
 0x183   : > { %v5197_v10 = vpack.c.bf16 %v3453_v1, %v3453_v1  ;;  %v5067_v11 = vpack.c.bf16 %v1471_v2, %v1471_v2  ;;  %v3454_v12 = vmax.f32 %v3180_v3, 0.0  ;;  %v1472_v13 = vmax.f32 %v1192_v4, 0.0 }
 0x184   : > { %2114 = vst.msk [vmem:[%s6084_s4 + $0x138] sm:$0xf] %vm2035_vm3, %v5069_v6  ;;  %v5195_v14 = vpack.c.bf16 %v3451_v7, %v3451_v7  ;;  %v5070_v15 = vpack.c.bf16 %v1474_v8, %v1474_v8  ;;  %v3452_v55 = vmax.f32 %v3172_v9, 0.0 }
 0x185   : > { %4937 = vst.msk [vmem:[%s6084_s4 + $0x338] sm:$0xf] %vm2035_vm3, %v5197_v10  ;;  %2112 = vst.msk [vmem:[%s6084_s4 + $0x130] sm:$0xf] %vm2035_vm3, %v5067_v11  ;;  %v5198_v17 = vpack.c.bf16 %v3454_v12, %v3454_v12  ;;  %v5068_v18 = vpack.c.bf16 %v1472_v13, %v1472_v13  ;;  %v5465_v19 = vpop.f32.mrb[80].mxu0 }
 0x186   : > { %4935 = vst.msk [vmem:[%s6084_s4 + $0x330] sm:$0xf] %vm2035_vm3, %v5195_v14  ;;  %2115 = vst.msk [vmem:[%s6084_s4 + $0x13c] sm:$0xf] %vm2035_vm3, %v5070_v15  ;;  %v5196_v20 = vpack.c.bf16 %v3452_v55, %v3452_v55  ;;  %v1213_v21 = vadd.f32 %v6398_v16, %v5465_v19  ;;  %v5597_v22 = vpop.f32.mrb[80].mxu1  ;;  %v1204_v23 = vpop.f32.mrb[81].mxu0 }
 0x187   : > { %4938 = vst.msk [vmem:[%s6084_s4 + $0x33c] sm:$0xf] %vm2035_vm3, %v5198_v17  ;;  %2113 = vst.msk [vmem:[%s6084_s4 + $0x134] sm:$0xf] %vm2035_vm3, %v5068_v18  ;;  %v3193_v24 = vadd.f32 %v6398_v16, %v5597_v22  ;;  %v1205_v25 = vadd.f32 %v6398_v16, %v1204_v23  ;;  %v3184_v26 = vpop.f32.mrb[81].mxu1  ;;  %v5466_v27 = vpop.f32.mrb[82].mxu0 }
 0x188   : > { %4936 = vst.msk [vmem:[%s6084_s4 + $0x334] sm:$0xf] %vm2035_vm3, %v5196_v20  ;;  %v1477_v28 = vmax.f32 %v1213_v21, 0.0  ;;  %v3185_v29 = vadd.f32 %v6398_v16, %v3184_v26  ;;  %v1216_v30 = vadd.f32 %v6398_v16, %v5466_v27  ;;  %v5598_v31 = vpop.f32.mrb[82].mxu1  ;;  %v1207_v32 = vpop.f32.mrb[83].mxu0 }
 0x189   : > { %v3457_v33 = vmax.f32 %v3193_v24, 0.0  ;;  %v1475_v34 = vmax.f32 %v1205_v25, 0.0  ;;  %v3196_v35 = vadd.f32 %v6398_v16, %v5598_v31  ;;  %v1208_v36 = vadd.f32 %v6398_v16, %v1207_v32  ;;  %v3187_v37 = vpop.f32.mrb[83].mxu1 }
 0x18a   : > { %v5073_v38 = vpack.c.bf16 %v1477_v28, %v1477_v28  ;;  %v3455_v39 = vmax.f32 %v3185_v29, 0.0  ;;  %v1478_v40 = vmax.f32 %v1216_v30, 0.0  ;;  %v3188_v41 = vadd.f32 %v6398_v16, %v3187_v37 }
 0x18b   : > { %v5201_v42 = vpack.c.bf16 %v3457_v33, %v3457_v33  ;;  %v5071_v43 = vpack.c.bf16 %v1475_v34, %v1475_v34  ;;  %v3458_v44 = vmax.f32 %v3196_v35, 0.0  ;;  %v1476_v45 = vmax.f32 %v1208_v36, 0.0 }
 0x18c   : > { %2118 = vst.msk [vmem:[%s6084_s4 + $0x148] sm:$0xf] %vm2035_vm3, %v5073_v38  ;;  %v5199_v46 = vpack.c.bf16 %v3455_v39, %v3455_v39  ;;  %v5074_v47 = vpack.c.bf16 %v1478_v40, %v1478_v40  ;;  %v3456_v48 = vmax.f32 %v3188_v41, 0.0 }
 0x18d   : > { %4941 = vst.msk [vmem:[%s6084_s4 + $0x348] sm:$0xf] %vm2035_vm3, %v5201_v42  ;;  %2116 = vst.msk [vmem:[%s6084_s4 + $0x140] sm:$0xf] %vm2035_vm3, %v5071_v43  ;;  %v5202_v49 = vpack.c.bf16 %v3458_v44, %v3458_v44  ;;  %v5072_v50 = vpack.c.bf16 %v1476_v45, %v1476_v45  ;;  %v5469_v51 = vpop.f32.mrb[84].mxu0 }
 0x18e   : > { %4939 = vst.msk [vmem:[%s6084_s4 + $0x340] sm:$0xf] %vm2035_vm3, %v5199_v46  ;;  %2119 = vst.msk [vmem:[%s6084_s4 + $0x14c] sm:$0xf] %vm2035_vm3, %v5074_v47  ;;  %v5200_v52 = vpack.c.bf16 %v3456_v48, %v3456_v48  ;;  %v1229_v53 = vadd.f32 %v6398_v16, %v5469_v51  ;;  %v5601_v54 = vpop.f32.mrb[84].mxu1  ;;  %v1220_v56 = vpop.f32.mrb[85].mxu0 }
 0x18f   : > { %4942 = vst.msk [vmem:[%s6084_s4 + $0x34c] sm:$0xf] %vm2035_vm3, %v5202_v49  ;;  %2117 = vst.msk [vmem:[%s6084_s4 + $0x144] sm:$0xf] %vm2035_vm3, %v5072_v50  ;;  %v3209_v57 = vadd.f32 %v6398_v16, %v5601_v54  ;;  %v1221_v58 = vadd.f32 %v6398_v16, %v1220_v56  ;;  %v3200_v59 = vpop.f32.mrb[85].mxu1  ;;  %v5470_v60 = vpop.f32.mrb[86].mxu0 }
 0x190   : > { %4940 = vst.msk [vmem:[%s6084_s4 + $0x344] sm:$0xf] %vm2035_vm3, %v5200_v52  ;;  %v1481_v61 = vmax.f32 %v1229_v53, 0.0  ;;  %v3201_v62 = vadd.f32 %v6398_v16, %v3200_v59  ;;  %v1232_v63 = vadd.f32 %v6398_v16, %v5470_v60  ;;  %v5602_v0 = vpop.f32.mrb[86].mxu1  ;;  %v1223_v1 = vpop.f32.mrb[87].mxu0 }
 0x191   : > { %v3461_v2 = vmax.f32 %v3209_v57, 0.0  ;;  %v1479_v3 = vmax.f32 %v1221_v58, 0.0  ;;  %v3212_v4 = vadd.f32 %v6398_v16, %v5602_v0  ;;  %v1224_v5 = vadd.f32 %v6398_v16, %v1223_v1  ;;  %v3203_v6 = vpop.f32.mrb[87].mxu1 }
 0x192   : > { %v5077_v7 = vpack.c.bf16 %v1481_v61, %v1481_v61  ;;  %v3459_v8 = vmax.f32 %v3201_v62, 0.0  ;;  %v1482_v9 = vmax.f32 %v1232_v63, 0.0  ;;  %v3204_v10 = vadd.f32 %v6398_v16, %v3203_v6 }
 0x193   : > { %v5205_v11 = vpack.c.bf16 %v3461_v2, %v3461_v2  ;;  %v5075_v12 = vpack.c.bf16 %v1479_v3, %v1479_v3  ;;  %v3462_v13 = vmax.f32 %v3212_v4, 0.0  ;;  %v1480_v14 = vmax.f32 %v1224_v5, 0.0 }
 0x194   : > { %2122 = vst.msk [vmem:[%s6084_s4 + $0x158] sm:$0xf] %vm2035_vm3, %v5077_v7  ;;  %v5203_v15 = vpack.c.bf16 %v3459_v8, %v3459_v8  ;;  %v5078_v55 = vpack.c.bf16 %v1482_v9, %v1482_v9  ;;  %v3460_v17 = vmax.f32 %v3204_v10, 0.0 }
 0x195   : > { %4945 = vst.msk [vmem:[%s6084_s4 + $0x358] sm:$0xf] %vm2035_vm3, %v5205_v11  ;;  %2120 = vst.msk [vmem:[%s6084_s4 + $0x150] sm:$0xf] %vm2035_vm3, %v5075_v12  ;;  %v5206_v18 = vpack.c.bf16 %v3462_v13, %v3462_v13  ;;  %v5076_v19 = vpack.c.bf16 %v1480_v14, %v1480_v14  ;;  %v5473_v20 = vpop.f32.mrb[88].mxu0 }
 0x196   : > { %4943 = vst.msk [vmem:[%s6084_s4 + $0x350] sm:$0xf] %vm2035_vm3, %v5203_v15  ;;  %2123 = vst.msk [vmem:[%s6084_s4 + $0x15c] sm:$0xf] %vm2035_vm3, %v5078_v55  ;;  %v5204_v21 = vpack.c.bf16 %v3460_v17, %v3460_v17  ;;  %v1245_v22 = vadd.f32 %v6398_v16, %v5473_v20  ;;  %v5605_v23 = vpop.f32.mrb[88].mxu1  ;;  %v1236_v24 = vpop.f32.mrb[89].mxu0 }
 0x197   : > { %4946 = vst.msk [vmem:[%s6084_s4 + $0x35c] sm:$0xf] %vm2035_vm3, %v5206_v18  ;;  %2121 = vst.msk [vmem:[%s6084_s4 + $0x154] sm:$0xf] %vm2035_vm3, %v5076_v19  ;;  %v3225_v25 = vadd.f32 %v6398_v16, %v5605_v23  ;;  %v1237_v26 = vadd.f32 %v6398_v16, %v1236_v24  ;;  %v3216_v27 = vpop.f32.mrb[89].mxu1  ;;  %v5474_v28 = vpop.f32.mrb[90].mxu0 }
 0x198   : > { %4944 = vst.msk [vmem:[%s6084_s4 + $0x354] sm:$0xf] %vm2035_vm3, %v5204_v21  ;;  %v1485_v29 = vmax.f32 %v1245_v22, 0.0  ;;  %v3217_v30 = vadd.f32 %v6398_v16, %v3216_v27  ;;  %v1248_v31 = vadd.f32 %v6398_v16, %v5474_v28  ;;  %v5606_v32 = vpop.f32.mrb[90].mxu1  ;;  %v1239_v33 = vpop.f32.mrb[91].mxu0 }
 0x199   : > { %v3465_v34 = vmax.f32 %v3225_v25, 0.0  ;;  %v1483_v35 = vmax.f32 %v1237_v26, 0.0  ;;  %v3228_v36 = vadd.f32 %v6398_v16, %v5606_v32  ;;  %v1240_v37 = vadd.f32 %v6398_v16, %v1239_v33  ;;  %v3219_v38 = vpop.f32.mrb[91].mxu1 }
 0x19a   : > { %v5081_v39 = vpack.c.bf16 %v1485_v29, %v1485_v29  ;;  %v3463_v40 = vmax.f32 %v3217_v30, 0.0  ;;  %v1486_v41 = vmax.f32 %v1248_v31, 0.0  ;;  %v3220_v42 = vadd.f32 %v6398_v16, %v3219_v38 }
 0x19b   : > { %v5209_v43 = vpack.c.bf16 %v3465_v34, %v3465_v34  ;;  %v5079_v44 = vpack.c.bf16 %v1483_v35, %v1483_v35  ;;  %v3466_v45 = vmax.f32 %v3228_v36, 0.0  ;;  %v1484_v46 = vmax.f32 %v1240_v37, 0.0 }
 0x19c   : > { %2126 = vst.msk [vmem:[%s6084_s4 + $0x168] sm:$0xf] %vm2035_vm3, %v5081_v39  ;;  %v5207_v47 = vpack.c.bf16 %v3463_v40, %v3463_v40  ;;  %v5082_v48 = vpack.c.bf16 %v1486_v41, %v1486_v41  ;;  %v3464_v49 = vmax.f32 %v3220_v42, 0.0 }
 0x19d   : > { %4949 = vst.msk [vmem:[%s6084_s4 + $0x368] sm:$0xf] %vm2035_vm3, %v5209_v43  ;;  %2124 = vst.msk [vmem:[%s6084_s4 + $0x160] sm:$0xf] %vm2035_vm3, %v5079_v44  ;;  %v5210_v50 = vpack.c.bf16 %v3466_v45, %v3466_v45  ;;  %v5080_v51 = vpack.c.bf16 %v1484_v46, %v1484_v46  ;;  %v5477_v52 = vpop.f32.mrb[92].mxu0 }
 0x19e   : > { %4947 = vst.msk [vmem:[%s6084_s4 + $0x360] sm:$0xf] %vm2035_vm3, %v5207_v47  ;;  %2127 = vst.msk [vmem:[%s6084_s4 + $0x16c] sm:$0xf] %vm2035_vm3, %v5082_v48  ;;  %v5208_v53 = vpack.c.bf16 %v3464_v49, %v3464_v49  ;;  %v1261_v54 = vadd.f32 %v6398_v16, %v5477_v52  ;;  %v5609_v56 = vpop.f32.mrb[92].mxu1  ;;  %v1252_v57 = vpop.f32.mrb[93].mxu0 }
 0x19f   : > { %4950 = vst.msk [vmem:[%s6084_s4 + $0x36c] sm:$0xf] %vm2035_vm3, %v5210_v50  ;;  %2125 = vst.msk [vmem:[%s6084_s4 + $0x164] sm:$0xf] %vm2035_vm3, %v5080_v51  ;;  %v3241_v58 = vadd.f32 %v6398_v16, %v5609_v56  ;;  %v1253_v59 = vadd.f32 %v6398_v16, %v1252_v57  ;;  %v3232_v60 = vpop.f32.mrb[93].mxu1  ;;  %v5478_v61 = vpop.f32.mrb[94].mxu0 }
 0x1a0   : > { %4948 = vst.msk [vmem:[%s6084_s4 + $0x364] sm:$0xf] %vm2035_vm3, %v5208_v53  ;;  %v1489_v62 = vmax.f32 %v1261_v54, 0.0  ;;  %v3233_v63 = vadd.f32 %v6398_v16, %v3232_v60  ;;  %v1264_v0 = vadd.f32 %v6398_v16, %v5478_v61  ;;  %v5610_v1 = vpop.f32.mrb[94].mxu1  ;;  %v1255_v2 = vpop.f32.mrb[95].mxu0 }
 0x1a1   : > { %v3469_v3 = vmax.f32 %v3241_v58, 0.0  ;;  %v1487_v4 = vmax.f32 %v1253_v59, 0.0  ;;  %v3244_v5 = vadd.f32 %v6398_v16, %v5610_v1  ;;  %v1256_v6 = vadd.f32 %v6398_v16, %v1255_v2  ;;  %v3235_v7 = vpop.f32.mrb[95].mxu1  ;;  %v6715_v54 = vld [vmem:[%s6896_s2] ss:$0 sm:$0xff] }
 0x1a2   : > { %v5085_v8 = vpack.c.bf16 %v1489_v62, %v1489_v62  ;;  %v3467_v9 = vmax.f32 %v3233_v63, 0.0  ;;  %v1490_v10 = vmax.f32 %v1264_v0, 0.0  ;;  %v3236_v11 = vadd.f32 %v6398_v16, %v3235_v7 }
 0x1a3   : > { %v5213_v12 = vpack.c.bf16 %v3469_v3, %v3469_v3  ;;  %v5083_v13 = vpack.c.bf16 %v1487_v4, %v1487_v4  ;;  %v3470_v14 = vmax.f32 %v3244_v5, 0.0  ;;  %v1488_v15 = vmax.f32 %v1256_v6, 0.0 }
 0x1a4   : > { %2130 = vst.msk [vmem:[%s6084_s4 + $0x178] sm:$0xf] %vm2035_vm3, %v5085_v8  ;;  %v5211_v55 = vpack.c.bf16 %v3467_v9, %v3467_v9  ;;  %v5086_v17 = vpack.c.bf16 %v1490_v10, %v1490_v10  ;;  %v3468_v18 = vmax.f32 %v3236_v11, 0.0 }
 0x1a5   : > { %4953 = vst.msk [vmem:[%s6084_s4 + $0x378] sm:$0xf] %vm2035_vm3, %v5213_v12  ;;  %2128 = vst.msk [vmem:[%s6084_s4 + $0x170] sm:$0xf] %vm2035_vm3, %v5083_v13  ;;  %v5214_v19 = vpack.c.bf16 %v3470_v14, %v3470_v14  ;;  %v5084_v20 = vpack.c.bf16 %v1488_v15, %v1488_v15  ;;  %v5481_v21 = vpop.f32.mrb[96].mxu0 }
 0x1a6   : > { %4951 = vst.msk [vmem:[%s6084_s4 + $0x370] sm:$0xf] %vm2035_vm3, %v5211_v55  ;;  %2131 = vst.msk [vmem:[%s6084_s4 + $0x17c] sm:$0xf] %vm2035_vm3, %v5086_v17  ;;  %v5212_v22 = vpack.c.bf16 %v3468_v18, %v3468_v18  ;;  %v1277_v23 = vadd.f32 %v6398_v16, %v5481_v21  ;;  %v5613_v24 = vpop.f32.mrb[96].mxu1  ;;  %v1268_v25 = vpop.f32.mrb[97].mxu0 }
 0x1a7   : > { %4954 = vst.msk [vmem:[%s6084_s4 + $0x37c] sm:$0xf] %vm2035_vm3, %v5214_v19  ;;  %2129 = vst.msk [vmem:[%s6084_s4 + $0x174] sm:$0xf] %vm2035_vm3, %v5084_v20  ;;  %v3257_v26 = vadd.f32 %v6398_v16, %v5613_v24  ;;  %v1269_v27 = vadd.f32 %v6398_v16, %v1268_v25  ;;  %v3248_v28 = vpop.f32.mrb[97].mxu1  ;;  %v5482_v29 = vpop.f32.mrb[98].mxu0 }
 0x1a8   : > { %4952 = vst.msk [vmem:[%s6084_s4 + $0x374] sm:$0xf] %vm2035_vm3, %v5212_v22  ;;  %v1493_v30 = vmax.f32 %v1277_v23, 0.0  ;;  %v3249_v31 = vadd.f32 %v6398_v16, %v3248_v28  ;;  %v1280_v32 = vadd.f32 %v6398_v16, %v5482_v29  ;;  %v5614_v33 = vpop.f32.mrb[98].mxu1  ;;  %v1271_v34 = vpop.f32.mrb[99].mxu0 }
 0x1a9   : > { %v3473_v35 = vmax.f32 %v3257_v26, 0.0  ;;  %v1491_v36 = vmax.f32 %v1269_v27, 0.0  ;;  %v3260_v37 = vadd.f32 %v6398_v16, %v5614_v33  ;;  %v1272_v38 = vadd.f32 %v6398_v16, %v1271_v34  ;;  %v3251_v39 = vpop.f32.mrb[99].mxu1 }
 0x1aa   : > { %v5089_v40 = vpack.c.bf16 %v1493_v30, %v1493_v30  ;;  %v3471_v41 = vmax.f32 %v3249_v31, 0.0  ;;  %v1494_v42 = vmax.f32 %v1280_v32, 0.0  ;;  %v3252_v43 = vadd.f32 %v6398_v16, %v3251_v39 }
 0x1ab   : > { %v5217_v44 = vpack.c.bf16 %v3473_v35, %v3473_v35  ;;  %v5087_v45 = vpack.c.bf16 %v1491_v36, %v1491_v36  ;;  %v3474_v46 = vmax.f32 %v3260_v37, 0.0  ;;  %v1492_v47 = vmax.f32 %v1272_v38, 0.0 }
 0x1ac   : > { %2134 = vst.msk [vmem:[%s6084_s4 + $0x188] sm:$0xf] %vm2035_vm3, %v5089_v40  ;;  %v5215_v48 = vpack.c.bf16 %v3471_v41, %v3471_v41  ;;  %v5090_v49 = vpack.c.bf16 %v1494_v42, %v1494_v42  ;;  %v3472_v50 = vmax.f32 %v3252_v43, 0.0 }
 0x1ad   : > { %4957 = vst.msk [vmem:[%s6084_s4 + $0x388] sm:$0xf] %vm2035_vm3, %v5217_v44  ;;  %2132 = vst.msk [vmem:[%s6084_s4 + $0x180] sm:$0xf] %vm2035_vm3, %v5087_v45  ;;  %v5218_v51 = vpack.c.bf16 %v3474_v46, %v3474_v46  ;;  %v5088_v52 = vpack.c.bf16 %v1492_v47, %v1492_v47  ;;  %v5485_v53 = vpop.f32.mrb[100].mxu0 }
 0x1ae   : > { %4955 = vst.msk [vmem:[%s6084_s4 + $0x380] sm:$0xf] %vm2035_vm3, %v5215_v48  ;;  %2135 = vst.msk [vmem:[%s6084_s4 + $0x18c] sm:$0xf] %vm2035_vm3, %v5090_v49  ;;  %v5216_v16 = vpack.c.bf16 %v3472_v50, %v3472_v50  ;;  %v1293_v56 = vadd.f32 %v6715_v54, %v5485_v53  ;;  %v5617_v57 = vpop.f32.mrb[100].mxu1  ;;  %v1284_v58 = vpop.f32.mrb[101].mxu0 }
 0x1af   : > { %4958 = vst.msk [vmem:[%s6084_s4 + $0x38c] sm:$0xf] %vm2035_vm3, %v5218_v51  ;;  %2133 = vst.msk [vmem:[%s6084_s4 + $0x184] sm:$0xf] %vm2035_vm3, %v5088_v52  ;;  %v3273_v59 = vadd.f32 %v6715_v54, %v5617_v57  ;;  %v1285_v60 = vadd.f32 %v6715_v54, %v1284_v58  ;;  %v3264_v61 = vpop.f32.mrb[101].mxu1  ;;  %v5486_v62 = vpop.f32.mrb[102].mxu0 }
 0x1b0   : > { %4956 = vst.msk [vmem:[%s6084_s4 + $0x384] sm:$0xf] %vm2035_vm3, %v5216_v16  ;;  %v1497_v63 = vmax.f32 %v1293_v56, 0.0  ;;  %v3265_v0 = vadd.f32 %v6715_v54, %v3264_v61  ;;  %v1296_v1 = vadd.f32 %v6715_v54, %v5486_v62  ;;  %v5618_v2 = vpop.f32.mrb[102].mxu1  ;;  %v1287_v3 = vpop.f32.mrb[103].mxu0 }
 0x1b1   : > { %v3477_v4 = vmax.f32 %v3273_v59, 0.0  ;;  %v1495_v5 = vmax.f32 %v1285_v60, 0.0  ;;  %v3276_v6 = vadd.f32 %v6715_v54, %v5618_v2  ;;  %v1288_v7 = vadd.f32 %v6715_v54, %v1287_v3  ;;  %v3267_v8 = vpop.f32.mrb[103].mxu1 }
 0x1b2   : > { %v5093_v9 = vpack.c.bf16 %v1497_v63, %v1497_v63  ;;  %v3475_v10 = vmax.f32 %v3265_v0, 0.0  ;;  %v1498_v11 = vmax.f32 %v1296_v1, 0.0  ;;  %v3268_v12 = vadd.f32 %v6715_v54, %v3267_v8 }
 0x1b3   : > { %v5221_v13 = vpack.c.bf16 %v3477_v4, %v3477_v4  ;;  %v5091_v14 = vpack.c.bf16 %v1495_v5, %v1495_v5  ;;  %v3478_v15 = vmax.f32 %v3276_v6, 0.0  ;;  %v1496_v55 = vmax.f32 %v1288_v7, 0.0 }
 0x1b4   : > { %2138 = vst.msk [vmem:[%s6084_s4 + $0x198] sm:$0xf] %vm2035_vm3, %v5093_v9  ;;  %v5219_v17 = vpack.c.bf16 %v3475_v10, %v3475_v10  ;;  %v5094_v18 = vpack.c.bf16 %v1498_v11, %v1498_v11  ;;  %v3476_v19 = vmax.f32 %v3268_v12, 0.0 }
 0x1b5   : > { %4961 = vst.msk [vmem:[%s6084_s4 + $0x398] sm:$0xf] %vm2035_vm3, %v5221_v13  ;;  %2136 = vst.msk [vmem:[%s6084_s4 + $0x190] sm:$0xf] %vm2035_vm3, %v5091_v14  ;;  %v5222_v20 = vpack.c.bf16 %v3478_v15, %v3478_v15  ;;  %v5092_v21 = vpack.c.bf16 %v1496_v55, %v1496_v55  ;;  %v5489_v22 = vpop.f32.mrb[104].mxu0 }
 0x1b6   : > { %4959 = vst.msk [vmem:[%s6084_s4 + $0x390] sm:$0xf] %vm2035_vm3, %v5219_v17  ;;  %2139 = vst.msk [vmem:[%s6084_s4 + $0x19c] sm:$0xf] %vm2035_vm3, %v5094_v18  ;;  %v5220_v23 = vpack.c.bf16 %v3476_v19, %v3476_v19  ;;  %v1309_v24 = vadd.f32 %v6715_v54, %v5489_v22  ;;  %v5621_v25 = vpop.f32.mrb[104].mxu1  ;;  %v1300_v26 = vpop.f32.mrb[105].mxu0 }
 0x1b7   : > { %4962 = vst.msk [vmem:[%s6084_s4 + $0x39c] sm:$0xf] %vm2035_vm3, %v5222_v20  ;;  %2137 = vst.msk [vmem:[%s6084_s4 + $0x194] sm:$0xf] %vm2035_vm3, %v5092_v21  ;;  %v3289_v27 = vadd.f32 %v6715_v54, %v5621_v25  ;;  %v1301_v28 = vadd.f32 %v6715_v54, %v1300_v26  ;;  %v3280_v29 = vpop.f32.mrb[105].mxu1  ;;  %v5490_v30 = vpop.f32.mrb[106].mxu0 }
 0x1b8   : > { %4960 = vst.msk [vmem:[%s6084_s4 + $0x394] sm:$0xf] %vm2035_vm3, %v5220_v23  ;;  %v1501_v31 = vmax.f32 %v1309_v24, 0.0  ;;  %v3281_v32 = vadd.f32 %v6715_v54, %v3280_v29  ;;  %v1312_v33 = vadd.f32 %v6715_v54, %v5490_v30  ;;  %v5622_v34 = vpop.f32.mrb[106].mxu1  ;;  %v1303_v35 = vpop.f32.mrb[107].mxu0 }
 0x1b9   : > { %v3481_v36 = vmax.f32 %v3289_v27, 0.0  ;;  %v1499_v37 = vmax.f32 %v1301_v28, 0.0  ;;  %v3292_v38 = vadd.f32 %v6715_v54, %v5622_v34  ;;  %v1304_v39 = vadd.f32 %v6715_v54, %v1303_v35  ;;  %v3283_v40 = vpop.f32.mrb[107].mxu1 }
 0x1ba   : > { %v5097_v41 = vpack.c.bf16 %v1501_v31, %v1501_v31  ;;  %v3479_v42 = vmax.f32 %v3281_v32, 0.0  ;;  %v1502_v43 = vmax.f32 %v1312_v33, 0.0  ;;  %v3284_v44 = vadd.f32 %v6715_v54, %v3283_v40 }
 0x1bb   : > { %v5225_v45 = vpack.c.bf16 %v3481_v36, %v3481_v36  ;;  %v5095_v46 = vpack.c.bf16 %v1499_v37, %v1499_v37  ;;  %v3482_v47 = vmax.f32 %v3292_v38, 0.0  ;;  %v1500_v48 = vmax.f32 %v1304_v39, 0.0 }
 0x1bc   : > { %2142 = vst.msk [vmem:[%s6084_s4 + $0x1a8] sm:$0xf] %vm2035_vm3, %v5097_v41  ;;  %v5223_v49 = vpack.c.bf16 %v3479_v42, %v3479_v42  ;;  %v5098_v50 = vpack.c.bf16 %v1502_v43, %v1502_v43  ;;  %v3480_v51 = vmax.f32 %v3284_v44, 0.0 }
 0x1bd   : > { %4965 = vst.msk [vmem:[%s6084_s4 + $0x3a8] sm:$0xf] %vm2035_vm3, %v5225_v45  ;;  %2140 = vst.msk [vmem:[%s6084_s4 + $0x1a0] sm:$0xf] %vm2035_vm3, %v5095_v46  ;;  %v5226_v52 = vpack.c.bf16 %v3482_v47, %v3482_v47  ;;  %v5096_v53 = vpack.c.bf16 %v1500_v48, %v1500_v48  ;;  %v5493_v16 = vpop.f32.mrb[108].mxu0 }
 0x1be   : > { %4963 = vst.msk [vmem:[%s6084_s4 + $0x3a0] sm:$0xf] %vm2035_vm3, %v5223_v49  ;;  %2143 = vst.msk [vmem:[%s6084_s4 + $0x1ac] sm:$0xf] %vm2035_vm3, %v5098_v50  ;;  %v5224_v56 = vpack.c.bf16 %v3480_v51, %v3480_v51  ;;  %v1325_v57 = vadd.f32 %v6715_v54, %v5493_v16  ;;  %v5625_v58 = vpop.f32.mrb[108].mxu1  ;;  %v1316_v59 = vpop.f32.mrb[109].mxu0 }
 0x1bf   : > { %4966 = vst.msk [vmem:[%s6084_s4 + $0x3ac] sm:$0xf] %vm2035_vm3, %v5226_v52  ;;  %2141 = vst.msk [vmem:[%s6084_s4 + $0x1a4] sm:$0xf] %vm2035_vm3, %v5096_v53  ;;  %v3305_v60 = vadd.f32 %v6715_v54, %v5625_v58  ;;  %v1317_v61 = vadd.f32 %v6715_v54, %v1316_v59  ;;  %v3296_v62 = vpop.f32.mrb[109].mxu1  ;;  %v5494_v63 = vpop.f32.mrb[110].mxu0 }
 0x1c0   : > { %4964 = vst.msk [vmem:[%s6084_s4 + $0x3a4] sm:$0xf] %vm2035_vm3, %v5224_v56  ;;  %v1505_v0 = vmax.f32 %v1325_v57, 0.0  ;;  %v3297_v1 = vadd.f32 %v6715_v54, %v3296_v62  ;;  %v1328_v2 = vadd.f32 %v6715_v54, %v5494_v63  ;;  %v5626_v3 = vpop.f32.mrb[110].mxu1  ;;  %v1319_v4 = vpop.f32.mrb[111].mxu0 }
 0x1c1   : > { %v3485_v5 = vmax.f32 %v3305_v60, 0.0  ;;  %v1503_v6 = vmax.f32 %v1317_v61, 0.0  ;;  %v3308_v7 = vadd.f32 %v6715_v54, %v5626_v3  ;;  %v1320_v8 = vadd.f32 %v6715_v54, %v1319_v4  ;;  %v3299_v9 = vpop.f32.mrb[111].mxu1 }
 0x1c2   : > { %v5101_v10 = vpack.c.bf16 %v1505_v0, %v1505_v0  ;;  %v3483_v11 = vmax.f32 %v3297_v1, 0.0  ;;  %v1506_v12 = vmax.f32 %v1328_v2, 0.0  ;;  %v3300_v13 = vadd.f32 %v6715_v54, %v3299_v9 }
 0x1c3   : > { %v5229_v14 = vpack.c.bf16 %v3485_v5, %v3485_v5  ;;  %v5099_v15 = vpack.c.bf16 %v1503_v6, %v1503_v6  ;;  %v3486_v55 = vmax.f32 %v3308_v7, 0.0  ;;  %v1504_v17 = vmax.f32 %v1320_v8, 0.0 }
 0x1c4   : > { %2146 = vst.msk [vmem:[%s6084_s4 + $0x1b8] sm:$0xf] %vm2035_vm3, %v5101_v10  ;;  %v5227_v18 = vpack.c.bf16 %v3483_v11, %v3483_v11  ;;  %v5102_v19 = vpack.c.bf16 %v1506_v12, %v1506_v12  ;;  %v3484_v20 = vmax.f32 %v3300_v13, 0.0 }
 0x1c5   : > { %4969 = vst.msk [vmem:[%s6084_s4 + $0x3b8] sm:$0xf] %vm2035_vm3, %v5229_v14  ;;  %2144 = vst.msk [vmem:[%s6084_s4 + $0x1b0] sm:$0xf] %vm2035_vm3, %v5099_v15  ;;  %v5230_v21 = vpack.c.bf16 %v3486_v55, %v3486_v55  ;;  %v5100_v22 = vpack.c.bf16 %v1504_v17, %v1504_v17  ;;  %v5497_v23 = vpop.f32.mrb[112].mxu0 }
 0x1c6   : > { %4967 = vst.msk [vmem:[%s6084_s4 + $0x3b0] sm:$0xf] %vm2035_vm3, %v5227_v18  ;;  %2147 = vst.msk [vmem:[%s6084_s4 + $0x1bc] sm:$0xf] %vm2035_vm3, %v5102_v19  ;;  %v5228_v24 = vpack.c.bf16 %v3484_v20, %v3484_v20  ;;  %v1341_v25 = vadd.f32 %v6715_v54, %v5497_v23  ;;  %v5629_v26 = vpop.f32.mrb[112].mxu1  ;;  %v1332_v27 = vpop.f32.mrb[113].mxu0 }
 0x1c7   : > { %4970 = vst.msk [vmem:[%s6084_s4 + $0x3bc] sm:$0xf] %vm2035_vm3, %v5230_v21  ;;  %2145 = vst.msk [vmem:[%s6084_s4 + $0x1b4] sm:$0xf] %vm2035_vm3, %v5100_v22  ;;  %v3321_v28 = vadd.f32 %v6715_v54, %v5629_v26  ;;  %v1333_v29 = vadd.f32 %v6715_v54, %v1332_v27  ;;  %v3312_v30 = vpop.f32.mrb[113].mxu1  ;;  %v5498_v31 = vpop.f32.mrb[114].mxu0 }
 0x1c8   : > { %4968 = vst.msk [vmem:[%s6084_s4 + $0x3b4] sm:$0xf] %vm2035_vm3, %v5228_v24  ;;  %v1509_v32 = vmax.f32 %v1341_v25, 0.0  ;;  %v3313_v33 = vadd.f32 %v6715_v54, %v3312_v30  ;;  %v1344_v34 = vadd.f32 %v6715_v54, %v5498_v31  ;;  %v5630_v35 = vpop.f32.mrb[114].mxu1  ;;  %v1335_v36 = vpop.f32.mrb[115].mxu0 }
 0x1c9   : > { %v3489_v37 = vmax.f32 %v3321_v28, 0.0  ;;  %v1507_v38 = vmax.f32 %v1333_v29, 0.0  ;;  %v3324_v39 = vadd.f32 %v6715_v54, %v5630_v35  ;;  %v1336_v40 = vadd.f32 %v6715_v54, %v1335_v36  ;;  %v3315_v41 = vpop.f32.mrb[115].mxu1 }
 0x1ca   : > { %v5105_v42 = vpack.c.bf16 %v1509_v32, %v1509_v32  ;;  %v3487_v43 = vmax.f32 %v3313_v33, 0.0  ;;  %v1510_v44 = vmax.f32 %v1344_v34, 0.0  ;;  %v3316_v45 = vadd.f32 %v6715_v54, %v3315_v41 }
 0x1cb   : > { %v5233_v46 = vpack.c.bf16 %v3489_v37, %v3489_v37  ;;  %v5103_v47 = vpack.c.bf16 %v1507_v38, %v1507_v38  ;;  %v3490_v48 = vmax.f32 %v3324_v39, 0.0  ;;  %v1508_v49 = vmax.f32 %v1336_v40, 0.0 }
 0x1cc   : > { %2150 = vst.msk [vmem:[%s6084_s4 + $0x1c8] sm:$0xf] %vm2035_vm3, %v5105_v42  ;;  %v5231_v50 = vpack.c.bf16 %v3487_v43, %v3487_v43  ;;  %v5106_v51 = vpack.c.bf16 %v1510_v44, %v1510_v44  ;;  %v3488_v52 = vmax.f32 %v3316_v45, 0.0 }
 0x1cd   : > { %4973 = vst.msk [vmem:[%s6084_s4 + $0x3c8] sm:$0xf] %vm2035_vm3, %v5233_v46  ;;  %2148 = vst.msk [vmem:[%s6084_s4 + $0x1c0] sm:$0xf] %vm2035_vm3, %v5103_v47  ;;  %v5234_v53 = vpack.c.bf16 %v3490_v48, %v3490_v48  ;;  %v5104_v16 = vpack.c.bf16 %v1508_v49, %v1508_v49  ;;  %v5501_v56 = vpop.f32.mrb[116].mxu0 }
 0x1ce   : > { %4971 = vst.msk [vmem:[%s6084_s4 + $0x3c0] sm:$0xf] %vm2035_vm3, %v5231_v50  ;;  %2151 = vst.msk [vmem:[%s6084_s4 + $0x1cc] sm:$0xf] %vm2035_vm3, %v5106_v51  ;;  %v5232_v57 = vpack.c.bf16 %v3488_v52, %v3488_v52  ;;  %v1357_v58 = vadd.f32 %v6715_v54, %v5501_v56  ;;  %v5633_v59 = vpop.f32.mrb[116].mxu1  ;;  %v1348_v60 = vpop.f32.mrb[117].mxu0 }
 0x1cf   : > { %4974 = vst.msk [vmem:[%s6084_s4 + $0x3cc] sm:$0xf] %vm2035_vm3, %v5234_v53  ;;  %2149 = vst.msk [vmem:[%s6084_s4 + $0x1c4] sm:$0xf] %vm2035_vm3, %v5104_v16  ;;  %v3337_v61 = vadd.f32 %v6715_v54, %v5633_v59  ;;  %v1349_v62 = vadd.f32 %v6715_v54, %v1348_v60  ;;  %v3328_v63 = vpop.f32.mrb[117].mxu1  ;;  %v5502_v0 = vpop.f32.mrb[118].mxu0 }
 0x1d0   : > { %4972 = vst.msk [vmem:[%s6084_s4 + $0x3c4] sm:$0xf] %vm2035_vm3, %v5232_v57  ;;  %v1513_v1 = vmax.f32 %v1357_v58, 0.0  ;;  %v3329_v2 = vadd.f32 %v6715_v54, %v3328_v63  ;;  %v1360_v3 = vadd.f32 %v6715_v54, %v5502_v0  ;;  %v5634_v4 = vpop.f32.mrb[118].mxu1  ;;  %v1351_v5 = vpop.f32.mrb[119].mxu0 }
 0x1d1   : > { %v3493_v6 = vmax.f32 %v3337_v61, 0.0  ;;  %v1511_v7 = vmax.f32 %v1349_v62, 0.0  ;;  %v3340_v8 = vadd.f32 %v6715_v54, %v5634_v4  ;;  %v1352_v9 = vadd.f32 %v6715_v54, %v1351_v5  ;;  %v3331_v10 = vpop.f32.mrb[119].mxu1 }
 0x1d2   : > { %v5109_v11 = vpack.c.bf16 %v1513_v1, %v1513_v1  ;;  %v3491_v12 = vmax.f32 %v3329_v2, 0.0  ;;  %v1514_v13 = vmax.f32 %v1360_v3, 0.0  ;;  %v3332_v14 = vadd.f32 %v6715_v54, %v3331_v10 }
 0x1d3   : > { %v5237_v15 = vpack.c.bf16 %v3493_v6, %v3493_v6  ;;  %v5107_v55 = vpack.c.bf16 %v1511_v7, %v1511_v7  ;;  %v3494_v17 = vmax.f32 %v3340_v8, 0.0  ;;  %v1512_v18 = vmax.f32 %v1352_v9, 0.0 }
 0x1d4   : > { %2154 = vst.msk [vmem:[%s6084_s4 + $0x1d8] sm:$0xf] %vm2035_vm3, %v5109_v11  ;;  %v5235_v19 = vpack.c.bf16 %v3491_v12, %v3491_v12  ;;  %v5110_v20 = vpack.c.bf16 %v1514_v13, %v1514_v13  ;;  %v3492_v21 = vmax.f32 %v3332_v14, 0.0 }
 0x1d5   : > { %4977 = vst.msk [vmem:[%s6084_s4 + $0x3d8] sm:$0xf] %vm2035_vm3, %v5237_v15  ;;  %2152 = vst.msk [vmem:[%s6084_s4 + $0x1d0] sm:$0xf] %vm2035_vm3, %v5107_v55  ;;  %v5238_v22 = vpack.c.bf16 %v3494_v17, %v3494_v17  ;;  %v5108_v23 = vpack.c.bf16 %v1512_v18, %v1512_v18  ;;  %v5505_v24 = vpop.f32.mrb[120].mxu0 }
 0x1d6   : > { %4975 = vst.msk [vmem:[%s6084_s4 + $0x3d0] sm:$0xf] %vm2035_vm3, %v5235_v19  ;;  %2155 = vst.msk [vmem:[%s6084_s4 + $0x1dc] sm:$0xf] %vm2035_vm3, %v5110_v20  ;;  %v5236_v25 = vpack.c.bf16 %v3492_v21, %v3492_v21  ;;  %v1373_v26 = vadd.f32 %v6715_v54, %v5505_v24  ;;  %v5637_v27 = vpop.f32.mrb[120].mxu1  ;;  %v1364_v28 = vpop.f32.mrb[121].mxu0 }
 0x1d7   : > { %4978 = vst.msk [vmem:[%s6084_s4 + $0x3dc] sm:$0xf] %vm2035_vm3, %v5238_v22  ;;  %2153 = vst.msk [vmem:[%s6084_s4 + $0x1d4] sm:$0xf] %vm2035_vm3, %v5108_v23  ;;  %v3353_v29 = vadd.f32 %v6715_v54, %v5637_v27  ;;  %v1365_v30 = vadd.f32 %v6715_v54, %v1364_v28  ;;  %v3344_v31 = vpop.f32.mrb[121].mxu1  ;;  %v5506_v32 = vpop.f32.mrb[122].mxu0 }
 0x1d8   : > { %4976 = vst.msk [vmem:[%s6084_s4 + $0x3d4] sm:$0xf] %vm2035_vm3, %v5236_v25  ;;  %v1517_v33 = vmax.f32 %v1373_v26, 0.0  ;;  %v3345_v34 = vadd.f32 %v6715_v54, %v3344_v31  ;;  %v1376_v35 = vadd.f32 %v6715_v54, %v5506_v32  ;;  %v5638_v36 = vpop.f32.mrb[122].mxu1  ;;  %v1367_v37 = vpop.f32.mrb[123].mxu0 }
 0x1d9   : > { %v3497_v38 = vmax.f32 %v3353_v29, 0.0  ;;  %v1515_v39 = vmax.f32 %v1365_v30, 0.0  ;;  %v3356_v40 = vadd.f32 %v6715_v54, %v5638_v36  ;;  %v1368_v41 = vadd.f32 %v6715_v54, %v1367_v37  ;;  %v3347_v42 = vpop.f32.mrb[123].mxu1 }
 0x1da   : > { %v5113_v43 = vpack.c.bf16 %v1517_v33, %v1517_v33  ;;  %v3495_v44 = vmax.f32 %v3345_v34, 0.0  ;;  %v1518_v45 = vmax.f32 %v1376_v35, 0.0  ;;  %v3348_v46 = vadd.f32 %v6715_v54, %v3347_v42 }
 0x1db   : > { %v5241_v47 = vpack.c.bf16 %v3497_v38, %v3497_v38  ;;  %v5111_v48 = vpack.c.bf16 %v1515_v39, %v1515_v39  ;;  %v3498_v49 = vmax.f32 %v3356_v40, 0.0  ;;  %v1516_v50 = vmax.f32 %v1368_v41, 0.0 }
 0x1dc   : > { %2158 = vst.msk [vmem:[%s6084_s4 + $0x1e8] sm:$0xf] %vm2035_vm3, %v5113_v43  ;;  %v5239_v51 = vpack.c.bf16 %v3495_v44, %v3495_v44  ;;  %v5114_v52 = vpack.c.bf16 %v1518_v45, %v1518_v45  ;;  %v3496_v53 = vmax.f32 %v3348_v46, 0.0 }
 0x1dd   : > { %4981 = vst.msk [vmem:[%s6084_s4 + $0x3e8] sm:$0xf] %vm2035_vm3, %v5241_v47  ;;  %2156 = vst.msk [vmem:[%s6084_s4 + $0x1e0] sm:$0xf] %vm2035_vm3, %v5111_v48  ;;  %v5242_v16 = vpack.c.bf16 %v3498_v49, %v3498_v49  ;;  %v5112_v56 = vpack.c.bf16 %v1516_v50, %v1516_v50  ;;  %v5509_v57 = vpop.f32.mrb[124].mxu0 }
 0x1de   : > { %4979 = vst.msk [vmem:[%s6084_s4 + $0x3e0] sm:$0xf] %vm2035_vm3, %v5239_v51  ;;  %2159 = vst.msk [vmem:[%s6084_s4 + $0x1ec] sm:$0xf] %vm2035_vm3, %v5114_v52  ;;  %v5240_v58 = vpack.c.bf16 %v3496_v53, %v3496_v53  ;;  %v1389_v59 = vadd.f32 %v6715_v54, %v5509_v57  ;;  %v5641_v60 = vpop.f32.mrb[124].mxu1  ;;  %v1380_v61 = vpop.f32.mrb[125].mxu0 }
 0x1df   : > { %4982 = vst.msk [vmem:[%s6084_s4 + $0x3ec] sm:$0xf] %vm2035_vm3, %v5242_v16  ;;  %2157 = vst.msk [vmem:[%s6084_s4 + $0x1e4] sm:$0xf] %vm2035_vm3, %v5112_v56  ;;  %v3369_v62 = vadd.f32 %v6715_v54, %v5641_v60  ;;  %v1381_v63 = vadd.f32 %v6715_v54, %v1380_v61  ;;  %v3360_v0 = vpop.f32.mrb[125].mxu1  ;;  %v5510_v1 = vpop.f32.mrb[126].mxu0 }
 0x1e0   : > { %4980 = vst.msk [vmem:[%s6084_s4 + $0x3e4] sm:$0xf] %vm2035_vm3, %v5240_v58  ;;  %v1521_v2 = vmax.f32 %v1389_v59, 0.0  ;;  %v3361_v3 = vadd.f32 %v6715_v54, %v3360_v0  ;;  %v1392_v4 = vadd.f32 %v6715_v54, %v5510_v1  ;;  %v5642_v5 = vpop.f32.mrb[126].mxu1  ;;  %v1383_v6 = vpop.f32.mrb[127].mxu0 }
 0x1e1   : > { %v3501_v7 = vmax.f32 %v3369_v62, 0.0  ;;  %v1519_v8 = vmax.f32 %v1381_v63, 0.0  ;;  %v3372_v9 = vadd.f32 %v6715_v54, %v5642_v5  ;;  %v1384_v10 = vadd.f32 %v6715_v54, %v1383_v6  ;;  %v3363_v11 = vpop.f32.mrb[127].mxu1 }
 0x1e2   : > { %v5117_v12 = vpack.c.bf16 %v1521_v2, %v1521_v2  ;;  %v3499_v13 = vmax.f32 %v3361_v3, 0.0  ;;  %v1522_v14 = vmax.f32 %v1392_v4, 0.0  ;;  %v3364_v15 = vadd.f32 %v6715_v54, %v3363_v11 }
 0x1e3   : > { %v5245_v55 = vpack.c.bf16 %v3501_v7, %v3501_v7  ;;  %v5115_v17 = vpack.c.bf16 %v1519_v8, %v1519_v8  ;;  %v3502_v18 = vmax.f32 %v3372_v9, 0.0  ;;  %v1520_v19 = vmax.f32 %v1384_v10, 0.0 }
 0x1e4   : > { %2162 = vst.msk [vmem:[%s6084_s4 + $0x1f8] sm:$0xf] %vm2035_vm3, %v5117_v12  ;;  %v5243_v20 = vpack.c.bf16 %v3499_v13, %v3499_v13  ;;  %v5118_v21 = vpack.c.bf16 %v1522_v14, %v1522_v14  ;;  %v3500_v22 = vmax.f32 %v3364_v15, 0.0 }
 0x1e5   : > { %4985 = vst.msk [vmem:[%s6084_s4 + $0x3f8] sm:$0xf] %vm2035_vm3, %v5245_v55  ;;  %2160 = vst.msk [vmem:[%s6084_s4 + $0x1f0] sm:$0xf] %vm2035_vm3, %v5115_v17  ;;  %v5246_v23 = vpack.c.bf16 %v3502_v18, %v3502_v18  ;;  %v5116_v24 = vpack.c.bf16 %v1520_v19, %v1520_v19 }
 0x1e6   : > { %4983 = vst.msk [vmem:[%s6084_s4 + $0x3f0] sm:$0xf] %vm2035_vm3, %v5243_v20  ;;  %2163 = vst.msk [vmem:[%s6084_s4 + $0x1fc] sm:$0xf] %vm2035_vm3, %v5118_v21  ;;  %v5244_v54 = vpack.c.bf16 %v3500_v22, %v3500_v22 }
 0x1e7   : > { %4986 = vst.msk [vmem:[%s6084_s4 + $0x3fc] sm:$0xf] %vm2035_vm3, %v5246_v23  ;;  %2161 = vst.msk [vmem:[%s6084_s4 + $0x1f4] sm:$0xf] %vm2035_vm3, %v5116_v24 }
 0x1e8   : > { %4984 = vst.msk [vmem:[%s6084_s4 + $0x3f4] sm:$0xf] %vm2035_vm3, %v5244_v54 }
 0x1e9 PF: > { %s13_s12 = sadd.s32 1, %s5792_s12  }
 0x1ea   : > { %p10_p4 = scmp.ge.s32.totalorder %s13_s12, 4  }
 0x1ec   :  { %12 = sbr.rel (!%p10_p4) target bundleno = 1 (0x1), region = 64 }

// kernel: face_identity_loss_pallas.5
= control target key start
LH: loop header
LB: loop body
LE: loop exit
PB: predicated region body
PF: predicated region fallthrough
CT: control target
= control target key end

     0   :  { %s4283_s12 = smov 0   ;;  %s5358_s0 = inlined_call_operand.vmem [shape: bf16[4,288,192], index: 0, kind: input, shape index: {}]   ;;  %s5359_s1 = inlined_call_operand.vmem [shape: bf16[3,192,128], index: 1, kind: input, shape index: {}]   ;;  %s5360_s2 = inlined_call_operand.vmem [shape: f32[1,128], index: 2, kind: input, shape index: {}]   ;;  %s5361_s3 = inlined_call_operand.vmem [shape: bf16[4,256,128], index: 3, kind: output, shape index: {}]  }
   0x1 LB: > { %s3235_s13 = sadd.s32 4294967295, %s4260_s12   ;;  %p3239_p0 = scmp.ge.s32.totalorder %s4260_s12, 1  ;;  %s4260_s12 = sphi %s4283_s12, %s13_s12  }
   0x2   : > { %p139_p1 = scmp.lt.s32.totalorder %s4260_s12, 3 }
   0x4   : > { %p140_p2 = pnand %p3239_p0, %p139_p1 }
   0x5   : > { %v4073_v0 = vld [vmem:[%s5359_s1 + $0x60] sm:$0xff] (!%p140_p2)   ;;  %v4262_v1 = vmov (!%p140_p2), 0   ;;  %v4075_v3 = vld [vmem:[%s5359_s1 + $0x68] sm:$0xff] (!%p140_p2)   ;;  %v4077_v5 = vld [vmem:[%s5359_s1 + $0x70] sm:$0xff] (!%p140_p2)   ;;  %s3240_s26 = sshll.u32 (!%p140_p2), %s3235_s13, 1  ;;  %vm479_vm0 = vcmask (!%p140_p2), 523264  }
   0x6   : > { %143 = sbr.rel (%p140_p2) target bundleno = 655 (0x28f), region = 32  ;;  %528 = vmatprep.subr.bf16.mxu0 (!%p140_p2), %v4262_v1  ;;  %773 = vmatprep.subr.bf16.mxu1 (!%p140_p2), %v4262_v1  ;;  %v4074_v2 = vld [vmem:[%s5359_s1] sm:$0xff] (!%p140_p2)   ;;  %v4076_v4 = vld [vmem:[%s5359_s1 + $0x8] sm:$0xff] (!%p140_p2)   ;;  %v4078_v6 = vld [vmem:[%s5359_s1 + $0x10] sm:$0xff] (!%p140_p2)   ;;  %p166_p3 = scmp.lt.s32.totalorder (!%p140_p2), %s3240_s26, 3 }
   0x7   : > { %529 = vmatpush1.bf16.msra.mxu0 (!%p140_p2), %v4073_v0  ;;  %774 = vmatpush1.bf16.msra.mxu1 (!%p140_p2), %v4074_v2  ;;  %v4079_v7 = vld [vmem:[%s5359_s1 + $0x78] sm:$0xff] (!%p140_p2)   ;;  %v4081_v9 = vld [vmem:[%s5359_s1 + $0x80] sm:$0xff] (!%p140_p2)   ;;  %v4083_v11 = vld [vmem:[%s5359_s1 + $0x88] sm:$0xff] (!%p140_p2)  }
   0x8   : > { %530 = vmatprep.subr.bf16.mxu0 (!%p140_p2), %v4262_v1  ;;  %775 = vmatprep.subr.bf16.mxu1 (!%p140_p2), %v4262_v1  ;;  %v4080_v8 = vld [vmem:[%s5359_s1 + $0x18] sm:$0xff] (!%p140_p2)   ;;  %v4082_v10 = vld [vmem:[%s5359_s1 + $0x20] sm:$0xff] (!%p140_p2)   ;;  %v4084_v12 = vld [vmem:[%s5359_s1 + $0x28] sm:$0xff] (!%p140_p2)  }
   0x9   : > { %v4085_v13 = vld [vmem:[%s5359_s1 + $0x90] sm:$0xff] (!%p140_p2)   ;;  %v4087_v16 = vld [vmem:[%s5359_s1 + $0x98] sm:$0xff] (!%p140_p2)   ;;  %v4089_v19 = vld [vmem:[%s5359_s1 + $0xa0] sm:$0xff] (!%p140_p2)  }
   0xa   : > { %v4086_v14 = vld [vmem:[%s5359_s1 + $0x30] sm:$0xff] (!%p140_p2)   ;;  %v4088_v18 = vld [vmem:[%s5359_s1 + $0x38] sm:$0xff] (!%p140_p2)   ;;  %v4090_v20 = vld [vmem:[%s5359_s1 + $0x40] sm:$0xff] (!%p140_p2)  }
   0xb   : > { %531 = vmatpush1.bf16.msra.mxu0 (!%p140_p2), %v4075_v3  ;;  %776 = vmatpush1.bf16.msra.mxu1 (!%p140_p2), %v4076_v4  ;;  %v4091_v21 = vld [vmem:[%s5359_s1 + $0xa8] sm:$0xff] (!%p140_p2)   ;;  %v4093_v23 = vld [vmem:[%s5359_s1 + $0xb0] sm:$0xff] (!%p140_p2)   ;;  %v4095_v25 = vld [vmem:[%s5359_s1 + $0xb8] sm:$0xff] (!%p140_p2)  }
   0xc   : > { %532 = vmatprep.subr.bf16.mxu0 (!%p140_p2), %v4262_v1  ;;  %777 = vmatprep.subr.bf16.mxu1 (!%p140_p2), %v4262_v1  ;;  %v4092_v22 = vld [vmem:[%s5359_s1 + $0x48] sm:$0xff] (!%p140_p2)   ;;  %v4094_v24 = vld [vmem:[%s5359_s1 + $0x50] sm:$0xff] (!%p140_p2)   ;;  %v4096_v26 = vld [vmem:[%s5359_s1 + $0x58] sm:$0xff] (!%p140_p2)  }
   0xd   : > { %s5363_s26 = smov (!%p166_p3, %s3240_s26), 3  ;;  %v4103_v29 = vld [vmem:[%s5359_s1 + $0xc0] sm:$0xff]   ;;  %v4108_v32 = vld [vmem:[%s5359_s1 + $0xc8] sm:$0xff]   ;;  %v4115_v36 = vld [vmem:[%s5359_s1 + $0xd0] sm:$0xff]  }
   0xe   : > { %s4063_s10 = smul.u32 288, %s5363_s26  ;;  %v4104_v30 = vld [vmem:[%s5359_s1 + $0x60] sm:$0xff]   ;;  %v4109_v33 = vld [vmem:[%s5359_s1 + $0x68] sm:$0xff]   ;;  %v4117_v37 = vld [vmem:[%s5359_s1 + $0x70] sm:$0xff]   ;;  %s3807_s19 = sshll.u32 %s5363_s26, 7 }
   0xf   : > { %533 = vmatpush1.bf16.msra.mxu0 %v4077_v5  ;;  %778 = vmatpush1.bf16.msra.mxu1 %v4078_v6  ;;  %v4121_v38 = vld [vmem:[%s5359_s1 + $0xd8] sm:$0xff]   ;;  %v4126_v42 = vld [vmem:[%s5359_s1 + $0xe0] sm:$0xff]   ;;  %v4133_v44 = vld [vmem:[%s5359_s1 + $0xe8] sm:$0xff]   ;;  %s5120_s22 = scalar_lea.vmem %s5361_s3, %s3807_s19 }
  0x10   : > { %534 = vmatprep.subr.bf16.mxu0 %v4262_v1  ;;  %779 = vmatprep.subr.bf16.mxu1 %v4262_v1  ;;  %s4348_s18 = scalar_lea.vmem %s5358_s0, %s4063_s10  ;;  %v4122_v39 = vld [vmem:[%s5359_s1 + $0x78] sm:$0xff]   ;;  %v4127_v43 = vld [vmem:[%s5359_s1 + $0x80] sm:$0xff]   ;;  %v4135_v45 = vld [vmem:[%s5359_s1 + $0x88] sm:$0xff]  }
  0x11   : > { %v4099_v15 = vld [vmem:[%s4348_s18 + $0x14] ss:$8 sps:$4 sm:$0xff]   ;;  %v4102_v17 = vld [vmem:[%s4348_s18 + $0x4] ss:$8 sps:$4 sm:$0xff]   ;;  %v4097_v27 = vld [vmem:[%s4348_s18 + $0x10] ss:$8 sps:$4 sm:$0xff]  }
  0x12   : > { %3313 = vmatprep.mubr.msk.bf16.mxu0 %vm479_vm0, %v4099_v15  ;;  %3343 = vmatprep.mubr.msk.bf16.mxu1 %vm479_vm0, %v4102_v17  ;;  %v4100_v28 = vld [vmem:[%s4348_s18] ss:$8 sps:$4 sm:$0xff]   ;;  %v4409_v31 = vld [vmem:[%s4348_s18 + $0x24] ss:$8 sps:$4 sm:$0xff]   ;;  %v4427_v35 = vld [vmem:[%s4348_s18 + $0x34] ss:$8 sps:$4 sm:$0xff]  }
  0x13   : > { %535 = vmatpush1.bf16.msra.mxu0 %v4079_v7  ;;  %780 = vmatpush1.bf16.msra.mxu1 %v4080_v8  ;;  %v4423_v34 = vld [vmem:[%s4348_s18 + $0x20] ss:$8 sps:$4 sm:$0xff]   ;;  %v4450_v40 = vld [vmem:[%s4348_s18 + $0x30] ss:$8 sps:$4 sm:$0xff]   ;;  %v4454_v41 = vld [vmem:[%s4348_s18 + $0x44] ss:$8 sps:$4 sm:$0xff]  }
  0x14   : > { %536 = vmatprep.subr.bf16.mxu0 %v4262_v1  ;;  %781 = vmatprep.subr.bf16.mxu1 %v4262_v1  ;;  %v4478_v46 = vld [vmem:[%s4348_s18 + $0x40] ss:$8 sps:$4 sm:$0xff]   ;;  %v4482_v47 = vld [vmem:[%s4348_s18 + $0x54] ss:$8 sps:$4 sm:$0xff]   ;;  %v4506_v52 = vld [vmem:[%s4348_s18 + $0x50] ss:$8 sps:$4 sm:$0xff]  }
  0x15   : > { %v4139_v48 = vld [vmem:[%s5359_s1 + $0xf0] sm:$0xff]   ;;  %v4144_v50 = vld [vmem:[%s5359_s1 + $0xf8] sm:$0xff]   ;;  %v4510_v53 = vld [vmem:[%s4348_s18 + $0x64] ss:$8 sps:$4 sm:$0xff]  }
  0x16   : > { %v4140_v49 = vld [vmem:[%s5359_s1 + $0x90] sm:$0xff]   ;;  %v4145_v51 = vld [vmem:[%s5359_s1 + $0x98] sm:$0xff]   ;;  %v4151_v54 = vld [vmem:[%s5359_s1 + $0x100] sm:$0xff]  }
  0x17   : > { %537 = vmatpush1.bf16.msra.mxu0 %v4081_v9  ;;  %782 = vmatpush1.bf16.msra.mxu1 %v4082_v10  ;;  %v4153_v55 = vld [vmem:[%s5359_s1 + $0xa0] sm:$0xff]   ;;  %v4157_v57 = vld [vmem:[%s5359_s1 + $0x108] sm:$0xff]   ;;  %v4537_v59 = vld [vmem:[%s4348_s18 + $0x74] ss:$8 sps:$4 sm:$0xff]  }
  0x18   : > { %538 = vmatprep.subr.bf16.mxu0 %v4262_v1  ;;  %783 = vmatprep.subr.bf16.mxu1 %v4262_v1  ;;  %v4527_v56 = vld [vmem:[%s4348_s18 + $0x60] ss:$8 sps:$4 sm:$0xff]   ;;  %v4162_v60 = vld [vmem:[%s5359_s1 + $0x110] sm:$0xff]   ;;  %v4169_v62 = vld [vmem:[%s5359_s1 + $0x118] sm:$0xff]  }
  0x19   : > { %v4158_v58 = vld [vmem:[%s5359_s1 + $0xa8] sm:$0xff]   ;;  %v4163_v61 = vld [vmem:[%s5359_s1 + $0xb0] sm:$0xff]   ;;  %v4171_v63 = vld [vmem:[%s5359_s1 + $0xb8] sm:$0xff]  }
  0x1a   : > { %v4561_v0 = vld [vmem:[%s4348_s18 + $0x70] ss:$8 sps:$4 sm:$0xff]   ;;  %v4564_v2 = vld [vmem:[%s4348_s18 + $0x84] ss:$8 sps:$4 sm:$0xff]   ;;  %v4577_v3 = vld [vmem:[%s4348_s18 + $0x80] ss:$8 sps:$4 sm:$0xff]  }
  0x1b   : > { %539 = vmatpush1.bf16.msra.mxu0 %v4083_v11  ;;  %784 = vmatpush1.bf16.msra.mxu1 %v4084_v12  ;;  %v4580_v4 = vld [vmem:[%s4348_s18 + $0x94] ss:$8 sps:$4 sm:$0xff]   ;;  %v4589_v5 = vld [vmem:[%s4348_s18 + $0x90] ss:$8 sps:$4 sm:$0xff]   ;;  %v4592_v6 = vld [vmem:[%s4348_s18 + $0xa4] ss:$8 sps:$4 sm:$0xff]  }
  0x1c   : > { %540 = vmatprep.subr.bf16.mxu0 %v4262_v1  ;;  %785 = vmatprep.subr.bf16.mxu1 %v4262_v1  ;;  %v4601_v7 = vld [vmem:[%s4348_s18 + $0xa0] ss:$8 sps:$4 sm:$0xff]   ;;  %v4604_v8 = vld [vmem:[%s4348_s18 + $0xb4] ss:$8 sps:$4 sm:$0xff]   ;;  %v4613_v9 = vld [vmem:[%s4348_s18 + $0xb0] ss:$8 sps:$4 sm:$0xff]  }
  0x1d   : > { %v4616_v10 = vld [vmem:[%s4348_s18 + $0xc4] ss:$8 sps:$4 sm:$0xff]   ;;  %v4625_v11 = vld [vmem:[%s4348_s18 + $0xc0] ss:$8 sps:$4 sm:$0xff]   ;;  %v4628_v12 = vld [vmem:[%s4348_s18 + $0xd4] ss:$8 sps:$4 sm:$0xff]  }
  0x1e   : > { %v4661_v17 = vld [vmem:[%s4348_s18 + $0xf0] ss:$8 sps:$4 sm:$0xff]  }
  0x1f   : > { %541 = vmatpush1.bf16.msra.mxu0 %v4085_v13  ;;  %786 = vmatpush1.bf16.msra.mxu1 %v4086_v14  ;;  %v4637_v13 = vld [vmem:[%s4348_s18 + $0xd0] ss:$8 sps:$4 sm:$0xff]   ;;  %v4640_v14 = vld [vmem:[%s4348_s18 + $0xe4] ss:$8 sps:$4 sm:$0xff]  }
  0x20   : > { %542 = vmatprep.subr.bf16.mxu0 %v4262_v1  ;;  %787 = vmatprep.subr.bf16.mxu1 %v4262_v1 }
  0x23   : > { %543 = vmatpush1.bf16.msra.mxu0 %v4087_v16  ;;  %788 = vmatpush1.bf16.msra.mxu1 %v4088_v18  ;;  %v4652_v16 = vld [vmem:[%s4348_s18 + $0xf4] ss:$8 sps:$4 sm:$0xff]   ;;  %v4664_v18 = vld [vmem:[%s4348_s18 + $0x104] ss:$8 sps:$4 sm:$0xff]  }
  0x24   : > { %544 = vmatprep.subr.bf16.mxu0 %v4262_v1  ;;  %789 = vmatprep.subr.bf16.mxu1 %v4262_v1 }
  0x27   : > { %545 = vmatpush1.bf16.msra.mxu0 %v4089_v19  ;;  %790 = vmatpush1.bf16.msra.mxu1 %v4090_v20  ;;  %v4673_v19 = vld [vmem:[%s4348_s18 + $0x100] ss:$8 sps:$4 sm:$0xff]   ;;  %v4676_v20 = vld [vmem:[%s4348_s18 + $0x134] ss:$8 sps:$4 sm:$0xff]  }
  0x28   : > { %546 = vmatprep.subr.bf16.mxu0 %v4262_v1  ;;  %791 = vmatprep.subr.bf16.mxu1 %v4262_v1 }
  0x2b   : > { %547 = vmatpush1.bf16.msra.mxu0 %v4091_v21  ;;  %792 = vmatpush1.bf16.msra.mxu1 %v4092_v22  ;;  %v4685_v21 = vld [vmem:[%s4348_s18 + $0x130] ss:$8 sps:$4 sm:$0xff]   ;;  %v4175_v22 = vld [vmem:[%s5359_s1] sm:$0xff]  }
  0x2c   : > { %548 = vmatprep.subr.bf16.mxu0 %v4262_v1  ;;  %793 = vmatprep.subr.bf16.mxu1 %v4262_v1 }
  0x2f   : > { %549 = vmatpush1.bf16.msra.mxu0 %v4093_v23  ;;  %794 = vmatpush1.bf16.msra.mxu1 %v4094_v24  ;;  %v4176_v23 = vld [vmem:[%s5359_s1 + $0xc0] sm:$0xff]  }
  0x30   : > { %550 = vmatprep.subr.bf16.mxu0 %v4262_v1  ;;  %795 = vmatprep.subr.bf16.mxu1 %v4262_v1  ;;  %v4694_v24 = vld [vmem:[%s4348_s18 + $0x144] ss:$8 sps:$4 sm:$0xff]  }
  0x33   : > { %551 = vmatpush1.bf16.msra.mxu0 %v4095_v25  ;;  %796 = vmatpush1.bf16.msra.mxu1 %v4096_v26  ;;  %v4180_v25 = vld [vmem:[%s5359_s1 + $0x8] sm:$0xff]  }
  0x34   : > { %1255 = vmatprep.subr.bf16.mxu0 %v4262_v1  ;;  %2026 = vmatprep.subr.bf16.mxu1 %v4262_v1  ;;  %v4181_v26 = vld [vmem:[%s5359_s1 + $0xc8] sm:$0xff]  }
  0x36   : > { %561 = vmatmul.mubr.bf16.vlgmr.msra.gmra.mrb[0].mxu0 %v4097_v27  ;;  %806 = vmatmul.mubr.bf16.vlgmr.msra.gmra.mrb[0].mxu1 %v4100_v28  ;;  %v4714_v28 = vld [vmem:[%s4348_s18 + $0x154] ss:$8 sps:$4 sm:$0xff]  }
  0x37   : > { %1256 = vmatpush1.bf16.msra.mxu0 %v4103_v29  ;;  %2027 = vmatpush1.bf16.msra.mxu1 %v4104_v30  ;;  %v4187_v29 = vld [vmem:[%s5359_s1 + $0x10] sm:$0xff]  }
  0x38   : > { %3314 = vmatprep.mubr.msk.bf16.mxu0 %vm479_vm0, %v4409_v31  ;;  %3344 = vmatprep.mubr.msk.bf16.mxu1 %vm479_vm0, %v4099_v15  ;;  %v4649_v15 = vld [vmem:[%s4348_s18 + $0xe0] ss:$8 sps:$4 sm:$0xff]   ;;  %v4189_v30 = vld [vmem:[%s5359_s1 + $0xd0] sm:$0xff]  }
  0x39   : > { %1257 = vmatprep.subr.bf16.mxu0 %v4262_v1  ;;  %2028 = vmatprep.subr.bf16.mxu1 %v4262_v1 }
  0x3b   : > { %1258 = vmatpush1.bf16.msra.mxu0 %v4108_v32  ;;  %2029 = vmatpush1.bf16.msra.mxu1 %v4109_v33  ;;  %v4194_v32 = vld [vmem:[%s5359_s1 + $0xd8] sm:$0xff]  }
  0x3c   : > { %1259 = vmatprep.subr.bf16.mxu0 %v4262_v1  ;;  %2030 = vmatprep.subr.bf16.mxu1 %v4262_v1  ;;  %v4739_v33 = vld [vmem:[%s4348_s18 + $0x150] ss:$8 sps:$4 sm:$0xff]  }
  0x3e   : > { %569 = vmatmul.mubr.bf16.gmra.mrb[4].mxu0 %v4423_v34  ;;  %814 = vmatmul.mubr.bf16.gmra.mrb[4].mxu1 %v4097_v27  ;;  %v4711_v27 = vld [vmem:[%s4348_s18 + $0x140] ss:$8 sps:$4 sm:$0xff]  }
  0x3f   : > { %3315 = vmatprep.mubr.msk.bf16.mxu0 %vm479_vm0, %v4427_v35  ;;  %3345 = vmatprep.mubr.msk.bf16.mxu1 %vm479_vm0, %v4409_v31 }
  0x40   : > { %1260 = vmatpush1.bf16.msra.mxu0 %v4115_v36  ;;  %2031 = vmatpush1.bf16.msra.mxu1 %v4117_v37  ;;  %v4199_v36 = vld [vmem:[%s5359_s1 + $0xe0] sm:$0xff]   ;;  %v4205_v37 = vld [vmem:[%s5359_s1 + $0x28] sm:$0xff]  }
  0x41   : > { %1261 = vmatprep.subr.bf16.mxu0 %v4262_v1  ;;  %2032 = vmatprep.subr.bf16.mxu1 %v4262_v1 }
  0x44   : > { %1262 = vmatpush1.bf16.msra.mxu0 %v4121_v38  ;;  %2033 = vmatpush1.bf16.msra.mxu1 %v4122_v39  ;;  %v4207_v38 = vld [vmem:[%s5359_s1 + $0xe8] sm:$0xff]  }
  0x45   : > { %1263 = vmatprep.subr.bf16.mxu0 %v4262_v1  ;;  %2034 = vmatprep.subr.bf16.mxu1 %v4262_v1  ;;  %v4767_v39 = vld [vmem:[%s4348_s18 + $0x160] ss:$8 sps:$4 sm:$0xff]  }
  0x46   : > { %577 = vmatmul.mubr.bf16.gmra.mrb[8].mxu0 %v4450_v40  ;;  %822 = vmatmul.mubr.bf16.gmra.mrb[8].mxu1 %v4423_v34 }
  0x47   : > { %3316 = vmatprep.mubr.msk.bf16.mxu0 %vm479_vm0, %v4454_v41  ;;  %3346 = vmatprep.mubr.msk.bf16.mxu1 %vm479_vm0, %v4427_v35 }
  0x48   : > { %1264 = vmatpush1.bf16.msra.mxu0 %v4126_v42  ;;  %2035 = vmatpush1.bf16.msra.mxu1 %v4127_v43  ;;  %v4212_v42 = vld [vmem:[%s5359_s1 + $0xf0] sm:$0xff]   ;;  %v4216_v43 = vld [vmem:[%s5359_s1 + $0x38] sm:$0xff]  }
  0x49   : > { %1265 = vmatprep.subr.bf16.mxu0 %v4262_v1  ;;  %2036 = vmatprep.subr.bf16.mxu1 %v4262_v1 }
  0x4c   : > { %1266 = vmatpush1.bf16.msra.mxu0 %v4133_v44  ;;  %2037 = vmatpush1.bf16.msra.mxu1 %v4135_v45  ;;  %v4217_v44 = vld [vmem:[%s5359_s1 + $0xf8] sm:$0xff]  }
  0x4d   : > { %1267 = vmatprep.subr.bf16.mxu0 %v4262_v1  ;;  %2038 = vmatprep.subr.bf16.mxu1 %v4262_v1  ;;  %v4795_v45 = vld [vmem:[%s4348_s18 + $0x170] ss:$8 sps:$4 sm:$0xff]  }
  0x4e   : > { %585 = vmatmul.mubr.bf16.gmra.mrb[12].mxu0 %v4478_v46  ;;  %830 = vmatmul.mubr.bf16.gmra.mrb[12].mxu1 %v4450_v40 }
  0x4f   : > { %3317 = vmatprep.mubr.msk.bf16.mxu0 %vm479_vm0, %v4482_v47  ;;  %3347 = vmatprep.mubr.msk.bf16.mxu1 %vm479_vm0, %v4454_v41 }
  0x50   : > { %1268 = vmatpush1.bf16.msra.mxu0 %v4139_v48  ;;  %2039 = vmatpush1.bf16.msra.mxu1 %v4140_v49  ;;  %v4225_v48 = vld [vmem:[%s5359_s1 + $0x100] sm:$0xff]   ;;  %v4229_v49 = vld [vmem:[%s5359_s1 + $0x48] sm:$0xff]  }
  0x51   : > { %1269 = vmatprep.subr.bf16.mxu0 %v4262_v1  ;;  %2040 = vmatprep.subr.bf16.mxu1 %v4262_v1 }
  0x54   : > { %1270 = vmatpush1.bf16.msra.mxu0 %v4144_v50  ;;  %2041 = vmatpush1.bf16.msra.mxu1 %v4145_v51  ;;  %v4230_v50 = vld [vmem:[%s5359_s1 + $0x108] sm:$0xff]  }
  0x55   : > { %1271 = vmatprep.subr.bf16.mxu0 %v4262_v1  ;;  %2042 = vmatprep.subr.bf16.mxu1 %v4262_v1  ;;  %v4823_v51 = vld [vmem:[%s4348_s18 + $0x180] ss:$8 sps:$4 sm:$0xff]  }
  0x56   : > { %593 = vmatmul.mubr.bf16.gmra.mrb[16].mxu0 %v4506_v52  ;;  %838 = vmatmul.mubr.bf16.gmra.mrb[16].mxu1 %v4478_v46 }
  0x57   : > { %3318 = vmatprep.mubr.msk.bf16.mxu0 %vm479_vm0, %v4510_v53  ;;  %3348 = vmatprep.mubr.msk.bf16.mxu1 %vm479_vm0, %v4482_v47 }
  0x58   : > { %1272 = vmatpush1.bf16.msra.mxu0 %v4151_v54  ;;  %2043 = vmatpush1.bf16.msra.mxu1 %v4153_v55  ;;  %v4235_v54 = vld [vmem:[%s5359_s1 + $0x110] sm:$0xff]   ;;  %v4243_v55 = vld [vmem:[%s5359_s1 + $0x58] sm:$0xff]  }
  0x59   : > { %1273 = vmatprep.subr.bf16.mxu0 %v4262_v1  ;;  %2044 = vmatprep.subr.bf16.mxu1 %v4262_v1 }
  0x5c   : > { %1274 = vmatpush1.bf16.msra.mxu0 %v4157_v57  ;;  %2045 = vmatpush1.bf16.msra.mxu1 %v4158_v58  ;;  %v4851_v57 = vld [vmem:[%s4348_s18 + $0x190] ss:$8 sps:$4 sm:$0xff]   ;;  %v4854_v58 = vld [vmem:[%s4348_s18 + $0x1a4] ss:$8 sps:$4 sm:$0xff]  }
  0x5d   : > { %1275 = vmatprep.subr.bf16.mxu0 %v4262_v1  ;;  %2046 = vmatprep.subr.bf16.mxu1 %v4262_v1 }
  0x5e   : > { %601 = vmatmul.mubr.bf16.gmra.mrb[20].mxu0 %v4527_v56  ;;  %846 = vmatmul.mubr.bf16.gmra.mrb[20].mxu1 %v4506_v52 }
  0x5f   : > { %3319 = vmatprep.mubr.msk.bf16.mxu0 %vm479_vm0, %v4537_v59  ;;  %3349 = vmatprep.mubr.msk.bf16.mxu1 %vm479_vm0, %v4510_v53 }
  0x60   : > { %1276 = vmatpush1.bf16.msra.mxu0 %v4162_v60  ;;  %2047 = vmatpush1.bf16.msra.mxu1 %v4163_v61  ;;  %v4875_v60 = vld [vmem:[%s4348_s18 + $0x1b0] ss:$8 sps:$4 sm:$0xff]   ;;  %v4878_v61 = vld [vmem:[%s4348_s18 + $0x1c4] ss:$8 sps:$4 sm:$0xff]  }
  0x61   : > { %1277 = vmatprep.subr.bf16.mxu0 %v4262_v1  ;;  %2048 = vmatprep.subr.bf16.mxu1 %v4262_v1 }
  0x64   : > { %1278 = vmatpush1.bf16.msra.mxu0 %v4169_v62  ;;  %2049 = vmatpush1.bf16.msra.mxu1 %v4171_v63  ;;  %v4887_v62 = vld [vmem:[%s4348_s18 + $0x1c0] ss:$8 sps:$4 sm:$0xff]   ;;  %v4890_v63 = vld [vmem:[%s4348_s18 + $0x1d4] ss:$8 sps:$4 sm:$0xff]  }
  0x65   : > { %2271 = vmatprep.subr.bf16.mxu0 %v4262_v1  ;;  %2752 = vmatprep.subr.bf16.mxu1 %v4262_v1 }
  0x66   : > { %609 = vmatmul.mubr.bf16.gmra.mrb[24].mxu0 %v4561_v0  ;;  %854 = vmatmul.mubr.bf16.gmra.mrb[24].mxu1 %v4527_v56 }
  0x67   : > { %3320 = vmatprep.mubr.msk.bf16.mxu0 %vm479_vm0, %v4564_v2  ;;  %3350 = vmatprep.mubr.msk.bf16.mxu1 %vm479_vm0, %v4537_v59 }
  0x6e   : > { %617 = vmatmul.mubr.bf16.gmra.mrb[28].mxu0 %v4577_v3  ;;  %862 = vmatmul.mubr.bf16.gmra.mrb[28].mxu1 %v4561_v0 }
  0x6f   : > { %3321 = vmatprep.mubr.msk.bf16.mxu0 %vm479_vm0, %v4580_v4  ;;  %3351 = vmatprep.mubr.msk.bf16.mxu1 %vm479_vm0, %v4564_v2 }
  0x76   : > { %625 = vmatmul.mubr.bf16.gmra.mrb[32].mxu0 %v4589_v5  ;;  %870 = vmatmul.mubr.bf16.gmra.mrb[32].mxu1 %v4577_v3 }
  0x77   : > { %3322 = vmatprep.mubr.msk.bf16.mxu0 %vm479_vm0, %v4592_v6  ;;  %3352 = vmatprep.mubr.msk.bf16.mxu1 %vm479_vm0, %v4580_v4 }
  0x7e   : > { %633 = vmatmul.mubr.bf16.gmra.mrb[36].mxu0 %v4601_v7  ;;  %878 = vmatmul.mubr.bf16.gmra.mrb[36].mxu1 %v4589_v5 }
  0x7f   : > { %3323 = vmatprep.mubr.msk.bf16.mxu0 %vm479_vm0, %v4604_v8  ;;  %3353 = vmatprep.mubr.msk.bf16.mxu1 %vm479_vm0, %v4592_v6 }
  0x86   : > { %641 = vmatmul.mubr.bf16.gmra.mrb[40].mxu0 %v4613_v9  ;;  %886 = vmatmul.mubr.bf16.gmra.mrb[40].mxu1 %v4601_v7 }
  0x87   : > { %3324 = vmatprep.mubr.msk.bf16.mxu0 %vm479_vm0, %v4616_v10  ;;  %3354 = vmatprep.mubr.msk.bf16.mxu1 %vm479_vm0, %v4604_v8 }
  0x8e   : > { %649 = vmatmul.mubr.bf16.gmra.mrb[44].mxu0 %v4625_v11  ;;  %894 = vmatmul.mubr.bf16.gmra.mrb[44].mxu1 %v4613_v9 }
  0x8f   : > { %3325 = vmatprep.mubr.msk.bf16.mxu0 %vm479_vm0, %v4628_v12  ;;  %3355 = vmatprep.mubr.msk.bf16.mxu1 %vm479_vm0, %v4616_v10 }
  0x96   : > { %657 = vmatmul.mubr.bf16.gmra.mrb[48].mxu0 %v4637_v13  ;;  %902 = vmatmul.mubr.bf16.gmra.mrb[48].mxu1 %v4625_v11 }
  0x97   : > { %3326 = vmatprep.mubr.msk.bf16.mxu0 %vm479_vm0, %v4640_v14  ;;  %3356 = vmatprep.mubr.msk.bf16.mxu1 %vm479_vm0, %v4628_v12 }
  0x9e   : > { %665 = vmatmul.mubr.bf16.gmra.mrb[52].mxu0 %v4649_v15  ;;  %910 = vmatmul.mubr.bf16.gmra.mrb[52].mxu1 %v4637_v13 }
  0x9f   : > { %3327 = vmatprep.mubr.msk.bf16.mxu0 %vm479_vm0, %v4652_v16  ;;  %3357 = vmatprep.mubr.msk.bf16.mxu1 %vm479_vm0, %v4640_v14 }
  0xa6   : > { %673 = vmatmul.mubr.bf16.gmra.mrb[56].mxu0 %v4661_v17  ;;  %918 = vmatmul.mubr.bf16.gmra.mrb[56].mxu1 %v4649_v15 }
  0xa7   : > { %3328 = vmatprep.mubr.msk.bf16.mxu0 %vm479_vm0, %v4664_v18  ;;  %3358 = vmatprep.mubr.msk.bf16.mxu1 %vm479_vm0, %v4652_v16 }
  0xae   : > { %681 = vmatmul.mubr.bf16.gmra.mrb[60].mxu0 %v4673_v19  ;;  %926 = vmatmul.mubr.bf16.gmra.mrb[60].mxu1 %v4661_v17 }
  0xaf   : > { %3427 = vmatprep.mubr.msk.bf16.mxu0 %vm479_vm0, %v4409_v31  ;;  %3578 = vmatprep.mubr.msk.bf16.mxu1 %vm479_vm0, %v4676_v20  ;;  %v4193_v31 = vld [vmem:[%s5359_s1 + $0x18] sm:$0xff]  }
  0xb6   : > { %1288 = vmatmul.mubr.bf16.vlgmr.msra.gmra.mrb[64].mxu0 %v4423_v34  ;;  %2059 = vmatmul.mubr.bf16.vlgmr.msra.gmra.mrb[64].mxu1 %v4685_v21  ;;  %v4742_v34 = vld [vmem:[%s4348_s18 + $0x164] ss:$8 sps:$4 sm:$0xff]  }
  0xb7   : > { %2272 = vmatpush1.bf16.msra.mxu0 %v4175_v22  ;;  %2753 = vmatpush1.bf16.msra.mxu1 %v4176_v23  ;;  %v4916_v22 = vld [vmem:[%s4348_s18 + $0x1f4] ss:$8 sps:$4 sm:$0xff]  }
  0xb8   : > { %3428 = vmatprep.mubr.msk.bf16.mxu0 %vm479_vm0, %v4427_v35  ;;  %3579 = vmatprep.mubr.msk.bf16.mxu1 %vm479_vm0, %v4694_v24  ;;  %v4198_v35 = vld [vmem:[%s5359_s1 + $0x20] sm:$0xff]  }
  0xb9   : > { %2273 = vmatprep.subr.bf16.mxu0 %v4262_v1  ;;  %2754 = vmatprep.subr.bf16.mxu1 %v4262_v1 }
  0xbb   : > { %2274 = vmatpush1.bf16.msra.mxu0 %v4180_v25  ;;  %2755 = vmatpush1.bf16.msra.mxu1 %v4181_v26 }
  0xbc   : > { %2275 = vmatprep.subr.bf16.mxu0 %v4262_v1  ;;  %2756 = vmatprep.subr.bf16.mxu1 %v4262_v1 }
  0xbe   : > { %1296 = vmatmul.mubr.bf16.gmra.mrb[68].mxu0 %v4450_v40  ;;  %2067 = vmatmul.mubr.bf16.gmra.mrb[68].mxu1 %v4711_v27  ;;  %v4770_v40 = vld [vmem:[%s4348_s18 + $0x174] ss:$8 sps:$4 sm:$0xff]  }
  0xbf   : > { %3429 = vmatprep.mubr.msk.bf16.mxu0 %vm479_vm0, %v4454_v41  ;;  %3580 = vmatprep.mubr.msk.bf16.mxu1 %vm479_vm0, %v4714_v28  ;;  %v4211_v41 = vld [vmem:[%s5359_s1 + $0x30] sm:$0xff]  }
  0xc0   : > { %2276 = vmatpush1.bf16.msra.mxu0 %v4187_v29  ;;  %2757 = vmatpush1.bf16.msra.mxu1 %v4189_v30 }
  0xc1   : > { %2277 = vmatprep.subr.bf16.mxu0 %v4262_v1  ;;  %2758 = vmatprep.subr.bf16.mxu1 %v4262_v1 }
  0xc4   : > { %2278 = vmatpush1.bf16.msra.mxu0 %v4193_v31  ;;  %2759 = vmatpush1.bf16.msra.mxu1 %v4194_v32 }
  0xc5   : > { %2279 = vmatprep.subr.bf16.mxu0 %v4262_v1  ;;  %2760 = vmatprep.subr.bf16.mxu1 %v4262_v1 }
  0xc6   : > { %1304 = vmatmul.mubr.bf16.gmra.mrb[72].mxu0 %v4478_v46  ;;  %2075 = vmatmul.mubr.bf16.gmra.mrb[72].mxu1 %v4739_v33  ;;  %v4798_v46 = vld [vmem:[%s4348_s18 + $0x184] ss:$8 sps:$4 sm:$0xff]  }
  0xc7   : > { %3430 = vmatprep.mubr.msk.bf16.mxu0 %vm479_vm0, %v4482_v47  ;;  %3581 = vmatprep.mubr.msk.bf16.mxu1 %vm479_vm0, %v4742_v34  ;;  %v4223_v47 = vld [vmem:[%s5359_s1 + $0x40] sm:$0xff]  }
  0xc8   : > { %2280 = vmatpush1.bf16.msra.mxu0 %v4198_v35  ;;  %2761 = vmatpush1.bf16.msra.mxu1 %v4199_v36  ;;  %v4929_v35 = vld [vmem:[%s4348_s18 + $0x1f0] ss:$8 sps:$4 sm:$0xff]  }
  0xc9   : > { %2281 = vmatprep.subr.bf16.mxu0 %v4262_v1  ;;  %2762 = vmatprep.subr.bf16.mxu1 %v4262_v1 }
  0xcc   : > { %2282 = vmatpush1.bf16.msra.mxu0 %v4205_v37  ;;  %2763 = vmatpush1.bf16.msra.mxu1 %v4207_v38  ;;  %v4932_v37 = vld [vmem:[%s4348_s18 + $0x204] ss:$8 sps:$4 sm:$0xff]  }
  0xcd   : > { %2283 = vmatprep.subr.bf16.mxu0 %v4262_v1  ;;  %2764 = vmatprep.subr.bf16.mxu1 %v4262_v1 }
  0xce   : > { %1312 = vmatmul.mubr.bf16.gmra.mrb[76].mxu0 %v4506_v52  ;;  %2083 = vmatmul.mubr.bf16.gmra.mrb[76].mxu1 %v4767_v39  ;;  %v4826_v52 = vld [vmem:[%s4348_s18 + $0x194] ss:$8 sps:$4 sm:$0xff]  }
  0xcf   : > { %3431 = vmatprep.mubr.msk.bf16.mxu0 %vm479_vm0, %v4510_v53  ;;  %3582 = vmatprep.mubr.msk.bf16.mxu1 %vm479_vm0, %v4770_v40  ;;  %v4234_v53 = vld [vmem:[%s5359_s1 + $0x50] sm:$0xff]  }
  0xd0   : > { %2284 = vmatpush1.bf16.msra.mxu0 %v4211_v41  ;;  %2765 = vmatpush1.bf16.msra.mxu1 %v4212_v42 }
  0xd1   : > { %2285 = vmatprep.subr.bf16.mxu0 %v4262_v1  ;;  %2766 = vmatprep.subr.bf16.mxu1 %v4262_v1 }
  0xd4   : > { %2286 = vmatpush1.bf16.msra.mxu0 %v4216_v43  ;;  %2767 = vmatpush1.bf16.msra.mxu1 %v4217_v44 }
  0xd5   : > { %2287 = vmatprep.subr.bf16.mxu0 %v4262_v1  ;;  %2768 = vmatprep.subr.bf16.mxu1 %v4262_v1 }
  0xd6   : > { %1320 = vmatmul.mubr.bf16.gmra.mrb[80].mxu0 %v4527_v56  ;;  %2091 = vmatmul.mubr.bf16.gmra.mrb[80].mxu1 %v4795_v45  ;;  %v4246_v56 = vld [vmem:[%s5359_s1 + $0x118] sm:$0xff]  }
  0xd7   : > { %3432 = vmatprep.mubr.msk.bf16.mxu0 %vm479_vm0, %v4537_v59  ;;  %3583 = vmatprep.mubr.msk.bf16.mxu1 %vm479_vm0, %v4798_v46  ;;  %v4866_v59 = vld [vmem:[%s4348_s18 + $0x1b4] ss:$8 sps:$4 sm:$0xff]  }
  0xd8   : > { %2288 = vmatpush1.bf16.msra.mxu0 %v4223_v47  ;;  %2769 = vmatpush1.bf16.msra.mxu1 %v4225_v48 }
  0xd9   : > { %2289 = vmatprep.subr.bf16.mxu0 %v4262_v1  ;;  %2770 = vmatprep.subr.bf16.mxu1 %v4262_v1 }
  0xdc   : > { %2290 = vmatpush1.bf16.msra.mxu0 %v4229_v49  ;;  %2771 = vmatpush1.bf16.msra.mxu1 %v4230_v50  ;;  %v4945_v49 = vld [vmem:[%s4348_s18 + $0x200] ss:$8 sps:$4 sm:$0xff]  }
  0xdd   : > { %2291 = vmatprep.subr.bf16.mxu0 %v4262_v1  ;;  %2772 = vmatprep.subr.bf16.mxu1 %v4262_v1 }
  0xde   : > { %1328 = vmatmul.mubr.bf16.gmra.mrb[84].mxu0 %v4561_v0  ;;  %2099 = vmatmul.mubr.bf16.gmra.mrb[84].mxu1 %v4823_v51  ;;  %v4899_v0 = vld [vmem:[%s4348_s18 + $0x1d0] ss:$8 sps:$4 sm:$0xff]  }
  0xdf   : > { %3433 = vmatprep.mubr.msk.bf16.mxu0 %vm479_vm0, %v4564_v2  ;;  %3584 = vmatprep.mubr.msk.bf16.mxu1 %vm479_vm0, %v4826_v52  ;;  %v4902_v2 = vld [vmem:[%s4348_s18 + $0x1e4] ss:$8 sps:$4 sm:$0xff]  }
  0xe0   : > { %2292 = vmatpush1.bf16.msra.mxu0 %v4234_v53  ;;  %2773 = vmatpush1.bf16.msra.mxu1 %v4235_v54  ;;  %v4948_v53 = vld [vmem:[%s4348_s18 + $0x214] ss:$8 sps:$4 sm:$0xff]  }
  0xe1   : > { %2293 = vmatprep.subr.bf16.mxu0 %v4262_v1  ;;  %2774 = vmatprep.subr.bf16.mxu1 %v4262_v1  ;;  %v4863_v1 = vld [vmem:[%s4348_s18 + $0x1a0] ss:$8 sps:$4 sm:$0xff]  }
  0xe4   : > { %2294 = vmatpush1.bf16.msra.mxu0 %v4243_v55  ;;  %2775 = vmatpush1.bf16.msra.mxu1 %v4246_v56 }
  0xe6   : > { %1336 = vmatmul.mubr.bf16.gmra.mrb[88].mxu0 %v4577_v3  ;;  %2107 = vmatmul.mubr.bf16.gmra.mrb[88].mxu1 %v4851_v57 }
  0xe7   : > { %3434 = vmatprep.mubr.msk.bf16.mxu0 %vm479_vm0, %v4580_v4  ;;  %3585 = vmatprep.mubr.msk.bf16.mxu1 %vm479_vm0, %v4854_v58 }
  0xee   : > { %1344 = vmatmul.mubr.bf16.gmra.mrb[92].mxu0 %v4589_v5  ;;  %2115 = vmatmul.mubr.bf16.gmra.mrb[92].mxu1 %v4863_v1 }
  0xef   : > { %3435 = vmatprep.mubr.msk.bf16.mxu0 %vm479_vm0, %v4592_v6  ;;  %3586 = vmatprep.mubr.msk.bf16.mxu1 %vm479_vm0, %v4866_v59 }
  0xf6   : > { %1352 = vmatmul.mubr.bf16.gmra.mrb[96].mxu0 %v4601_v7  ;;  %2123 = vmatmul.mubr.bf16.gmra.mrb[96].mxu1 %v4875_v60 }
  0xf7   : > { %3436 = vmatprep.mubr.msk.bf16.mxu0 %vm479_vm0, %v4604_v8  ;;  %3587 = vmatprep.mubr.msk.bf16.mxu1 %vm479_vm0, %v4878_v61 }
  0xfe   : > { %1360 = vmatmul.mubr.bf16.gmra.mrb[100].mxu0 %v4613_v9  ;;  %2131 = vmatmul.mubr.bf16.gmra.mrb[100].mxu1 %v4887_v62  ;;  %v4913_v9 = vld [vmem:[%s4348_s18 + $0x1e0] ss:$8 sps:$4 sm:$0xff]  }
  0xff   : > { %3437 = vmatprep.mubr.msk.bf16.mxu0 %vm479_vm0, %v4616_v10  ;;  %3588 = vmatprep.mubr.msk.bf16.mxu1 %vm479_vm0, %v4890_v63 }
 0x106   : > { %1368 = vmatmul.mubr.bf16.gmra.mrb[104].mxu0 %v4625_v11  ;;  %2139 = vmatmul.mubr.bf16.gmra.mrb[104].mxu1 %v4899_v0 }
 0x107   : > { %3438 = vmatprep.mubr.msk.bf16.mxu0 %vm479_vm0, %v4628_v12  ;;  %3589 = vmatprep.mubr.msk.bf16.mxu1 %vm479_vm0, %v4902_v2 }
 0x109   : > { %v562_v3 = vpop.f32.mrb[0].mxu0  ;;  %v807_v4 = vpop.f32.mrb[0].mxu1 }
 0x10a   : > { %v564_v5 = vpop.f32.mrb[1].mxu0  ;;  %v4910_v6 = vadd.f32 %v807_v4, %v562_v3  ;;  %v809_v7 = vpop.f32.mrb[1].mxu1 }
 0x10b   : > { %v565_v8 = vpop.f32.mrb[2].mxu0  ;;  %v810_v10 = vpop.f32.mrb[2].mxu1 }
 0x10c   : > { %v567_v11 = vpop.f32.mrb[3].mxu0  ;;  %v4918_v23 = vadd.f32 %v810_v10, %v565_v8  ;;  %v812_v12 = vpop.f32.mrb[3].mxu1  ;;  %v4961_v8 = vld [vmem:[%s4348_s18 + $0x210] ss:$8 sps:$4 sm:$0xff]   ;;  %v4239_v10 = vld [vmem:[%s4348_s18 + $0x114] ss:$8 sps:$4 sm:$0xff]  }
 0x10d   : > { %v4965_v12 = vld [vmem:[%s4348_s18 + $0x224] ss:$8 sps:$4 sm:$0xff]  }
 0x10e   : > { %1376 = vmatmul.mubr.bf16.gmra.mrb[108].mxu0 %v4637_v13  ;;  %2147 = vmatmul.mubr.bf16.gmra.mrb[108].mxu1 %v4913_v9 }
 0x10f   : > { %3439 = vmatprep.mubr.msk.bf16.mxu0 %vm479_vm0, %v4640_v14  ;;  %3590 = vmatprep.mubr.msk.bf16.mxu1 %vm479_vm0, %v4916_v22 }
 0x111   : > { %v570_v25 = vpop.f32.mrb[4].mxu0  ;;  %v815_v26 = vpop.f32.mrb[4].mxu1 }
 0x112   : > { %v572_v29 = vpop.f32.mrb[5].mxu0  ;;  %v4926_v30 = vadd.f32 %v815_v26, %v570_v25  ;;  %v817_v31 = vpop.f32.mrb[5].mxu1 }
 0x113   : > { %v573_v32 = vpop.f32.mrb[6].mxu0  ;;  %v818_v36 = vpop.f32.mrb[6].mxu1 }
 0x114   : > { %v575_v13 = vpop.f32.mrb[7].mxu0  ;;  %v4934_v38 = vadd.f32 %v818_v36, %v573_v32  ;;  %v820_v14 = vpop.f32.mrb[7].mxu1  ;;  %v4244_v32 = vld [vmem:[%s4348_s18 + $0x110] ss:$8 sps:$4 sm:$0xff]  }
 0x116   : > { %1384 = vmatmul.mubr.bf16.gmra.mrb[112].mxu0 %v4649_v15  ;;  %2155 = vmatmul.mubr.bf16.gmra.mrb[112].mxu1 %v4929_v35 }
 0x117   : > { %3440 = vmatprep.mubr.msk.bf16.mxu0 %vm479_vm0, %v4652_v16  ;;  %3591 = vmatprep.mubr.msk.bf16.mxu1 %vm479_vm0, %v4932_v37 }
 0x119   : > { %v578_v41 = vpop.f32.mrb[8].mxu0  ;;  %v823_v42 = vpop.f32.mrb[8].mxu1 }
 0x11a   : > { %v580_v43 = vpop.f32.mrb[9].mxu0  ;;  %v4942_v44 = vadd.f32 %v823_v42, %v578_v41  ;;  %v825_v47 = vpop.f32.mrb[9].mxu1  ;;  %v4978_v41 = vld [vmem:[%s4348_s18 + $0x220] ss:$8 sps:$4 sm:$0xff]   ;;  %v4249_v42 = vld [vmem:[%s4348_s18 + $0x124] ss:$8 sps:$4 sm:$0xff]  }
 0x11b   : > { %v581_v48 = vpop.f32.mrb[10].mxu0  ;;  %v826_v50 = vpop.f32.mrb[10].mxu1 }
 0x11c   : > { %v583_v15 = vpop.f32.mrb[11].mxu0  ;;  %v4950_v54 = vadd.f32 %v826_v50, %v581_v48  ;;  %v828_v16 = vpop.f32.mrb[11].mxu1 }
 0x11e   : > { %1392 = vmatmul.mubr.bf16.gmra.mrb[116].mxu0 %v4661_v17  ;;  %2163 = vmatmul.mubr.bf16.gmra.mrb[116].mxu1 %v4945_v49 }
 0x11f   : > { %3441 = vmatprep.mubr.msk.bf16.mxu0 %vm479_vm0, %v4664_v18  ;;  %3592 = vmatprep.mubr.msk.bf16.mxu1 %vm479_vm0, %v4948_v53 }
 0x121   : > { %v586_v55 = vpop.f32.mrb[12].mxu0  ;;  %v831_v56 = vpop.f32.mrb[12].mxu1 }
 0x122   : > { %v588_v3 = vpop.f32.mrb[13].mxu0  ;;  %v4958_v4 = vadd.f32 %v831_v56, %v586_v55  ;;  %v833_v5 = vpop.f32.mrb[13].mxu1  ;;  %v4247_v55 = vld [vmem:[%s4348_s18 + $0x120] ss:$8 sps:$4 sm:$0xff]  }
 0x123   : > { %v589_v7 = vpop.f32.mrb[14].mxu0  ;;  %v834_v17 = vpop.f32.mrb[14].mxu1 }
 0x124   : > { %v591_v11 = vpop.f32.mrb[15].mxu0  ;;  %v4967_v18 = vadd.f32 %v834_v17, %v589_v7  ;;  %v836_v25 = vpop.f32.mrb[15].mxu1 }
 0x126   : > { %1400 = vmatmul.mubr.bf16.gmra.mrb[120].mxu0 %v4673_v19  ;;  %2171 = vmatmul.mubr.bf16.gmra.mrb[120].mxu1 %v4961_v8 }
 0x127   : > { %3442 = vmatprep.mubr.msk.bf16.mxu0 %vm479_vm0, %v4239_v10  ;;  %3593 = vmatprep.mubr.msk.bf16.mxu1 %vm479_vm0, %v4965_v12 }
 0x129   : > { %v594_v26 = vpop.f32.mrb[16].mxu0  ;;  %v839_v29 = vpop.f32.mrb[16].mxu1 }
 0x12a   : > { %v596_v31 = vpop.f32.mrb[17].mxu0  ;;  %v4975_v36 = vadd.f32 %v839_v29, %v594_v26  ;;  %v841_v13 = vpop.f32.mrb[17].mxu1 }
 0x12b   : > { %v597_v14 = vpop.f32.mrb[18].mxu0  ;;  %v842_v19 = vpop.f32.mrb[18].mxu1 }
 0x12c   : > { %v599_v43 = vpop.f32.mrb[19].mxu0  ;;  %v4981_v47 = vadd.f32 %v842_v19, %v597_v14  ;;  %v844_v48 = vpop.f32.mrb[19].mxu1 }
 0x12e   : > { %1408 = vmatmul.mubr.bf16.gmra.mrb[124].mxu0 %v4244_v32  ;;  %2179 = vmatmul.mubr.bf16.gmra.mrb[124].mxu1 %v4978_v41 }
 0x12f   : > { %3608 = vmatprep.mubr.msk.bf16.mxu0 %vm479_vm0, %v4249_v42  ;;  %3724 = vmatprep.mubr.msk.bf16.mxu1 %vm479_vm0, %v4694_v24 }
 0x131   : > { %v602_v50 = vpop.f32.mrb[20].mxu0  ;;  %v847_v15 = vpop.f32.mrb[20].mxu1 }
 0x132   : > { %v604_v16 = vpop.f32.mrb[21].mxu0  ;;  %v4988_v56 = vadd.f32 %v847_v15, %v602_v50  ;;  %v849_v3 = vpop.f32.mrb[21].mxu1 }
 0x133   : > { %v605_v5 = vpop.f32.mrb[22].mxu0  ;;  %v850_v7 = vpop.f32.mrb[22].mxu1 }
 0x134   : > { %v607_v10 = vpop.f32.mrb[23].mxu0  ;;  %v4990_v17 = vadd.f32 %v850_v7, %v605_v5  ;;  %v852_v11 = vpop.f32.mrb[23].mxu1 }
 0x136   : > { %2304 = vmatmul.mubr.bf16.vlgmr.msra.gmra.mrb[128].mxu0 %v4247_v55  ;;  %2785 = vmatmul.mubr.bf16.vlgmr.msra.gmra.mrb[128].mxu1 %v4711_v27 }
 0x137   : > { %3609 = vmatprep.mubr.msk.bf16.mxu0 %vm479_vm0, %v4676_v20  ;;  %3725 = vmatprep.mubr.msk.bf16.mxu1 %vm479_vm0, %v4714_v28 }
 0x139   : > { %v610_v25 = vpop.f32.mrb[24].mxu0  ;;  %v855_v26 = vpop.f32.mrb[24].mxu1 }
 0x13a   : > { %v612_v29 = vpop.f32.mrb[25].mxu0  ;;  %v4997_v31 = vadd.f32 %v855_v26, %v610_v25  ;;  %v857_v32 = vpop.f32.mrb[25].mxu1 }
 0x13b   : > { %v613_v13 = vpop.f32.mrb[26].mxu0  ;;  %v858_v14 = vpop.f32.mrb[26].mxu1 }
 0x13c   : > { %v615_v42 = vpop.f32.mrb[27].mxu0  ;;  %v4999_v19 = vadd.f32 %v858_v14, %v613_v13  ;;  %v860_v43 = vpop.f32.mrb[27].mxu1 }
 0x13e   : > { %2312 = vmatmul.mubr.bf16.gmra.mrb[132].mxu0 %v4685_v21  ;;  %2793 = vmatmul.mubr.bf16.gmra.mrb[132].mxu1 %v4739_v33 }
 0x13f   : > { %3610 = vmatprep.mubr.msk.bf16.mxu0 %vm479_vm0, %v4694_v24  ;;  %3726 = vmatprep.mubr.msk.bf16.mxu1 %vm479_vm0, %v4742_v34 }
 0x141   : > { %v618_v20 = vpop.f32.mrb[28].mxu0  ;;  %v863_v48 = vpop.f32.mrb[28].mxu1 }
 0x142   : > { %v620_v50 = vpop.f32.mrb[29].mxu0  ;;  %v5007_v15 = vadd.f32 %v863_v48, %v618_v20  ;;  %v865_v16 = vpop.f32.mrb[29].mxu1 }
 0x143   : > { %v621_v55 = vpop.f32.mrb[30].mxu0  ;;  %v866_v3 = vpop.f32.mrb[30].mxu1 }
 0x144   : > { %v623_v5 = vpop.f32.mrb[31].mxu0  ;;  %v5009_v7 = vadd.f32 %v866_v3, %v621_v55  ;;  %v868_v21 = vpop.f32.mrb[31].mxu1 }
 0x146   : > { %2320 = vmatmul.mubr.bf16.gmra.mrb[136].mxu0 %v4711_v27  ;;  %2801 = vmatmul.mubr.bf16.gmra.mrb[136].mxu1 %v4767_v39 }
 0x147   : > { %3611 = vmatprep.mubr.msk.bf16.mxu0 %vm479_vm0, %v4714_v28  ;;  %3727 = vmatprep.mubr.msk.bf16.mxu1 %vm479_vm0, %v4770_v40 }
 0x149   : > { %v626_v24 = vpop.f32.mrb[32].mxu0  ;;  %v871_v10 = vpop.f32.mrb[32].mxu1 }
 0x14a   : > { %v628_v11 = vpop.f32.mrb[33].mxu0  ;;  %v5017_v25 = vadd.f32 %v871_v10, %v626_v24  ;;  %v873_v26 = vpop.f32.mrb[33].mxu1 }
 0x14b   : > { %v629_v29 = vpop.f32.mrb[34].mxu0  ;;  %v874_v32 = vpop.f32.mrb[34].mxu1 }
 0x14c   : > { %v631_v13 = vpop.f32.mrb[35].mxu0  ;;  %v5019_v14 = vadd.f32 %v874_v32, %v629_v29  ;;  %v876_v27 = vpop.f32.mrb[35].mxu1 }
 0x14e   : > { %2328 = vmatmul.mubr.bf16.gmra.mrb[140].mxu0 %v4739_v33  ;;  %2809 = vmatmul.mubr.bf16.gmra.mrb[140].mxu1 %v4795_v45 }
 0x14f   : > { %3612 = vmatprep.mubr.msk.bf16.mxu0 %vm479_vm0, %v4742_v34  ;;  %3728 = vmatprep.mubr.msk.bf16.mxu1 %vm479_vm0, %v4798_v46 }
 0x151   : > { %v634_v28 = vpop.f32.mrb[36].mxu0  ;;  %v879_v42 = vpop.f32.mrb[36].mxu1 }
 0x152   : > { %v636_v43 = vpop.f32.mrb[37].mxu0  ;;  %v5027_v20 = vadd.f32 %v879_v42, %v634_v28  ;;  %v881_v48 = vpop.f32.mrb[37].mxu1 }
 0x153   : > { %v637_v50 = vpop.f32.mrb[38].mxu0  ;;  %v882_v16 = vpop.f32.mrb[38].mxu1 }
 0x154   : > { %v639_v55 = vpop.f32.mrb[39].mxu0  ;;  %v5029_v3 = vadd.f32 %v882_v16, %v637_v50  ;;  %v884_v33 = vpop.f32.mrb[39].mxu1 }
 0x156   : > { %2336 = vmatmul.mubr.bf16.gmra.mrb[144].mxu0 %v4767_v39  ;;  %2817 = vmatmul.mubr.bf16.gmra.mrb[144].mxu1 %v4823_v51 }
 0x157   : > { %3613 = vmatprep.mubr.msk.bf16.mxu0 %vm479_vm0, %v4770_v40  ;;  %3729 = vmatprep.mubr.msk.bf16.mxu1 %vm479_vm0, %v4826_v52 }
 0x159   : > { %v642_v34 = vpop.f32.mrb[40].mxu0  ;;  %v887_v5 = vpop.f32.mrb[40].mxu1 }
 0x15a   : > { %v644_v21 = vpop.f32.mrb[41].mxu0  ;;  %v5037_v24 = vadd.f32 %v887_v5, %v642_v34  ;;  %v889_v10 = vpop.f32.mrb[41].mxu1 }
 0x15b   : > { %v645_v11 = vpop.f32.mrb[42].mxu0  ;;  %v890_v26 = vpop.f32.mrb[42].mxu1 }
 0x15c   : > { %v647_v29 = vpop.f32.mrb[43].mxu0  ;;  %v5039_v32 = vadd.f32 %v890_v26, %v645_v11  ;;  %v892_v39 = vpop.f32.mrb[43].mxu1 }
 0x15e   : > { %2344 = vmatmul.mubr.bf16.gmra.mrb[148].mxu0 %v4795_v45  ;;  %2825 = vmatmul.mubr.bf16.gmra.mrb[148].mxu1 %v4851_v57 }
 0x15f   : > { %3614 = vmatprep.mubr.msk.bf16.mxu0 %vm479_vm0, %v4798_v46  ;;  %3730 = vmatprep.mubr.msk.bf16.mxu1 %vm479_vm0, %v4854_v58 }
 0x161   : > { %v650_v40 = vpop.f32.mrb[44].mxu0  ;;  %v895_v13 = vpop.f32.mrb[44].mxu1 }
 0x162   : > { %v652_v27 = vpop.f32.mrb[45].mxu0  ;;  %v5047_v28 = vadd.f32 %v895_v13, %v650_v40  ;;  %v897_v42 = vpop.f32.mrb[45].mxu1 }
 0x163   : > { %v653_v43 = vpop.f32.mrb[46].mxu0  ;;  %v898_v48 = vpop.f32.mrb[46].mxu1 }
 0x164   : > { %v655_v50 = vpop.f32.mrb[47].mxu0  ;;  %v5049_v16 = vadd.f32 %v898_v48, %v653_v43  ;;  %v900_v45 = vpop.f32.mrb[47].mxu1 }
 0x166   : > { %2352 = vmatmul.mubr.bf16.gmra.mrb[152].mxu0 %v4823_v51  ;;  %2833 = vmatmul.mubr.bf16.gmra.mrb[152].mxu1 %v4863_v1 }
 0x167   : > { %3615 = vmatprep.mubr.msk.bf16.mxu0 %vm479_vm0, %v4826_v52  ;;  %3731 = vmatprep.mubr.msk.bf16.mxu1 %vm479_vm0, %v4866_v59 }
 0x169   : > { %v658_v46 = vpop.f32.mrb[48].mxu0  ;;  %v903_v55 = vpop.f32.mrb[48].mxu1 }
 0x16a   : > { %v660_v33 = vpop.f32.mrb[49].mxu0  ;;  %v5057_v34 = vadd.f32 %v903_v55, %v658_v46  ;;  %v905_v5 = vpop.f32.mrb[49].mxu1 }
 0x16b   : > { %v661_v21 = vpop.f32.mrb[50].mxu0  ;;  %v906_v10 = vpop.f32.mrb[50].mxu1 }
 0x16c   : > { %v663_v11 = vpop.f32.mrb[51].mxu0  ;;  %v5059_v26 = vadd.f32 %v906_v10, %v661_v21  ;;  %v908_v51 = vpop.f32.mrb[51].mxu1 }
 0x16e   : > { %2360 = vmatmul.mubr.bf16.gmra.mrb[156].mxu0 %v4851_v57  ;;  %2841 = vmatmul.mubr.bf16.gmra.mrb[156].mxu1 %v4875_v60 }
 0x16f   : > { %3616 = vmatprep.mubr.msk.bf16.mxu0 %vm479_vm0, %v4854_v58  ;;  %3732 = vmatprep.mubr.msk.bf16.mxu1 %vm479_vm0, %v4878_v61 }
 0x171   : > { %v666_v52 = vpop.f32.mrb[52].mxu0  ;;  %v911_v29 = vpop.f32.mrb[52].mxu1 }
 0x172   : > { %v668_v39 = vpop.f32.mrb[53].mxu0  ;;  %v5067_v40 = vadd.f32 %v911_v29, %v666_v52  ;;  %v913_v13 = vpop.f32.mrb[53].mxu1 }
 0x173   : > { %v669_v27 = vpop.f32.mrb[54].mxu0  ;;  %v914_v42 = vpop.f32.mrb[54].mxu1 }
 0x174   : > { %v671_v43 = vpop.f32.mrb[55].mxu0  ;;  %v5069_v48 = vadd.f32 %v914_v42, %v669_v27  ;;  %v916_v57 = vpop.f32.mrb[55].mxu1 }
 0x175   : > { %v5100_v43 = vld [vmem:[%s5360_s2] ss:$0 sm:$0xff] }
 0x176   : > { %2368 = vmatmul.mubr.bf16.gmra.mrb[160].mxu0 %v4863_v1  ;;  %2849 = vmatmul.mubr.bf16.gmra.mrb[160].mxu1 %v4887_v62 }
 0x177   : > { %3617 = vmatprep.mubr.msk.bf16.mxu0 %vm479_vm0, %v4866_v59  ;;  %3733 = vmatprep.mubr.msk.bf16.mxu1 %vm479_vm0, %v4890_v63 }
 0x179   : > { %v674_v58 = vpop.f32.mrb[56].mxu0  ;;  %v919_v50 = vpop.f32.mrb[56].mxu1 }
 0x17a   : > { %v676_v45 = vpop.f32.mrb[57].mxu0  ;;  %v5077_v46 = vadd.f32 %v919_v50, %v674_v58  ;;  %v921_v55 = vpop.f32.mrb[57].mxu1 }
 0x17b   : > { %v677_v33 = vpop.f32.mrb[58].mxu0  ;;  %v922_v5 = vpop.f32.mrb[58].mxu1 }
 0x17c   : > { %v679_v21 = vpop.f32.mrb[59].mxu0  ;;  %v5079_v10 = vadd.f32 %v922_v5, %v677_v33  ;;  %v924_v1 = vpop.f32.mrb[59].mxu1 }
 0x17e   : > { %2376 = vmatmul.mubr.bf16.gmra.mrb[164].mxu0 %v4875_v60  ;;  %2857 = vmatmul.mubr.bf16.gmra.mrb[164].mxu1 %v4899_v0 }
 0x17f   : > { %3618 = vmatprep.mubr.msk.bf16.mxu0 %vm479_vm0, %v4878_v61  ;;  %3734 = vmatprep.mubr.msk.bf16.mxu1 %vm479_vm0, %v4902_v2 }
 0x181   : > { %v682_v59 = vpop.f32.mrb[60].mxu0  ;;  %v927_v11 = vpop.f32.mrb[60].mxu1 }
 0x182   : > { %v684_v51 = vpop.f32.mrb[61].mxu0  ;;  %v5087_v52 = vadd.f32 %v927_v11, %v682_v59  ;;  %v929_v29 = vpop.f32.mrb[61].mxu1 }
 0x183   : > { %v685_v39 = vpop.f32.mrb[62].mxu0  ;;  %v930_v13 = vpop.f32.mrb[62].mxu1 }
 0x184   : > { %v687_v27 = vpop.f32.mrb[63].mxu0  ;;  %v5089_v42 = vadd.f32 %v930_v13, %v685_v39  ;;  %v932_v60 = vpop.f32.mrb[63].mxu1 }
 0x186   : > { %2384 = vmatmul.mubr.bf16.gmra.mrb[168].mxu0 %v4887_v62  ;;  %2865 = vmatmul.mubr.bf16.gmra.mrb[168].mxu1 %v4913_v9 }
 0x187   : > { %3619 = vmatprep.mubr.msk.bf16.mxu0 %vm479_vm0, %v4890_v63  ;;  %3735 = vmatprep.mubr.msk.bf16.mxu1 %vm479_vm0, %v4916_v22 }
 0x189   : > { %v1289_v61 = vpop.f32.mrb[64].mxu0  ;;  %v5103_v58 = vpop.f32.mrb[64].mxu1 }
 0x18a   : > { %v1416_v57 = vadd.f32 %v1289_v61, %v4910_v6  ;;  %v1291_v62 = vpop.f32.mrb[65].mxu0  ;;  %v2062_v50 = vpop.f32.mrb[65].mxu1 }
 0x18b   : > { %v1292_v45 = vpop.f32.mrb[66].mxu0  ;;  %v5107_v33 = vpop.f32.mrb[66].mxu1 }
 0x18c   : > { %v1455_v55 = vadd.f32 %v5100_v43, %v1416_v57  ;;  %v1417_v63 = vadd.f32 %v1292_v45, %v4918_v23  ;;  %v1294_v5 = vpop.f32.mrb[67].mxu0  ;;  %v2065_v21 = vpop.f32.mrb[67].mxu1 }
 0x18e   : > { %v1456_v1 = vadd.f32 %v5100_v43, %v1417_v63  ;;  %2392 = vmatmul.mubr.bf16.gmra.mrb[172].mxu0 %v4899_v0  ;;  %2873 = vmatmul.mubr.bf16.gmra.mrb[172].mxu1 %v4929_v35  ;;  %v1487_v6 = vmax.f32 %v1455_v55, 0.0 }
 0x18f   : > { %3620 = vmatprep.mubr.msk.bf16.mxu0 %vm479_vm0, %v4902_v2  ;;  %3736 = vmatprep.mubr.msk.bf16.mxu1 %vm479_vm0, %v4932_v37 }
 0x190   : > { %v1488_v59 = vmax.f32 %v1456_v1, 0.0 }
 0x191   : > { %v1297_v23 = vpop.f32.mrb[68].mxu0  ;;  %v5123_v51 = vpop.f32.mrb[68].mxu1 }
 0x192   : > { %v3875_v11 = vpack.c.bf16 %v1488_v59, %v1487_v6  ;;  %v1418_v0 = vadd.f32 %v1297_v23, %v4926_v30  ;;  %v1299_v29 = vpop.f32.mrb[69].mxu0  ;;  %v2070_v39 = vpop.f32.mrb[69].mxu1 }
 0x193   : > { %v1300_v2 = vpop.f32.mrb[70].mxu0  ;;  %v5128_v60 = vpop.f32.mrb[70].mxu1 }
 0x194   : > { %3876 = vst [vmem:[%s5120_s22] sm:$0xff] %v3875_v11   ;;  %v1457_v13 = vadd.f32 %v5100_v43, %v1418_v0  ;;  %v1419_v27 = vadd.f32 %v1300_v2, %v4934_v38  ;;  %v1302_v61 = vpop.f32.mrb[71].mxu0  ;;  %v2073_v57 = vpop.f32.mrb[71].mxu1 }
 0x196   : > { %v1458_v62 = vadd.f32 %v5100_v43, %v1419_v27  ;;  %2400 = vmatmul.mubr.bf16.gmra.mrb[176].mxu0 %v4913_v9  ;;  %2881 = vmatmul.mubr.bf16.gmra.mrb[176].mxu1 %v4945_v49  ;;  %v1489_v30 = vmax.f32 %v1457_v13, 0.0 }
 0x197   : > { %3621 = vmatprep.mubr.msk.bf16.mxu0 %vm479_vm0, %v4916_v22  ;;  %3737 = vmatprep.mubr.msk.bf16.mxu1 %vm479_vm0, %v4948_v53 }
 0x198   : > { %v1490_v50 = vmax.f32 %v1458_v62, 0.0 }
 0x199   : > { %v1305_v38 = vpop.f32.mrb[72].mxu0  ;;  %v5138_v63 = vpop.f32.mrb[72].mxu1 }
 0x19a   : > { %v3880_v45 = vpack.c.bf16 %v1490_v50, %v1489_v30  ;;  %v1420_v55 = vadd.f32 %v1305_v38, %v4942_v44  ;;  %v1307_v5 = vpop.f32.mrb[73].mxu0  ;;  %v2078_v21 = vpop.f32.mrb[73].mxu1  ;;  %v4250_v30 = vld [vmem:[%s4348_s18 + $0x234] ss:$8 sps:$4 sm:$0xff]  }
 0x19b   : > { %v1308_v1 = vpop.f32.mrb[74].mxu0  ;;  %v5143_v22 = vpop.f32.mrb[74].mxu1 }
 0x19c   : > { %4032 = vst [vmem:[%s5120_s22 + $0x8] sm:$0xff] %v3880_v45   ;;  %v1459_v9 = vadd.f32 %v5100_v43, %v1420_v55  ;;  %v1421_v6 = vadd.f32 %v1308_v1, %v4950_v54  ;;  %v1310_v59 = vpop.f32.mrb[75].mxu0  ;;  %v2081_v23 = vpop.f32.mrb[75].mxu1 }
 0x19e   : > { %v1460_v11 = vadd.f32 %v5100_v43, %v1421_v6  ;;  %2408 = vmatmul.mubr.bf16.gmra.mrb[180].mxu0 %v4929_v35  ;;  %2889 = vmatmul.mubr.bf16.gmra.mrb[180].mxu1 %v4961_v8  ;;  %v1491_v44 = vmax.f32 %v1459_v9, 0.0  ;;  %v4252_v6 = vld [vmem:[%s4348_s18 + $0x230] ss:$8 sps:$4 sm:$0xff]  }
 0x19f   : > { %3622 = vmatprep.mubr.msk.bf16.mxu0 %vm479_vm0, %v4932_v37  ;;  %3738 = vmatprep.mubr.msk.bf16.mxu1 %vm479_vm0, %v4965_v12 }
 0x1a0   : > { %v1492_v0 = vmax.f32 %v1460_v11, 0.0 }
 0x1a1   : > { %v1313_v54 = vpop.f32.mrb[76].mxu0  ;;  %v5153_v2 = vpop.f32.mrb[76].mxu1 }
 0x1a2   : > { %v3885_v29 = vpack.c.bf16 %v1492_v0, %v1491_v44  ;;  %v1422_v39 = vadd.f32 %v1313_v54, %v4958_v4  ;;  %v1315_v13 = vpop.f32.mrb[77].mxu0  ;;  %v2086_v27 = vpop.f32.mrb[77].mxu1 }
 0x1a3   : > { %v1316_v35 = vpop.f32.mrb[78].mxu0  ;;  %v5158_v57 = vpop.f32.mrb[78].mxu1 }
 0x1a4   : > { %4033 = vst [vmem:[%s5120_s22 + $0x10] sm:$0xff] %v3885_v29   ;;  %v1461_v61 = vadd.f32 %v5100_v43, %v1422_v39  ;;  %v1423_v37 = vadd.f32 %v1316_v35, %v4967_v18  ;;  %v1318_v62 = vpop.f32.mrb[79].mxu0  ;;  %v2089_v12 = vpop.f32.mrb[79].mxu1 }
 0x1a6   : > { %v1462_v50 = vadd.f32 %v5100_v43, %v1423_v37  ;;  %2416 = vmatmul.mubr.bf16.gmra.mrb[184].mxu0 %v4945_v49  ;;  %2897 = vmatmul.mubr.bf16.gmra.mrb[184].mxu1 %v4978_v41  ;;  %v1493_v4 = vmax.f32 %v1461_v61, 0.0 }
 0x1a7   : > { %3623 = vmatprep.mubr.msk.bf16.mxu0 %vm479_vm0, %v4948_v53  ;;  %3739 = vmatprep.mubr.msk.bf16.mxu1 %vm479_vm0, %v4250_v30 }
 0x1a8   : > { %v1494_v38 = vmax.f32 %v1462_v50, 0.0 }
 0x1a9   : > { %v1321_v18 = vpop.f32.mrb[80].mxu0  ;;  %v5168_v5 = vpop.f32.mrb[80].mxu1 }
 0x1aa   : > { %v3890_v45 = vpack.c.bf16 %v1494_v38, %v1493_v4  ;;  %v1424_v55 = vadd.f32 %v1321_v18, %v4975_v36  ;;  %v1323_v21 = vpop.f32.mrb[81].mxu0  ;;  %v2094_v1 = vpop.f32.mrb[81].mxu1 }
 0x1ab   : > { %v1324_v9 = vpop.f32.mrb[82].mxu0  ;;  %v5174_v53 = vpop.f32.mrb[82].mxu1 }
 0x1ac   : > { %4034 = vst [vmem:[%s5120_s22 + $0x18] sm:$0xff] %v3890_v45   ;;  %v1463_v49 = vadd.f32 %v5100_v43, %v1424_v55  ;;  %v1425_v41 = vadd.f32 %v1324_v9, %v4981_v47  ;;  %v1326_v59 = vpop.f32.mrb[83].mxu0  ;;  %v2097_v23 = vpop.f32.mrb[83].mxu1 }
 0x1ae   : > { %v1464_v11 = vadd.f32 %v5100_v43, %v1425_v41  ;;  %2424 = vmatmul.mubr.bf16.gmra.mrb[188].mxu0 %v4961_v8  ;;  %2905 = vmatmul.mubr.bf16.gmra.mrb[188].mxu1 %v4252_v6  ;;  %v1495_v36 = vmax.f32 %v1463_v49, 0.0 }
 0x1b0   : > { %v1496_v44 = vmax.f32 %v1464_v11, 0.0 }
 0x1b1   : > { %v1329_v0 = vpop.f32.mrb[84].mxu0  ;;  %v5179_v39 = vpop.f32.mrb[84].mxu1 }
 0x1b2   : > { %v3895_v54 = vpack.c.bf16 %v1496_v44, %v1495_v36  ;;  %v1426_v29 = vadd.f32 %v1329_v0, %v4988_v56  ;;  %v1331_v13 = vpop.f32.mrb[85].mxu0  ;;  %v2102_v47 = vpop.f32.mrb[85].mxu1 }
 0x1b3   : > { %v1332_v27 = vpop.f32.mrb[86].mxu0  ;;  %v5184_v37 = vpop.f32.mrb[86].mxu1 }
 0x1b4   : > { %4035 = vst [vmem:[%s5120_s22 + $0x20] sm:$0xff] %v3895_v54   ;;  %v1465_v35 = vadd.f32 %v5100_v43, %v1426_v29  ;;  %v1427_v61 = vadd.f32 %v1332_v27, %v4990_v17  ;;  %v1334_v8 = vpop.f32.mrb[87].mxu0  ;;  %v2105_v62 = vpop.f32.mrb[87].mxu1 }
 0x1b6   : > { %v1466_v30 = vadd.f32 %v5100_v43, %v1427_v61  ;;  %v1497_v12 = vmax.f32 %v1465_v35, 0.0 }
 0x1b8   : > { %v1498_v50 = vmax.f32 %v1466_v30, 0.0 }
 0x1b9   : > { %v1337_v56 = vpop.f32.mrb[88].mxu0  ;;  %v5188_v18 = vpop.f32.mrb[88].mxu1 }
 0x1ba   : > { %v3900_v4 = vpack.c.bf16 %v1498_v50, %v1497_v12  ;;  %v1428_v38 = vadd.f32 %v1337_v56, %v4997_v31  ;;  %v1339_v45 = vpop.f32.mrb[89].mxu0  ;;  %v2110_v55 = vpop.f32.mrb[89].mxu1 }
 0x1bb   : > { %v1340_v21 = vpop.f32.mrb[90].mxu0  ;;  %v5193_v9 = vpop.f32.mrb[90].mxu1 }
 0x1bc   : > { %4036 = vst [vmem:[%s5120_s22 + $0x28] sm:$0xff] %v3900_v4   ;;  %v1467_v17 = vadd.f32 %v5100_v43, %v1428_v38  ;;  %v1429_v1 = vadd.f32 %v1340_v21, %v4999_v19  ;;  %v1342_v6 = vpop.f32.mrb[91].mxu0  ;;  %v2113_v49 = vpop.f32.mrb[91].mxu1 }
 0x1be   : > { %v1468_v41 = vadd.f32 %v5100_v43, %v1429_v1  ;;  %v1499_v59 = vmax.f32 %v1467_v17, 0.0 }
 0x1c0   : > { %v1500_v23 = vmax.f32 %v1468_v41, 0.0 }
 0x1c1   : > { %v1345_v31 = vpop.f32.mrb[92].mxu0  ;;  %v5197_v44 = vpop.f32.mrb[92].mxu1 }
 0x1c2   : > { %v3905_v11 = vpack.c.bf16 %v1500_v23, %v1499_v59  ;;  %v1430_v36 = vadd.f32 %v1345_v31, %v5007_v15  ;;  %v1347_v0 = vpop.f32.mrb[93].mxu0  ;;  %v2118_v54 = vpop.f32.mrb[93].mxu1 }
 0x1c3   : > { %v1348_v29 = vpop.f32.mrb[94].mxu0  ;;  %v5202_v47 = vpop.f32.mrb[94].mxu1 }
 0x1c4   : > { %4037 = vst [vmem:[%s5120_s22 + $0x30] sm:$0xff] %v3905_v11   ;;  %v1469_v19 = vadd.f32 %v5100_v43, %v1430_v36  ;;  %v1431_v13 = vadd.f32 %v1348_v29, %v5009_v7  ;;  %v1350_v27 = vpop.f32.mrb[95].mxu0  ;;  %v2121_v35 = vpop.f32.mrb[95].mxu1 }
 0x1c6   : > { %v1470_v61 = vadd.f32 %v5100_v43, %v1431_v13  ;;  %v1501_v8 = vmax.f32 %v1469_v19, 0.0 }
 0x1c8   : > { %v1502_v62 = vmax.f32 %v1470_v61, 0.0 }
 0x1c9   : > { %v1353_v15 = vpop.f32.mrb[96].mxu0  ;;  %v5206_v50 = vpop.f32.mrb[96].mxu1 }
 0x1ca   : > { %v3910_v30 = vpack.c.bf16 %v1502_v62, %v1501_v8  ;;  %v1432_v12 = vadd.f32 %v1353_v15, %v5017_v25  ;;  %v1355_v56 = vpop.f32.mrb[97].mxu0  ;;  %v2126_v4 = vpop.f32.mrb[97].mxu1 }
 0x1cb   : > { %v1356_v38 = vpop.f32.mrb[98].mxu0  ;;  %v5211_v55 = vpop.f32.mrb[98].mxu1 }
 0x1cc   : > { %4038 = vst [vmem:[%s5120_s22 + $0x38] sm:$0xff] %v3910_v30   ;;  %v1471_v7 = vadd.f32 %v5100_v43, %v1432_v12  ;;  %v1433_v45 = vadd.f32 %v1356_v38, %v5019_v14  ;;  %v1358_v21 = vpop.f32.mrb[99].mxu0  ;;  %v2129_v17 = vpop.f32.mrb[99].mxu1 }
 0x1ce   : > { %v1472_v1 = vadd.f32 %v5100_v43, %v1433_v45  ;;  %v1503_v6 = vmax.f32 %v1471_v7, 0.0 }
 0x1d0   : > { %v1504_v49 = vmax.f32 %v1472_v1, 0.0 }
 0x1d1   : > { %v1361_v25 = vpop.f32.mrb[100].mxu0  ;;  %v5215_v23 = vpop.f32.mrb[100].mxu1 }
 0x1d2   : > { %v3915_v41 = vpack.c.bf16 %v1504_v49, %v1503_v6  ;;  %v1434_v59 = vadd.f32 %v1361_v25, %v5027_v20  ;;  %v1363_v31 = vpop.f32.mrb[101].mxu0  ;;  %v2134_v11 = vpop.f32.mrb[101].mxu1 }
 0x1d3   : > { %v1364_v36 = vpop.f32.mrb[102].mxu0  ;;  %v5220_v54 = vpop.f32.mrb[102].mxu1 }
 0x1d4   : > { %4039 = vst [vmem:[%s5120_s22 + $0x40] sm:$0xff] %v3915_v41   ;;  %v1473_v14 = vadd.f32 %v5100_v43, %v1434_v59  ;;  %v1435_v0 = vadd.f32 %v1364_v36, %v5029_v3  ;;  %v1366_v29 = vpop.f32.mrb[103].mxu0  ;;  %v2137_v19 = vpop.f32.mrb[103].mxu1 }
 0x1d6   : > { %v1474_v13 = vadd.f32 %v5100_v43, %v1435_v0  ;;  %v1505_v27 = vmax.f32 %v1473_v14, 0.0 }
 0x1d8   : > { %v1506_v35 = vmax.f32 %v1474_v13, 0.0 }
 0x1d9   : > { %v1369_v20 = vpop.f32.mrb[104].mxu0  ;;  %v5224_v62 = vpop.f32.mrb[104].mxu1 }
 0x1da   : > { %v3920_v61 = vpack.c.bf16 %v1506_v35, %v1505_v27  ;;  %v1436_v8 = vadd.f32 %v1369_v20, %v5037_v24  ;;  %v1371_v15 = vpop.f32.mrb[105].mxu0  ;;  %v2142_v30 = vpop.f32.mrb[105].mxu1 }
 0x1db   : > { %v1372_v12 = vpop.f32.mrb[106].mxu0  ;;  %v5229_v4 = vpop.f32.mrb[106].mxu1 }
 0x1dc   : > { %4040 = vst [vmem:[%s5120_s22 + $0x48] sm:$0xff] %v3920_v61   ;;  %v1475_v3 = vadd.f32 %v5100_v43, %v1436_v8  ;;  %v1437_v56 = vadd.f32 %v1372_v12, %v5039_v32  ;;  %v1374_v38 = vpop.f32.mrb[107].mxu0  ;;  %v2145_v7 = vpop.f32.mrb[107].mxu1 }
 0x1de   : > { %v1476_v45 = vadd.f32 %v5100_v43, %v1437_v56  ;;  %v1507_v21 = vmax.f32 %v1475_v3, 0.0 }
 0x1e0   : > { %v1508_v17 = vmax.f32 %v1476_v45, 0.0 }
 0x1e1   : > { %v1377_v24 = vpop.f32.mrb[108].mxu0  ;;  %v5233_v49 = vpop.f32.mrb[108].mxu1 }
 0x1e2   : > { %v3925_v1 = vpack.c.bf16 %v1508_v17, %v1507_v21  ;;  %v1438_v6 = vadd.f32 %v1377_v24, %v5047_v28  ;;  %v1379_v25 = vpop.f32.mrb[109].mxu0  ;;  %v2150_v41 = vpop.f32.mrb[109].mxu1 }
 0x1e3   : > { %v1380_v59 = vpop.f32.mrb[110].mxu0  ;;  %v5238_v11 = vpop.f32.mrb[110].mxu1 }
 0x1e4   : > { %4041 = vst [vmem:[%s5120_s22 + $0x50] sm:$0xff] %v3925_v1   ;;  %v1477_v32 = vadd.f32 %v5100_v43, %v1438_v6  ;;  %v1439_v31 = vadd.f32 %v1380_v59, %v5049_v16  ;;  %v1382_v36 = vpop.f32.mrb[111].mxu0  ;;  %v2153_v14 = vpop.f32.mrb[111].mxu1 }
 0x1e6   : > { %v1478_v0 = vadd.f32 %v5100_v43, %v1439_v31  ;;  %v1509_v29 = vmax.f32 %v1477_v32, 0.0 }
 0x1e8   : > { %v1510_v19 = vmax.f32 %v1478_v0, 0.0 }
 0x1e9   : > { %v1385_v28 = vpop.f32.mrb[112].mxu0  ;;  %v5242_v35 = vpop.f32.mrb[112].mxu1 }
 0x1ea   : > { %v3930_v13 = vpack.c.bf16 %v1510_v19, %v1509_v29  ;;  %v1440_v27 = vadd.f32 %v1385_v28, %v5057_v34  ;;  %v1387_v20 = vpop.f32.mrb[113].mxu0  ;;  %v2158_v61 = vpop.f32.mrb[113].mxu1 }
 0x1eb   : > { %v1388_v8 = vpop.f32.mrb[114].mxu0  ;;  %v5247_v30 = vpop.f32.mrb[114].mxu1 }
 0x1ec   : > { %4042 = vst [vmem:[%s5120_s22 + $0x58] sm:$0xff] %v3930_v13   ;;  %v1479_v16 = vadd.f32 %v5100_v43, %v1440_v27  ;;  %v1441_v15 = vadd.f32 %v1388_v8, %v5059_v26  ;;  %v1390_v12 = vpop.f32.mrb[115].mxu0  ;;  %v2161_v3 = vpop.f32.mrb[115].mxu1 }
 0x1ee   : > { %v1480_v56 = vadd.f32 %v5100_v43, %v1441_v15  ;;  %v1511_v38 = vmax.f32 %v1479_v16, 0.0 }
 0x1f0   : > { %v1512_v7 = vmax.f32 %v1480_v56, 0.0 }
 0x1f1   : > { %v1393_v34 = vpop.f32.mrb[116].mxu0  ;;  %v5251_v17 = vpop.f32.mrb[116].mxu1 }
 0x1f2   : > { %v3935_v45 = vpack.c.bf16 %v1512_v7, %v1511_v38  ;;  %v1442_v21 = vadd.f32 %v1393_v34, %v5067_v40  ;;  %v1395_v24 = vpop.f32.mrb[117].mxu0  ;;  %v2166_v1 = vpop.f32.mrb[117].mxu1 }
 0x1f3   : > { %v1396_v6 = vpop.f32.mrb[118].mxu0  ;;  %v5256_v41 = vpop.f32.mrb[118].mxu1 }
 0x1f4   : > { %4043 = vst [vmem:[%s5120_s22 + $0x60] sm:$0xff] %v3935_v45   ;;  %v1481_v26 = vadd.f32 %v5100_v43, %v1442_v21  ;;  %v1443_v25 = vadd.f32 %v1396_v6, %v5069_v48  ;;  %v1398_v59 = vpop.f32.mrb[119].mxu0  ;;  %v2169_v32 = vpop.f32.mrb[119].mxu1 }
 0x1f6   : > { %v1482_v31 = vadd.f32 %v5100_v43, %v1443_v25  ;;  %v1513_v36 = vmax.f32 %v1481_v26, 0.0 }
 0x1f8   : > { %v1514_v14 = vmax.f32 %v1482_v31, 0.0 }
 0x1f9   : > { %v1401_v40 = vpop.f32.mrb[120].mxu0  ;;  %v5260_v19 = vpop.f32.mrb[120].mxu1 }
 0x1fa   : > { %v3940_v0 = vpack.c.bf16 %v1514_v14, %v1513_v36  ;;  %v1444_v29 = vadd.f32 %v1401_v40, %v5077_v46  ;;  %v1403_v28 = vpop.f32.mrb[121].mxu0  ;;  %v2174_v13 = vpop.f32.mrb[121].mxu1 }
 0x1fb   : > { %v1404_v27 = vpop.f32.mrb[122].mxu0  ;;  %v5265_v61 = vpop.f32.mrb[122].mxu1 }
 0x1fc   : > { %4044 = vst [vmem:[%s5120_s22 + $0x68] sm:$0xff] %v3940_v0   ;;  %v1483_v48 = vadd.f32 %v5100_v43, %v1444_v29  ;;  %v1445_v20 = vadd.f32 %v1404_v27, %v5079_v10  ;;  %v1406_v8 = vpop.f32.mrb[123].mxu0  ;;  %v2177_v16 = vpop.f32.mrb[123].mxu1 }
 0x1fe   : > { %v1484_v15 = vadd.f32 %v5100_v43, %v1445_v20  ;;  %v1515_v12 = vmax.f32 %v1483_v48, 0.0 }
 0x200   : > { %v1516_v3 = vmax.f32 %v1484_v15, 0.0 }
 0x201   : > { %v1409_v46 = vpop.f32.mrb[124].mxu0  ;;  %v5269_v7 = vpop.f32.mrb[124].mxu1 }
 0x202   : > { %v3945_v56 = vpack.c.bf16 %v1516_v3, %v1515_v12  ;;  %v1446_v38 = vadd.f32 %v1409_v46, %v5087_v52  ;;  %v1411_v34 = vpop.f32.mrb[125].mxu0  ;;  %v2182_v45 = vpop.f32.mrb[125].mxu1 }
 0x203   : > { %v1412_v21 = vpop.f32.mrb[126].mxu0  ;;  %v5274_v1 = vpop.f32.mrb[126].mxu1 }
 0x204   : > { %4045 = vst [vmem:[%s5120_s22 + $0x70] sm:$0xff] %v3945_v56   ;;  %v1485_v10 = vadd.f32 %v5100_v43, %v1446_v38  ;;  %v1447_v24 = vadd.f32 %v1412_v21, %v5089_v42  ;;  %v1414_v6 = vpop.f32.mrb[127].mxu0  ;;  %v2185_v26 = vpop.f32.mrb[127].mxu1 }
 0x206   : > { %v1486_v25 = vadd.f32 %v5100_v43, %v1447_v24  ;;  %v1517_v59 = vmax.f32 %v1485_v10, 0.0 }
 0x208   : > { %v1518_v32 = vmax.f32 %v1486_v25, 0.0 }
 0x209   : > { %v2305_v52 = vpop.f32.mrb[128].mxu0  ;;  %v2786_v14 = vpop.f32.mrb[128].mxu1 }
 0x20a   : > { %v3950_v31 = vpack.c.bf16 %v1518_v32, %v1517_v59  ;;  %v2306_v36 = vadd.f32 %v2305_v52, %v5103_v58  ;;  %v2307_v40 = vpop.f32.mrb[129].mxu0  ;;  %v2788_v0 = vpop.f32.mrb[129].mxu1 }
 0x20b   : > { %v2308_v29 = vpop.f32.mrb[130].mxu0  ;;  %v2789_v13 = vpop.f32.mrb[130].mxu1 }
 0x20c   : > { %4046 = vst [vmem:[%s5120_s22 + $0x78] sm:$0xff] %v3950_v31   ;;  %v2913_v28 = vadd.f32 %v2786_v14, %v2306_v36  ;;  %v2309_v42 = vadd.f32 %v2308_v29, %v5107_v33  ;;  %v2310_v27 = vpop.f32.mrb[131].mxu0  ;;  %v2791_v48 = vpop.f32.mrb[131].mxu1 }
 0x20e   : > { %v2952_v20 = vadd.f32 %v5100_v43, %v2913_v28  ;;  %v2914_v8 = vadd.f32 %v2789_v13, %v2309_v42 }
 0x210   : > { %v2953_v16 = vadd.f32 %v5100_v43, %v2914_v8  ;;  %v2984_v12 = vmax.f32 %v2952_v20, 0.0 }
 0x211   : > { %v2313_v15 = vpop.f32.mrb[132].mxu0  ;;  %v2794_v46 = vpop.f32.mrb[132].mxu1 }
 0x212   : > { %v2985_v58 = vmax.f32 %v2953_v16, 0.0  ;;  %v2314_v3 = vadd.f32 %v2313_v15, %v5123_v51  ;;  %v2315_v56 = vpop.f32.mrb[133].mxu0  ;;  %v2796_v38 = vpop.f32.mrb[133].mxu1 }
 0x213   : > { %v2316_v34 = vpop.f32.mrb[134].mxu0  ;;  %v2797_v10 = vpop.f32.mrb[134].mxu1 }
 0x214   : > { %v3955_v45 = vpack.c.bf16 %v2985_v58, %v2984_v12  ;;  %v2915_v33 = vadd.f32 %v2794_v46, %v2314_v3  ;;  %v2317_v21 = vadd.f32 %v2316_v34, %v5128_v60  ;;  %v2318_v24 = vpop.f32.mrb[135].mxu0  ;;  %v2799_v6 = vpop.f32.mrb[135].mxu1 }
 0x216   : > { %4047 = vst [vmem:[%s5120_s22 + $0x80] sm:$0xff] %v3955_v45   ;;  %v2954_v26 = vadd.f32 %v5100_v43, %v2915_v33  ;;  %v2916_v25 = vadd.f32 %v2797_v10, %v2317_v21 }
 0x218   : > { %v2955_v59 = vadd.f32 %v5100_v43, %v2916_v25  ;;  %v2986_v51 = vmax.f32 %v2954_v26, 0.0 }
 0x219   : > { %v2321_v32 = vpop.f32.mrb[136].mxu0  ;;  %v2802_v36 = vpop.f32.mrb[136].mxu1 }
 0x21a   : > { %v2987_v52 = vmax.f32 %v2955_v59, 0.0  ;;  %v2322_v31 = vadd.f32 %v2321_v32, %v5138_v63  ;;  %v2323_v14 = vpop.f32.mrb[137].mxu0  ;;  %v2804_v40 = vpop.f32.mrb[137].mxu1 }
 0x21b   : > { %v2324_v0 = vpop.f32.mrb[138].mxu0  ;;  %v2805_v42 = vpop.f32.mrb[138].mxu1 }
 0x21c   : > { %v3960_v60 = vpack.c.bf16 %v2987_v52, %v2986_v51  ;;  %v2917_v29 = vadd.f32 %v2802_v36, %v2322_v31  ;;  %v2325_v28 = vadd.f32 %v2324_v0, %v5143_v22  ;;  %v2326_v13 = vpop.f32.mrb[139].mxu0  ;;  %v2807_v27 = vpop.f32.mrb[139].mxu1 }
 0x21e   : > { %4048 = vst [vmem:[%s5120_s22 + $0x88] sm:$0xff] %v3960_v60   ;;  %v2956_v48 = vadd.f32 %v5100_v43, %v2917_v29  ;;  %v2918_v20 = vadd.f32 %v2805_v42, %v2325_v28 }
 0x220   : > { %v2957_v8 = vadd.f32 %v5100_v43, %v2918_v20  ;;  %v2988_v63 = vmax.f32 %v2956_v48, 0.0 }
 0x221   : > { %v2329_v16 = vpop.f32.mrb[140].mxu0  ;;  %v2810_v58 = vpop.f32.mrb[140].mxu1 }
 0x222   : > { %v2989_v15 = vmax.f32 %v2957_v8, 0.0  ;;  %v2330_v12 = vadd.f32 %v2329_v16, %v5153_v2  ;;  %v2331_v3 = vpop.f32.mrb[141].mxu0  ;;  %v2812_v46 = vpop.f32.mrb[141].mxu1 }
 0x223   : > { %v2332_v56 = vpop.f32.mrb[142].mxu0  ;;  %v2813_v45 = vpop.f32.mrb[142].mxu1 }
 0x224   : > { %v3965_v22 = vpack.c.bf16 %v2989_v15, %v2988_v63  ;;  %v2919_v38 = vadd.f32 %v2810_v58, %v2330_v12  ;;  %v2333_v34 = vadd.f32 %v2332_v56, %v5158_v57  ;;  %v2334_v33 = vpop.f32.mrb[143].mxu0  ;;  %v2815_v21 = vpop.f32.mrb[143].mxu1 }
 0x226   : > { %4049 = vst [vmem:[%s5120_s22 + $0x90] sm:$0xff] %v3965_v22   ;;  %v2958_v10 = vadd.f32 %v5100_v43, %v2919_v38  ;;  %v2920_v24 = vadd.f32 %v2813_v45, %v2333_v34 }
 0x228   : > { %v2959_v6 = vadd.f32 %v5100_v43, %v2920_v24  ;;  %v2990_v2 = vmax.f32 %v2958_v10, 0.0 }
 0x229   : > { %v2337_v26 = vpop.f32.mrb[144].mxu0  ;;  %v2818_v32 = vpop.f32.mrb[144].mxu1 }
 0x22a   : > { %v2991_v25 = vmax.f32 %v2959_v6, 0.0  ;;  %v2338_v59 = vadd.f32 %v2337_v26, %v5168_v5  ;;  %v2339_v51 = vpop.f32.mrb[145].mxu0  ;;  %v2820_v52 = vpop.f32.mrb[145].mxu1 }
 0x22b   : > { %v2340_v31 = vpop.f32.mrb[146].mxu0  ;;  %v2821_v40 = vpop.f32.mrb[146].mxu1 }
 0x22c   : > { %v3970_v57 = vpack.c.bf16 %v2991_v25, %v2990_v2  ;;  %v2921_v36 = vadd.f32 %v2818_v32, %v2338_v59  ;;  %v2341_v14 = vadd.f32 %v2340_v31, %v5174_v53  ;;  %v2342_v0 = vpop.f32.mrb[147].mxu0  ;;  %v2823_v60 = vpop.f32.mrb[147].mxu1 }
 0x22e   : > { %4050 = vst [vmem:[%s5120_s22 + $0x98] sm:$0xff] %v3970_v57   ;;  %v2960_v29 = vadd.f32 %v5100_v43, %v2921_v36  ;;  %v2922_v28 = vadd.f32 %v2821_v40, %v2341_v14 }
 0x230   : > { %v2961_v42 = vadd.f32 %v5100_v43, %v2922_v28  ;;  %v2992_v5 = vmax.f32 %v2960_v29, 0.0 }
 0x231   : > { %v2345_v13 = vpop.f32.mrb[148].mxu0  ;;  %v2826_v20 = vpop.f32.mrb[148].mxu1 }
 0x232   : > { %v2993_v27 = vmax.f32 %v2961_v42, 0.0  ;;  %v2346_v48 = vadd.f32 %v2345_v13, %v5179_v39  ;;  %v2347_v8 = vpop.f32.mrb[149].mxu0  ;;  %v2828_v16 = vpop.f32.mrb[149].mxu1 }
 0x233   : > { %v2348_v63 = vpop.f32.mrb[150].mxu0  ;;  %v2829_v58 = vpop.f32.mrb[150].mxu1 }
 0x234   : > { %v3975_v53 = vpack.c.bf16 %v2993_v27, %v2992_v5  ;;  %v2923_v15 = vadd.f32 %v2826_v20, %v2346_v48  ;;  %v2349_v12 = vadd.f32 %v2348_v63, %v5184_v37  ;;  %v2350_v3 = vpop.f32.mrb[151].mxu0  ;;  %v2831_v46 = vpop.f32.mrb[151].mxu1 }
 0x236   : > { %4051 = vst [vmem:[%s5120_s22 + $0xa0] sm:$0xff] %v3975_v53   ;;  %v2962_v56 = vadd.f32 %v5100_v43, %v2923_v15  ;;  %v2924_v22 = vadd.f32 %v2829_v58, %v2349_v12 }
 0x238   : > { %v2963_v38 = vadd.f32 %v5100_v43, %v2924_v22  ;;  %v2994_v39 = vmax.f32 %v2962_v56, 0.0 }
 0x239   : > { %v2353_v34 = vpop.f32.mrb[152].mxu0  ;;  %v2834_v21 = vpop.f32.mrb[152].mxu1 }
 0x23a   : > { %v2995_v45 = vmax.f32 %v2963_v38, 0.0  ;;  %v2354_v33 = vadd.f32 %v2353_v34, %v5188_v18  ;;  %v2355_v10 = vpop.f32.mrb[153].mxu0  ;;  %v2836_v24 = vpop.f32.mrb[153].mxu1 }
 0x23b   : > { %v2356_v6 = vpop.f32.mrb[154].mxu0  ;;  %v2837_v25 = vpop.f32.mrb[154].mxu1 }
 0x23c   : > { %v3980_v37 = vpack.c.bf16 %v2995_v45, %v2994_v39  ;;  %v2925_v26 = vadd.f32 %v2834_v21, %v2354_v33  ;;  %v2357_v2 = vadd.f32 %v2356_v6, %v5193_v9  ;;  %v2358_v59 = vpop.f32.mrb[155].mxu0  ;;  %v2839_v32 = vpop.f32.mrb[155].mxu1 }
 0x23e   : > { %4052 = vst [vmem:[%s5120_s22 + $0xa8] sm:$0xff] %v3980_v37   ;;  %v2964_v51 = vadd.f32 %v5100_v43, %v2925_v26  ;;  %v2926_v52 = vadd.f32 %v2837_v25, %v2357_v2 }
 0x240   : > { %v2965_v31 = vadd.f32 %v5100_v43, %v2926_v52  ;;  %v2996_v18 = vmax.f32 %v2964_v51, 0.0 }
 0x241   : > { %v2361_v57 = vpop.f32.mrb[156].mxu0  ;;  %v2842_v40 = vpop.f32.mrb[156].mxu1 }
 0x242   : > { %v2997_v36 = vmax.f32 %v2965_v31, 0.0  ;;  %v2362_v14 = vadd.f32 %v2361_v57, %v5197_v44  ;;  %v2363_v0 = vpop.f32.mrb[157].mxu0  ;;  %v2844_v60 = vpop.f32.mrb[157].mxu1 }
 0x243   : > { %v2364_v29 = vpop.f32.mrb[158].mxu0  ;;  %v2845_v13 = vpop.f32.mrb[158].mxu1 }
 0x244   : > { %v3985_v9 = vpack.c.bf16 %v2997_v36, %v2996_v18  ;;  %v2927_v28 = vadd.f32 %v2842_v40, %v2362_v14  ;;  %v2365_v42 = vadd.f32 %v2364_v29, %v5202_v47  ;;  %v2366_v5 = vpop.f32.mrb[159].mxu0  ;;  %v2847_v27 = vpop.f32.mrb[159].mxu1 }
 0x246   : > { %4053 = vst [vmem:[%s5120_s22 + $0xb0] sm:$0xff] %v3985_v9   ;;  %v2966_v48 = vadd.f32 %v5100_v43, %v2927_v28  ;;  %v2928_v20 = vadd.f32 %v2845_v13, %v2365_v42 }
 0x248   : > { %v2967_v8 = vadd.f32 %v5100_v43, %v2928_v20  ;;  %v2998_v44 = vmax.f32 %v2966_v48, 0.0 }
 0x249   : > { %v2369_v16 = vpop.f32.mrb[160].mxu0  ;;  %v2850_v15 = vpop.f32.mrb[160].mxu1 }
 0x24a   : > { %v2999_v63 = vmax.f32 %v2967_v8, 0.0  ;;  %v2370_v53 = vadd.f32 %v2369_v16, %v5206_v50  ;;  %v2371_v12 = vpop.f32.mrb[161].mxu0  ;;  %v2852_v58 = vpop.f32.mrb[161].mxu1 }
 0x24b   : > { %v2372_v3 = vpop.f32.mrb[162].mxu0  ;;  %v2853_v22 = vpop.f32.mrb[162].mxu1 }
 0x24c   : > { %v3990_v47 = vpack.c.bf16 %v2999_v63, %v2998_v44  ;;  %v2929_v46 = vadd.f32 %v2850_v15, %v2370_v53  ;;  %v2373_v56 = vadd.f32 %v2372_v3, %v5211_v55  ;;  %v2374_v38 = vpop.f32.mrb[163].mxu0  ;;  %v2855_v34 = vpop.f32.mrb[163].mxu1 }
 0x24e   : > { %4054 = vst [vmem:[%s5120_s22 + $0xb8] sm:$0xff] %v3990_v47   ;;  %v2968_v39 = vadd.f32 %v5100_v43, %v2929_v46  ;;  %v2930_v45 = vadd.f32 %v2853_v22, %v2373_v56 }
 0x250   : > { %v2969_v33 = vadd.f32 %v5100_v43, %v2930_v45  ;;  %v3000_v50 = vmax.f32 %v2968_v39, 0.0 }
 0x251   : > { %v2377_v21 = vpop.f32.mrb[164].mxu0  ;;  %v2858_v6 = vpop.f32.mrb[164].mxu1 }
 0x252   : > { %v3001_v10 = vmax.f32 %v2969_v33, 0.0  ;;  %v2378_v24 = vadd.f32 %v2377_v21, %v5215_v23  ;;  %v2379_v37 = vpop.f32.mrb[165].mxu0  ;;  %v2860_v26 = vpop.f32.mrb[165].mxu1 }
 0x253   : > { %v2380_v2 = vpop.f32.mrb[166].mxu0  ;;  %v2861_v32 = vpop.f32.mrb[166].mxu1 }
 0x254   : > { %v3995_v55 = vpack.c.bf16 %v3001_v10, %v3000_v50  ;;  %v2931_v25 = vadd.f32 %v2858_v6, %v2378_v24  ;;  %v2381_v59 = vadd.f32 %v2380_v2, %v5220_v54  ;;  %v2382_v51 = vpop.f32.mrb[167].mxu0  ;;  %v2863_v52 = vpop.f32.mrb[167].mxu1 }
 0x256   : > { %4055 = vst [vmem:[%s5120_s22 + $0xc0] sm:$0xff] %v3995_v55   ;;  %v2970_v31 = vadd.f32 %v5100_v43, %v2931_v25  ;;  %v2932_v57 = vadd.f32 %v2861_v32, %v2381_v59 }
 0x258   : > { %v2971_v18 = vadd.f32 %v5100_v43, %v2932_v57  ;;  %v3002_v23 = vmax.f32 %v2970_v31, 0.0 }
 0x259   : > { %v2385_v36 = vpop.f32.mrb[168].mxu0  ;;  %v2866_v0 = vpop.f32.mrb[168].mxu1 }
 0x25a   : > { %v3003_v14 = vmax.f32 %v2971_v18, 0.0  ;;  %v2386_v40 = vadd.f32 %v2385_v36, %v5224_v62  ;;  %v2387_v60 = vpop.f32.mrb[169].mxu0  ;;  %v2868_v29 = vpop.f32.mrb[169].mxu1 }
 0x25b   : > { %v2388_v9 = vpop.f32.mrb[170].mxu0  ;;  %v2869_v13 = vpop.f32.mrb[170].mxu1 }
 0x25c   : > { %v4000_v54 = vpack.c.bf16 %v3003_v14, %v3002_v23  ;;  %v2933_v28 = vadd.f32 %v2866_v0, %v2386_v40  ;;  %v2389_v42 = vadd.f32 %v2388_v9, %v5229_v4  ;;  %v2390_v5 = vpop.f32.mrb[171].mxu0  ;;  %v2871_v27 = vpop.f32.mrb[171].mxu1 }
 0x25e   : > { %4056 = vst [vmem:[%s5120_s22 + $0xc8] sm:$0xff] %v4000_v54   ;;  %v2972_v48 = vadd.f32 %v5100_v43, %v2933_v28  ;;  %v2934_v20 = vadd.f32 %v2869_v13, %v2389_v42 }
 0x260   : > { %v2973_v8 = vadd.f32 %v5100_v43, %v2934_v20  ;;  %v3004_v62 = vmax.f32 %v2972_v48, 0.0 }
 0x261   : > { %v2393_v16 = vpop.f32.mrb[172].mxu0  ;;  %v2874_v53 = vpop.f32.mrb[172].mxu1 }
 0x262   : > { %v3005_v44 = vmax.f32 %v2973_v8, 0.0  ;;  %v2394_v63 = vadd.f32 %v2393_v16, %v5233_v49  ;;  %v2395_v15 = vpop.f32.mrb[173].mxu0  ;;  %v2876_v12 = vpop.f32.mrb[173].mxu1 }
 0x263   : > { %v2396_v58 = vpop.f32.mrb[174].mxu0  ;;  %v2877_v46 = vpop.f32.mrb[174].mxu1 }
 0x264   : > { %v4005_v4 = vpack.c.bf16 %v3005_v44, %v3004_v62  ;;  %v2935_v3 = vadd.f32 %v2874_v53, %v2394_v63  ;;  %v2397_v47 = vadd.f32 %v2396_v58, %v5238_v11  ;;  %v2398_v56 = vpop.f32.mrb[175].mxu0  ;;  %v2879_v22 = vpop.f32.mrb[175].mxu1 }
 0x266   : > { %4057 = vst [vmem:[%s5120_s22 + $0xd0] sm:$0xff] %v4005_v4   ;;  %v2974_v38 = vadd.f32 %v5100_v43, %v2935_v3  ;;  %v2936_v34 = vadd.f32 %v2877_v46, %v2397_v47 }
 0x268   : > { %v2975_v39 = vadd.f32 %v5100_v43, %v2936_v34  ;;  %v3006_v49 = vmax.f32 %v2974_v38, 0.0 }
 0x269   : > { %v2401_v45 = vpop.f32.mrb[176].mxu0  ;;  %v2882_v50 = vpop.f32.mrb[176].mxu1 }
 0x26a   : > { %v3007_v33 = vmax.f32 %v2975_v39, 0.0  ;;  %v2402_v21 = vadd.f32 %v2401_v45, %v5242_v35  ;;  %v2403_v10 = vpop.f32.mrb[177].mxu0  ;;  %v2884_v24 = vpop.f32.mrb[177].mxu1 }
 0x26b   : > { %v2404_v6 = vpop.f32.mrb[178].mxu0  ;;  %v2885_v2 = vpop.f32.mrb[178].mxu1 }
 0x26c   : > { %v4010_v11 = vpack.c.bf16 %v3007_v33, %v3006_v49  ;;  %v2937_v37 = vadd.f32 %v2882_v50, %v2402_v21  ;;  %v2405_v26 = vadd.f32 %v2404_v6, %v5247_v30  ;;  %v2406_v55 = vpop.f32.mrb[179].mxu0  ;;  %v2887_v25 = vpop.f32.mrb[179].mxu1 }
 0x26e   : > { %4058 = vst [vmem:[%s5120_s22 + $0xd8] sm:$0xff] %v4010_v11   ;;  %v2976_v59 = vadd.f32 %v5100_v43, %v2937_v37  ;;  %v2938_v32 = vadd.f32 %v2885_v2, %v2405_v26 }
 0x270   : > { %v2977_v51 = vadd.f32 %v5100_v43, %v2938_v32  ;;  %v3008_v35 = vmax.f32 %v2976_v59, 0.0  ;;  %v4253_v43 = vld [vmem:[%s5360_s2] ss:$0 sm:$0xff] }
 0x271   : > { %v2409_v52 = vpop.f32.mrb[180].mxu0  ;;  %v2890_v18 = vpop.f32.mrb[180].mxu1 }
 0x272   : > { %v3009_v31 = vmax.f32 %v2977_v51, 0.0  ;;  %v2410_v57 = vadd.f32 %v2409_v52, %v5251_v17  ;;  %v2411_v36 = vpop.f32.mrb[181].mxu0  ;;  %v2892_v23 = vpop.f32.mrb[181].mxu1 }
 0x273   : > { %v2412_v14 = vpop.f32.mrb[182].mxu0  ;;  %v2893_v60 = vpop.f32.mrb[182].mxu1 }
 0x274   : > { %v4015_v30 = vpack.c.bf16 %v3009_v31, %v3008_v35  ;;  %v2939_v40 = vadd.f32 %v2890_v18, %v2410_v57  ;;  %v2413_v0 = vadd.f32 %v2412_v14, %v5256_v41  ;;  %v2414_v29 = vpop.f32.mrb[183].mxu0  ;;  %v2895_v9 = vpop.f32.mrb[183].mxu1 }
 0x276   : > { %4059 = vst [vmem:[%s5120_s22 + $0xe0] sm:$0xff] %v4015_v30   ;;  %v2978_v54 = vadd.f32 %v4253_v43, %v2939_v40  ;;  %v2940_v28 = vadd.f32 %v2893_v60, %v2413_v0 }
 0x278   : > { %v2979_v17 = vadd.f32 %v4253_v43, %v2940_v28  ;;  %v3010_v13 = vmax.f32 %v2978_v54, 0.0 }
 0x279   : > { %v2417_v42 = vpop.f32.mrb[184].mxu0  ;;  %v2898_v48 = vpop.f32.mrb[184].mxu1 }
 0x27a   : > { %v3011_v5 = vmax.f32 %v2979_v17, 0.0  ;;  %v2418_v27 = vadd.f32 %v2417_v42, %v5260_v19  ;;  %v2419_v20 = vpop.f32.mrb[185].mxu0  ;;  %v2900_v41 = vpop.f32.mrb[185].mxu1 }
 0x27b   : > { %v2420_v8 = vpop.f32.mrb[186].mxu0  ;;  %v2901_v63 = vpop.f32.mrb[186].mxu1 }
 0x27c   : > { %v4020_v16 = vpack.c.bf16 %v3011_v5, %v3010_v13  ;;  %v2941_v62 = vadd.f32 %v2898_v48, %v2418_v27  ;;  %v2421_v44 = vadd.f32 %v2420_v8, %v5265_v61  ;;  %v2422_v53 = vpop.f32.mrb[187].mxu0  ;;  %v2903_v15 = vpop.f32.mrb[187].mxu1 }
 0x27e   : > { %4060 = vst [vmem:[%s5120_s22 + $0xe8] sm:$0xff] %v4020_v16   ;;  %v2980_v12 = vadd.f32 %v4253_v43, %v2941_v62  ;;  %v2942_v58 = vadd.f32 %v2901_v63, %v2421_v44 }
 0x280   : > { %v2981_v4 = vadd.f32 %v4253_v43, %v2942_v58  ;;  %v3012_v47 = vmax.f32 %v2980_v12, 0.0 }
 0x281   : > { %v2425_v3 = vpop.f32.mrb[188].mxu0  ;;  %v2906_v56 = vpop.f32.mrb[188].mxu1 }
 0x282   : > { %v3013_v46 = vmax.f32 %v2981_v4, 0.0  ;;  %v2426_v19 = vadd.f32 %v2425_v3, %v5269_v7  ;;  %v2427_v22 = vpop.f32.mrb[189].mxu0  ;;  %v2908_v38 = vpop.f32.mrb[189].mxu1 }
 0x283   : > { %v2428_v34 = vpop.f32.mrb[190].mxu0  ;;  %v2909_v49 = vpop.f32.mrb[190].mxu1 }
 0x284   : > { %v4025_v39 = vpack.c.bf16 %v3013_v46, %v3012_v47  ;;  %v2943_v61 = vadd.f32 %v2906_v56, %v2426_v19  ;;  %v2429_v45 = vadd.f32 %v2428_v34, %v5274_v1  ;;  %v2430_v33 = vpop.f32.mrb[191].mxu0  ;;  %v2911_v21 = vpop.f32.mrb[191].mxu1 }
 0x286   : > { %4061 = vst [vmem:[%s5120_s22 + $0xf0] sm:$0xff] %v4025_v39   ;;  %v2982_v50 = vadd.f32 %v4253_v43, %v2943_v61  ;;  %v2944_v10 = vadd.f32 %v2909_v49, %v2429_v45 }
 0x288   : > { %v2983_v24 = vadd.f32 %v4253_v43, %v2944_v10  ;;  %v3014_v6 = vmax.f32 %v2982_v50, 0.0 }
 0x28a   : > { %v3015_v11 = vmax.f32 %v2983_v24, 0.0 }
 0x28c   : > { %v4030_v37 = vpack.c.bf16 %v3015_v11, %v3014_v6 }
 0x28e   : > { %4062 = vst [vmem:[%s5120_s22 + $0xf8] sm:$0xff] %v4030_v37  }
 0x28f PF: > { %s13_s12 = sadd.s32 1, %s4260_s12  }
 0x290   : > { %p10_p4 = scmp.ge.s32.totalorder %s13_s12, 4  }
 0x292   :  { %12 = sbr.rel (!%p10_p4) target bundleno = 1 (0x1), region = 66 }

// kernel: face_identity_loss_pallas.7
= control target key start
LH: loop header
LB: loop body
LE: loop exit
PB: predicated region body
PF: predicated region fallthrough
CT: control target
= control target key end

     0   :  { %v261_v1 = vmov 0.0   ;;  %vm262_vm0 = vmmov 0   ;;  %s326_s0 = inlined_call_operand.vmem [shape: f32[4,128], index: 0, kind: input, shape index: {}]   ;;  %s327_s1 = inlined_call_operand.vmem [shape: bf16[128,128], index: 1, kind: input, shape index: {}]   ;;  %s328_s2 = inlined_call_operand.vmem [shape: f32[1,128], index: 2, kind: input, shape index: {}]   ;;  %s329_s3 = inlined_call_operand.hbm [shape: f32[1,1], index: 3, kind: output, shape index: {}]  }
   0x1   :  { %v227_v0 = vld [vmem:[%s327_s1] sm:$0xff]   ;;  %202 = vmatprep.subr.bf16.mxu0 %v261_v1  ;;  %v228_v2 = vld [vmem:[%s327_s1 + $0x8] sm:$0xff]   ;;  %218 = vmatprep.mubr.msk.bf16.mxu0 %vm262_vm0, %v261_v1  ;;  %v229_v3 = vld [vmem:[%s327_s1 + $0x10] sm:$0xff]  }
   0x2   :  { %203 = vmatpush3.bf16.msra.mxu0 %v227_v0 }
   0x3   :  { %204 = vmatprep.subr.bf16.mxu0 %v261_v1 }
   0x6   :  { %205 = vmatpush3.bf16.msra.mxu0 %v228_v2 }
   0x7   :  { %206 = vmatprep.subr.bf16.mxu0 %v261_v1 }
   0x8   :  { %8 = vsyncpa [#allocation3], 0  ;;  %v230_v4 = vld [vmem:[%s327_s1 + $0x18] sm:$0xff]   ;;  %v231_v5 = vld [vmem:[%s327_s1 + $0x20] sm:$0xff]   ;;  %vm141_vm1 = vcmask 1043458   ;;  %vm133_vm2 = vcmask 1041408  }
   0x9   :  { %v232_v6 = vld [vmem:[%s327_s1 + $0x28] sm:$0xff]   ;;  %v233_v7 = vld [vmem:[%s327_s1 + $0x30] sm:$0xff]   ;;  %v234_v8 = vld [vmem:[%s327_s1 + $0x38] sm:$0xff]   ;;  %vm153_vm3 = vcmask 1024   ;;  %vm168_vm4 = vcmask 0  }
   0xa   :  { %207 = vmatpush3.bf16.msra.mxu0 %v229_v3  ;;  %v16_v9 = vld [vmem:[%s326_s0] sm:$0xf]  ;;  %s263_s0 = smov [#allocation2]  }
   0xb   :  { %208 = vmatprep.subr.bf16.mxu0 %v261_v1  ;;  %v17_v10 = vpack.c.bf16 %v16_v9, %v16_v9  ;;  %v184_v11 = vld [vmem:[%s328_s2] ss:$0 sm:$0xff]  ;;  %s176_s1 = sshll.u32 %s263_s0, 4  ;;  %s177_s1 = int_to_ptr.vmem [resolvable:$true] %s176_s1 }
   0xc   :  { %s237_s6 = scalar_lea.vmem %s177_s1, 16  ;;  %s241_s7 = scalar_lea.vmem %s177_s1, 32 }
   0xd   :  { %p238_p0 = scmp.ne.s32.totalorder %s177_s1, %s237_s6  ;;  %p242_p1 = scmp.lt.s32.totalorder %s177_s1, %s177_s1 }
   0xe   :  { %209 = vmatpush3.bf16.msra.mxu0 %v230_v4  ;;  %p243_p2 = scmp.lt.s32.totalorder %s241_s7, %s237_s6 }
   0xf   :  { %210 = vmatprep.subr.bf16.mxu0 %v261_v1 }
  0x10   :  { %p244_p3 = por %p243_p2, %p242_p1 }
  0x12   :  { %211 = vmatpush3.bf16.msra.mxu0 %v231_v5  ;;  %p245_p4 = pnand %p244_p3, %p238_p0 }
  0x13   :  { %212 = vmatprep.subr.bf16.mxu0 %v261_v1 }
  0x16   :  { %213 = vmatpush3.bf16.msra.mxu0 %v232_v6 }
  0x17   :  { %214 = vmatprep.subr.bf16.mxu0 %v261_v1 }
  0x1a   :  { %215 = vmatpush3.bf16.msra.mxu0 %v233_v7 }
  0x1b   :  { %216 = vmatprep.subr.bf16.mxu0 %v261_v1 }
  0x1e   :  { %217 = vmatpush3.bf16.msra.mxu0 %v234_v8 }
  0x21   :  { %219 = vmatmul.mubr.bf16.vlgmr.msra.gmra.mrb[0].mxu0 %v17_v10 }
  0xf4   :  { %v123_v12 = vpop.f32.mrb[0].mxu0 }
  0xf5   :  { %v124_v13 = vadd.f32 %v184_v11, %v123_v12  ;;  %v220_v14 = vpop.f32.mrb[1].mxu0 }
  0xf6   :  { %v126_v15 = vpop.f32.mrb[2].mxu0 }
  0xf7   :  { %v221_v16 = vpop.f32.mrb[3].mxu0  ;;  %v137_v17 = vmul.f32 %v124_v13, %v124_v13  ;;  %v130_v18 = vrot.slane %v124_v13, 2 }
  0xf9   :  { %v142_v19 = vsel %vm141_vm1, %v137_v17, 0.0  ;;  %v132_v20 = vmul.f32 %v130_v18, %v124_v13  ;;  %v138_v22 = vsel %vm133_vm2, %v137_v17, 0.0 }
  0xfa   :  { %143 = vadd.xlane.f32.xlu0 %v142_v19 }
  0xfb   :  { %v134_v21 = vsel %vm133_vm2, %v132_v20, 0.0 }
  0xfc   :  { %135 = vadd.xlane.f32.xlu1 %v134_v21 }
  0xfe   :  { %139 = vadd.xlane.f32.xlu0 %v138_v22 }
 0x187   :  { %v144_v23 = vpop.xlane.xlu0 %143 }
 0x188   :  { %v146_v24 = vrot.slane %v144_v23, 2 }
 0x189   :  { %v136_v29 = vpop.xlane.xlu1 %135 }
 0x18b   :  { %v140_v25 = vpop.xlane.xlu0 %139 }
 0x18c   :  { %v148_v26 = vmul.f32 %v146_v24, %v140_v25 }
 0x18e   :  { %v149_v27 = vmax.f32 %v148_v26, 1e-16 }
 0x190   :  { %235 = vrsqrt.f32 %v149_v27 }
 0x19a   :  { %v236_v28 = vpop.eup %235 }
 0x19b   :  { %v151_v30 = vmul.f32 %v236_v28, %v136_v29 }
 0x19d   :  { %v152_v31 = vsub.f32 1.0, %v151_v30 }
 0x19f   :  { %v154_v32 = vsel %vm153_vm3, %v152_v31, 0.0 }
 0x1a0   :  { %155 = vadd.xlane.f32.xlu1 %v154_v32 }
 0x22d   :  { %v156_v33 = vpop.xlane.xlu1 %155 }
 0x22e   :  { %v157_v34 = vrot.slane %v156_v33, 4 }
 0x230   :  { %v158_v35 = vadd.f32 %v157_v34, %v156_v33 }
 0x232   :  { %v159_v36 = vrot.slane %v158_v35, 2 }
 0x234   :  { %v160_v37 = vadd.f32 %v159_v36, %v158_v35 }
 0x236   :  { %v161_v38 = vrot.slane %v160_v37, 1 }
 0x238   :  { %v162_v39 = vadd.f32 %v161_v38, %v160_v37 }
 0x23a   :  { %222 = vpush %v162_v39 }
 0x26b   :  { %s223_s2 = spop %222 }
 0x26c   :  { %s166_s5 = smul.f32 0.5, %s223_s2 }
 0x26e   :  { %v167_v40 = vstv %s166_s5 }
 0x26f   :  { %169 = vst.msk [vmem:[#allocation2] sm:$0x1] %vm168_vm4, %v167_v40 }
 0x270   :  { %248 = shalt.err (!%p245_p4)
}
 0x271   :  { %s249_s10 = scalar_lea.hbm %s329_s3, 16 }
 0x272   :  { %p250_p5 = scmp.ne.s32.totalorder %s329_s3, %s249_s10  ;;  %p253_p6 = scmp.lt.u32.totalorder %s249_s10, %s329_s3 }
 0x274   :  { %p255_p7 = pnand %p253_p6, %p250_p5 }
 0x276   :  { %258 = shalt.err (!%p255_p7)
}
 0x277   :  { %179 = dma.vmem_to_hbm [thread:$0]  %s177_s1, 16, %s329_s3, [#allocation3]  }
 0x278   :  { %259 = dma.done.wait [#allocation3], 16  }
 0x279   :  { %260 = vsyncadd [#allocation3], 4294967280 }
 0x27a   :  { %183 = vsyncpa [#allocation3], 1 }

// kernel: face_identity_loss_pallas.6
= control target key start
LH: loop header
LB: loop body
LE: loop exit
PB: predicated region body
PF: predicated region fallthrough
CT: control target
= control target key end

     0   :  { %s3868_s12 = smov 0   ;;  %s4583_s0 = inlined_call_operand.vmem [shape: bf16[4,80,384], index: 0, kind: input, shape index: {}]   ;;  %s4584_s1 = inlined_call_operand.vmem [shape: bf16[3,384,128], index: 1, kind: input, shape index: {}]   ;;  %s4585_s2 = inlined_call_operand.vmem [shape: f32[1,128], index: 2, kind: input, shape index: {}]   ;;  %s4586_s3 = inlined_call_operand.vmem [shape: f32[4,1,128], index: 3, kind: output, shape index: {}]  }
   0x1 LB: > { %s2636_s13 = sadd.s32 4294967295, %s3846_s12   ;;  %p2640_p0 = scmp.ge.s32.totalorder %s3846_s12, 1  ;;  %s3846_s12 = sphi %s3868_s12, %s13_s12  }
   0x2   : > { %p139_p1 = scmp.lt.s32.totalorder %s3846_s12, 3 }
   0x4   : > { %p140_p2 = pnand %p2640_p0, %p139_p1 }
   0x5   : > { %v3636_v0 = vld [vmem:[%s4584_s1 + $0x100] sm:$0xff] (!%p140_p2)   ;;  %v3639_v3 = vld [vmem:[%s4584_s1 + $0x108] sm:$0xff] (!%p140_p2)   ;;  %v3642_v6 = vld [vmem:[%s4584_s1 + $0x110] sm:$0xff] (!%p140_p2)   ;;  %s2641_s28 = sshll.u32 (!%p140_p2), %s2636_s13, 1 }
   0x6   : > { %143 = sbr.rel (%p140_p2) target bundleno = 465 (0x1d1), region = 32  ;;  %v3637_v1 = vld [vmem:[%s4584_s1 + $0x140] sm:$0xff] (!%p140_p2)   ;;  %3091 = vmatprep.subr.bf16.mxu0 (!%p140_p2), %v3636_v0  ;;  %v3640_v4 = vld [vmem:[%s4584_s1 + $0x148] sm:$0xff] (!%p140_p2)   ;;  %v3643_v7 = vld [vmem:[%s4584_s1 + $0x150] sm:$0xff] (!%p140_p2)   ;;  %p164_p3 = scmp.lt.s32.totalorder (!%p140_p2), %s2641_s28, 3 }
   0x7   : > { %v3638_v2 = vld [vmem:[%s4584_s1 + $0xc0] sm:$0xff] (!%p140_p2)   ;;  %3403 = vmatprep.subr.bf16.mxu1 (!%p140_p2), %v3637_v1  ;;  %v3641_v5 = vld [vmem:[%s4584_s1 + $0xc8] sm:$0xff] (!%p140_p2)   ;;  %v3644_v8 = vld [vmem:[%s4584_s1 + $0xd0] sm:$0xff] (!%p140_p2)  }
   0x8   : > { %3092 = vmatpush3.bf16.msra.mxu0 (!%p140_p2), %v3638_v2  ;;  %3404 = vmatpush3.bf16.msra.mxu1 (!%p140_p2), %v3637_v1  ;;  %v3645_v9 = vld [vmem:[%s4584_s1 + $0x118] sm:$0xff] (!%p140_p2)   ;;  %v3648_v12 = vld [vmem:[%s4584_s1 + $0x120] sm:$0xff] (!%p140_p2)   ;;  %v3651_v15 = vld [vmem:[%s4584_s1 + $0x128] sm:$0xff] (!%p140_p2)  }
   0x9   : > { %3093 = vmatprep.subr.bf16.mxu0 (!%p140_p2), %v3639_v3  ;;  %3405 = vmatprep.subr.bf16.mxu1 (!%p140_p2), %v3640_v4  ;;  %v3646_v10 = vld [vmem:[%s4584_s1 + $0x158] sm:$0xff] (!%p140_p2)   ;;  %v3649_v13 = vld [vmem:[%s4584_s1 + $0x160] sm:$0xff] (!%p140_p2)   ;;  %v3652_v16 = vld [vmem:[%s4584_s1 + $0x168] sm:$0xff] (!%p140_p2)  }
   0xa   : > { %v3647_v11 = vld [vmem:[%s4584_s1 + $0xd8] sm:$0xff] (!%p140_p2)   ;;  %v3650_v14 = vld [vmem:[%s4584_s1 + $0xe0] sm:$0xff] (!%p140_p2)   ;;  %v3653_v17 = vld [vmem:[%s4584_s1 + $0xe8] sm:$0xff] (!%p140_p2)  }
   0xb   : > { %v3654_v18 = vld [vmem:[%s4584_s1 + $0x130] sm:$0xff] (!%p140_p2)   ;;  %v3657_v21 = vld [vmem:[%s4584_s1 + $0x138] sm:$0xff] (!%p140_p2)   ;;  %v3665_v31 = vld [vmem:[%s4584_s1 + $0x40] sm:$0xff] (!%p140_p2)  }
   0xc   : > { %3094 = vmatpush3.bf16.msra.mxu0 (!%p140_p2), %v3641_v5  ;;  %3406 = vmatpush3.bf16.msra.mxu1 (!%p140_p2), %v3640_v4  ;;  %v3655_v19 = vld [vmem:[%s4584_s1 + $0x170] sm:$0xff] (!%p140_p2)   ;;  %v3658_v24 = vld [vmem:[%s4584_s1 + $0x178] sm:$0xff] (!%p140_p2)   ;;  %v3666_v33 = vld [vmem:[%s4584_s1 + $0x80] sm:$0xff] (!%p140_p2)  }
   0xd   : > { %3095 = vmatprep.subr.bf16.mxu0 %v3642_v6  ;;  %3407 = vmatprep.subr.bf16.mxu1 %v3643_v7  ;;  %s4588_s28 = smov (!%p164_p3, %s2641_s28), 3  ;;  %v3656_v20 = vld [vmem:[%s4584_s1 + $0xf0] sm:$0xff]   ;;  %v3659_v28 = vld [vmem:[%s4584_s1 + $0xf8] sm:$0xff]   ;;  %v3668_v36 = vld [vmem:[%s4584_s1] sm:$0xff]  }
   0xe   : > { %s3627_s23 = smul.u32 120, %s4588_s28  ;;  %v3669_v37 = vld [vmem:[%s4584_s1 + $0x48] sm:$0xff]   ;;  %v3674_v43 = vld [vmem:[%s4584_s1 + $0x50] sm:$0xff]   ;;  %v3677_v49 = vld [vmem:[%s4584_s1 + $0x58] sm:$0xff]   ;;  %s4565_s19 = scalar_lea.vmem %s4586_s3, %s4588_s28 }
   0xf   : > { %v3670_v40 = vld [vmem:[%s4584_s1 + $0x88] sm:$0xff]   ;;  %v3675_v44 = vld [vmem:[%s4584_s1 + $0x90] sm:$0xff]   ;;  %v3678_v50 = vld [vmem:[%s4584_s1 + $0x98] sm:$0xff]  }
  0x10   : > { %3096 = vmatpush3.bf16.msra.mxu0 %v3644_v8  ;;  %3408 = vmatpush3.bf16.msra.mxu1 %v3643_v7  ;;  %s3942_s6 = scalar_lea.vmem %s4583_s0, %s3627_s23  ;;  %v3671_v42 = vld [vmem:[%s4584_s1 + $0x8] sm:$0xff]   ;;  %v3676_v45 = vld [vmem:[%s4584_s1 + $0x10] sm:$0xff]   ;;  %v3679_v52 = vld [vmem:[%s4584_s1 + $0x18] sm:$0xff]  }
  0x11   : > { %3097 = vmatprep.subr.bf16.mxu0 %v3645_v9  ;;  %3409 = vmatprep.subr.bf16.mxu1 %v3646_v10  ;;  %v3951_v22 = vld [vmem:[%s3942_s6 + $0xc] sm:$0xff]  ;;  %v3954_v23 = vld [vmem:[%s3942_s6 + $0x18] sm:$0xff]  ;;  %v3962_v26 = vld [vmem:[%s3942_s6 + $0x14] sm:$0xf] }
  0x12   : > { %v2693_v25 = vcombine.high %v3951_v22, %v3954_v23  ;;  %v3965_v27 = vld [vmem:[%s3942_s6 + $0x20] sm:$0xf]  ;;  %v3971_v29 = vld [vmem:[%s3942_s6 + $0x2c] sm:$0xf]  ;;  %v3979_v32 = vld [vmem:[%s3942_s6 + $0x38] sm:$0xf]  ;;  %v2692_v34 = vcombine.low %v3951_v22, %v3954_v23 }
  0x13   : > { %v2694_v30 = vcombine.low %v3962_v26, %v3965_v27  ;;  %v2697_v35 = vcombine.low %v3971_v29, %v3979_v32  ;;  %v3995_v38 = vld [vmem:[%s3942_s6 + $0x24] sm:$0xff]  ;;  %v3998_v39 = vld [vmem:[%s3942_s6 + $0x30] sm:$0xff]  ;;  %v4020_v47 = vld [vmem:[%s3942_s6 + $0x3c] sm:$0xff] }
  0x14   : > { %3098 = vmatpush3.bf16.msra.mxu0 %v3647_v11  ;;  %3410 = vmatpush3.bf16.msra.mxu1 %v3646_v10  ;;  %v2696_v41 = vcombine.high %v3995_v38, %v3998_v39  ;;  %v2695_v46 = vcombine.low %v3995_v38, %v3998_v39  ;;  %v4023_v48 = vld [vmem:[%s3942_s6 + $0x48] sm:$0xff]  ;;  %v3682_v53 = vld [vmem:[%s4584_s1 + $0x60] sm:$0xff]   ;;  %v4047_v57 = vld [vmem:[%s3942_s6 + $0x54] sm:$0xff] }
  0x15   : > { %3099 = vmatprep.subr.bf16.mxu0 %v3648_v12  ;;  %3411 = vmatprep.subr.bf16.mxu1 %v3649_v13  ;;  %v2699_v51 = vcombine.high %v4020_v47, %v4023_v48  ;;  %v3683_v54 = vld [vmem:[%s4584_s1 + $0xa0] sm:$0xff]   ;;  %v177_v55 = vld [vmem:[%s3942_s6 + $0x8] sm:$0xf]  ;;  %v4053_v59 = vld [vmem:[%s3942_s6 + $0x50] sm:$0xf]  ;;  %v2698_v60 = vcombine.low %v4020_v47, %v4023_v48 }
  0x16   : > { %531 = vmatprep.mubr.bf16.mxu0 %v2693_v25  ;;  %3419 = vmatprep.mubr.bf16.mxu1 %v2694_v30  ;;  %v3684_v56 = vld [vmem:[%s4584_s1 + $0x20] sm:$0xff]   ;;  %v3685_v61 = vld [vmem:[%s4584_s1 + $0x68] sm:$0xff]   ;;  %v4069_v1 = vld [vmem:[%s3942_s6 + $0x5c] sm:$0xf]  ;;  %v2730_v5 = vcombine.low %v177_v55, %v3962_v26  ;;  %v4121_v25 = vcombine.high %v3954_v23, %v3995_v38 }
  0x17   : > { %v4050_v58 = vld [vmem:[%s3942_s6 + $0x44] sm:$0xf]  ;;  %v3686_v0 = vld [vmem:[%s4584_s1 + $0xa8] sm:$0xff]   ;;  %v3691_v7 = vld [vmem:[%s4584_s1 + $0x70] sm:$0xff]  }
  0x18   : > { %3100 = vmatpush3.bf16.msra.mxu0 %v3650_v14  ;;  %3412 = vmatpush3.bf16.msra.mxu1 %v3649_v13  ;;  %v4061_v62 = vld [vmem:[%s3942_s6 + $0x60] sm:$0xff]  ;;  %v2700_v63 = vcombine.low %v4050_v58, %v4053_v59  ;;  %v241_v2 = vld [vmem:[%s3942_s6 + $0x68] sm:$0xf]  ;;  %v3692_v8 = vld [vmem:[%s4584_s1 + $0xb0] sm:$0xff]  }
  0x19   : > { %3101 = vmatprep.subr.bf16.mxu0 %v3651_v15  ;;  %3413 = vmatprep.subr.bf16.mxu1 %v3652_v16  ;;  %v2702_v3 = vcombine.high %v4047_v57, %v4061_v62  ;;  %v2703_v4 = vcombine.low %v4069_v1, %v241_v2  ;;  %v3687_v6 = vld [vmem:[%s4584_s1 + $0x28] sm:$0xff]   ;;  %v3694_v9 = vld [vmem:[%s4584_s1 + $0x30] sm:$0xff]   ;;  %v2701_v10 = vcombine.low %v4047_v57, %v4061_v62  ;;  %v176_v11 = vld [vmem:[%s3942_s6] sm:$0xff] }
  0x1a   : > { %v3695_v12 = vld [vmem:[%s4584_s1 + $0x78] sm:$0xff]   ;;  %v2729_v14 = vcombine.high %v176_v11, %v3951_v22  ;;  %v3705_v26 = vld [vmem:[%s4584_s1 + $0x188] sm:$0xff]   ;;  %v3710_v30 = vld [vmem:[%s4584_s1 + $0x190] sm:$0xff]  }
  0x1b   : > { %v3696_v13 = vld [vmem:[%s4584_s1 + $0xb8] sm:$0xff]   ;;  %v3737_v55 = vld [vmem:[%s4584_s1 + $0x108] sm:$0xff]  }
  0x1c   : > { %3102 = vmatpush3.bf16.msra.mxu0 %v3653_v17  ;;  %3414 = vmatpush3.bf16.msra.mxu1 %v3652_v16  ;;  %v3697_v15 = vld [vmem:[%s4584_s1 + $0x38] sm:$0xff]   ;;  %v3700_v16 = vld [vmem:[%s4584_s1 + $0x1c0] sm:$0xff]  }
  0x1d   : > { %3103 = vmatprep.subr.bf16.mxu0 %v3654_v18  ;;  %3415 = vmatprep.subr.bf16.mxu1 %v3655_v19  ;;  %v3701_v17 = vld [vmem:[%s4584_s1 + $0x200] sm:$0xff]   ;;  %v2733_v18 = vcombine.low %v3965_v27, %v3971_v29  ;;  %v3708_v27 = vld [vmem:[%s4584_s1 + $0x1d0] sm:$0xff]   ;;  %v4137_v29 = vcombine.low %v3954_v23, %v3995_v38  ;;  %v3712_v23 = vld [vmem:[%s4584_s1 + $0x218] sm:$0xff]   ;;  %v4168_v38 = vcombine.low %v3998_v39, %v4020_v47 }
  0x1e   : > { %v3747_v2 = vld [vmem:[%s4584_s1 + $0xd8] sm:$0xff]  }
  0x20   : > { %3104 = vmatpush3.bf16.msra.mxu0 %v3656_v20  ;;  %3416 = vmatpush3.bf16.msra.mxu1 %v3655_v19  ;;  %v2728_v19 = vcombine.low %v176_v11, %v3951_v22  ;;  %v3702_v20 = vld [vmem:[%s4584_s1 + $0x180] sm:$0xff]   ;;  %v2736_v22 = vcombine.low %v3979_v32, %v4050_v58  ;;  %v3711_v32 = vld [vmem:[%s4584_s1 + $0x1d8] sm:$0xff]   ;;  %v3739_v58 = vld [vmem:[%s4584_s1 + $0xc8] sm:$0xff]  }
  0x21   : > { %3105 = vmatprep.subr.bf16.mxu0 %v3657_v21  ;;  %3417 = vmatprep.subr.bf16.mxu1 %v3658_v24  ;;  %v3703_v21 = vld [vmem:[%s4584_s1 + $0x1c8] sm:$0xff]  }
  0x22   : > { %v3752_v11 = vld [vmem:[%s4584_s1 + $0x168] sm:$0xff]  }
  0x24   : > { %3106 = vmatpush3.bf16.msra.mxu0 %v3659_v28  ;;  %3418 = vmatpush3.bf16.msra.mxu1 %v3658_v24  ;;  %v3704_v24 = vld [vmem:[%s4584_s1 + $0x208] sm:$0xff]   ;;  %v3709_v28 = vld [vmem:[%s4584_s1 + $0x210] sm:$0xff]  }
  0x25   : > { %3143 = vmatprep.subr.bf16.mxu0 %v3665_v31  ;;  %3427 = vmatprep.subr.bf16.mxu1 %v3666_v33  ;;  %v2739_v31 = vcombine.low %v4053_v59, %v4069_v1  ;;  %v3742_v59 = vld [vmem:[%s4584_s1 + $0x110] sm:$0xff]   ;;  %v3746_v1 = vld [vmem:[%s4584_s1 + $0x158] sm:$0xff]  }
  0x27   : > { %532 = vmatmul.mubr.bf16.vlgmr.msra.gmra.mrb[0].mxu0 %v2692_v34  ;;  %3420 = vmatmul.mubr.bf16.vlgmr.msra.gmra.mrb[0].mxu1 %v2697_v35  ;;  %v3713_v34 = vld [vmem:[%s4584_s1 + $0x198] sm:$0xff]   ;;  %v3716_v35 = vld [vmem:[%s4584_s1 + $0x1e0] sm:$0xff]  }
  0x28   : > { %3144 = vmatpush3.bf16.msra.mxu0 %v3668_v36  ;;  %3428 = vmatpush3.bf16.msra.mxu1 %v3666_v33  ;;  %v4152_v33 = vcombine.high %v3998_v39, %v4020_v47  ;;  %v3717_v36 = vld [vmem:[%s4584_s1 + $0x220] sm:$0xff]   ;;  %v4181_v39 = vcombine.high %v4023_v48, %v4047_v57  ;;  %v3728_v47 = vld [vmem:[%s4584_s1 + $0x1b0] sm:$0xff]  }
  0x29   : > { %3145 = vmatprep.subr.bf16.mxu0 %v3669_v37  ;;  %3429 = vmatprep.subr.bf16.mxu1 %v3670_v40  ;;  %v3732_v37 = vld [vmem:[%s3942_s6 + $0x20] ss:$12 sps:$4 sm:$0xff]  }
  0x2a   : > { %539 = vmatprep.mubr.bf16.mxu0 %v2696_v41  ;;  %3423 = vmatprep.mubr.bf16.mxu1 %v2700_v63  ;;  %v3719_v41 = vld [vmem:[%s4584_s1 + $0x1e8] sm:$0xff]   ;;  %v3744_v63 = vld [vmem:[%s4584_s1 + $0xd0] sm:$0xff]  }
  0x2c   : > { %3146 = vmatpush3.bf16.msra.mxu0 %v3671_v42  ;;  %3430 = vmatpush3.bf16.msra.mxu1 %v3670_v40  ;;  %v3718_v40 = vld [vmem:[%s4584_s1 + $0x1a0] sm:$0xff]   ;;  %v3720_v42 = vld [vmem:[%s4584_s1 + $0x228] sm:$0xff]  }
  0x2d   : > { %3147 = vmatprep.subr.bf16.mxu0 %v3674_v43  ;;  %3431 = vmatprep.subr.bf16.mxu1 %v3675_v44  ;;  %v3721_v43 = vld [vmem:[%s4584_s1 + $0x1a8] sm:$0xff]  }
  0x2f   : > { %540 = vmatmul.mubr.bf16.gmra.mrb[4].mxu0 %v2695_v46  ;;  %3424 = vmatmul.mubr.bf16.gmra.mrb[4].mxu1 %v2703_v4  ;;  %v4196_v46 = vcombine.low %v4023_v48, %v4047_v57  ;;  %v3731_v48 = vld [vmem:[%s4584_s1 + $0x1b8] sm:$0xff]  }
  0x30   : > { %3148 = vmatpush3.bf16.msra.mxu0 %v3676_v45  ;;  %3432 = vmatpush3.bf16.msra.mxu1 %v3675_v44  ;;  %v3726_v44 = vld [vmem:[%s4584_s1 + $0x1f0] sm:$0xff]   ;;  %v4258_v4 = vld [vmem:[%s3942_s6 + $0x98] sm:$0xf] }
  0x31   : > { %3149 = vmatprep.subr.bf16.mxu0 %v3677_v49  ;;  %3433 = vmatprep.subr.bf16.mxu1 %v3678_v50  ;;  %v3727_v45 = vld [vmem:[%s4584_s1 + $0x230] sm:$0xff]   ;;  %v3729_v49 = vld [vmem:[%s4584_s1 + $0x1f8] sm:$0xff]  }
  0x32   : > { %547 = vmatprep.mubr.bf16.mxu0 %v2699_v51  ;;  %3443 = vmatprep.mubr.bf16.mxu1 %v2730_v5  ;;  %v3734_v51 = vld [vmem:[%s4584_s1 + $0x100] sm:$0xff]   ;;  %v3740_v57 = vld [vmem:[%s3942_s6 + $0x50] ss:$12 sps:$4 sm:$0xff]  }
  0x33   : > { %v3748_v5 = vld [vmem:[%s4584_s1 + $0x120] sm:$0xff]  }
  0x34   : > { %3150 = vmatpush3.bf16.msra.mxu0 %v3679_v52  ;;  %3434 = vmatpush3.bf16.msra.mxu1 %v3678_v50  ;;  %v3730_v50 = vld [vmem:[%s4584_s1 + $0x238] sm:$0xff]   ;;  %v3735_v52 = vld [vmem:[%s4584_s1 + $0x140] sm:$0xff]  }
  0x35   : > { %3151 = vmatprep.subr.bf16.mxu0 %v3682_v53  ;;  %3435 = vmatprep.subr.bf16.mxu1 %v3683_v54  ;;  %v3733_v53 = vld [vmem:[%s3942_s6 + $0x38] ss:$12 sps:$4 sm:$0xff]  }
  0x37   : > { %548 = vmatmul.mubr.bf16.gmra.mrb[8].mxu0 %v2698_v60  ;;  %v3743_v60 = vld [vmem:[%s4584_s1 + $0x150] sm:$0xff]  }
  0x38   : > { %3152 = vmatpush3.bf16.msra.mxu0 %v3684_v56  ;;  %3436 = vmatpush3.bf16.msra.mxu1 %v3683_v54  ;;  %v3736_v54 = vld [vmem:[%s4584_s1 + $0xc0] sm:$0xff]   ;;  %v3738_v56 = vld [vmem:[%s4584_s1 + $0x148] sm:$0xff]  }
  0x39   : > { %3153 = vmatprep.subr.bf16.mxu0 %v3685_v61  ;;  %3437 = vmatprep.subr.bf16.mxu1 %v3686_v0  ;;  %v3741_v61 = vld [vmem:[%s3942_s6 + $0x68] ss:$12 sps:$4 sm:$0xff]  }
  0x3a   : > { %555 = vmatprep.mubr.bf16.mxu0 %v2702_v3  ;;  %v4255_v3 = vld [vmem:[%s3942_s6 + $0x8c] sm:$0xf] }
  0x3c   : > { %3154 = vmatpush3.bf16.msra.mxu0 %v3687_v6  ;;  %3438 = vmatpush3.bf16.msra.mxu1 %v3686_v0  ;;  %v3745_v0 = vld [vmem:[%s4584_s1 + $0x118] sm:$0xff]   ;;  %v2917_v6 = vcombine.low %v4255_v3, %v4258_v4 }
  0x3d   : > { %3155 = vmatprep.subr.bf16.mxu0 %v3691_v7  ;;  %3439 = vmatprep.subr.bf16.mxu1 %v3692_v8  ;;  %v3749_v7 = vld [vmem:[%s4584_s1 + $0x160] sm:$0xff]  }
  0x3f   : > { %556 = vmatmul.mubr.bf16.gmra.mrb[12].mxu0 %v2701_v10  ;;  %v3751_v10 = vld [vmem:[%s4584_s1 + $0x128] sm:$0xff]  }
  0x40   : > { %3156 = vmatpush3.bf16.msra.mxu0 %v3694_v9  ;;  %3440 = vmatpush3.bf16.msra.mxu1 %v3692_v8  ;;  %v3750_v8 = vld [vmem:[%s4584_s1 + $0xe0] sm:$0xff]   ;;  %v946_v9 = vld [vmem:[%s3942_s6 + $0x6c] sm:$0xff] }
  0x41   : > { %3157 = vmatprep.subr.bf16.mxu0 %v3695_v12  ;;  %3441 = vmatprep.subr.bf16.mxu1 %v3696_v13  ;;  %v2822_v12 = vcombine.high %v4061_v62, %v946_v9 }
  0x42   : > { %834 = vmatprep.mubr.bf16.mxu0 %v2729_v14  ;;  %v3756_v14 = vld [vmem:[%s4584_s1 + $0x130] sm:$0xff]  }
  0x44   : > { %3158 = vmatpush3.bf16.msra.mxu0 %v3697_v15  ;;  %3442 = vmatpush3.bf16.msra.mxu1 %v3696_v13  ;;  %v3753_v13 = vld [vmem:[%s4584_s1 + $0xe8] sm:$0xff]   ;;  %v3757_v15 = vld [vmem:[%s4584_s1 + $0x170] sm:$0xff]  }
  0x45   : > { %3195 = vmatprep.subr.bf16.mxu0 %v3700_v16  ;;  %3451 = vmatprep.subr.bf16.mxu1 %v3701_v17  ;;  %v4291_v16 = vld [vmem:[%s3942_s6 + $0x84] sm:$0xff] }
  0x47   : > { %835 = vmatmul.mubr.bf16.vlgmr.msra.gmra.mrb[16].mxu0 %v2728_v19  ;;  %3444 = vmatmul.mubr.bf16.vlgmr.msra.gmra.mrb[0].mxu1 %v2733_v18  ;;  %v4295_v18 = vld [vmem:[%s3942_s6 + $0x90] sm:$0xff] }
  0x48   : > { %3196 = vmatpush3.bf16.msra.mxu0 %v3702_v20  ;;  %3452 = vmatpush3.bf16.msra.mxu1 %v3701_v17  ;;  %v2821_v17 = vcombine.low %v4061_v62, %v946_v9  ;;  %v3758_v19 = vld [vmem:[%s4584_s1 + $0xf0] sm:$0xff]   ;;  %v3759_v20 = vld [vmem:[%s4584_s1 + $0x138] sm:$0xff]  }
  0x49   : > { %3197 = vmatprep.subr.bf16.mxu0 %v3703_v21  ;;  %3453 = vmatprep.subr.bf16.mxu1 %v3704_v24  ;;  %v3760_v21 = vld [vmem:[%s4584_s1 + $0x178] sm:$0xff]  }
  0x4a   : > { %842 = vmatprep.mubr.bf16.mxu0 %v4121_v25  ;;  %3447 = vmatprep.mubr.bf16.mxu1 %v2736_v22  ;;  %v3761_v62 = vld [vmem:[%s4584_s1 + $0xf8] sm:$0xff]   ;;  %v4315_v22 = vld [vmem:[%s3942_s6 + $0xb0] sm:$0xf] }
  0x4c   : > { %3198 = vmatpush3.bf16.msra.mxu0 %v3705_v26  ;;  %3454 = vmatpush3.bf16.msra.mxu1 %v3704_v24  ;;  %v2916_v24 = vcombine.high %v4291_v16, %v4295_v18  ;;  %v3767_v26 = vld [vmem:[%s4584_s1 + $0x40] sm:$0xff]  }
  0x4d   : > { %3199 = vmatprep.subr.bf16.mxu0 %v3708_v27  ;;  %3455 = vmatprep.subr.bf16.mxu1 %v3709_v28  ;;  %v3768_v27 = vld [vmem:[%s4584_s1 + $0x80] sm:$0xff]  }
  0x4f   : > { %843 = vmatmul.mubr.bf16.gmra.mrb[20].mxu0 %v4137_v29  ;;  %3448 = vmatmul.mubr.bf16.gmra.mrb[4].mxu1 %v2739_v31  ;;  %v4331_v31 = vld [vmem:[%s3942_s6 + $0x9c] sm:$0xff] }
  0x50   : > { %3200 = vmatpush3.bf16.msra.mxu0 %v3710_v30  ;;  %3456 = vmatpush3.bf16.msra.mxu1 %v3709_v28  ;;  %v3769_v28 = vld [vmem:[%s4584_s1] sm:$0xff]  }
  0x51   : > { %3201 = vmatprep.subr.bf16.mxu0 %v3711_v32  ;;  %3457 = vmatprep.subr.bf16.mxu1 %v3712_v23  ;;  %v4334_v32 = vld [vmem:[%s3942_s6 + $0xa8] sm:$0xff] }
  0x52   : > { %850 = vmatprep.mubr.bf16.mxu0 %v4152_v33  ;;  %3467 = vmatprep.mubr.bf16.mxu1 %v3732_v37  ;;  %v2919_v37 = vcombine.high %v4331_v31, %v4334_v32 }
  0x54   : > { %3202 = vmatpush3.bf16.msra.mxu0 %v3713_v34  ;;  %3458 = vmatpush3.bf16.msra.mxu1 %v3712_v23  ;;  %v3770_v23 = vld [vmem:[%s4584_s1 + $0x48] sm:$0xff]  }
  0x55   : > { %3203 = vmatprep.subr.bf16.mxu0 %v3716_v35  ;;  %3459 = vmatprep.subr.bf16.mxu1 %v3717_v36  ;;  %v4343_v34 = vld [vmem:[%s3942_s6 + $0xc8] sm:$0xf] }
  0x56   : > { %v3771_v35 = vld [vmem:[%s4584_s1 + $0x88] sm:$0xff]  }
  0x57   : > { %851 = vmatmul.mubr.bf16.gmra.mrb[24].mxu0 %v4168_v38 }
  0x58   : > { %3204 = vmatpush3.bf16.msra.mxu0 %v3718_v40  ;;  %3460 = vmatpush3.bf16.msra.mxu1 %v3717_v36  ;;  %v3772_v36 = vld [vmem:[%s4584_s1 + $0x8] sm:$0xff]   ;;  %v3775_v40 = vld [vmem:[%s4584_s1 + $0x50] sm:$0xff]  }
  0x59   : > { %3205 = vmatprep.subr.bf16.mxu0 %v3719_v41  ;;  %3461 = vmatprep.subr.bf16.mxu1 %v3720_v42  ;;  %v4359_v41 = vld [vmem:[%s3942_s6 + $0xd4] sm:$0xf] }
  0x5a   : > { %858 = vmatprep.mubr.bf16.mxu0 %v4181_v39 }
  0x5c   : > { %3206 = vmatpush3.bf16.msra.mxu0 %v3721_v43  ;;  %3462 = vmatpush3.bf16.msra.mxu1 %v3720_v42  ;;  %v2866_v42 = vld [vmem:[%s3942_s6 + $0xe0] sm:$0xf]  ;;  %v3777_v43 = vld [vmem:[%s4584_s1 + $0x10] sm:$0xff]  }
  0x5d   : > { %3207 = vmatprep.subr.bf16.mxu0 %v3726_v44  ;;  %3463 = vmatprep.subr.bf16.mxu1 %v3727_v45  ;;  %v2918_v44 = vcombine.low %v4331_v31, %v4334_v32 }
  0x5f   : > { %859 = vmatmul.mubr.bf16.gmra.mrb[28].mxu0 %v4196_v46 }
  0x60   : > { %3208 = vmatpush3.bf16.msra.mxu0 %v3728_v47  ;;  %3464 = vmatpush3.bf16.msra.mxu1 %v3727_v45  ;;  %v3778_v45 = vld [vmem:[%s4584_s1 + $0x58] sm:$0xff]   ;;  %v4377_v47 = vld [vmem:[%s3942_s6 + $0xc0] sm:$0xff] }
  0x61   : > { %3209 = vmatprep.subr.bf16.mxu0 %v3729_v49  ;;  %3465 = vmatprep.subr.bf16.mxu1 %v3730_v50  ;;  %v2926_v49 = vcombine.low %v4359_v41, %v2866_v42  ;;  %v3831_v42 = vld [vmem:[%s4584_s1 + $0x1f8] sm:$0xff]  }
  0x62   : > { %1237 = vmatprep.mubr.bf16.mxu0 %v4121_v25  ;;  %v4312_v25 = vld [vmem:[%s3942_s6 + $0xa4] sm:$0xf] }
  0x63   : > { %v2920_v30 = vcombine.low %v4312_v25, %v4315_v22 }
  0x64   : > { %3210 = vmatpush3.bf16.msra.mxu0 %v3731_v48  ;;  %3466 = vmatpush3.bf16.msra.mxu1 %v3730_v50  ;;  %v2850_v50 = vld [vmem:[%s3942_s6 + $0x80] sm:$0xf]  ;;  %v3779_v48 = vld [vmem:[%s4584_s1 + $0x98] sm:$0xff]  }
  0x65   : > { %3247 = vmatprep.subr.bf16.mxu0 %v3734_v51  ;;  %3475 = vmatprep.subr.bf16.mxu1 %v3735_v52 }
  0x67   : > { %1238 = vmatmul.mubr.bf16.vlgmr.msra.gmra.mrb[32].mxu0 %v4137_v29  ;;  %3468 = vmatmul.mubr.bf16.vlgmr.msra.gmra.mrb[0].mxu1 %v3733_v53  ;;  %v2915_v29 = vcombine.low %v4291_v16, %v4295_v18  ;;  %v3780_v53 = vld [vmem:[%s4584_s1 + $0x18] sm:$0xff]  }
  0x68   : > { %3248 = vmatpush3.bf16.msra.mxu0 %v3736_v54  ;;  %3476 = vmatpush3.bf16.msra.mxu1 %v3735_v52  ;;  %v2953_v52 = vcombine.low %v2850_v50, %v4255_v3  ;;  %v3783_v54 = vld [vmem:[%s4584_s1 + $0x60] sm:$0xff]   ;;  %v3795_v3 = vld [vmem:[%s4584_s1 + $0x30] sm:$0xff]  }
  0x69   : > { %3249 = vmatprep.subr.bf16.mxu0 %v3737_v55  ;;  %3477 = vmatprep.subr.bf16.mxu1 %v3738_v56  ;;  %v3784_v55 = vld [vmem:[%s4584_s1 + $0xa0] sm:$0xff]  }
  0x6a   : > { %1245 = vmatprep.mubr.bf16.mxu0 %v4152_v33  ;;  %3471 = vmatprep.mubr.bf16.mxu1 %v3740_v57  ;;  %v4340_v33 = vld [vmem:[%s3942_s6 + $0xbc] sm:$0xf]  ;;  %v4400_v57 = vld [vmem:[%s3942_s6 + $0xcc] sm:$0xff] }
  0x6c   : > { %3250 = vmatpush3.bf16.msra.mxu0 %v3739_v58  ;;  %3478 = vmatpush3.bf16.msra.mxu1 %v3738_v56  ;;  %v3785_v56 = vld [vmem:[%s4584_s1 + $0x20] sm:$0xff]  }
  0x6d   : > { %3251 = vmatprep.subr.bf16.mxu0 %v3742_v59  ;;  %3479 = vmatprep.subr.bf16.mxu1 %v3743_v60  ;;  %v4405_v59 = vld [vmem:[%s3942_s6 + $0xd8] sm:$0xff] }
  0x6f   : > { %1246 = vmatmul.mubr.bf16.gmra.mrb[36].mxu0 %v4168_v38  ;;  %3472 = vmatmul.mubr.bf16.gmra.mrb[4].mxu1 %v3741_v61  ;;  %v2923_v38 = vcombine.low %v4340_v33, %v4343_v34  ;;  %v3787_v61 = vld [vmem:[%s4584_s1 + $0xa8] sm:$0xff]  }
  0x70   : > { %3252 = vmatpush3.bf16.msra.mxu0 %v3744_v63  ;;  %3480 = vmatpush3.bf16.msra.mxu1 %v3743_v60  ;;  %v3786_v60 = vld [vmem:[%s4584_s1 + $0x68] sm:$0xff]   ;;  %v2925_v63 = vcombine.high %v4400_v57, %v4405_v59 }
  0x71   : > { %3253 = vmatprep.subr.bf16.mxu0 %v3745_v0  ;;  %3481 = vmatprep.subr.bf16.mxu1 %v3746_v1  ;;  %v3788_v0 = vld [vmem:[%s4584_s1 + $0x28] sm:$0xff]  }
  0x72   : > { %1253 = vmatprep.mubr.bf16.mxu0 %v4181_v39  ;;  %3491 = vmatprep.mubr.bf16.mxu1 %v2917_v6  ;;  %v3776_v39 = vld [vmem:[%s4584_s1 + $0x90] sm:$0xff]   ;;  %v2849_v6 = vld [vmem:[%s3942_s6 + $0x78] sm:$0xff] }
  0x73   : > { %v2952_v9 = vcombine.high %v2849_v6, %v4291_v16 }
  0x74   : > { %3254 = vmatpush3.bf16.msra.mxu0 %v3747_v2  ;;  %3482 = vmatpush3.bf16.msra.mxu1 %v3746_v1  ;;  %v3792_v1 = vld [vmem:[%s4584_s1 + $0x70] sm:$0xff]  }
  0x75   : > { %3255 = vmatprep.subr.bf16.mxu0 %v3748_v5  ;;  %3483 = vmatprep.subr.bf16.mxu1 %v3749_v7  ;;  %v3793_v2 = vld [vmem:[%s4584_s1 + $0xb0] sm:$0xff]   ;;  %v2924_v5 = vcombine.low %v4400_v57, %v4405_v59 }
  0x77   : > { %1254 = vmatmul.mubr.bf16.gmra.mrb[40].mxu0 %v4196_v46  ;;  %v4374_v46 = vld [vmem:[%s3942_s6 + $0xb4] sm:$0xff] }
  0x78   : > { %3256 = vmatpush3.bf16.msra.mxu0 %v3750_v8  ;;  %3484 = vmatpush3.bf16.msra.mxu1 %v3749_v7  ;;  %v2922_v51 = vcombine.high %v4374_v46, %v4377_v47  ;;  %v2921_v58 = vcombine.low %v4374_v46, %v4377_v47  ;;  %v3796_v7 = vld [vmem:[%s4584_s1 + $0x78] sm:$0xff]  }
  0x79   : > { %3257 = vmatprep.subr.bf16.mxu0 %v3751_v10  ;;  %3485 = vmatprep.subr.bf16.mxu1 %v3752_v11  ;;  %v3797_v8 = vld [vmem:[%s4584_s1 + $0xb8] sm:$0xff]  }
  0x7a   : > { %1261 = vmatprep.mubr.bf16.mxu0 %v2822_v12  ;;  %v3798_v10 = vld [vmem:[%s4584_s1 + $0x38] sm:$0xff]   ;;  %v3803_v12 = vld [vmem:[%s4584_s1 + $0x200] sm:$0xff]  }
  0x7c   : > { %3258 = vmatpush3.bf16.msra.mxu0 %v3753_v13  ;;  %3486 = vmatpush3.bf16.msra.mxu1 %v3752_v11  ;;  %v3802_v11 = vld [vmem:[%s4584_s1 + $0x1c0] sm:$0xff]   ;;  %v2956_v13 = vcombine.low %v4258_v4, %v4312_v25  ;;  %v4460_v4 = vcombine.high %v4295_v18, %v4331_v31  ;;  %v2962_v25 = vcombine.low %v4343_v34, %v4359_v41  ;;  %v3821_v34 = vld [vmem:[%s4584_s1 + $0x1e8] sm:$0xff]   ;;  %v3830_v41 = vld [vmem:[%s4584_s1 + $0x1b0] sm:$0xff]  }
  0x7d   : > { %3259 = vmatprep.subr.bf16.mxu0 %v3756_v14  ;;  %3487 = vmatprep.subr.bf16.mxu1 %v3757_v15  ;;  %v2951_v14 = vcombine.low %v2849_v6, %v4291_v16  ;;  %v2959_v16 = vcombine.low %v4315_v22, %v4340_v33  ;;  %v3812_v22 = vld [vmem:[%s4584_s1 + $0x190] sm:$0xff]   ;;  %v3820_v33 = vld [vmem:[%s4584_s1 + $0x1a0] sm:$0xff]  }
  0x7f   : > { %1262 = vmatmul.mubr.bf16.gmra.mrb[44].mxu0 %v2821_v17  ;;  %v3805_v17 = vld [vmem:[%s4584_s1 + $0x1c8] sm:$0xff]  }
  0x80   : > { %3260 = vmatpush3.bf16.msra.mxu0 %v3758_v19  ;;  %3488 = vmatpush3.bf16.msra.mxu1 %v3757_v15  ;;  %v3804_v15 = vld [vmem:[%s4584_s1 + $0x180] sm:$0xff]   ;;  %v3806_v19 = vld [vmem:[%s4584_s1 + $0x208] sm:$0xff]  }
  0x81   : > { %3261 = vmatprep.subr.bf16.mxu0 %v3759_v20  ;;  %3489 = vmatprep.subr.bf16.mxu1 %v3760_v21  ;;  %v3807_v20 = vld [vmem:[%s4584_s1 + $0x188] sm:$0xff]  }
  0x82   : > { %1736 = vmatprep.mubr.bf16.mxu0 %v2916_v24  ;;  %v2954_v24 = vcombine.low %v4295_v18, %v4331_v31  ;;  %v2958_v18 = vcombine.high %v4334_v32, %v4374_v46  ;;  %v3819_v31 = vld [vmem:[%s4584_s1 + $0x220] sm:$0xff]  }
  0x84   : > { %3262 = vmatpush3.bf16.msra.mxu0 %v3761_v62  ;;  %3490 = vmatpush3.bf16.msra.mxu1 %v3760_v21  ;;  %v3810_v21 = vld [vmem:[%s4584_s1 + $0x1d0] sm:$0xff]  }
  0x85   : > { %3299 = vmatprep.subr.bf16.mxu0 %v3767_v26  ;;  %3499 = vmatprep.subr.bf16.mxu1 %v3768_v27  ;;  %v3811_v62 = vld [vmem:[%s4584_s1 + $0x210] sm:$0xff]   ;;  %v3813_v26 = vld [vmem:[%s4584_s1 + $0x1d8] sm:$0xff]  }
  0x87   : > { %1737 = vmatmul.mubr.bf16.vlgmr.msra.gmra.mrb[48].mxu0 %v2915_v29  ;;  %3492 = vmatmul.mubr.bf16.vlgmr.msra.gmra.mrb[8].mxu1 %v2920_v30  ;;  %v3815_v29 = vld [vmem:[%s4584_s1 + $0x198] sm:$0xff]   ;;  %v3818_v30 = vld [vmem:[%s4584_s1 + $0x1e0] sm:$0xff]  }
  0x88   : > { %3300 = vmatpush3.bf16.msra.mxu0 %v3769_v28  ;;  %3500 = vmatpush3.bf16.msra.mxu1 %v3768_v27  ;;  %v3814_v27 = vld [vmem:[%s4584_s1 + $0x218] sm:$0xff]  }
  0x89   : > { %3301 = vmatprep.subr.bf16.mxu0 %v3770_v23  ;;  %3501 = vmatprep.subr.bf16.mxu1 %v3771_v35  ;;  %v3834_v28 = vld [vmem:[%s3942_s6 + $0x98] ss:$12 sps:$4 sm:$0xff]   ;;  %v2957_v23 = vcombine.low %v4334_v32, %v4374_v46  ;;  %v3823_v32 = vld [vmem:[%s4584_s1 + $0x1a8] sm:$0xff]  }
  0x8a   : > { %1744 = vmatprep.mubr.bf16.mxu0 %v2919_v37  ;;  %3495 = vmatprep.mubr.bf16.mxu1 %v2923_v38  ;;  %v3828_v37 = vld [vmem:[%s4584_s1 + $0x1f0] sm:$0xff]   ;;  %v3837_v46 = vld [vmem:[%s3942_s6 + $0xe0] ss:$12 sps:$4 sm:$0xff]  }
  0x8b   : > { %v3829_v38 = vld [vmem:[%s4584_s1 + $0x230] sm:$0xff]  }
  0x8c   : > { %3302 = vmatpush3.bf16.msra.mxu0 %v3772_v36  ;;  %3502 = vmatpush3.bf16.msra.mxu1 %v3771_v35  ;;  %v3822_v35 = vld [vmem:[%s4584_s1 + $0x228] sm:$0xff]   ;;  %v2961_v36 = vcombine.high %v4377_v47, %v4400_v57 }
  0x8d   : > { %3303 = vmatprep.subr.bf16.mxu0 %v3775_v40  ;;  %3503 = vmatprep.subr.bf16.mxu1 %v3776_v39  ;;  %v2960_v40 = vcombine.low %v4377_v47, %v4400_v57  ;;  %v3001_v47 = vld [vmem:[%s3942_s6 + $0xe4] sm:$0xff] }
  0x8e   : > { %v3060_v50 = vcombine.low %v4405_v59, %v3001_v47 }
  0x8f   : > { %1745 = vmatmul.mubr.bf16.gmra.mrb[52].mxu0 %v2918_v44  ;;  %3496 = vmatmul.mubr.bf16.gmra.mrb[12].mxu1 %v2926_v49  ;;  %v3835_v44 = vld [vmem:[%s3942_s6 + $0xb0] ss:$12 sps:$4 sm:$0xff]   ;;  %v3061_v49 = vcombine.high %v4405_v59, %v3001_v47 }
  0x90   : > { %3304 = vmatpush3.bf16.msra.mxu0 %v3777_v43  ;;  %3504 = vmatpush3.bf16.msra.mxu1 %v3776_v39  ;;  %v3832_v39 = vld [vmem:[%s4584_s1 + $0x238] sm:$0xff]  }
  0x91   : > { %3305 = vmatprep.subr.bf16.mxu0 %v3778_v45  ;;  %3505 = vmatprep.subr.bf16.mxu1 %v3779_v48  ;;  %v3833_v43 = vld [vmem:[%s4584_s1 + $0x1b8] sm:$0xff]   ;;  %v3836_v45 = vld [vmem:[%s3942_s6 + $0xc8] ss:$12 sps:$4 sm:$0xff]  }
  0x92   : > { %1752 = vmatprep.mubr.bf16.mxu0 %v2922_v51  ;;  %3515 = vmatprep.mubr.bf16.mxu1 %v2953_v52 }
  0x94   : > { %3306 = vmatpush3.bf16.msra.mxu0 %v3780_v53  ;;  %3506 = vmatpush3.bf16.msra.mxu1 %v3779_v48 }
  0x95   : > { %3307 = vmatprep.subr.bf16.mxu0 %v3783_v54  ;;  %3507 = vmatprep.subr.bf16.mxu1 %v3784_v55 }
  0x97   : > { %1753 = vmatmul.mubr.bf16.gmra.mrb[56].mxu0 %v2921_v58 }
  0x98   : > { %3308 = vmatpush3.bf16.msra.mxu0 %v3785_v56  ;;  %3508 = vmatpush3.bf16.msra.mxu1 %v3784_v55 }
  0x99   : > { %3309 = vmatprep.subr.bf16.mxu0 %v3786_v60  ;;  %3509 = vmatprep.subr.bf16.mxu1 %v3787_v61 }
  0x9a   : > { %1760 = vmatprep.mubr.bf16.mxu0 %v2925_v63 }
  0x9c   : > { %3310 = vmatpush3.bf16.msra.mxu0 %v3788_v0  ;;  %3510 = vmatpush3.bf16.msra.mxu1 %v3787_v61 }
  0x9d   : > { %3311 = vmatprep.subr.bf16.mxu0 %v3792_v1  ;;  %3511 = vmatprep.subr.bf16.mxu1 %v3793_v2 }
  0x9f   : > { %1761 = vmatmul.mubr.bf16.gmra.mrb[60].mxu0 %v2924_v5 }
  0xa0   : > { %3312 = vmatpush3.bf16.msra.mxu0 %v3795_v3  ;;  %3512 = vmatpush3.bf16.msra.mxu1 %v3793_v2 }
  0xa1   : > { %3313 = vmatprep.subr.bf16.mxu0 %v3796_v7  ;;  %3513 = vmatprep.subr.bf16.mxu1 %v3797_v8 }
  0xa2   : > { %2039 = vmatprep.mubr.bf16.mxu0 %v2952_v9 }
  0xa4   : > { %3314 = vmatpush3.bf16.msra.mxu0 %v3798_v10  ;;  %3514 = vmatpush3.bf16.msra.mxu1 %v3797_v8 }
  0xa5   : > { %3351 = vmatprep.subr.bf16.mxu0 %v3802_v11  ;;  %3523 = vmatprep.subr.bf16.mxu1 %v3803_v12 }
  0xa7   : > { %2040 = vmatmul.mubr.bf16.vlgmr.msra.gmra.mrb[64].mxu0 %v2951_v14  ;;  %3516 = vmatmul.mubr.bf16.vlgmr.msra.gmra.mrb[8].mxu1 %v2956_v13 }
  0xa8   : > { %3352 = vmatpush3.bf16.msra.mxu0 %v3804_v15  ;;  %3524 = vmatpush3.bf16.msra.mxu1 %v3803_v12 }
  0xa9   : > { %3353 = vmatprep.subr.bf16.mxu0 %v3805_v17  ;;  %3525 = vmatprep.subr.bf16.mxu1 %v3806_v19 }
  0xaa   : > { %2047 = vmatprep.mubr.bf16.mxu0 %v4460_v4  ;;  %3519 = vmatprep.mubr.bf16.mxu1 %v2959_v16 }
  0xac   : > { %3354 = vmatpush3.bf16.msra.mxu0 %v3807_v20  ;;  %3526 = vmatpush3.bf16.msra.mxu1 %v3806_v19 }
  0xad   : > { %3355 = vmatprep.subr.bf16.mxu0 %v3810_v21  ;;  %3527 = vmatprep.subr.bf16.mxu1 %v3811_v62 }
  0xaf   : > { %2048 = vmatmul.mubr.bf16.gmra.mrb[68].mxu0 %v2954_v24  ;;  %3520 = vmatmul.mubr.bf16.gmra.mrb[12].mxu1 %v2962_v25 }
  0xb0   : > { %3356 = vmatpush3.bf16.msra.mxu0 %v3812_v22  ;;  %3528 = vmatpush3.bf16.msra.mxu1 %v3811_v62 }
  0xb1   : > { %3357 = vmatprep.subr.bf16.mxu0 %v3813_v26  ;;  %3529 = vmatprep.subr.bf16.mxu1 %v3814_v27 }
  0xb2   : > { %2055 = vmatprep.mubr.bf16.mxu0 %v2958_v18  ;;  %3539 = vmatprep.mubr.bf16.mxu1 %v3834_v28 }
  0xb4   : > { %3358 = vmatpush3.bf16.msra.mxu0 %v3815_v29  ;;  %3530 = vmatpush3.bf16.msra.mxu1 %v3814_v27 }
  0xb5   : > { %3359 = vmatprep.subr.bf16.mxu0 %v3818_v30  ;;  %3531 = vmatprep.subr.bf16.mxu1 %v3819_v31 }
  0xb7   : > { %2056 = vmatmul.mubr.bf16.gmra.mrb[72].mxu0 %v2957_v23 }
  0xb8   : > { %3360 = vmatpush3.bf16.msra.mxu0 %v3820_v33  ;;  %3532 = vmatpush3.bf16.msra.mxu1 %v3819_v31 }
  0xb9   : > { %3361 = vmatprep.subr.bf16.mxu0 %v3821_v34  ;;  %3533 = vmatprep.subr.bf16.mxu1 %v3822_v35 }
  0xba   : > { %2063 = vmatprep.mubr.bf16.mxu0 %v2961_v36 }
  0xbc   : > { %3362 = vmatpush3.bf16.msra.mxu0 %v3823_v32  ;;  %3534 = vmatpush3.bf16.msra.mxu1 %v3822_v35 }
  0xbd   : > { %3363 = vmatprep.subr.bf16.mxu0 %v3828_v37  ;;  %3535 = vmatprep.subr.bf16.mxu1 %v3829_v38 }
  0xbf   : > { %2064 = vmatmul.mubr.bf16.gmra.mrb[76].mxu0 %v2960_v40 }
  0xc0   : > { %3364 = vmatpush3.bf16.msra.mxu0 %v3830_v41  ;;  %3536 = vmatpush3.bf16.msra.mxu1 %v3829_v38 }
  0xc1   : > { %3365 = vmatprep.subr.bf16.mxu0 %v3831_v42  ;;  %3537 = vmatprep.subr.bf16.mxu1 %v3832_v39 }
  0xc2   : > { %2441 = vmatprep.mubr.bf16.mxu0 %v4460_v4 }
  0xc4   : > { %3366 = vmatpush3.bf16.msra.mxu0 %v3833_v43  ;;  %3538 = vmatpush3.bf16.msra.mxu1 %v3832_v39 }
  0xc7   : > { %2442 = vmatmul.mubr.bf16.vlgmr.msra.gmra.mrb[80].mxu0 %v2954_v24  ;;  %3540 = vmatmul.mubr.bf16.vlgmr.msra.gmra.mrb[8].mxu1 %v3835_v44 }
  0xc8   : > { %2449 = vmatprep.mubr.bf16.mxu0 %v2958_v18  ;;  %3543 = vmatprep.mubr.bf16.mxu1 %v3836_v45 }
  0xcf   : > { %2450 = vmatmul.mubr.bf16.gmra.mrb[84].mxu0 %v2957_v23  ;;  %3544 = vmatmul.mubr.bf16.gmra.mrb[12].mxu1 %v3837_v46 }
  0xd0   : > { %2457 = vmatprep.mubr.bf16.mxu0 %v2961_v36 }
  0xd7   : > { %2458 = vmatmul.mubr.bf16.gmra.mrb[88].mxu0 %v2960_v40 }
  0xd8   : > { %2465 = vmatprep.mubr.bf16.mxu0 %v3061_v49 }
  0xdf   : > { %2466 = vmatmul.mubr.bf16.gmra.mrb[92].mxu0 %v3060_v50 }
  0xfa   : > { %v3107_v48 = vpop.f32.mrb[0].mxu0 }
  0xfb   : > { %v3108_v51 = vpop.f32.mrb[1].mxu0 }
  0xfc   : > { %v3109_v52 = vadd.f32 %v3108_v51, %v3107_v48  ;;  %v3110_v53 = vpop.f32.mrb[2].mxu0 }
  0xfd   : > { %v3111_v54 = vpop.f32.mrb[3].mxu0 }
  0xfe   : > { %v3112_v55 = vadd.f32 %v3111_v54, %v3110_v53  ;;  %v4549_v53 = vld [vmem:[%s4585_s2] ss:$0 sm:$0xff] }
 0x102   : > { %v3113_v56 = vpop.f32.mrb[4].mxu0 }
 0x103   : > { %v3114_v57 = vpop.f32.mrb[5].mxu0 }
 0x104   : > { %v3115_v58 = vadd.f32 %v3114_v57, %v3113_v56  ;;  %v3116_v60 = vpop.f32.mrb[6].mxu0 }
 0x105   : > { %v3117_v61 = vpop.f32.mrb[7].mxu0 }
 0x106   : > { %v3118_v63 = vadd.f32 %v3117_v61, %v3116_v60 }
 0x10a   : > { %v3119_v0 = vpop.f32.mrb[8].mxu0 }
 0x10b   : > { %v3120_v1 = vpop.f32.mrb[9].mxu0 }
 0x10c   : > { %v3121_v2 = vadd.f32 %v3120_v1, %v3119_v0  ;;  %v3122_v3 = vpop.f32.mrb[10].mxu0 }
 0x10d   : > { %v3123_v5 = vpop.f32.mrb[11].mxu0 }
 0x10e   : > { %v3124_v6 = vadd.f32 %v3123_v5, %v3122_v3 }
 0x112   : > { %v3125_v59 = vpop.f32.mrb[12].mxu0 }
 0x113   : > { %v3126_v7 = vpop.f32.mrb[13].mxu0 }
 0x114   : > { %v3127_v8 = vadd.f32 %v3126_v7, %v3125_v59  ;;  %v3128_v9 = vpop.f32.mrb[14].mxu0 }
 0x115   : > { %v3129_v10 = vpop.f32.mrb[15].mxu0 }
 0x116   : > { %v3130_v11 = vadd.f32 %v3129_v10, %v3128_v9 }
 0x11a   : > { %v3159_v12 = vpop.f32.mrb[16].mxu0 }
 0x11b   : > { %v3160_v13 = vpop.f32.mrb[17].mxu0 }
 0x11c   : > { %v3161_v14 = vadd.f32 %v3160_v13, %v3159_v12  ;;  %v3162_v15 = vpop.f32.mrb[18].mxu0 }
 0x11d   : > { %v3163_v17 = vpop.f32.mrb[19].mxu0 }
 0x11e   : > { %v3550_v19 = vadd.f32 %v3161_v14, %v3109_v52  ;;  %v3164_v4 = vadd.f32 %v3163_v17, %v3162_v15 }
 0x120   : > { %v3556_v16 = vadd.f32 %v3164_v4, %v3112_v55 }
 0x122   : > { %v3165_v20 = vpop.f32.mrb[20].mxu0 }
 0x123   : > { %v3166_v21 = vpop.f32.mrb[21].mxu0 }
 0x124   : > { %v3167_v62 = vadd.f32 %v3166_v21, %v3165_v20  ;;  %v3168_v24 = vpop.f32.mrb[22].mxu0 }
 0x125   : > { %v3169_v25 = vpop.f32.mrb[23].mxu0 }
 0x126   : > { %v3547_v22 = vadd.f32 %v3167_v62, %v3115_v58  ;;  %v3170_v26 = vadd.f32 %v3169_v25, %v3168_v24 }
 0x128   : > { %v3553_v27 = vadd.f32 %v3170_v26, %v3118_v63 }
 0x12a   : > { %v3171_v18 = vpop.f32.mrb[24].mxu0 }
 0x12b   : > { %v3172_v28 = vpop.f32.mrb[25].mxu0 }
 0x12c   : > { %v3173_v29 = vadd.f32 %v3172_v28, %v3171_v18  ;;  %v3174_v30 = vpop.f32.mrb[26].mxu0 }
 0x12d   : > { %v3175_v31 = vpop.f32.mrb[27].mxu0 }
 0x12e   : > { %v3562_v23 = vadd.f32 %v3173_v29, %v3121_v2  ;;  %v3176_v33 = vadd.f32 %v3175_v31, %v3174_v30 }
 0x130   : > { %v3568_v34 = vadd.f32 %v3176_v33, %v3124_v6 }
 0x132   : > { %v3177_v35 = vpop.f32.mrb[28].mxu0 }
 0x133   : > { %v3178_v36 = vpop.f32.mrb[29].mxu0 }
 0x134   : > { %v3179_v32 = vadd.f32 %v3178_v36, %v3177_v35  ;;  %v3180_v37 = vpop.f32.mrb[30].mxu0 }
 0x135   : > { %v3181_v38 = vpop.f32.mrb[31].mxu0 }
 0x136   : > { %v4542_v40 = vadd.f32 %v3179_v32, %v3127_v8  ;;  %v3182_v41 = vadd.f32 %v3181_v38, %v3180_v37 }
 0x138   : > { %v4544_v42 = vadd.f32 %v3182_v41, %v3130_v11 }
 0x13a   : > { %v3211_v39 = vpop.f32.mrb[32].mxu0  ;;  %v3469_v43 = vpop.f32.mrb[0].mxu1 }
 0x13b   : > { %v3212_v44 = vpop.f32.mrb[33].mxu0  ;;  %v1304_v45 = vpop.f32.mrb[1].mxu1 }
 0x13c   : > { %v3213_v46 = vadd.f32 %v3212_v44, %v3211_v39  ;;  %v3214_v47 = vpop.f32.mrb[34].mxu0  ;;  %v3470_v49 = vpop.f32.mrb[2].mxu1 }
 0x13d   : > { %v3215_v50 = vpop.f32.mrb[35].mxu0  ;;  %v1307_v48 = vpop.f32.mrb[3].mxu1 }
 0x13e   : > { %v3551_v51 = vadd.f32 %v3550_v19, %v3213_v46  ;;  %v3216_v52 = vadd.f32 %v3215_v50, %v3214_v47 }
 0x140   : > { %v3552_v54 = vadd.f32 %v3551_v51, %v1304_v45  ;;  %v3557_v55 = vadd.f32 %v3556_v16, %v3216_v52 }
 0x142   : > { %v1350_v56 = vadd.f32 %v3552_v54, %v4549_v53  ;;  %v3558_v57 = vadd.f32 %v3557_v55, %v1307_v48  ;;  %v3217_v58 = vpop.f32.mrb[36].mxu0  ;;  %v3473_v60 = vpop.f32.mrb[4].mxu1 }
 0x143   : > { %v3218_v61 = vpop.f32.mrb[37].mxu0  ;;  %v1320_v63 = vpop.f32.mrb[5].mxu1 }
 0x144   : > { %v1351_v0 = vadd.f32 %v3558_v57, %v4549_v53  ;;  %v3219_v1 = vadd.f32 %v3218_v61, %v3217_v58  ;;  %v3220_v2 = vpop.f32.mrb[38].mxu0  ;;  %v3474_v3 = vpop.f32.mrb[6].mxu1  ;;  %v1358_v59 = vmax.f32 %v1350_v56, 0.0 }
 0x145   : > { %v3221_v5 = vpop.f32.mrb[39].mxu0  ;;  %v1323_v6 = vpop.f32.mrb[7].mxu1 }
 0x146   : > { %v1359_v7 = vmax.f32 %v1351_v0, 0.0  ;;  %v3548_v8 = vadd.f32 %v3547_v22, %v3219_v1  ;;  %v3222_v9 = vadd.f32 %v3221_v5, %v3220_v2 }
 0x148   : > { %v1366_v10 = vadd.f32 %v1359_v7, %v1358_v59  ;;  %v3549_v11 = vadd.f32 %v3548_v8, %v3469_v43  ;;  %v3554_v12 = vadd.f32 %v3553_v27, %v3222_v9 }
 0x14a   : > { %v1352_v13 = vadd.f32 %v3549_v11, %v4549_v53  ;;  %v3555_v14 = vadd.f32 %v3554_v12, %v3470_v49  ;;  %v3223_v15 = vpop.f32.mrb[40].mxu0 }
 0x14b   : > { %v3224_v17 = vpop.f32.mrb[41].mxu0 }
 0x14c   : > { %v1360_v19 = vmax.f32 %v1352_v13, 0.0  ;;  %v1353_v4 = vadd.f32 %v3555_v14, %v4549_v53  ;;  %v3225_v16 = vadd.f32 %v3224_v17, %v3223_v15  ;;  %v3226_v20 = vpop.f32.mrb[42].mxu0 }
 0x14d   : > { %v3227_v21 = vpop.f32.mrb[43].mxu0 }
 0x14e   : > { %v1367_v62 = vadd.f32 %v1366_v10, %v1360_v19  ;;  %v1361_v24 = vmax.f32 %v1353_v4, 0.0  ;;  %v3563_v25 = vadd.f32 %v3562_v23, %v3225_v16  ;;  %v3228_v26 = vadd.f32 %v3227_v21, %v3226_v20 }
 0x150   : > { %v1368_v22 = vadd.f32 %v1367_v62, %v1361_v24  ;;  %v3564_v18 = vadd.f32 %v3563_v25, %v1320_v63  ;;  %v3569_v28 = vadd.f32 %v3568_v34, %v3228_v26 }
 0x152   : > { %v1354_v27 = vadd.f32 %v3564_v18, %v4549_v53  ;;  %v3570_v29 = vadd.f32 %v3569_v28, %v1323_v6  ;;  %v3229_v30 = vpop.f32.mrb[44].mxu0 }
 0x153   : > { %v3230_v31 = vpop.f32.mrb[45].mxu0 }
 0x154   : > { %v1362_v33 = vmax.f32 %v1354_v27, 0.0  ;;  %v1355_v35 = vadd.f32 %v3570_v29, %v4549_v53  ;;  %v3231_v36 = vadd.f32 %v3230_v31, %v3229_v30  ;;  %v3232_v32 = vpop.f32.mrb[46].mxu0 }
 0x155   : > { %v3233_v37 = vpop.f32.mrb[47].mxu0 }
 0x156   : > { %v1369_v38 = vadd.f32 %v1368_v22, %v1362_v33  ;;  %v1363_v41 = vmax.f32 %v1355_v35, 0.0  ;;  %v3560_v39 = vadd.f32 %v4542_v40, %v3231_v36  ;;  %v3234_v23 = vadd.f32 %v3233_v37, %v3232_v32 }
 0x158   : > { %v1370_v43 = vadd.f32 %v1369_v38, %v1363_v41  ;;  %v3561_v44 = vadd.f32 %v3560_v39, %v3473_v60  ;;  %v3566_v34 = vadd.f32 %v4544_v42, %v3234_v23 }
 0x15a   : > { %v1356_v45 = vadd.f32 %v3561_v44, %v4549_v53  ;;  %v3567_v46 = vadd.f32 %v3566_v34, %v3474_v3  ;;  %v3263_v47 = vpop.f32.mrb[48].mxu0 }
 0x15b   : > { %v3264_v49 = vpop.f32.mrb[49].mxu0 }
 0x15c   : > { %v1364_v50 = vmax.f32 %v1356_v45, 0.0  ;;  %v1357_v48 = vadd.f32 %v3567_v46, %v4549_v53  ;;  %v3265_v51 = vadd.f32 %v3264_v49, %v3263_v47  ;;  %v3266_v52 = vpop.f32.mrb[50].mxu0 }
 0x15d   : > { %v3267_v54 = vpop.f32.mrb[51].mxu0 }
 0x15e   : > { %v1371_v55 = vadd.f32 %v1370_v43, %v1364_v50  ;;  %v1365_v56 = vmax.f32 %v1357_v48, 0.0  ;;  %v3268_v57 = vadd.f32 %v3267_v54, %v3266_v52 }
 0x160   : > { %v1372_v40 = vadd.f32 %v1371_v55, %v1365_v56 }
 0x162   : > { %v1373_v58 = vrot.slane %v1372_v40, 4  ;;  %v3269_v60 = vpop.f32.mrb[52].mxu0 }
 0x163   : > { %v3270_v61 = vpop.f32.mrb[53].mxu0 }
 0x164   : > { %v1374_v42 = vadd.f32 %v1373_v58, %v1372_v40  ;;  %v3271_v63 = vadd.f32 %v3270_v61, %v3269_v60  ;;  %v3272_v0 = vpop.f32.mrb[54].mxu0 }
 0x165   : > { %v3273_v1 = vpop.f32.mrb[55].mxu0 }
 0x166   : > { %v1375_v2 = vrot.slane %v1374_v42, 2  ;;  %v3274_v3 = vadd.f32 %v3273_v1, %v3272_v0 }
 0x168   : > { %v1376_v5 = vadd.f32 %v1375_v2, %v1374_v42 }
 0x16a   : > { %v1377_v6 = vrot.slane %v1376_v5, 1  ;;  %v3275_v59 = vpop.f32.mrb[56].mxu0 }
 0x16b   : > { %v3276_v7 = vpop.f32.mrb[57].mxu0 }
 0x16c   : > { %v1378_v8 = vadd.f32 %v1377_v6, %v1376_v5  ;;  %v3277_v9 = vadd.f32 %v3276_v7, %v3275_v59  ;;  %v3278_v10 = vpop.f32.mrb[58].mxu0 }
 0x16d   : > { %v3279_v11 = vpop.f32.mrb[59].mxu0 }
 0x16e   : > { %v1379_v12 = vmul.f32 0.015625, %v1378_v8  ;;  %v3280_v13 = vadd.f32 %v3279_v11, %v3278_v10 }
 0x170   : > { %1380 = vst [vmem:[%s4565_s19] sm:$0x1] %v1379_v12 }
 0x172   : > { %v3281_v14 = vpop.f32.mrb[60].mxu0 }
 0x173   : > { %v3282_v15 = vpop.f32.mrb[61].mxu0 }
 0x174   : > { %v3283_v17 = vadd.f32 %v3282_v15, %v3281_v14  ;;  %v3284_v19 = vpop.f32.mrb[62].mxu0 }
 0x175   : > { %v3285_v4 = vpop.f32.mrb[63].mxu0 }
 0x176   : > { %v3286_v16 = vadd.f32 %v3285_v4, %v3284_v19 }
 0x17a   : > { %v3315_v20 = vpop.f32.mrb[64].mxu0 }
 0x17b   : > { %v3316_v21 = vpop.f32.mrb[65].mxu0 }
 0x17c   : > { %v3317_v62 = vadd.f32 %v3316_v21, %v3315_v20  ;;  %v3318_v24 = vpop.f32.mrb[66].mxu0 }
 0x17d   : > { %v3319_v25 = vpop.f32.mrb[67].mxu0 }
 0x17e   : > { %v3574_v26 = vadd.f32 %v3317_v62, %v3265_v51  ;;  %v3320_v22 = vadd.f32 %v3319_v25, %v3318_v24 }
 0x180   : > { %v3580_v18 = vadd.f32 %v3320_v22, %v3268_v57 }
 0x182   : > { %v3321_v28 = vpop.f32.mrb[68].mxu0 }
 0x183   : > { %v3322_v27 = vpop.f32.mrb[69].mxu0 }
 0x184   : > { %v3323_v29 = vadd.f32 %v3322_v27, %v3321_v28  ;;  %v3324_v30 = vpop.f32.mrb[70].mxu0 }
 0x185   : > { %v3325_v31 = vpop.f32.mrb[71].mxu0 }
 0x186   : > { %v3571_v33 = vadd.f32 %v3323_v29, %v3271_v63  ;;  %v3326_v35 = vadd.f32 %v3325_v31, %v3324_v30 }
 0x188   : > { %v3577_v36 = vadd.f32 %v3326_v35, %v3274_v3 }
 0x18a   : > { %v3327_v32 = vpop.f32.mrb[72].mxu0 }
 0x18b   : > { %v3328_v37 = vpop.f32.mrb[73].mxu0 }
 0x18c   : > { %v3329_v38 = vadd.f32 %v3328_v37, %v3327_v32  ;;  %v3330_v41 = vpop.f32.mrb[74].mxu0 }
 0x18d   : > { %v3331_v39 = vpop.f32.mrb[75].mxu0 }
 0x18e   : > { %v3586_v23 = vadd.f32 %v3329_v38, %v3277_v9  ;;  %v3332_v43 = vadd.f32 %v3331_v39, %v3330_v41 }
 0x190   : > { %v3592_v44 = vadd.f32 %v3332_v43, %v3280_v13 }
 0x192   : > { %v3333_v34 = vpop.f32.mrb[76].mxu0 }
 0x193   : > { %v3334_v45 = vpop.f32.mrb[77].mxu0 }
 0x194   : > { %v3335_v46 = vadd.f32 %v3334_v45, %v3333_v34  ;;  %v3336_v47 = vpop.f32.mrb[78].mxu0 }
 0x195   : > { %v3337_v49 = vpop.f32.mrb[79].mxu0 }
 0x196   : > { %v3583_v50 = vadd.f32 %v3335_v46, %v3283_v17  ;;  %v3338_v48 = vadd.f32 %v3337_v49, %v3336_v47 }
 0x198   : > { %v4568_v51 = vadd.f32 %v3338_v48, %v3286_v16 }
 0x19a   : > { %v3367_v52 = vpop.f32.mrb[80].mxu0  ;;  %v3541_v54 = vpop.f32.mrb[8].mxu1 }
 0x19b   : > { %v3368_v55 = vpop.f32.mrb[81].mxu0  ;;  %v2508_v56 = vpop.f32.mrb[9].mxu1 }
 0x19c   : > { %v3369_v57 = vadd.f32 %v3368_v55, %v3367_v52  ;;  %v3370_v40 = vpop.f32.mrb[82].mxu0  ;;  %v3542_v58 = vpop.f32.mrb[10].mxu1 }
 0x19d   : > { %v3371_v60 = vpop.f32.mrb[83].mxu0  ;;  %v2511_v61 = vpop.f32.mrb[11].mxu1 }
 0x19e   : > { %v3575_v42 = vadd.f32 %v3574_v26, %v3369_v57  ;;  %v3372_v63 = vadd.f32 %v3371_v60, %v3370_v40 }
 0x1a0   : > { %v3576_v0 = vadd.f32 %v3575_v42, %v2508_v56  ;;  %v3581_v1 = vadd.f32 %v3580_v18, %v3372_v63 }
 0x1a2   : > { %v2554_v2 = vadd.f32 %v3576_v0, %v4549_v53  ;;  %v3582_v3 = vadd.f32 %v3581_v1, %v2511_v61  ;;  %v3373_v5 = vpop.f32.mrb[84].mxu0  ;;  %v3545_v6 = vpop.f32.mrb[12].mxu1 }
 0x1a3   : > { %v3374_v59 = vpop.f32.mrb[85].mxu0  ;;  %v2524_v7 = vpop.f32.mrb[13].mxu1 }
 0x1a4   : > { %v2555_v8 = vadd.f32 %v3582_v3, %v4549_v53  ;;  %v3375_v9 = vadd.f32 %v3374_v59, %v3373_v5  ;;  %v3376_v10 = vpop.f32.mrb[86].mxu0  ;;  %v3546_v11 = vpop.f32.mrb[14].mxu1  ;;  %v2562_v14 = vmax.f32 %v2554_v2, 0.0 }
 0x1a5   : > { %v3377_v12 = vpop.f32.mrb[87].mxu0  ;;  %v2527_v13 = vpop.f32.mrb[15].mxu1 }
 0x1a6   : > { %v2563_v15 = vmax.f32 %v2555_v8, 0.0  ;;  %v3572_v17 = vadd.f32 %v3571_v33, %v3375_v9  ;;  %v3378_v19 = vadd.f32 %v3377_v12, %v3376_v10 }
 0x1a8   : > { %v2570_v4 = vadd.f32 %v2563_v15, %v2562_v14  ;;  %v3573_v16 = vadd.f32 %v3572_v17, %v3541_v54  ;;  %v3578_v20 = vadd.f32 %v3577_v36, %v3378_v19 }
 0x1aa   : > { %v2556_v21 = vadd.f32 %v3573_v16, %v4549_v53  ;;  %v3579_v62 = vadd.f32 %v3578_v20, %v3542_v58  ;;  %v3379_v24 = vpop.f32.mrb[88].mxu0 }
 0x1ab   : > { %v3380_v25 = vpop.f32.mrb[89].mxu0 }
 0x1ac   : > { %v2564_v26 = vmax.f32 %v2556_v21, 0.0  ;;  %v2557_v22 = vadd.f32 %v3579_v62, %v4549_v53  ;;  %v3381_v18 = vadd.f32 %v3380_v25, %v3379_v24  ;;  %v3382_v28 = vpop.f32.mrb[90].mxu0 }
 0x1ad   : > { %v3383_v27 = vpop.f32.mrb[91].mxu0 }
 0x1ae   : > { %v2571_v29 = vadd.f32 %v2570_v4, %v2564_v26  ;;  %v2565_v30 = vmax.f32 %v2557_v22, 0.0  ;;  %v3587_v31 = vadd.f32 %v3586_v23, %v3381_v18  ;;  %v3384_v35 = vadd.f32 %v3383_v27, %v3382_v28 }
 0x1b0   : > { %v2572_v33 = vadd.f32 %v2571_v29, %v2565_v30  ;;  %v3588_v32 = vadd.f32 %v3587_v31, %v2524_v7  ;;  %v3593_v37 = vadd.f32 %v3592_v44, %v3384_v35 }
 0x1b2   : > { %v2558_v36 = vadd.f32 %v3588_v32, %v4549_v53  ;;  %v3594_v38 = vadd.f32 %v3593_v37, %v2527_v13  ;;  %v3385_v41 = vpop.f32.mrb[92].mxu0 }
 0x1b3   : > { %v3386_v39 = vpop.f32.mrb[93].mxu0 }
 0x1b4   : > { %v2566_v43 = vmax.f32 %v2558_v36, 0.0  ;;  %v2559_v34 = vadd.f32 %v3594_v38, %v4549_v53  ;;  %v3387_v45 = vadd.f32 %v3386_v39, %v3385_v41  ;;  %v3388_v46 = vpop.f32.mrb[94].mxu0 }
 0x1b5   : > { %v3389_v47 = vpop.f32.mrb[95].mxu0 }
 0x1b6   : > { %v2573_v49 = vadd.f32 %v2572_v33, %v2566_v43  ;;  %v2567_v48 = vmax.f32 %v2559_v34, 0.0  ;;  %v3584_v52 = vadd.f32 %v3583_v50, %v3387_v45  ;;  %v3390_v54 = vadd.f32 %v3389_v47, %v3388_v46 }
 0x1b8   : > { %v2574_v23 = vadd.f32 %v2573_v49, %v2567_v48  ;;  %v3585_v55 = vadd.f32 %v3584_v52, %v3545_v6  ;;  %v3590_v44 = vadd.f32 %v4568_v51, %v3390_v54 }
 0x1ba   : > { %v2560_v56 = vadd.f32 %v3585_v55, %v4549_v53  ;;  %v3591_v57 = vadd.f32 %v3590_v44, %v3546_v11 }
 0x1bc   : > { %v2568_v40 = vmax.f32 %v2560_v56, 0.0  ;;  %v2561_v58 = vadd.f32 %v3591_v57, %v4549_v53 }
 0x1be   : > { %v2575_v60 = vadd.f32 %v2574_v23, %v2568_v40  ;;  %v2569_v61 = vmax.f32 %v2561_v58, 0.0 }
 0x1c0   : > { %v2576_v42 = vadd.f32 %v2575_v60, %v2569_v61 }
 0x1c2   : > { %v2577_v63 = vrot.slane %v2576_v42, 4 }
 0x1c4   : > { %v2578_v0 = vadd.f32 %v2577_v63, %v2576_v42 }
 0x1c6   : > { %v2579_v1 = vrot.slane %v2578_v0, 2 }
 0x1c8   : > { %v2580_v2 = vadd.f32 %v2579_v1, %v2578_v0 }
 0x1ca   : > { %v2581_v50 = vrot.slane %v2580_v2, 1 }
 0x1cc   : > { %v2582_v3 = vadd.f32 %v2581_v50, %v2580_v2 }
 0x1ce   : > { %v2583_v5 = vmul.f32 0.015625, %v2582_v3 }
 0x1d0   : > { %3088 = vst [vmem:[%s4565_s19 + $0x1] sm:$0x1] %v2583_v5 }
 0x1d1 PF: > { %s13_s12 = sadd.s32 1, %s3846_s12  }
 0x1d2   : > { %p10_p4 = scmp.ge.s32.totalorder %s13_s12, 4  }
 0x1d4   :  { %12 = sbr.rel (!%p10_p4) target bundleno = 1 (0x1), region = 66 }

</bundles_post_ra>
